<compile_context>
chip_gen: v6e
topology: v6e:2x2x1
jax: 0.10.0
libtpu: 0.0.40
codegen_flags: <defaults>
</compile_context>

<pallas_src>
import jax
import jax.numpy as jnp
from jax.experimental import pallas as pl
from jax.experimental.pallas import tpu as pltpu


# ---------------------------------------------------------------------------
# Fused kernel
# ---------------------------------------------------------------------------
def _imu_kernel(x_ref, w1_ref, b1c_ref, b2c_ref, fcw_ref, fcb_ref,
                w2_hbm, p1_hbm, p2_hbm,
                o_ref,
                w2_vm, p1_vm, p2_vm, sem):
    # x_ref : (B, L, 6)  channels-last input, ch 0..2 = ang_vel, 3..5 = acc
    # w1_ref: (K*6, 2C)  conv1 taps, block-structured over both branches
    # b1c/b2c: (1, 2C)   conv biases, lanes [branch A | branch B]
    # fcw: (2H, 7)  fcb: (1, 7)
    # w2_hbm: (2, K*C, C)            conv2 taps per branch        (HBM -> DMA)
    # p1_hbm/p2_hbm: (2C+H+1, 8H)    packed LSTM weights per layer (HBM -> DMA)
    #     rows [0:2C] W_ih (lstm1's pre-permuted for the scramble fold),
    #     rows [2C:2C+H] W_hh, row [2C+H] b_ih+b_hh; cols [fwd 4H | rev 4H]
    # o_ref : (B, 7)
    B, L, _ = x_ref.shape
    C = w2_vm.shape[2]
    K = w2_vm.shape[1] // C
    C2 = 2 * C
    L1 = L - K + 1
    L2 = L1 - K + 1
    T = L2 // 3
    H = p1_vm.shape[1] // 8
    G4 = 4 * H
    CB = C2 // T                     # scramble block width (requires T | 2C)
    f32 = jnp.float32

    # Kick off the big weight DMAs so they overlap conv / lstm1 compute.
    cp_w2 = pltpu.make_async_copy(w2_hbm, w2_vm, sem.at[0]); cp_w2.start()
    cp_p1 = pltpu.make_async_copy(p1_hbm, p1_vm, sem.at[1]); cp_p1.start()
    cp_p2 = pltpu.make_async_copy(p2_hbm, p2_vm, sem.at[2]); cp_p2.start()

    # ---- Conv1d #1: both branches in ONE im2col matmul (block weight) ----
    im1 = jnp.concatenate(
        [jnp.concatenate([x_ref[b, k:k + L1, :] for k in range(K)], axis=1)
         for b in range(B)], axis=0)                                   # (B*L1, K*6)
    a1 = jnp.dot(im1, w1_ref[...], preferred_element_type=f32) + b1c_ref[...]  # (B*L1, 2C)

    # ---- Conv1d #2: per-branch im2col (weights arriving by DMA) ----
    row = [[a1[b * L1 + k: b * L1 + k + L2, :] for k in range(K)] for b in range(B)]
    im2 = [jnp.concatenate(
               [jnp.concatenate([row[b][k][:, h * C:(h + 1) * C] for k in range(K)],
                                axis=1)
                for b in range(B)], axis=0)                            # (B*L2, K*C)
           for h in range(2)]
    cp_w2.wait()
    a2 = jnp.concatenate(
        [jnp.dot(im2[0], w2_vm[0], preferred_element_type=f32),
         jnp.dot(im2[1], w2_vm[1], preferred_element_type=f32)],
        axis=1) + b2c_ref[...]                                         # (B*L2, 2C)

    # ---- MaxPool1d(kernel=3, stride=3) ----
    pooled = []                                                        # pooled[t]: (B, 2C)
    for t in range(T):
        pooled.append(jnp.concatenate(
            [jnp.max(a2[b * L2 + 3 * t: b * L2 + 3 * t + 3, :], axis=0, keepdims=True)
             for b in range(B)], axis=0))

    # ---- PyTorch cat(dim=1) + raw reshape scramble, folded into lstm1's W_ih ----
    # acat[tp*B + b, t*CB + j] == scrambled_x[b, tp, j*T + t]; the matching row
    # permutation is baked into p1's W_ih block host-side.
    acat = jnp.concatenate(
        [jnp.concatenate([pooled[t][:, tp * CB:(tp + 1) * CB] for t in range(T)],
                         axis=1)
         for tp in range(T)], axis=0)                                  # (T*B, 2C)

    def cell(gates, c):
        s = jax.nn.sigmoid(gates)                  # one wide sigmoid; g quarter is filler
        g = jnp.tanh(gates[:, 2 * H:3 * H])
        c = s[:, H:2 * H] * c + s[:, 0:H] * g
        return s[:, 3 * H:G4] * jnp.tanh(c), c

    def cell0(gates):                              # peeled first step: h0 = c0 = 0
        s = jax.nn.sigmoid(gates)
        c = s[:, 0:H] * jnp.tanh(gates[:, 2 * H:3 * H])
        return s[:, 3 * H:G4] * jnp.tanh(c), c

    # ---- lstm1 (bidirectional); input projection batched over time + direction ----
    cp_p1.wait()
    xw1 = (jnp.dot(acat, p1_vm[0:C2, :], preferred_element_type=f32)
           + p1_vm[C2 + H:C2 + H + 1, :])                              # (T*B, 8H)
    xw1_t = [xw1[tp * B:(tp + 1) * B, :] for tp in range(T)]
    whh1f = p1_vm[C2:C2 + H, 0:G4]
    whh1r = p1_vm[C2:C2 + H, G4:]
    h1f = [None] * T
    h1r = [None] * T
    h1f[0], cf = cell0(xw1_t[0][:, 0:G4])
    h1r[T - 1], cr = cell0(xw1_t[T - 1][:, G4:])
    for s in range(1, T):                          # fwd / rev chains interleaved
        gf = xw1_t[s][:, 0:G4] + jnp.dot(h1f[s - 1], whh1f, preferred_element_type=f32)
        gr = xw1_t[T - 1 - s][:, G4:] + jnp.dot(h1r[T - s], whh1r,
                                                preferred_element_type=f32)
        h1f[s], cf = cell(gf, cf)
        h1r[T - 1 - s], cr = cell(gr, cr)
    y1 = [jnp.tanh(jnp.concatenate([h1f[t], h1r[t]], axis=1)) for t in range(T)]
    # TODO(synk): F.dropout(p=0.35) (training=True by default) is stochastic; identity here.

    # ---- lstm2: fwd chain in full; rev specialised to the single step that the
    #      x[:, -1, :] readout consumes (h0 == 0 => no h @ W_hh term) ----
    cp_p2.wait()
    y1s = jnp.concatenate(y1, axis=0)                                  # (T*B, 2H)
    xw2 = (jnp.dot(y1s, p2_vm[0:C2, :], preferred_element_type=f32)
           + p2_vm[C2 + H:C2 + H + 1, :])                              # (T*B, 8H)
    whh2f = p2_vm[C2:C2 + H, 0:G4]
    h2f, c2 = cell0(xw2[0:B, 0:G4])
    for s in range(1, T):
        g = xw2[s * B:(s + 1) * B, 0:G4] + jnp.dot(h2f, whh2f,
                                                   preferred_element_type=f32)
        h2f, c2 = cell(g, c2)
    h2r, _ = cell0(xw2[(T - 1) * B:T * B, G4:])
    feat = jnp.tanh(jnp.concatenate([h2f, h2r], axis=1))               # (B, 2H)
    # TODO(synk): second F.dropout(p=0.35) likewise identity.

    # ---- fused fc_pos | fc_ori head ----
    o_ref[...] = jnp.dot(feat, fcw_ref[...], preferred_element_type=f32) + fcb_ref[...]


# ---------------------------------------------------------------------------
# Wrapper: one pallas_call; only a tiny NCL -> channels-last transpose outside.
# ---------------------------------------------------------------------------
def imu_encoder_forward(x_ncl, params):
    """x_ncl: (B, 6, L) float32 (PyTorch NCL input). Returns (B, 7) = cat(pos, ori)."""
    B, _, L = x_ncl.shape
    w1 = params['conv1_w']
    K = w1.shape[0] // 6
    C2 = w1.shape[1]
    C = C2 // 2
    T = (L - 2 * (K - 1)) // 3
    H = params['lstm1_pack'].shape[1] // 8
    NP = params['lstm1_pack'].shape[0]
    assert T >= 1 and C2 % T == 0, "scramble fold requires T | 2C"
    assert 2 * H == C2 and NP == C2 + H + 1
    assert params['lstm2_pack'].shape == params['lstm1_pack'].shape

    x_cl = jnp.transpose(x_ncl, (0, 2, 1))                   # (B, L, 6) channels-last

    vmem = pl.BlockSpec(memory_space=pltpu.MemorySpace.VMEM)
    hbm = pl.BlockSpec(memory_space=pl.ANY)                  # stay in HBM, manual DMA
    return pl.pallas_call(
        _imu_kernel,
        out_shape=jax.ShapeDtypeStruct((B, 7), jnp.float32),
        in_specs=[vmem, vmem, vmem, vmem, vmem, vmem, hbm, hbm, hbm],
        out_specs=vmem,
        scratch_shapes=[
            pltpu.VMEM((2, K * C, C), jnp.float32),          # conv2 weights
            pltpu.VMEM((NP, 8 * H), jnp.float32),            # lstm1 pack
            pltpu.VMEM((NP, 8 * H), jnp.float32),            # lstm2 pack
            pltpu.SemaphoreType.DMA((3,)),
        ],
    )(x_cl, params['conv1_w'], params['conv1_b'], params['conv2_b'],
      params['fc_w'], params['fc_b'],
      params['conv2_w'], params['lstm1_pack'], params['lstm2_pack'])


# ---------------------------------------------------------------------------
# Parameters: PyTorch-layout init + one-time packing into the kernel layout.
# ---------------------------------------------------------------------------
def init_params(key, hidden=128, K=11):
    C = 128
    H = hidden
    keys = iter(jax.random.split(key, 24))

    def u(shape, fan_in):
        s = 1.0 / (fan_in ** 0.5)
        return jax.random.uniform(next(keys), shape, jnp.float32, -s, s)

    def lstm(in_dim):
        # stacked over direction (0 = fwd, 1 = rev); PyTorch weight orientation
        return {'wih': u((2, 4 * H, in_dim), H), 'whh': u((2, 4 * H, H), H),
                'bih': u((2, 4 * H), H), 'bhh': u((2, 4 * H), H)}

    return {
        'convA1_w': u((C, 3, K), 3 * K), 'convA1_b': u((C,), 3 * K),
        'convB1_w': u((C, 3, K), 3 * K), 'convB1_b': u((C,), 3 * K),
        'convA2_w': u((C, C, K), C * K), 'convA2_b': u((C,), C * K),
        'convB2_w': u((C, C, K), C * K), 'convB2_b': u((C,), C * K),
        'lstm1': lstm(2 * C), 'lstm2': lstm(2 * H),
        'fc_pos_w': u((3, 2 * H), 2 * H), 'fc_pos_b': u((3,), 2 * H),
        'fc_ori_w': u((4, 2 * H), 2 * H), 'fc_ori_b': u((4,), 2 * H),
    }


def pack_params(p, T):
    """One-time re-layout of PyTorch-style parameters for the fused kernel."""
    C, _, K = p['convA1_w'].shape
    H = p['lstm1']['whh'].shape[2]
    C2 = 2 * C
    f32 = jnp.float32

    # conv1: (K*6, 2C) block-structured weight, rows ordered (tap k, in-channel 0..5).
    wa = jnp.transpose(p['convA1_w'], (2, 1, 0))               # (K, 3, C)
    wb = jnp.transpose(p['convB1_w'], (2, 1, 0))
    w1 = jnp.concatenate(
        [jnp.concatenate([wa, jnp.zeros((K, 3, C), f32)], axis=2),
         jnp.concatenate([jnp.zeros((K, 3, C), f32), wb], axis=2)],
        axis=1).reshape(K * 6, C2)
    b1c = jnp.concatenate([p['convA1_b'], p['convB1_b']])[None, :]

    # conv2: per-branch (K*C, C) im2col weights, rows ordered (tap k, in-channel).
    w2 = jnp.stack([jnp.transpose(p['convA2_w'], (2, 1, 0)).reshape(K * C, C),
                    jnp.transpose(p['convB2_w'], (2, 1, 0)).reshape(K * C, C)])
    b2c = jnp.concatenate([p['convA2_b'], p['convB2_b']])[None, :]

    # LSTM packs: rows [W_ih | W_hh | b_ih+b_hh], cols [fwd 4H | rev 4H].
    def lstm_pack(lp, row_perm=None):
        wih = jnp.transpose(lp['wih'], (0, 2, 1))              # (2, in, 4H)
        if row_perm is not None:
            wih = wih[:, row_perm, :]
        whh = jnp.transpose(lp['whh'], (0, 2, 1))              # (2, H, 4H)
        b = (lp['bih'] + lp['bhh'])[:, None, :]                # (2, 1, 4H)
        blk = jnp.concatenate([wih, whh, b], axis=1)           # (2, in+H+1, 4H)
        return jnp.concatenate([blk[0], blk[1]], axis=1)       # (in+H+1, 8H)

    # Fold PyTorch's cat(dim=1) + raw reshape scramble into lstm1's W_ih rows:
    # kernel column (t*CB + j) must multiply original input channel (j*T + t).
    CB = C2 // T
    r = jnp.arange(C2)
    perm = (r % CB) * T + r // CB

    return {
        'conv1_w': w1, 'conv1_b': b1c, 'conv2_w': w2, 'conv2_b': b2c,
        'lstm1_pack': lstm_pack(p['lstm1'], perm),
        'lstm2_pack': lstm_pack(p['lstm2']),
        'fc_w': jnp.concatenate([p['fc_pos_w'], p['fc_ori_w']], axis=0).T,   # (2H, 7)
        'fc_b': jnp.concatenate([p['fc_pos_b'], p['fc_ori_b']])[None, :],    # (1, 7)
    }


if __name__ == "__main__":
    key = jax.random.PRNGKey(0)
    pkey, xkey = jax.random.split(key)

    hidden = 128            # module requires 2*hidden == 256 (lstm2 / fc input size)
    B, L, K = 2, 32, 11     # conv: 32 -> 22 -> 12 ; maxpool/3 -> T = 4 timesteps

    T = (L - 2 * (K - 1)) // 3
    params = pack_params(init_params(pkey, hidden, K), T)    # packed once, off the hot path
    x = jax.random.normal(xkey, (B, 6, L), jnp.float32)      # PyTorch NCL input

    fwd = jax.jit(imu_encoder_forward)
    out = jax.block_until_ready(fwd(x, params))
    assert out.shape == (B, 7), out.shape
    assert bool(jnp.all(jnp.isfinite(out)))
    print("KERNEL_OK")
</pallas_src>

<mosaic_0001>
module attributes {stable_mosaic.version = 11 : i64} {
  func.func @_imu_kernel(%arg0: memref<2x32x6xf32, #tpu.memory_space<vmem>>, %arg1: memref<66x256xf32, #tpu.memory_space<vmem>>, %arg2: memref<1x256xf32, #tpu.memory_space<vmem>>, %arg3: memref<1x256xf32, #tpu.memory_space<vmem>>, %arg4: memref<256x7xf32, #tpu.memory_space<vmem>>, %arg5: memref<1x7xf32, #tpu.memory_space<vmem>>, %arg6: memref<2x1408x128xf32, #tpu.memory_space<any>>, %arg7: memref<385x1024xf32, #tpu.memory_space<any>>, %arg8: memref<385x1024xf32, #tpu.memory_space<any>>, %arg9: memref<2x7xf32, #tpu.memory_space<vmem>>, %arg10: memref<2x1408x128xf32, #tpu.memory_space<vmem>>, %arg11: memref<385x1024xf32, #tpu.memory_space<vmem>>, %arg12: memref<385x1024xf32, #tpu.memory_space<vmem>>, %arg13: memref<3x!tpu.dma_semaphore, #tpu.memory_space<semaphore_mem>>) attributes {dimension_semantics = [], scalar_prefetch = 0 : i64, scratch_operands = 4 : i64, tpu.core_type = #tpu.core_type<tc>} {
    %c0_i32 = arith.constant 0 : i32
    %0 = tpu.memref_slice %arg13[%c0_i32] : memref<3x!tpu.dma_semaphore, #tpu.memory_space<semaphore_mem>> -> memref<1x!tpu.dma_semaphore, #tpu.memory_space<semaphore_mem>>
    %1 = tpu.memref_squeeze %0 : memref<1x!tpu.dma_semaphore, #tpu.memory_space<semaphore_mem>> -> memref<!tpu.dma_semaphore, #tpu.memory_space<semaphore_mem>>
    tpu.enqueue_dma source(%arg6 : memref<2x1408x128xf32, #tpu.memory_space<any>>) target(%arg10 : memref<2x1408x128xf32, #tpu.memory_space<vmem>>) target_semaphore(%1 : memref<!tpu.dma_semaphore, #tpu.memory_space<semaphore_mem>>)
    %c1_i32 = arith.constant 1 : i32
    %2 = tpu.memref_slice %arg13[%c1_i32] : memref<3x!tpu.dma_semaphore, #tpu.memory_space<semaphore_mem>> -> memref<1x!tpu.dma_semaphore, #tpu.memory_space<semaphore_mem>>
    %3 = tpu.memref_squeeze %2 : memref<1x!tpu.dma_semaphore, #tpu.memory_space<semaphore_mem>> -> memref<!tpu.dma_semaphore, #tpu.memory_space<semaphore_mem>>
    tpu.enqueue_dma source(%arg7 : memref<385x1024xf32, #tpu.memory_space<any>>) target(%arg11 : memref<385x1024xf32, #tpu.memory_space<vmem>>) target_semaphore(%3 : memref<!tpu.dma_semaphore, #tpu.memory_space<semaphore_mem>>)
    %c2_i32 = arith.constant 2 : i32
    %4 = tpu.memref_slice %arg13[%c2_i32] : memref<3x!tpu.dma_semaphore, #tpu.memory_space<semaphore_mem>> -> memref<1x!tpu.dma_semaphore, #tpu.memory_space<semaphore_mem>>
    %5 = tpu.memref_squeeze %4 : memref<1x!tpu.dma_semaphore, #tpu.memory_space<semaphore_mem>> -> memref<!tpu.dma_semaphore, #tpu.memory_space<semaphore_mem>>
    tpu.enqueue_dma source(%arg8 : memref<385x1024xf32, #tpu.memory_space<any>>) target(%arg12 : memref<385x1024xf32, #tpu.memory_space<vmem>>) target_semaphore(%5 : memref<!tpu.dma_semaphore, #tpu.memory_space<semaphore_mem>>)
    %c0 = arith.constant 0 : index
    %c0_0 = arith.constant 0 : index
    %c0_1 = arith.constant 0 : index
    %6 = vector.load %arg0[%c0, %c0_0, %c0_1] : memref<2x32x6xf32, #tpu.memory_space<vmem>>, vector<1x22x6xf32>
    %7 = vector.shape_cast %6 : vector<1x22x6xf32> to vector<22x6xf32>
    %c0_2 = arith.constant 0 : index
    %c1 = arith.constant 1 : index
    %c0_3 = arith.constant 0 : index
    %8 = vector.load %arg0[%c0_2, %c1, %c0_3] : memref<2x32x6xf32, #tpu.memory_space<vmem>>, vector<1x22x6xf32>
    %9 = vector.shape_cast %8 : vector<1x22x6xf32> to vector<22x6xf32>
    %c0_4 = arith.constant 0 : index
    %c2 = arith.constant 2 : index
    %c0_5 = arith.constant 0 : index
    %10 = vector.load %arg0[%c0_4, %c2, %c0_5] : memref<2x32x6xf32, #tpu.memory_space<vmem>>, vector<1x22x6xf32>
    %11 = vector.shape_cast %10 : vector<1x22x6xf32> to vector<22x6xf32>
    %c0_6 = arith.constant 0 : index
    %c3 = arith.constant 3 : index
    %c0_7 = arith.constant 0 : index
    %12 = vector.load %arg0[%c0_6, %c3, %c0_7] : memref<2x32x6xf32, #tpu.memory_space<vmem>>, vector<1x22x6xf32>
    %13 = vector.shape_cast %12 : vector<1x22x6xf32> to vector<22x6xf32>
    %c0_8 = arith.constant 0 : index
    %c4 = arith.constant 4 : index
    %c0_9 = arith.constant 0 : index
    %14 = vector.load %arg0[%c0_8, %c4, %c0_9] : memref<2x32x6xf32, #tpu.memory_space<vmem>>, vector<1x22x6xf32>
    %15 = vector.shape_cast %14 : vector<1x22x6xf32> to vector<22x6xf32>
    %c0_10 = arith.constant 0 : index
    %c5 = arith.constant 5 : index
    %c0_11 = arith.constant 0 : index
    %16 = vector.load %arg0[%c0_10, %c5, %c0_11] : memref<2x32x6xf32, #tpu.memory_space<vmem>>, vector<1x22x6xf32>
    %17 = vector.shape_cast %16 : vector<1x22x6xf32> to vector<22x6xf32>
    %c0_12 = arith.constant 0 : index
    %c6 = arith.constant 6 : index
    %c0_13 = arith.constant 0 : index
    %18 = vector.load %arg0[%c0_12, %c6, %c0_13] : memref<2x32x6xf32, #tpu.memory_space<vmem>>, vector<1x22x6xf32>
    %19 = vector.shape_cast %18 : vector<1x22x6xf32> to vector<22x6xf32>
    %c0_14 = arith.constant 0 : index
    %c7 = arith.constant 7 : index
    %c0_15 = arith.constant 0 : index
    %20 = vector.load %arg0[%c0_14, %c7, %c0_15] : memref<2x32x6xf32, #tpu.memory_space<vmem>>, vector<1x22x6xf32>
    %21 = vector.shape_cast %20 : vector<1x22x6xf32> to vector<22x6xf32>
    %c0_16 = arith.constant 0 : index
    %c8 = arith.constant 8 : index
    %c0_17 = arith.constant 0 : index
    %22 = vector.load %arg0[%c0_16, %c8, %c0_17] : memref<2x32x6xf32, #tpu.memory_space<vmem>>, vector<1x22x6xf32>
    %23 = vector.shape_cast %22 : vector<1x22x6xf32> to vector<22x6xf32>
    %c0_18 = arith.constant 0 : index
    %c9 = arith.constant 9 : index
    %c0_19 = arith.constant 0 : index
    %24 = vector.load %arg0[%c0_18, %c9, %c0_19] : memref<2x32x6xf32, #tpu.memory_space<vmem>>, vector<1x22x6xf32>
    %25 = vector.shape_cast %24 : vector<1x22x6xf32> to vector<22x6xf32>
    %c0_20 = arith.constant 0 : index
    %c10 = arith.constant 10 : index
    %c0_21 = arith.constant 0 : index
    %26 = vector.load %arg0[%c0_20, %c10, %c0_21] : memref<2x32x6xf32, #tpu.memory_space<vmem>>, vector<1x22x6xf32>
    %27 = vector.shape_cast %26 : vector<1x22x6xf32> to vector<22x6xf32>
    %28 = tpu.concatenate %7, %9, %11, %13, %15, %17, %19, %21, %23, %25, %27 in 1 : vector<22x6xf32>, vector<22x6xf32>, vector<22x6xf32>, vector<22x6xf32>, vector<22x6xf32>, vector<22x6xf32>, vector<22x6xf32>, vector<22x6xf32>, vector<22x6xf32>, vector<22x6xf32>, vector<22x6xf32> -> vector<22x66xf32>
    %c1_22 = arith.constant 1 : index
    %c0_23 = arith.constant 0 : index
    %c0_24 = arith.constant 0 : index
    %29 = vector.load %arg0[%c1_22, %c0_23, %c0_24] : memref<2x32x6xf32, #tpu.memory_space<vmem>>, vector<1x22x6xf32>
    %30 = vector.shape_cast %29 : vector<1x22x6xf32> to vector<22x6xf32>
    %c1_25 = arith.constant 1 : index
    %c1_26 = arith.constant 1 : index
    %c0_27 = arith.constant 0 : index
    %31 = vector.load %arg0[%c1_25, %c1_26, %c0_27] : memref<2x32x6xf32, #tpu.memory_space<vmem>>, vector<1x22x6xf32>
    %32 = vector.shape_cast %31 : vector<1x22x6xf32> to vector<22x6xf32>
    %c1_28 = arith.constant 1 : index
    %c2_29 = arith.constant 2 : index
    %c0_30 = arith.constant 0 : index
    %33 = vector.load %arg0[%c1_28, %c2_29, %c0_30] : memref<2x32x6xf32, #tpu.memory_space<vmem>>, vector<1x22x6xf32>
    %34 = vector.shape_cast %33 : vector<1x22x6xf32> to vector<22x6xf32>
    %c1_31 = arith.constant 1 : index
    %c3_32 = arith.constant 3 : index
    %c0_33 = arith.constant 0 : index
    %35 = vector.load %arg0[%c1_31, %c3_32, %c0_33] : memref<2x32x6xf32, #tpu.memory_space<vmem>>, vector<1x22x6xf32>
    %36 = vector.shape_cast %35 : vector<1x22x6xf32> to vector<22x6xf32>
    %c1_34 = arith.constant 1 : index
    %c4_35 = arith.constant 4 : index
    %c0_36 = arith.constant 0 : index
    %37 = vector.load %arg0[%c1_34, %c4_35, %c0_36] : memref<2x32x6xf32, #tpu.memory_space<vmem>>, vector<1x22x6xf32>
    %38 = vector.shape_cast %37 : vector<1x22x6xf32> to vector<22x6xf32>
    %c1_37 = arith.constant 1 : index
    %c5_38 = arith.constant 5 : index
    %c0_39 = arith.constant 0 : index
    %39 = vector.load %arg0[%c1_37, %c5_38, %c0_39] : memref<2x32x6xf32, #tpu.memory_space<vmem>>, vector<1x22x6xf32>
    %40 = vector.shape_cast %39 : vector<1x22x6xf32> to vector<22x6xf32>
    %c1_40 = arith.constant 1 : index
    %c6_41 = arith.constant 6 : index
    %c0_42 = arith.constant 0 : index
    %41 = vector.load %arg0[%c1_40, %c6_41, %c0_42] : memref<2x32x6xf32, #tpu.memory_space<vmem>>, vector<1x22x6xf32>
    %42 = vector.shape_cast %41 : vector<1x22x6xf32> to vector<22x6xf32>
    %c1_43 = arith.constant 1 : index
    %c7_44 = arith.constant 7 : index
    %c0_45 = arith.constant 0 : index
    %43 = vector.load %arg0[%c1_43, %c7_44, %c0_45] : memref<2x32x6xf32, #tpu.memory_space<vmem>>, vector<1x22x6xf32>
    %44 = vector.shape_cast %43 : vector<1x22x6xf32> to vector<22x6xf32>
    %c1_46 = arith.constant 1 : index
    %c8_47 = arith.constant 8 : index
    %c0_48 = arith.constant 0 : index
    %45 = vector.load %arg0[%c1_46, %c8_47, %c0_48] : memref<2x32x6xf32, #tpu.memory_space<vmem>>, vector<1x22x6xf32>
    %46 = vector.shape_cast %45 : vector<1x22x6xf32> to vector<22x6xf32>
    %c1_49 = arith.constant 1 : index
    %c9_50 = arith.constant 9 : index
    %c0_51 = arith.constant 0 : index
    %47 = vector.load %arg0[%c1_49, %c9_50, %c0_51] : memref<2x32x6xf32, #tpu.memory_space<vmem>>, vector<1x22x6xf32>
    %48 = vector.shape_cast %47 : vector<1x22x6xf32> to vector<22x6xf32>
    %c1_52 = arith.constant 1 : index
    %c10_53 = arith.constant 10 : index
    %c0_54 = arith.constant 0 : index
    %49 = vector.load %arg0[%c1_52, %c10_53, %c0_54] : memref<2x32x6xf32, #tpu.memory_space<vmem>>, vector<1x22x6xf32>
    %50 = vector.shape_cast %49 : vector<1x22x6xf32> to vector<22x6xf32>
    %51 = tpu.concatenate %30, %32, %34, %36, %38, %40, %42, %44, %46, %48, %50 in 1 : vector<22x6xf32>, vector<22x6xf32>, vector<22x6xf32>, vector<22x6xf32>, vector<22x6xf32>, vector<22x6xf32>, vector<22x6xf32>, vector<22x6xf32>, vector<22x6xf32>, vector<22x6xf32>, vector<22x6xf32> -> vector<22x66xf32>
    %52 = tpu.concatenate %28, %51 in 0 : vector<22x66xf32>, vector<22x66xf32> -> vector<44x66xf32>
    %c0_55 = arith.constant 0 : index
    %c0_56 = arith.constant 0 : index
    %53 = vector.load %arg1[%c0_55, %c0_56] : memref<66x256xf32, #tpu.memory_space<vmem>>, vector<66x256xf32>
    %cst = arith.constant dense<0.000000e+00> : vector<44x256xf32>
    %54 = tpu.matmul %52, %53, %cst {dimension_numbers = #tpu.dot_dimension_numbers<[1], [0], [0], [1], [0, 0, 1, 1], [], []>} : vector<44x66xf32>, vector<66x256xf32>, vector<44x256xf32> -> vector<44x256xf32>
    %c0_57 = arith.constant 0 : index
    %c0_58 = arith.constant 0 : index
    %55 = vector.load %arg2[%c0_57, %c0_58] : memref<1x256xf32, #tpu.memory_space<vmem>>, vector<1x256xf32>
    %56 = vector.broadcast %55 : vector<1x256xf32> to vector<44x256xf32>
    %57 = arith.addf %54, %56 : vector<44x256xf32>
    %58 = vector.extract_strided_slice %57 {offsets = [0, 0], sizes = [12, 256], strides = [1, 1]} : vector<44x256xf32> to vector<12x256xf32>
    %59 = vector.extract_strided_slice %57 {offsets = [1, 0], sizes = [12, 256], strides = [1, 1]} : vector<44x256xf32> to vector<12x256xf32>
    %60 = vector.extract_strided_slice %57 {offsets = [2, 0], sizes = [12, 256], strides = [1, 1]} : vector<44x256xf32> to vector<12x256xf32>
    %61 = vector.extract_strided_slice %57 {offsets = [3, 0], sizes = [12, 256], strides = [1, 1]} : vector<44x256xf32> to vector<12x256xf32>
    %62 = vector.extract_strided_slice %57 {offsets = [4, 0], sizes = [12, 256], strides = [1, 1]} : vector<44x256xf32> to vector<12x256xf32>
    %63 = vector.extract_strided_slice %57 {offsets = [5, 0], sizes = [12, 256], strides = [1, 1]} : vector<44x256xf32> to vector<12x256xf32>
    %64 = vector.extract_strided_slice %57 {offsets = [6, 0], sizes = [12, 256], strides = [1, 1]} : vector<44x256xf32> to vector<12x256xf32>
    %65 = vector.extract_strided_slice %57 {offsets = [7, 0], sizes = [12, 256], strides = [1, 1]} : vector<44x256xf32> to vector<12x256xf32>
    %66 = vector.extract_strided_slice %57 {offsets = [8, 0], sizes = [12, 256], strides = [1, 1]} : vector<44x256xf32> to vector<12x256xf32>
    %67 = vector.extract_strided_slice %57 {offsets = [9, 0], sizes = [12, 256], strides = [1, 1]} : vector<44x256xf32> to vector<12x256xf32>
    %68 = vector.extract_strided_slice %57 {offsets = [10, 0], sizes = [12, 256], strides = [1, 1]} : vector<44x256xf32> to vector<12x256xf32>
    %69 = vector.extract_strided_slice %57 {offsets = [22, 0], sizes = [12, 256], strides = [1, 1]} : vector<44x256xf32> to vector<12x256xf32>
    %70 = vector.extract_strided_slice %57 {offsets = [23, 0], sizes = [12, 256], strides = [1, 1]} : vector<44x256xf32> to vector<12x256xf32>
    %71 = vector.extract_strided_slice %57 {offsets = [24, 0], sizes = [12, 256], strides = [1, 1]} : vector<44x256xf32> to vector<12x256xf32>
    %72 = vector.extract_strided_slice %57 {offsets = [25, 0], sizes = [12, 256], strides = [1, 1]} : vector<44x256xf32> to vector<12x256xf32>
    %73 = vector.extract_strided_slice %57 {offsets = [26, 0], sizes = [12, 256], strides = [1, 1]} : vector<44x256xf32> to vector<12x256xf32>
    %74 = vector.extract_strided_slice %57 {offsets = [27, 0], sizes = [12, 256], strides = [1, 1]} : vector<44x256xf32> to vector<12x256xf32>
    %75 = vector.extract_strided_slice %57 {offsets = [28, 0], sizes = [12, 256], strides = [1, 1]} : vector<44x256xf32> to vector<12x256xf32>
    %76 = vector.extract_strided_slice %57 {offsets = [29, 0], sizes = [12, 256], strides = [1, 1]} : vector<44x256xf32> to vector<12x256xf32>
    %77 = vector.extract_strided_slice %57 {offsets = [30, 0], sizes = [12, 256], strides = [1, 1]} : vector<44x256xf32> to vector<12x256xf32>
    %78 = vector.extract_strided_slice %57 {offsets = [31, 0], sizes = [12, 256], strides = [1, 1]} : vector<44x256xf32> to vector<12x256xf32>
    %79 = vector.extract_strided_slice %57 {offsets = [32, 0], sizes = [12, 256], strides = [1, 1]} : vector<44x256xf32> to vector<12x256xf32>
    %80 = vector.extract_strided_slice %58 {offsets = [0, 0], sizes = [12, 128], strides = [1, 1]} : vector<12x256xf32> to vector<12x128xf32>
    %81 = vector.extract_strided_slice %59 {offsets = [0, 0], sizes = [12, 128], strides = [1, 1]} : vector<12x256xf32> to vector<12x128xf32>
    %82 = vector.extract_strided_slice %60 {offsets = [0, 0], sizes = [12, 128], strides = [1, 1]} : vector<12x256xf32> to vector<12x128xf32>
    %83 = vector.extract_strided_slice %61 {offsets = [0, 0], sizes = [12, 128], strides = [1, 1]} : vector<12x256xf32> to vector<12x128xf32>
    %84 = vector.extract_strided_slice %62 {offsets = [0, 0], sizes = [12, 128], strides = [1, 1]} : vector<12x256xf32> to vector<12x128xf32>
    %85 = vector.extract_strided_slice %63 {offsets = [0, 0], sizes = [12, 128], strides = [1, 1]} : vector<12x256xf32> to vector<12x128xf32>
    %86 = vector.extract_strided_slice %64 {offsets = [0, 0], sizes = [12, 128], strides = [1, 1]} : vector<12x256xf32> to vector<12x128xf32>
    %87 = vector.extract_strided_slice %65 {offsets = [0, 0], sizes = [12, 128], strides = [1, 1]} : vector<12x256xf32> to vector<12x128xf32>
    %88 = vector.extract_strided_slice %66 {offsets = [0, 0], sizes = [12, 128], strides = [1, 1]} : vector<12x256xf32> to vector<12x128xf32>
    %89 = vector.extract_strided_slice %67 {offsets = [0, 0], sizes = [12, 128], strides = [1, 1]} : vector<12x256xf32> to vector<12x128xf32>
    %90 = vector.extract_strided_slice %68 {offsets = [0, 0], sizes = [12, 128], strides = [1, 1]} : vector<12x256xf32> to vector<12x128xf32>
    %91 = tpu.concatenate %80, %81, %82, %83, %84, %85, %86, %87, %88, %89, %90 in 1 : vector<12x128xf32>, vector<12x128xf32>, vector<12x128xf32>, vector<12x128xf32>, vector<12x128xf32>, vector<12x128xf32>, vector<12x128xf32>, vector<12x128xf32>, vector<12x128xf32>, vector<12x128xf32>, vector<12x128xf32> -> vector<12x1408xf32>
    %92 = vector.extract_strided_slice %69 {offsets = [0, 0], sizes = [12, 128], strides = [1, 1]} : vector<12x256xf32> to vector<12x128xf32>
    %93 = vector.extract_strided_slice %70 {offsets = [0, 0], sizes = [12, 128], strides = [1, 1]} : vector<12x256xf32> to vector<12x128xf32>
    %94 = vector.extract_strided_slice %71 {offsets = [0, 0], sizes = [12, 128], strides = [1, 1]} : vector<12x256xf32> to vector<12x128xf32>
    %95 = vector.extract_strided_slice %72 {offsets = [0, 0], sizes = [12, 128], strides = [1, 1]} : vector<12x256xf32> to vector<12x128xf32>
    %96 = vector.extract_strided_slice %73 {offsets = [0, 0], sizes = [12, 128], strides = [1, 1]} : vector<12x256xf32> to vector<12x128xf32>
    %97 = vector.extract_strided_slice %74 {offsets = [0, 0], sizes = [12, 128], strides = [1, 1]} : vector<12x256xf32> to vector<12x128xf32>
    %98 = vector.extract_strided_slice %75 {offsets = [0, 0], sizes = [12, 128], strides = [1, 1]} : vector<12x256xf32> to vector<12x128xf32>
    %99 = vector.extract_strided_slice %76 {offsets = [0, 0], sizes = [12, 128], strides = [1, 1]} : vector<12x256xf32> to vector<12x128xf32>
    %100 = vector.extract_strided_slice %77 {offsets = [0, 0], sizes = [12, 128], strides = [1, 1]} : vector<12x256xf32> to vector<12x128xf32>
    %101 = vector.extract_strided_slice %78 {offsets = [0, 0], sizes = [12, 128], strides = [1, 1]} : vector<12x256xf32> to vector<12x128xf32>
    %102 = vector.extract_strided_slice %79 {offsets = [0, 0], sizes = [12, 128], strides = [1, 1]} : vector<12x256xf32> to vector<12x128xf32>
    %103 = tpu.concatenate %92, %93, %94, %95, %96, %97, %98, %99, %100, %101, %102 in 1 : vector<12x128xf32>, vector<12x128xf32>, vector<12x128xf32>, vector<12x128xf32>, vector<12x128xf32>, vector<12x128xf32>, vector<12x128xf32>, vector<12x128xf32>, vector<12x128xf32>, vector<12x128xf32>, vector<12x128xf32> -> vector<12x1408xf32>
    %104 = tpu.concatenate %91, %103 in 0 : vector<12x1408xf32>, vector<12x1408xf32> -> vector<24x1408xf32>
    %105 = vector.extract_strided_slice %58 {offsets = [0, 128], sizes = [12, 128], strides = [1, 1]} : vector<12x256xf32> to vector<12x128xf32>
    %106 = vector.extract_strided_slice %59 {offsets = [0, 128], sizes = [12, 128], strides = [1, 1]} : vector<12x256xf32> to vector<12x128xf32>
    %107 = vector.extract_strided_slice %60 {offsets = [0, 128], sizes = [12, 128], strides = [1, 1]} : vector<12x256xf32> to vector<12x128xf32>
    %108 = vector.extract_strided_slice %61 {offsets = [0, 128], sizes = [12, 128], strides = [1, 1]} : vector<12x256xf32> to vector<12x128xf32>
    %109 = vector.extract_strided_slice %62 {offsets = [0, 128], sizes = [12, 128], strides = [1, 1]} : vector<12x256xf32> to vector<12x128xf32>
    %110 = vector.extract_strided_slice %63 {offsets = [0, 128], sizes = [12, 128], strides = [1, 1]} : vector<12x256xf32> to vector<12x128xf32>
    %111 = vector.extract_strided_slice %64 {offsets = [0, 128], sizes = [12, 128], strides = [1, 1]} : vector<12x256xf32> to vector<12x128xf32>
    %112 = vector.extract_strided_slice %65 {offsets = [0, 128], sizes = [12, 128], strides = [1, 1]} : vector<12x256xf32> to vector<12x128xf32>
    %113 = vector.extract_strided_slice %66 {offsets = [0, 128], sizes = [12, 128], strides = [1, 1]} : vector<12x256xf32> to vector<12x128xf32>
    %114 = vector.extract_strided_slice %67 {offsets = [0, 128], sizes = [12, 128], strides = [1, 1]} : vector<12x256xf32> to vector<12x128xf32>
    %115 = vector.extract_strided_slice %68 {offsets = [0, 128], sizes = [12, 128], strides = [1, 1]} : vector<12x256xf32> to vector<12x128xf32>
    %116 = tpu.concatenate %105, %106, %107, %108, %109, %110, %111, %112, %113, %114, %115 in 1 : vector<12x128xf32>, vector<12x128xf32>, vector<12x128xf32>, vector<12x128xf32>, vector<12x128xf32>, vector<12x128xf32>, vector<12x128xf32>, vector<12x128xf32>, vector<12x128xf32>, vector<12x128xf32>, vector<12x128xf32> -> vector<12x1408xf32>
    %117 = vector.extract_strided_slice %69 {offsets = [0, 128], sizes = [12, 128], strides = [1, 1]} : vector<12x256xf32> to vector<12x128xf32>
    %118 = vector.extract_strided_slice %70 {offsets = [0, 128], sizes = [12, 128], strides = [1, 1]} : vector<12x256xf32> to vector<12x128xf32>
    %119 = vector.extract_strided_slice %71 {offsets = [0, 128], sizes = [12, 128], strides = [1, 1]} : vector<12x256xf32> to vector<12x128xf32>
    %120 = vector.extract_strided_slice %72 {offsets = [0, 128], sizes = [12, 128], strides = [1, 1]} : vector<12x256xf32> to vector<12x128xf32>
    %121 = vector.extract_strided_slice %73 {offsets = [0, 128], sizes = [12, 128], strides = [1, 1]} : vector<12x256xf32> to vector<12x128xf32>
    %122 = vector.extract_strided_slice %74 {offsets = [0, 128], sizes = [12, 128], strides = [1, 1]} : vector<12x256xf32> to vector<12x128xf32>
    %123 = vector.extract_strided_slice %75 {offsets = [0, 128], sizes = [12, 128], strides = [1, 1]} : vector<12x256xf32> to vector<12x128xf32>
    %124 = vector.extract_strided_slice %76 {offsets = [0, 128], sizes = [12, 128], strides = [1, 1]} : vector<12x256xf32> to vector<12x128xf32>
    %125 = vector.extract_strided_slice %77 {offsets = [0, 128], sizes = [12, 128], strides = [1, 1]} : vector<12x256xf32> to vector<12x128xf32>
    %126 = vector.extract_strided_slice %78 {offsets = [0, 128], sizes = [12, 128], strides = [1, 1]} : vector<12x256xf32> to vector<12x128xf32>
    %127 = vector.extract_strided_slice %79 {offsets = [0, 128], sizes = [12, 128], strides = [1, 1]} : vector<12x256xf32> to vector<12x128xf32>
    %128 = tpu.concatenate %117, %118, %119, %120, %121, %122, %123, %124, %125, %126, %127 in 1 : vector<12x128xf32>, vector<12x128xf32>, vector<12x128xf32>, vector<12x128xf32>, vector<12x128xf32>, vector<12x128xf32>, vector<12x128xf32>, vector<12x128xf32>, vector<12x128xf32>, vector<12x128xf32>, vector<12x128xf32> -> vector<12x1408xf32>
    %129 = tpu.concatenate %116, %128 in 0 : vector<12x1408xf32>, vector<12x1408xf32> -> vector<24x1408xf32>
    %c0_i32_59 = arith.constant 0 : i32
    %130 = tpu.memref_slice %arg13[%c0_i32_59] : memref<3x!tpu.dma_semaphore, #tpu.memory_space<semaphore_mem>> -> memref<1x!tpu.dma_semaphore, #tpu.memory_space<semaphore_mem>>
    %131 = tpu.memref_squeeze %130 : memref<1x!tpu.dma_semaphore, #tpu.memory_space<semaphore_mem>> -> memref<!tpu.dma_semaphore, #tpu.memory_space<semaphore_mem>>
    tpu.wait_dma2 semaphore(%131 : memref<!tpu.dma_semaphore, #tpu.memory_space<semaphore_mem>>) src(%arg6 : memref<2x1408x128xf32, #tpu.memory_space<any>>) dst(%arg10 : memref<2x1408x128xf32, #tpu.memory_space<vmem>>)
    %c0_60 = arith.constant 0 : index
    %c0_61 = arith.constant 0 : index
    %c0_62 = arith.constant 0 : index
    %132 = vector.load %arg10[%c0_60, %c0_61, %c0_62] : memref<2x1408x128xf32, #tpu.memory_space<vmem>>, vector<1x1408x128xf32>
    %133 = vector.shape_cast %132 : vector<1x1408x128xf32> to vector<1408x128xf32>
    %cst_63 = arith.constant dense<0.000000e+00> : vector<24x128xf32>
    %134 = tpu.matmul %104, %133, %cst_63 {dimension_numbers = #tpu.dot_dimension_numbers<[1], [0], [0], [1], [0, 0, 1, 1], [], []>} : vector<24x1408xf32>, vector<1408x128xf32>, vector<24x128xf32> -> vector<24x128xf32>
    %c1_64 = arith.constant 1 : index
    %c0_65 = arith.constant 0 : index
    %c0_66 = arith.constant 0 : index
    %135 = vector.load %arg10[%c1_64, %c0_65, %c0_66] : memref<2x1408x128xf32, #tpu.memory_space<vmem>>, vector<1x1408x128xf32>
    %136 = vector.shape_cast %135 : vector<1x1408x128xf32> to vector<1408x128xf32>
    %cst_67 = arith.constant dense<0.000000e+00> : vector<24x128xf32>
    %137 = tpu.matmul %129, %136, %cst_67 {dimension_numbers = #tpu.dot_dimension_numbers<[1], [0], [0], [1], [0, 0, 1, 1], [], []>} : vector<24x1408xf32>, vector<1408x128xf32>, vector<24x128xf32> -> vector<24x128xf32>
    %138 = tpu.concatenate %134, %137 in 1 : vector<24x128xf32>, vector<24x128xf32> -> vector<24x256xf32>
    %c0_68 = arith.constant 0 : index
    %c0_69 = arith.constant 0 : index
    %139 = vector.load %arg3[%c0_68, %c0_69] : memref<1x256xf32, #tpu.memory_space<vmem>>, vector<1x256xf32>
    %140 = vector.broadcast %139 : vector<1x256xf32> to vector<24x256xf32>
    %141 = arith.addf %138, %140 : vector<24x256xf32>
    %142 = vector.extract_strided_slice %141 {offsets = [0, 0], sizes = [3, 256], strides = [1, 1]} : vector<24x256xf32> to vector<3x256xf32>
    %cst_70 = arith.constant dense<0xFF800000> : vector<256xf32>
    %143 = vector.multi_reduction <maximumf>, %142, %cst_70 [0] : vector<3x256xf32> to vector<256xf32>
    %144 = vector.shape_cast %143 : vector<256xf32> to vector<1x256xf32>
    %145 = vector.extract_strided_slice %141 {offsets = [12, 0], sizes = [3, 256], strides = [1, 1]} : vector<24x256xf32> to vector<3x256xf32>
    %cst_71 = arith.constant dense<0xFF800000> : vector<256xf32>
    %146 = vector.multi_reduction <maximumf>, %145, %cst_71 [0] : vector<3x256xf32> to vector<256xf32>
    %147 = vector.shape_cast %146 : vector<256xf32> to vector<1x256xf32>
    %148 = tpu.concatenate %144, %147 in 0 : vector<1x256xf32>, vector<1x256xf32> -> vector<2x256xf32>
    %149 = vector.extract_strided_slice %141 {offsets = [3, 0], sizes = [3, 256], strides = [1, 1]} : vector<24x256xf32> to vector<3x256xf32>
    %cst_72 = arith.constant dense<0xFF800000> : vector<256xf32>
    %150 = vector.multi_reduction <maximumf>, %149, %cst_72 [0] : vector<3x256xf32> to vector<256xf32>
    %151 = vector.shape_cast %150 : vector<256xf32> to vector<1x256xf32>
    %152 = vector.extract_strided_slice %141 {offsets = [15, 0], sizes = [3, 256], strides = [1, 1]} : vector<24x256xf32> to vector<3x256xf32>
    %cst_73 = arith.constant dense<0xFF800000> : vector<256xf32>
    %153 = vector.multi_reduction <maximumf>, %152, %cst_73 [0] : vector<3x256xf32> to vector<256xf32>
    %154 = vector.shape_cast %153 : vector<256xf32> to vector<1x256xf32>
    %155 = tpu.concatenate %151, %154 in 0 : vector<1x256xf32>, vector<1x256xf32> -> vector<2x256xf32>
    %156 = vector.extract_strided_slice %141 {offsets = [6, 0], sizes = [3, 256], strides = [1, 1]} : vector<24x256xf32> to vector<3x256xf32>
    %cst_74 = arith.constant dense<0xFF800000> : vector<256xf32>
    %157 = vector.multi_reduction <maximumf>, %156, %cst_74 [0] : vector<3x256xf32> to vector<256xf32>
    %158 = vector.shape_cast %157 : vector<256xf32> to vector<1x256xf32>
    %159 = vector.extract_strided_slice %141 {offsets = [18, 0], sizes = [3, 256], strides = [1, 1]} : vector<24x256xf32> to vector<3x256xf32>
    %cst_75 = arith.constant dense<0xFF800000> : vector<256xf32>
    %160 = vector.multi_reduction <maximumf>, %159, %cst_75 [0] : vector<3x256xf32> to vector<256xf32>
    %161 = vector.shape_cast %160 : vector<256xf32> to vector<1x256xf32>
    %162 = tpu.concatenate %158, %161 in 0 : vector<1x256xf32>, vector<1x256xf32> -> vector<2x256xf32>
    %163 = vector.extract_strided_slice %141 {offsets = [9, 0], sizes = [3, 256], strides = [1, 1]} : vector<24x256xf32> to vector<3x256xf32>
    %cst_76 = arith.constant dense<0xFF800000> : vector<256xf32>
    %164 = vector.multi_reduction <maximumf>, %163, %cst_76 [0] : vector<3x256xf32> to vector<256xf32>
    %165 = vector.shape_cast %164 : vector<256xf32> to vector<1x256xf32>
    %166 = vector.extract_strided_slice %141 {offsets = [21, 0], sizes = [3, 256], strides = [1, 1]} : vector<24x256xf32> to vector<3x256xf32>
    %cst_77 = arith.constant dense<0xFF800000> : vector<256xf32>
    %167 = vector.multi_reduction <maximumf>, %166, %cst_77 [0] : vector<3x256xf32> to vector<256xf32>
    %168 = vector.shape_cast %167 : vector<256xf32> to vector<1x256xf32>
    %169 = tpu.concatenate %165, %168 in 0 : vector<1x256xf32>, vector<1x256xf32> -> vector<2x256xf32>
    %170 = vector.extract_strided_slice %148 {offsets = [0, 0], sizes = [2, 64], strides = [1, 1]} : vector<2x256xf32> to vector<2x64xf32>
    %171 = vector.extract_strided_slice %155 {offsets = [0, 0], sizes = [2, 64], strides = [1, 1]} : vector<2x256xf32> to vector<2x64xf32>
    %172 = vector.extract_strided_slice %162 {offsets = [0, 0], sizes = [2, 64], strides = [1, 1]} : vector<2x256xf32> to vector<2x64xf32>
    %173 = vector.extract_strided_slice %169 {offsets = [0, 0], sizes = [2, 64], strides = [1, 1]} : vector<2x256xf32> to vector<2x64xf32>
    %174 = tpu.concatenate %170, %171, %172, %173 in 1 : vector<2x64xf32>, vector<2x64xf32>, vector<2x64xf32>, vector<2x64xf32> -> vector<2x256xf32>
    %175 = vector.extract_strided_slice %148 {offsets = [0, 64], sizes = [2, 64], strides = [1, 1]} : vector<2x256xf32> to vector<2x64xf32>
    %176 = vector.extract_strided_slice %155 {offsets = [0, 64], sizes = [2, 64], strides = [1, 1]} : vector<2x256xf32> to vector<2x64xf32>
    %177 = vector.extract_strided_slice %162 {offsets = [0, 64], sizes = [2, 64], strides = [1, 1]} : vector<2x256xf32> to vector<2x64xf32>
    %178 = vector.extract_strided_slice %169 {offsets = [0, 64], sizes = [2, 64], strides = [1, 1]} : vector<2x256xf32> to vector<2x64xf32>
    %179 = tpu.concatenate %175, %176, %177, %178 in 1 : vector<2x64xf32>, vector<2x64xf32>, vector<2x64xf32>, vector<2x64xf32> -> vector<2x256xf32>
    %180 = vector.extract_strided_slice %148 {offsets = [0, 128], sizes = [2, 64], strides = [1, 1]} : vector<2x256xf32> to vector<2x64xf32>
    %181 = vector.extract_strided_slice %155 {offsets = [0, 128], sizes = [2, 64], strides = [1, 1]} : vector<2x256xf32> to vector<2x64xf32>
    %182 = vector.extract_strided_slice %162 {offsets = [0, 128], sizes = [2, 64], strides = [1, 1]} : vector<2x256xf32> to vector<2x64xf32>
    %183 = vector.extract_strided_slice %169 {offsets = [0, 128], sizes = [2, 64], strides = [1, 1]} : vector<2x256xf32> to vector<2x64xf32>
    %184 = tpu.concatenate %180, %181, %182, %183 in 1 : vector<2x64xf32>, vector<2x64xf32>, vector<2x64xf32>, vector<2x64xf32> -> vector<2x256xf32>
    %185 = vector.extract_strided_slice %148 {offsets = [0, 192], sizes = [2, 64], strides = [1, 1]} : vector<2x256xf32> to vector<2x64xf32>
    %186 = vector.extract_strided_slice %155 {offsets = [0, 192], sizes = [2, 64], strides = [1, 1]} : vector<2x256xf32> to vector<2x64xf32>
    %187 = vector.extract_strided_slice %162 {offsets = [0, 192], sizes = [2, 64], strides = [1, 1]} : vector<2x256xf32> to vector<2x64xf32>
    %188 = vector.extract_strided_slice %169 {offsets = [0, 192], sizes = [2, 64], strides = [1, 1]} : vector<2x256xf32> to vector<2x64xf32>
    %189 = tpu.concatenate %185, %186, %187, %188 in 1 : vector<2x64xf32>, vector<2x64xf32>, vector<2x64xf32>, vector<2x64xf32> -> vector<2x256xf32>
    %190 = tpu.concatenate %174, %179, %184, %189 in 0 : vector<2x256xf32>, vector<2x256xf32>, vector<2x256xf32>, vector<2x256xf32> -> vector<8x256xf32>
    %c1_i32_78 = arith.constant 1 : i32
    %191 = tpu.memref_slice %arg13[%c1_i32_78] : memref<3x!tpu.dma_semaphore, #tpu.memory_space<semaphore_mem>> -> memref<1x!tpu.dma_semaphore, #tpu.memory_space<semaphore_mem>>
    %192 = tpu.memref_squeeze %191 : memref<1x!tpu.dma_semaphore, #tpu.memory_space<semaphore_mem>> -> memref<!tpu.dma_semaphore, #tpu.memory_space<semaphore_mem>>
    tpu.wait_dma2 semaphore(%192 : memref<!tpu.dma_semaphore, #tpu.memory_space<semaphore_mem>>) src(%arg7 : memref<385x1024xf32, #tpu.memory_space<any>>) dst(%arg11 : memref<385x1024xf32, #tpu.memory_space<vmem>>)
    %c0_79 = arith.constant 0 : index
    %c0_80 = arith.constant 0 : index
    %193 = vector.load %arg11[%c0_79, %c0_80] : memref<385x1024xf32, #tpu.memory_space<vmem>>, vector<256x1024xf32>
    %cst_81 = arith.constant dense<0.000000e+00> : vector<8x1024xf32>
    %194 = tpu.matmul %190, %193, %cst_81 {dimension_numbers = #tpu.dot_dimension_numbers<[1], [0], [0], [1], [0, 0, 1, 1], [], []>} : vector<8x256xf32>, vector<256x1024xf32>, vector<8x1024xf32> -> vector<8x1024xf32>
    %c384 = arith.constant 384 : index
    %c0_82 = arith.constant 0 : index
    %195 = vector.load %arg11[%c384, %c0_82] : memref<385x1024xf32, #tpu.memory_space<vmem>>, vector<1x1024xf32>
    %196 = vector.broadcast %195 : vector<1x1024xf32> to vector<8x1024xf32>
    %197 = arith.addf %194, %196 : vector<8x1024xf32>
    %198 = vector.extract_strided_slice %197 {offsets = [0, 0], sizes = [2, 1024], strides = [1, 1]} : vector<8x1024xf32> to vector<2x1024xf32>
    %199 = vector.extract_strided_slice %197 {offsets = [2, 0], sizes = [2, 1024], strides = [1, 1]} : vector<8x1024xf32> to vector<2x1024xf32>
    %200 = vector.extract_strided_slice %197 {offsets = [4, 0], sizes = [2, 1024], strides = [1, 1]} : vector<8x1024xf32> to vector<2x1024xf32>
    %201 = vector.extract_strided_slice %197 {offsets = [6, 0], sizes = [2, 1024], strides = [1, 1]} : vector<8x1024xf32> to vector<2x1024xf32>
    %c256 = arith.constant 256 : index
    %c0_83 = arith.constant 0 : index
    %202 = vector.load %arg11[%c256, %c0_83] : memref<385x1024xf32, #tpu.memory_space<vmem>>, vector<128x512xf32>
    %c256_84 = arith.constant 256 : index
    %c512 = arith.constant 512 : index
    %203 = vector.load %arg11[%c256_84, %c512] : memref<385x1024xf32, #tpu.memory_space<vmem>>, vector<128x512xf32>
    %204 = vector.extract_strided_slice %198 {offsets = [0, 0], sizes = [2, 512], strides = [1, 1]} : vector<2x1024xf32> to vector<2x512xf32>
    %205 = arith.negf %204 : vector<2x512xf32>
    %206 = math.exp %205 : vector<2x512xf32>
    %cst_85 = arith.constant 1.000000e+00 : f32
    %207 = vector.broadcast %cst_85 : f32 to vector<2x512xf32>
    %208 = arith.addf %207, %206 : vector<2x512xf32>
    %209 = arith.divf %207, %208 : vector<2x512xf32>
    %210 = vector.extract_strided_slice %209 {offsets = [0, 0], sizes = [2, 128], strides = [1, 1]} : vector<2x512xf32> to vector<2x128xf32>
    %211 = vector.extract_strided_slice %204 {offsets = [0, 256], sizes = [2, 128], strides = [1, 1]} : vector<2x512xf32> to vector<2x128xf32>
    %212 = math.tanh %211 : vector<2x128xf32>
    %213 = arith.mulf %210, %212 : vector<2x128xf32>
    %214 = vector.extract_strided_slice %209 {offsets = [0, 384], sizes = [2, 128], strides = [1, 1]} : vector<2x512xf32> to vector<2x128xf32>
    %215 = math.tanh %213 : vector<2x128xf32>
    %216 = arith.mulf %214, %215 : vector<2x128xf32>
    %217 = vector.extract_strided_slice %201 {offsets = [0, 512], sizes = [2, 512], strides = [1, 1]} : vector<2x1024xf32> to vector<2x512xf32>
    %218 = arith.negf %217 : vector<2x512xf32>
    %219 = math.exp %218 : vector<2x512xf32>
    %cst_86 = arith.constant 1.000000e+00 : f32
    %220 = vector.broadcast %cst_86 : f32 to vector<2x512xf32>
    %221 = arith.addf %220, %219 : vector<2x512xf32>
    %222 = arith.divf %220, %221 : vector<2x512xf32>
    %223 = vector.extract_strided_slice %222 {offsets = [0, 0], sizes = [2, 128], strides = [1, 1]} : vector<2x512xf32> to vector<2x128xf32>
    %224 = vector.extract_strided_slice %217 {offsets = [0, 256], sizes = [2, 128], strides = [1, 1]} : vector<2x512xf32> to vector<2x128xf32>
    %225 = math.tanh %224 : vector<2x128xf32>
    %226 = arith.mulf %223, %225 : vector<2x128xf32>
    %227 = vector.extract_strided_slice %222 {offsets = [0, 384], sizes = [2, 128], strides = [1, 1]} : vector<2x512xf32> to vector<2x128xf32>
    %228 = math.tanh %226 : vector<2x128xf32>
    %229 = arith.mulf %227, %228 : vector<2x128xf32>
    %230 = vector.extract_strided_slice %199 {offsets = [0, 0], sizes = [2, 512], strides = [1, 1]} : vector<2x1024xf32> to vector<2x512xf32>
    %cst_87 = arith.constant dense<0.000000e+00> : vector<2x512xf32>
    %231 = tpu.matmul %216, %202, %cst_87 {dimension_numbers = #tpu.dot_dimension_numbers<[1], [0], [0], [1], [0, 0, 1, 1], [], []>} : vector<2x128xf32>, vector<128x512xf32>, vector<2x512xf32> -> vector<2x512xf32>
    %232 = arith.addf %230, %231 : vector<2x512xf32>
    %233 = vector.extract_strided_slice %200 {offsets = [0, 512], sizes = [2, 512], strides = [1, 1]} : vector<2x1024xf32> to vector<2x512xf32>
    %cst_88 = arith.constant dense<0.000000e+00> : vector<2x512xf32>
    %234 = tpu.matmul %229, %203, %cst_88 {dimension_numbers = #tpu.dot_dimension_numbers<[1], [0], [0], [1], [0, 0, 1, 1], [], []>} : vector<2x128xf32>, vector<128x512xf32>, vector<2x512xf32> -> vector<2x512xf32>
    %235 = arith.addf %233, %234 : vector<2x512xf32>
    %236 = arith.negf %232 : vector<2x512xf32>
    %237 = math.exp %236 : vector<2x512xf32>
    %cst_89 = arith.constant 1.000000e+00 : f32
    %238 = vector.broadcast %cst_89 : f32 to vector<2x512xf32>
    %239 = arith.addf %238, %237 : vector<2x512xf32>
    %240 = arith.divf %238, %239 : vector<2x512xf32>
    %241 = vector.extract_strided_slice %232 {offsets = [0, 256], sizes = [2, 128], strides = [1, 1]} : vector<2x512xf32> to vector<2x128xf32>
    %242 = math.tanh %241 : vector<2x128xf32>
    %243 = vector.extract_strided_slice %240 {offsets = [0, 128], sizes = [2, 128], strides = [1, 1]} : vector<2x512xf32> to vector<2x128xf32>
    %244 = arith.mulf %243, %213 : vector<2x128xf32>
    %245 = vector.extract_strided_slice %240 {offsets = [0, 0], sizes = [2, 128], strides = [1, 1]} : vector<2x512xf32> to vector<2x128xf32>
    %246 = arith.mulf %245, %242 : vector<2x128xf32>
    %247 = arith.addf %244, %246 : vector<2x128xf32>
    %248 = vector.extract_strided_slice %240 {offsets = [0, 384], sizes = [2, 128], strides = [1, 1]} : vector<2x512xf32> to vector<2x128xf32>
    %249 = math.tanh %247 : vector<2x128xf32>
    %250 = arith.mulf %248, %249 : vector<2x128xf32>
    %251 = arith.negf %235 : vector<2x512xf32>
    %252 = math.exp %251 : vector<2x512xf32>
    %cst_90 = arith.constant 1.000000e+00 : f32
    %253 = vector.broadcast %cst_90 : f32 to vector<2x512xf32>
    %254 = arith.addf %253, %252 : vector<2x512xf32>
    %255 = arith.divf %253, %254 : vector<2x512xf32>
    %256 = vector.extract_strided_slice %235 {offsets = [0, 256], sizes = [2, 128], strides = [1, 1]} : vector<2x512xf32> to vector<2x128xf32>
    %257 = math.tanh %256 : vector<2x128xf32>
    %258 = vector.extract_strided_slice %255 {offsets = [0, 128], sizes = [2, 128], strides = [1, 1]} : vector<2x512xf32> to vector<2x128xf32>
    %259 = arith.mulf %258, %226 : vector<2x128xf32>
    %260 = vector.extract_strided_slice %255 {offsets = [0, 0], sizes = [2, 128], strides = [1, 1]} : vector<2x512xf32> to vector<2x128xf32>
    %261 = arith.mulf %260, %257 : vector<2x128xf32>
    %262 = arith.addf %259, %261 : vector<2x128xf32>
    %263 = vector.extract_strided_slice %255 {offsets = [0, 384], sizes = [2, 128], strides = [1, 1]} : vector<2x512xf32> to vector<2x128xf32>
    %264 = math.tanh %262 : vector<2x128xf32>
    %265 = arith.mulf %263, %264 : vector<2x128xf32>
    %266 = vector.extract_strided_slice %200 {offsets = [0, 0], sizes = [2, 512], strides = [1, 1]} : vector<2x1024xf32> to vector<2x512xf32>
    %cst_91 = arith.constant dense<0.000000e+00> : vector<2x512xf32>
    %267 = tpu.matmul %250, %202, %cst_91 {dimension_numbers = #tpu.dot_dimension_numbers<[1], [0], [0], [1], [0, 0, 1, 1], [], []>} : vector<2x128xf32>, vector<128x512xf32>, vector<2x512xf32> -> vector<2x512xf32>
    %268 = arith.addf %266, %267 : vector<2x512xf32>
    %269 = vector.extract_strided_slice %199 {offsets = [0, 512], sizes = [2, 512], strides = [1, 1]} : vector<2x1024xf32> to vector<2x512xf32>
    %cst_92 = arith.constant dense<0.000000e+00> : vector<2x512xf32>
    %270 = tpu.matmul %265, %203, %cst_92 {dimension_numbers = #tpu.dot_dimension_numbers<[1], [0], [0], [1], [0, 0, 1, 1], [], []>} : vector<2x128xf32>, vector<128x512xf32>, vector<2x512xf32> -> vector<2x512xf32>
    %271 = arith.addf %269, %270 : vector<2x512xf32>
    %272 = arith.negf %268 : vector<2x512xf32>
    %273 = math.exp %272 : vector<2x512xf32>
    %cst_93 = arith.constant 1.000000e+00 : f32
    %274 = vector.broadcast %cst_93 : f32 to vector<2x512xf32>
    %275 = arith.addf %274, %273 : vector<2x512xf32>
    %276 = arith.divf %274, %275 : vector<2x512xf32>
    %277 = vector.extract_strided_slice %268 {offsets = [0, 256], sizes = [2, 128], strides = [1, 1]} : vector<2x512xf32> to vector<2x128xf32>
    %278 = math.tanh %277 : vector<2x128xf32>
    %279 = vector.extract_strided_slice %276 {offsets = [0, 128], sizes = [2, 128], strides = [1, 1]} : vector<2x512xf32> to vector<2x128xf32>
    %280 = arith.mulf %279, %247 : vector<2x128xf32>
    %281 = vector.extract_strided_slice %276 {offsets = [0, 0], sizes = [2, 128], strides = [1, 1]} : vector<2x512xf32> to vector<2x128xf32>
    %282 = arith.mulf %281, %278 : vector<2x128xf32>
    %283 = arith.addf %280, %282 : vector<2x128xf32>
    %284 = vector.extract_strided_slice %276 {offsets = [0, 384], sizes = [2, 128], strides = [1, 1]} : vector<2x512xf32> to vector<2x128xf32>
    %285 = math.tanh %283 : vector<2x128xf32>
    %286 = arith.mulf %284, %285 : vector<2x128xf32>
    %287 = arith.negf %271 : vector<2x512xf32>
    %288 = math.exp %287 : vector<2x512xf32>
    %cst_94 = arith.constant 1.000000e+00 : f32
    %289 = vector.broadcast %cst_94 : f32 to vector<2x512xf32>
    %290 = arith.addf %289, %288 : vector<2x512xf32>
    %291 = arith.divf %289, %290 : vector<2x512xf32>
    %292 = vector.extract_strided_slice %271 {offsets = [0, 256], sizes = [2, 128], strides = [1, 1]} : vector<2x512xf32> to vector<2x128xf32>
    %293 = math.tanh %292 : vector<2x128xf32>
    %294 = vector.extract_strided_slice %291 {offsets = [0, 128], sizes = [2, 128], strides = [1, 1]} : vector<2x512xf32> to vector<2x128xf32>
    %295 = arith.mulf %294, %262 : vector<2x128xf32>
    %296 = vector.extract_strided_slice %291 {offsets = [0, 0], sizes = [2, 128], strides = [1, 1]} : vector<2x512xf32> to vector<2x128xf32>
    %297 = arith.mulf %296, %293 : vector<2x128xf32>
    %298 = arith.addf %295, %297 : vector<2x128xf32>
    %299 = vector.extract_strided_slice %291 {offsets = [0, 384], sizes = [2, 128], strides = [1, 1]} : vector<2x512xf32> to vector<2x128xf32>
    %300 = math.tanh %298 : vector<2x128xf32>
    %301 = arith.mulf %299, %300 : vector<2x128xf32>
    %302 = vector.extract_strided_slice %201 {offsets = [0, 0], sizes = [2, 512], strides = [1, 1]} : vector<2x1024xf32> to vector<2x512xf32>
    %cst_95 = arith.constant dense<0.000000e+00> : vector<2x512xf32>
    %303 = tpu.matmul %286, %202, %cst_95 {dimension_numbers = #tpu.dot_dimension_numbers<[1], [0], [0], [1], [0, 0, 1, 1], [], []>} : vector<2x128xf32>, vector<128x512xf32>, vector<2x512xf32> -> vector<2x512xf32>
    %304 = arith.addf %302, %303 : vector<2x512xf32>
    %305 = vector.extract_strided_slice %198 {offsets = [0, 512], sizes = [2, 512], strides = [1, 1]} : vector<2x1024xf32> to vector<2x512xf32>
    %cst_96 = arith.constant dense<0.000000e+00> : vector<2x512xf32>
    %306 = tpu.matmul %301, %203, %cst_96 {dimension_numbers = #tpu.dot_dimension_numbers<[1], [0], [0], [1], [0, 0, 1, 1], [], []>} : vector<2x128xf32>, vector<128x512xf32>, vector<2x512xf32> -> vector<2x512xf32>
    %307 = arith.addf %305, %306 : vector<2x512xf32>
    %308 = arith.negf %304 : vector<2x512xf32>
    %309 = math.exp %308 : vector<2x512xf32>
    %cst_97 = arith.constant 1.000000e+00 : f32
    %310 = vector.broadcast %cst_97 : f32 to vector<2x512xf32>
    %311 = arith.addf %310, %309 : vector<2x512xf32>
    %312 = arith.divf %310, %311 : vector<2x512xf32>
    %313 = vector.extract_strided_slice %304 {offsets = [0, 256], sizes = [2, 128], strides = [1, 1]} : vector<2x512xf32> to vector<2x128xf32>
    %314 = math.tanh %313 : vector<2x128xf32>
    %315 = vector.extract_strided_slice %312 {offsets = [0, 128], sizes = [2, 128], strides = [1, 1]} : vector<2x512xf32> to vector<2x128xf32>
    %316 = arith.mulf %315, %283 : vector<2x128xf32>
    %317 = vector.extract_strided_slice %312 {offsets = [0, 0], sizes = [2, 128], strides = [1, 1]} : vector<2x512xf32> to vector<2x128xf32>
    %318 = arith.mulf %317, %314 : vector<2x128xf32>
    %319 = arith.addf %316, %318 : vector<2x128xf32>
    %320 = vector.extract_strided_slice %312 {offsets = [0, 384], sizes = [2, 128], strides = [1, 1]} : vector<2x512xf32> to vector<2x128xf32>
    %321 = math.tanh %319 : vector<2x128xf32>
    %322 = arith.mulf %320, %321 : vector<2x128xf32>
    %323 = arith.negf %307 : vector<2x512xf32>
    %324 = math.exp %323 : vector<2x512xf32>
    %cst_98 = arith.constant 1.000000e+00 : f32
    %325 = vector.broadcast %cst_98 : f32 to vector<2x512xf32>
    %326 = arith.addf %325, %324 : vector<2x512xf32>
    %327 = arith.divf %325, %326 : vector<2x512xf32>
    %328 = vector.extract_strided_slice %307 {offsets = [0, 256], sizes = [2, 128], strides = [1, 1]} : vector<2x512xf32> to vector<2x128xf32>
    %329 = math.tanh %328 : vector<2x128xf32>
    %330 = vector.extract_strided_slice %327 {offsets = [0, 128], sizes = [2, 128], strides = [1, 1]} : vector<2x512xf32> to vector<2x128xf32>
    %331 = arith.mulf %330, %298 : vector<2x128xf32>
    %332 = vector.extract_strided_slice %327 {offsets = [0, 0], sizes = [2, 128], strides = [1, 1]} : vector<2x512xf32> to vector<2x128xf32>
    %333 = arith.mulf %332, %329 : vector<2x128xf32>
    %334 = arith.addf %331, %333 : vector<2x128xf32>
    %335 = vector.extract_strided_slice %327 {offsets = [0, 384], sizes = [2, 128], strides = [1, 1]} : vector<2x512xf32> to vector<2x128xf32>
    %336 = math.tanh %334 : vector<2x128xf32>
    %337 = arith.mulf %335, %336 : vector<2x128xf32>
    %338 = tpu.concatenate %216, %337 in 1 : vector<2x128xf32>, vector<2x128xf32> -> vector<2x256xf32>
    %339 = math.tanh %338 : vector<2x256xf32>
    %340 = tpu.concatenate %250, %301 in 1 : vector<2x128xf32>, vector<2x128xf32> -> vector<2x256xf32>
    %341 = math.tanh %340 : vector<2x256xf32>
    %342 = tpu.concatenate %286, %265 in 1 : vector<2x128xf32>, vector<2x128xf32> -> vector<2x256xf32>
    %343 = math.tanh %342 : vector<2x256xf32>
    %344 = tpu.concatenate %322, %229 in 1 : vector<2x128xf32>, vector<2x128xf32> -> vector<2x256xf32>
    %345 = math.tanh %344 : vector<2x256xf32>
    %c2_i32_99 = arith.constant 2 : i32
    %346 = tpu.memref_slice %arg13[%c2_i32_99] : memref<3x!tpu.dma_semaphore, #tpu.memory_space<semaphore_mem>> -> memref<1x!tpu.dma_semaphore, #tpu.memory_space<semaphore_mem>>
    %347 = tpu.memref_squeeze %346 : memref<1x!tpu.dma_semaphore, #tpu.memory_space<semaphore_mem>> -> memref<!tpu.dma_semaphore, #tpu.memory_space<semaphore_mem>>
    tpu.wait_dma2 semaphore(%347 : memref<!tpu.dma_semaphore, #tpu.memory_space<semaphore_mem>>) src(%arg8 : memref<385x1024xf32, #tpu.memory_space<any>>) dst(%arg12 : memref<385x1024xf32, #tpu.memory_space<vmem>>)
    %348 = tpu.concatenate %339, %341, %343, %345 in 0 : vector<2x256xf32>, vector<2x256xf32>, vector<2x256xf32>, vector<2x256xf32> -> vector<8x256xf32>
    %c0_100 = arith.constant 0 : index
    %c0_101 = arith.constant 0 : index
    %349 = vector.load %arg12[%c0_100, %c0_101] : memref<385x1024xf32, #tpu.memory_space<vmem>>, vector<256x1024xf32>
    %cst_102 = arith.constant dense<0.000000e+00> : vector<8x1024xf32>
    %350 = tpu.matmul %348, %349, %cst_102 {dimension_numbers = #tpu.dot_dimension_numbers<[1], [0], [0], [1], [0, 0, 1, 1], [], []>} : vector<8x256xf32>, vector<256x1024xf32>, vector<8x1024xf32> -> vector<8x1024xf32>
    %c384_103 = arith.constant 384 : index
    %c0_104 = arith.constant 0 : index
    %351 = vector.load %arg12[%c384_103, %c0_104] : memref<385x1024xf32, #tpu.memory_space<vmem>>, vector<1x1024xf32>
    %352 = vector.broadcast %351 : vector<1x1024xf32> to vector<8x1024xf32>
    %353 = arith.addf %350, %352 : vector<8x1024xf32>
    %c256_105 = arith.constant 256 : index
    %c0_106 = arith.constant 0 : index
    %354 = vector.load %arg12[%c256_105, %c0_106] : memref<385x1024xf32, #tpu.memory_space<vmem>>, vector<128x512xf32>
    %355 = vector.extract_strided_slice %353 {offsets = [0, 0], sizes = [2, 512], strides = [1, 1]} : vector<8x1024xf32> to vector<2x512xf32>
    %356 = arith.negf %355 : vector<2x512xf32>
    %357 = math.exp %356 : vector<2x512xf32>
    %cst_107 = arith.constant 1.000000e+00 : f32
    %358 = vector.broadcast %cst_107 : f32 to vector<2x512xf32>
    %359 = arith.addf %358, %357 : vector<2x512xf32>
    %360 = arith.divf %358, %359 : vector<2x512xf32>
    %361 = vector.extract_strided_slice %360 {offsets = [0, 0], sizes = [2, 128], strides = [1, 1]} : vector<2x512xf32> to vector<2x128xf32>
    %362 = vector.extract_strided_slice %355 {offsets = [0, 256], sizes = [2, 128], strides = [1, 1]} : vector<2x512xf32> to vector<2x128xf32>
    %363 = math.tanh %362 : vector<2x128xf32>
    %364 = arith.mulf %361, %363 : vector<2x128xf32>
    %365 = vector.extract_strided_slice %360 {offsets = [0, 384], sizes = [2, 128], strides = [1, 1]} : vector<2x512xf32> to vector<2x128xf32>
    %366 = math.tanh %364 : vector<2x128xf32>
    %367 = arith.mulf %365, %366 : vector<2x128xf32>
    %368 = vector.extract_strided_slice %353 {offsets = [2, 0], sizes = [2, 512], strides = [1, 1]} : vector<8x1024xf32> to vector<2x512xf32>
    %cst_108 = arith.constant dense<0.000000e+00> : vector<2x512xf32>
    %369 = tpu.matmul %367, %354, %cst_108 {dimension_numbers = #tpu.dot_dimension_numbers<[1], [0], [0], [1], [0, 0, 1, 1], [], []>} : vector<2x128xf32>, vector<128x512xf32>, vector<2x512xf32> -> vector<2x512xf32>
    %370 = arith.addf %368, %369 : vector<2x512xf32>
    %371 = arith.negf %370 : vector<2x512xf32>
    %372 = math.exp %371 : vector<2x512xf32>
    %cst_109 = arith.constant 1.000000e+00 : f32
    %373 = vector.broadcast %cst_109 : f32 to vector<2x512xf32>
    %374 = arith.addf %373, %372 : vector<2x512xf32>
    %375 = arith.divf %373, %374 : vector<2x512xf32>
    %376 = vector.extract_strided_slice %370 {offsets = [0, 256], sizes = [2, 128], strides = [1, 1]} : vector<2x512xf32> to vector<2x128xf32>
    %377 = math.tanh %376 : vector<2x128xf32>
    %378 = vector.extract_strided_slice %375 {offsets = [0, 128], sizes = [2, 128], strides = [1, 1]} : vector<2x512xf32> to vector<2x128xf32>
    %379 = arith.mulf %378, %364 : vector<2x128xf32>
    %380 = vector.extract_strided_slice %375 {offsets = [0, 0], sizes = [2, 128], strides = [1, 1]} : vector<2x512xf32> to vector<2x128xf32>
    %381 = arith.mulf %380, %377 : vector<2x128xf32>
    %382 = arith.addf %379, %381 : vector<2x128xf32>
    %383 = vector.extract_strided_slice %375 {offsets = [0, 384], sizes = [2, 128], strides = [1, 1]} : vector<2x512xf32> to vector<2x128xf32>
    %384 = math.tanh %382 : vector<2x128xf32>
    %385 = arith.mulf %383, %384 : vector<2x128xf32>
    %386 = vector.extract_strided_slice %353 {offsets = [4, 0], sizes = [2, 512], strides = [1, 1]} : vector<8x1024xf32> to vector<2x512xf32>
    %cst_110 = arith.constant dense<0.000000e+00> : vector<2x512xf32>
    %387 = tpu.matmul %385, %354, %cst_110 {dimension_numbers = #tpu.dot_dimension_numbers<[1], [0], [0], [1], [0, 0, 1, 1], [], []>} : vector<2x128xf32>, vector<128x512xf32>, vector<2x512xf32> -> vector<2x512xf32>
    %388 = arith.addf %386, %387 : vector<2x512xf32>
    %389 = arith.negf %388 : vector<2x512xf32>
    %390 = math.exp %389 : vector<2x512xf32>
    %cst_111 = arith.constant 1.000000e+00 : f32
    %391 = vector.broadcast %cst_111 : f32 to vector<2x512xf32>
    %392 = arith.addf %391, %390 : vector<2x512xf32>
    %393 = arith.divf %391, %392 : vector<2x512xf32>
    %394 = vector.extract_strided_slice %388 {offsets = [0, 256], sizes = [2, 128], strides = [1, 1]} : vector<2x512xf32> to vector<2x128xf32>
    %395 = math.tanh %394 : vector<2x128xf32>
    %396 = vector.extract_strided_slice %393 {offsets = [0, 128], sizes = [2, 128], strides = [1, 1]} : vector<2x512xf32> to vector<2x128xf32>
    %397 = arith.mulf %396, %382 : vector<2x128xf32>
    %398 = vector.extract_strided_slice %393 {offsets = [0, 0], sizes = [2, 128], strides = [1, 1]} : vector<2x512xf32> to vector<2x128xf32>
    %399 = arith.mulf %398, %395 : vector<2x128xf32>
    %400 = arith.addf %397, %399 : vector<2x128xf32>
    %401 = vector.extract_strided_slice %393 {offsets = [0, 384], sizes = [2, 128], strides = [1, 1]} : vector<2x512xf32> to vector<2x128xf32>
    %402 = math.tanh %400 : vector<2x128xf32>
    %403 = arith.mulf %401, %402 : vector<2x128xf32>
    %404 = vector.extract_strided_slice %353 {offsets = [6, 0], sizes = [2, 512], strides = [1, 1]} : vector<8x1024xf32> to vector<2x512xf32>
    %cst_112 = arith.constant dense<0.000000e+00> : vector<2x512xf32>
    %405 = tpu.matmul %403, %354, %cst_112 {dimension_numbers = #tpu.dot_dimension_numbers<[1], [0], [0], [1], [0, 0, 1, 1], [], []>} : vector<2x128xf32>, vector<128x512xf32>, vector<2x512xf32> -> vector<2x512xf32>
    %406 = arith.addf %404, %405 : vector<2x512xf32>
    %407 = arith.negf %406 : vector<2x512xf32>
    %408 = math.exp %407 : vector<2x512xf32>
    %cst_113 = arith.constant 1.000000e+00 : f32
    %409 = vector.broadcast %cst_113 : f32 to vector<2x512xf32>
    %410 = arith.addf %409, %408 : vector<2x512xf32>
    %411 = arith.divf %409, %410 : vector<2x512xf32>
    %412 = vector.extract_strided_slice %406 {offsets = [0, 256], sizes = [2, 128], strides = [1, 1]} : vector<2x512xf32> to vector<2x128xf32>
    %413 = math.tanh %412 : vector<2x128xf32>
    %414 = vector.extract_strided_slice %411 {offsets = [0, 128], sizes = [2, 128], strides = [1, 1]} : vector<2x512xf32> to vector<2x128xf32>
    %415 = arith.mulf %414, %400 : vector<2x128xf32>
    %416 = vector.extract_strided_slice %411 {offsets = [0, 0], sizes = [2, 128], strides = [1, 1]} : vector<2x512xf32> to vector<2x128xf32>
    %417 = arith.mulf %416, %413 : vector<2x128xf32>
    %418 = arith.addf %415, %417 : vector<2x128xf32>
    %419 = vector.extract_strided_slice %411 {offsets = [0, 384], sizes = [2, 128], strides = [1, 1]} : vector<2x512xf32> to vector<2x128xf32>
    %420 = math.tanh %418 : vector<2x128xf32>
    %421 = arith.mulf %419, %420 : vector<2x128xf32>
    %422 = vector.extract_strided_slice %353 {offsets = [6, 512], sizes = [2, 512], strides = [1, 1]} : vector<8x1024xf32> to vector<2x512xf32>
    %423 = arith.negf %422 : vector<2x512xf32>
    %424 = math.exp %423 : vector<2x512xf32>
    %cst_114 = arith.constant 1.000000e+00 : f32
    %425 = vector.broadcast %cst_114 : f32 to vector<2x512xf32>
    %426 = arith.addf %425, %424 : vector<2x512xf32>
    %427 = arith.divf %425, %426 : vector<2x512xf32>
    %428 = vector.extract_strided_slice %427 {offsets = [0, 0], sizes = [2, 128], strides = [1, 1]} : vector<2x512xf32> to vector<2x128xf32>
    %429 = vector.extract_strided_slice %422 {offsets = [0, 256], sizes = [2, 128], strides = [1, 1]} : vector<2x512xf32> to vector<2x128xf32>
    %430 = math.tanh %429 : vector<2x128xf32>
    %431 = arith.mulf %428, %430 : vector<2x128xf32>
    %432 = vector.extract_strided_slice %427 {offsets = [0, 384], sizes = [2, 128], strides = [1, 1]} : vector<2x512xf32> to vector<2x128xf32>
    %433 = math.tanh %431 : vector<2x128xf32>
    %434 = arith.mulf %432, %433 : vector<2x128xf32>
    %435 = tpu.concatenate %421, %434 in 1 : vector<2x128xf32>, vector<2x128xf32> -> vector<2x256xf32>
    %436 = math.tanh %435 : vector<2x256xf32>
    %c0_115 = arith.constant 0 : index
    %c0_116 = arith.constant 0 : index
    %437 = vector.load %arg4[%c0_115, %c0_116] : memref<256x7xf32, #tpu.memory_space<vmem>>, vector<256x7xf32>
    %cst_117 = arith.constant dense<0.000000e+00> : vector<2x7xf32>
    %438 = tpu.matmul %436, %437, %cst_117 {dimension_numbers = #tpu.dot_dimension_numbers<[1], [0], [0], [1], [0, 0, 1, 1], [], []>} : vector<2x256xf32>, vector<256x7xf32>, vector<2x7xf32> -> vector<2x7xf32>
    %c0_118 = arith.constant 0 : index
    %c0_119 = arith.constant 0 : index
    %439 = vector.load %arg5[%c0_118, %c0_119] : memref<1x7xf32, #tpu.memory_space<vmem>>, vector<1x7xf32>
    %440 = vector.broadcast %439 : vector<1x7xf32> to vector<2x7xf32>
    %441 = arith.addf %438, %440 : vector<2x7xf32>
    %c0_120 = arith.constant 0 : index
    %c0_121 = arith.constant 0 : index
    %442 = vector.load %arg9[%c0_120, %c0_121] : memref<2x7xf32, #tpu.memory_space<vmem>>, vector<2x7xf32>
    tpu.vector_store %arg9[%c0_120, %c0_121], %441 {strides = array<i32>} : memref<2x7xf32, #tpu.memory_space<vmem>>, vector<2x7xf32>,
    return
  }
}

</mosaic_0001>

<bundles_post_ra>
// kernel: imu_encoder_forward.1
= control target key start
LH: loop header
LB: loop body
LE: loop exit
PB: predicated region body
PF: predicated region fallthrough
CT: control target
= control target key end

     0   :  { %14 = vsyncpa [#allocation7], 0  ;;  %s9269_s0 = inlined_call_operand.vmem [shape: f32[2,32,6], index: 0, kind: input, shape index: {}]   ;;  %s9270_s1 = inlined_call_operand.hbm [shape: f32[66,256], index: 1, kind: input, shape index: {}]   ;;  %s9271_s2 = inlined_call_operand.hbm [shape: f32[1,256], index: 2, kind: input, shape index: {}]   ;;  %s9272_s3 = inlined_call_operand.hbm [shape: f32[1,256], index: 3, kind: input, shape index: {}]   ;;  %s9273_s4 = inlined_call_operand.vmem [shape: f32[256,7], index: 4, kind: input, shape index: {}]   ;;  %s9274_s5 = inlined_call_operand.hbm [shape: f32[1,7], index: 5, kind: input, shape index: {}]   ;;  %s9275_s6 = inlined_call_operand.hbm [shape: f32[2,1408,128], index: 6, kind: input, shape index: {}]   ;;  %s9276_s7 = inlined_call_operand.hbm [shape: f32[385,1024], index: 7, kind: input, shape index: {}]   ;;  %s9277_s8 = inlined_call_operand.hbm [shape: f32[385,1024], index: 8, kind: input, shape index: {}]   ;;  %s9278_s9 = inlined_call_operand.hbm [shape: f32[2,7], index: 9, kind: output, shape index: {}]  }
   0x1   :  { %15 = vsyncpa [#allocation10], 0 }
   0x2   :  { %16 = vsyncpa [#allocation13], 0 }
   0x3   :  { %17 = vsyncpa [#allocation8], 0  ;;  %s6892_s30 = smov [#allocation9]   ;;  %s6893_s11 = smov [#allocation6]  }
   0x4   :  { %s38_s10 = sshll.u32 %s6892_s30, 4  ;;  %s25_s12 = sshll.u32 %s6893_s11, 4  ;;  %s39_s10 = int_to_ptr.vmem [resolvable:$true] %s38_s10  ;;  %s26_s12 = int_to_ptr.vmem [resolvable:$true] %s25_s12 }
   0x5   :  { %s6726_s13 = scalar_lea.vmem %s39_s10, 32  ;;  %p6731_p1 = scmp.lt.s32.totalorder %s39_s10, %s39_s10 }
   0x6   :  { %p6727_p0 = scmp.ne.s32.totalorder %s39_s10, %s6726_s13  ;;  %p6732_p2 = scmp.lt.s32.totalorder %s6726_s13, %s6726_s13 }
   0x8   :  { %p6733_p3 = por %p6732_p2, %p6731_p1 }
   0xa   :  { %p6734_p4 = pnand %p6733_p3, %p6727_p0 }
   0xc   :  { %6737 = shalt.err (!%p6734_p4)
}
   0xd   :  { %41 = dma.hbm_to_vmem [thread:$0]  %s9271_s2, 32, %s39_s10, [#allocation10]  }
   0xe   :  { %s6746_s16 = scalar_lea.vmem %s26_s12, 2304  ;;  %p6751_p6 = scmp.lt.s32.totalorder %s26_s12, %s26_s12 }
   0xf   :  { %p6747_p5 = scmp.ne.s32.totalorder %s26_s12, %s6746_s16  ;;  %p6752_p7 = scmp.lt.s32.totalorder %s6746_s16, %s6746_s16 }
  0x11   :  { %p6753_p8 = por %p6752_p7, %p6751_p6 }
  0x13   :  { %p6754_p9 = pnand %p6753_p8, %p6747_p5 }
  0x15   :  { %6757 = shalt.err (!%p6754_p9)
}
  0x16   :  { %s6894_s17 = smov 256   ;;  %s6895_s18 = smov 16  }
  0x17   :  { %31 = dma.hbm_to_vmem [thread:$0]  %s9270_s1, 2304, %s26_s12, [#allocation7], %s6894_s17, %s6894_s17, %s6895_s18  }
  0x18   :  { %s6896_s21 = smov [#allocation11]   ;;  %s6897_s23 = smov [#allocation12]  }
  0x19   :  { %s48_s22 = sshll.u32 %s6896_s21, 4  ;;  %s60_s24 = sshll.u32 %s6897_s23, 4  ;;  %s49_s22 = int_to_ptr.vmem [resolvable:$true] %s48_s22  ;;  %s61_s24 = int_to_ptr.vmem [resolvable:$true] %s60_s24 }
  0x1a   :  { %s6766_s2 = scalar_lea.vmem %s49_s22, 32  ;;  %p6771_p11 = scmp.lt.s32.totalorder %s49_s22, %s49_s22 }
  0x1b   :  { %p6767_p10 = scmp.ne.s32.totalorder %s49_s22, %s6766_s2  ;;  %p6772_p12 = scmp.lt.s32.totalorder %s6766_s2, %s6766_s2 }
  0x1d   :  { %p6773_p13 = por %p6772_p12, %p6771_p11 }
  0x1f   :  { %p6774_p0 = pnand %p6773_p13, %p6767_p10 }
  0x21   :  { %6777 = shalt.err (!%p6774_p0)
}
  0x22   :  { %51 = dma.hbm_to_vmem [thread:$0]  %s9272_s3, 32, %s49_s22, [#allocation10]  }
  0x23   :  { %s6786_s27 = scalar_lea.vmem %s61_s24, 16  ;;  %s6790_s1 = scalar_lea.vmem %s61_s24, 32 }
  0x24   :  { %p6787_p1 = scmp.ne.s32.totalorder %s61_s24, %s6786_s27  ;;  %p6791_p2 = scmp.lt.s32.totalorder %s61_s24, %s61_s24 }
  0x25   :  { %p6792_p3 = scmp.lt.s32.totalorder %s6790_s1, %s6786_s27 }
  0x27   :  { %p6793_p4 = por %p6792_p3, %p6791_p2 }
  0x29   :  { %p6794_p5 = pnand %p6793_p4, %p6787_p1 }
  0x2b   :  { %6797 = shalt.err (!%p6794_p5)
}
  0x2c   :  { %63 = dma.hbm_to_vmem [thread:$0]  %s9274_s5, 16, %s61_s24, [#allocation13]  }
  0x2d   :  { %6878 = dma.done.wait [#allocation7], 2304  }
  0x2e   :  { %6879 = vsyncadd [#allocation7], 4294964992 }
  0x2f   :  { %6880 = dma.done.wait [#allocation10], 64  }
  0x30   :  { %6881 = vsyncadd [#allocation10], 4294967232 }
  0x31   :  { %6882 = dma.done.wait [#allocation13], 16  }
  0x32   :  { %6883 = vsyncadd [#allocation13], 4294967280  ;;  %v120_v0 = vld [vmem:[%s9269_s0 + $0x3] sm:$0xff]  ;;  %s6898_s12 = smov 18   ;;  %s6899_s13 = smov 6   ;;  %vm535_vm0 = vcmask 1041408  }
  0x33   :  { %v114_v1 = vld [vmem:[%s9269_s0 + $0x1] sm:$0xff]  ;;  %168 = vrot.lane.b32.xlu1 %v120_v0, %s6898_s12  ;;  %s6900_s17 = smov 24   ;;  %s6901_s18 = smov 12   ;;  %v6999_v5 = vld [vmem:[%s9269_s0 + $0x9] sm:$0xff]  ;;  %v504_v14 = vld [vmem:[#allocation6 + $0x78] sm:$0xff]  ;;  %v9279_v31 = vmov 0.0  }
  0x34   :  { %144 = vrot.lane.b32.xlu0 %v114_v1, %s6899_s13  ;;  %v123_v2 = vld [vmem:[%s9269_s0 + $0x4] sm:$0xff]  ;;  %s6902_s23 = smov 30   ;;  %s6903_s27 = smov 36   ;;  %v505_v11 = vld [vmem:[#allocation6 + $0x80] sm:$0x3]  ;;  %v503_v15 = vld [vmem:[#allocation6 + $0x70] sm:$0xff]  ;;  %606 = vmatprep.mubr.f32.mxu0 %v9279_v31 }
  0x35   :  { %v117_v3 = vld [vmem:[%s9269_s0 + $0x2] sm:$0xff]  ;;  %v7010_v7 = vld [vmem:[%s9269_s0 + $0xa] sm:$0xff]  ;;  %s6904_s14 = smov 42   ;;  %v500_v20 = vld [vmem:[#allocation6 + $0x58] sm:$0xff]  ;;  %s6905_s25 = smov 48   ;;  %vm259_vm1 = vcmask 48128  }
  0x36   :  { %v126_v4 = vld [vmem:[%s9269_s0 + $0x5] sm:$0xff]  ;;  %v116_v17 = vld [vmem:[%s9269_s0 + $0x11] sm:$0x3f]  ;;  %v496_v26 = vld [vmem:[#allocation6 + $0x38] sm:$0xff]  ;;  %s6907_s10 = smov 54   ;;  %s6908_s21 = smov 60  }
  0x37   :  { %180 = vrot.lane.b32.xlu1 %v123_v2, %s6900_s17  ;;  %v129_v6 = vld [vmem:[%s9269_s0 + $0x6] sm:$0xff]  ;;  %v499_v21 = vld [vmem:[#allocation6 + $0x50] sm:$0xff]  ;;  %v492_v34 = vld [vmem:[#allocation6 + $0x18] sm:$0xff]  ;;  %vm263_vm2 = vcmask 97280   ;;  %vm267_vm3 = vcmask 146432   ;;  %vm271_vm4 = vcmask 195584  }
  0x38   :  { %156 = vrot.lane.b32.xlu0 %v117_v3, %s6901_s18  ;;  %v506_v8 = vld [vmem:[#allocation6 + $0x88] sm:$0x3]  ;;  %v121_v9 = vld [vmem:[%s9269_s0 + $0xb] sm:$0xff]  ;;  %v501_v19 = vld [vmem:[#allocation6 + $0x60] sm:$0xff]  ;;  %vm275_vm5 = vcmask 244736   ;;  %vm279_vm6 = vcmask 293888  }
  0x39   :  { %v5774_v10 = vld [vmem:[%s9269_s0 + $0x21] sm:$0xff]  ;;  %5801 = vmatprep.subr.msk.mxu0 %vm535_vm0, %v506_v8  ;;  %v124_v16 = vld [vmem:[%s9269_s0 + $0xc] sm:$0xff]  ;;  %v125_v41 = vld [vmem:[%s9269_s0 + $0x14] sm:$0x3f]  ;;  %vm283_vm7 = vcmask 343040   ;;  %vm287_vm8 = vcmask 392192  }
  0x3a   :  { %v5777_v12 = vld [vmem:[%s9269_s0 + $0x22] sm:$0xff]  ;;  %5802 = vmatpush1.msk.msra.mxu0 %vm535_vm0, %v505_v11  ;;  %v127_v27 = vld [vmem:[%s9269_s0 + $0xd] sm:$0xff]  ;;  %v128_v45 = vld [vmem:[%s9269_s0 + $0x15] sm:$0x3f]  ;;  %vm291_vm9 = vcmask 441344   ;;  %vm295_vm10 = vcmask 490496  }
  0x3b   :  { %192 = vrot.lane.b32.xlu1 %v126_v4, %s6902_s23  ;;  %v132_v13 = vld [vmem:[%s9269_s0 + $0x7] sm:$0xff]  ;;  %558 = vmatprep.subr.mxu0 %v504_v14  ;;  %v119_v28 = vld [vmem:[%s9269_s0 + $0x12] sm:$0x3f]  ;;  %v136_v59 = vld [vmem:[%s9269_s0 + $0x18] sm:$0x3f]  ;;  %vm519_vm11 = vcmask 539648  }
  0x3c   :  { %146 = vrot.lane.b32.xlu0 %v6999_v5, %s6899_s13  ;;  %v502_v18 = vld [vmem:[#allocation6 + $0x68] sm:$0xff]  ;;  %559 = vmatpush1.msra.mxu0 %v503_v15  ;;  %v497_v25 = vld [vmem:[#allocation6 + $0x40] sm:$0xff]  ;;  %v495_v29 = vld [vmem:[#allocation6 + $0x30] sm:$0xff]  ;;  %vm481_vm12 = vcmask 1045504   ;;  %s6910_s1 = smov [#allocation3]  }
  0x3d   :  { %560 = vmatprep.subr.mxu0 %v502_v18  ;;  %v5780_v22 = vld [vmem:[%s9269_s0 + $0x23] sm:$0xff]  ;;  %v491_v35 = vld [vmem:[#allocation6 + $0x10] sm:$0xff]  ;;  %v138_v62 = vld [vmem:[%s9269_s0 + $0x19] sm:$0x3f]  ;;  %s95_s28 = sshll.u32 %s6910_s1, 4  ;;  %s96_s28 = int_to_ptr.vmem [resolvable:$true] %s95_s28 }
  0x3e   :  { %v7047_v23 = vld [vmem:[%s9269_s0 + $0x8] sm:$0xff]  ;;  %561 = vmatpush1.msra.mxu0 %v501_v19  ;;  %v493_v32 = vld [vmem:[#allocation6 + $0x20] sm:$0xff]  ;;  %v122_v38 = vld [vmem:[%s9269_s0 + $0x13] sm:$0x3f] }
  0x3f   :  { %204 = vrot.lane.b32.xlu1 %v129_v6, %s6903_s27  ;;  %562 = vmatprep.subr.mxu0 %v500_v20  ;;  %v498_v24 = vld [vmem:[#allocation6 + $0x48] sm:$0xff]  ;;  %v489_v39 = vld [vmem:[#allocation6] sm:$0xff]  ;;  %v135_v48 = vld [vmem:[%s9269_s0 + $0x10] sm:$0xff] }
  0x40   :  { %158 = vrot.lane.b32.xlu0 %v7010_v7, %s6901_s18  ;;  %563 = vmatpush1.msra.mxu0 %v499_v21  ;;  %v494_v30 = vld [vmem:[#allocation6 + $0x28] sm:$0xff]  ;;  %v131_v49 = vld [vmem:[%s9269_s0 + $0x16] sm:$0x3f]  ;;  %v5771_v21 = vld [vmem:[%s9269_s0 + $0x20] sm:$0xff] }
  0x41   :  { %564 = vmatprep.subr.mxu0 %v498_v24  ;;  %v5783_v33 = vld [vmem:[%s9269_s0 + $0x24] sm:$0xff]  ;;  %v130_v37 = vld [vmem:[%s9269_s0 + $0xe] sm:$0xff]  ;;  %v134_v53 = vld [vmem:[%s9269_s0 + $0x17] sm:$0x3f] }
  0x42   :  { %565 = vmatpush1.msra.mxu0 %v497_v25  ;;  %v490_v36 = vld [vmem:[#allocation6 + $0x8] sm:$0xff]  ;;  %v137_v52 = vld [vmem:[%s9269_s0 + $0x11] sm:$0xff]  ;;  %v140_v63 = vld [vmem:[%s9269_s0 + $0x1a] sm:$0x3f] }
  0x43   :  { %170 = vrot.lane.b32.xlu1 %v121_v9, %s6898_s12  ;;  %566 = vmatprep.subr.mxu0 %v496_v26  ;;  %v5775_v40 = vld [vmem:[%s9269_s0 + $0x29] sm:$0xff]  ;;  %v5776_v55 = vld [vmem:[%s9269_s0 + $0x31] sm:$0x3f]  ;;  %v5796_v8 = vld [vmem:[%s9269_s0 + $0x38] sm:$0x3f] }
  0x44   :  { %333 = vrot.lane.b32.xlu0 %v5774_v10, %s6899_s13  ;;  %567 = vmatpush1.msra.mxu0 %v495_v29  ;;  %v5786_v42 = vld [vmem:[%s9269_s0 + $0x25] sm:$0xff]  ;;  %v133_v44 = vld [vmem:[%s9269_s0 + $0xf] sm:$0xff]  ;;  %v5798_v9 = vld [vmem:[%s9269_s0 + $0x39] sm:$0x3f] }
  0x45   :  { %568 = vmatprep.subr.mxu0 %v494_v30  ;;  %v5778_v43 = vld [vmem:[%s9269_s0 + $0x2a] sm:$0xff]  ;;  %v139_v56 = vld [vmem:[%s9269_s0 + $0x12] sm:$0xff]  ;;  %v5800_v10 = vld [vmem:[%s9269_s0 + $0x3a] sm:$0x3f] }
  0x46   :  { %569 = vmatpush1.msra.mxu0 %v493_v32  ;;  %v5789_v46 = vld [vmem:[%s9269_s0 + $0x26] sm:$0xff]  ;;  %v5779_v58 = vld [vmem:[%s9269_s0 + $0x32] sm:$0x3f] }
  0x47   :  { %345 = vrot.lane.b32.xlu1 %v5777_v12, %s6901_s18  ;;  %570 = vmatprep.subr.mxu0 %v492_v34  ;;  %v5781_v47 = vld [vmem:[%s9269_s0 + $0x2b] sm:$0xff]  ;;  %v5782_v61 = vld [vmem:[%s9269_s0 + $0x33] sm:$0x3f]  ;;  %v111_v29 = vld [vmem:[%s9269_s0] sm:$0xff] }
  0x48   :  { %216 = vrot.lane.b32.xlu0 %v132_v13, %s6904_s14  ;;  %571 = vmatpush1.msra.mxu0 %v491_v35  ;;  %v5792_v50 = vld [vmem:[%s9269_s0 + $0x27] sm:$0xff]  ;;  %v5793_v0 = vld [vmem:[%s9269_s0 + $0x2f] sm:$0xff] }
  0x49   :  { %572 = vmatprep.subr.mxu0 %v490_v36  ;;  %v5784_v51 = vld [vmem:[%s9269_s0 + $0x2c] sm:$0xff]  ;;  %v5785_v2 = vld [vmem:[%s9269_s0 + $0x34] sm:$0x3f] }
  0x4a   :  { %573 = vmatpush1.msra.mxu0 %v489_v39  ;;  %v7135_v54 = vld [vmem:[%s9269_s0 + $0x28] sm:$0xff]  ;;  %v5795_v1 = vld [vmem:[%s9269_s0 + $0x30] sm:$0xff] }
  0x4b   :  { %182 = vrot.lane.b32.xlu1 %v124_v16, %s6900_s17  ;;  %v5787_v57 = vld [vmem:[%s9269_s0 + $0x2d] sm:$0xff]  ;;  %v5788_v4 = vld [vmem:[%s9269_s0 + $0x35] sm:$0x3f] }
  0x4c   :  { %148 = vrot.lane.b32.xlu0 %v116_v17, %s6899_s13  ;;  %v5790_v60 = vld [vmem:[%s9269_s0 + $0x2e] sm:$0xff]  ;;  %v5791_v6 = vld [vmem:[%s9269_s0 + $0x36] sm:$0x3f] }
  0x4d   :  { %v5797_v3 = vld [vmem:[%s9269_s0 + $0x31] sm:$0xff] }
  0x4f   :  { %357 = vrot.lane.b32.xlu1 %v5780_v22, %s6898_s12 }
  0x50   :  { %228 = vrot.lane.b32.xlu0 %v7047_v23, %s6905_s25 }
  0x53   :  { %194 = vrot.lane.b32.xlu1 %v127_v27, %s6902_s23 }
  0x54   :  { %160 = vrot.lane.b32.xlu0 %v119_v28, %s6901_s18 }
  0x57   :  { %369 = vrot.lane.b32.xlu1 %v5783_v33, %s6900_s17 }
  0x58   :  { %239 = vrot.lane.b32.xlu0 %v6999_v5, %s6907_s10  ;;  %v5799_v5 = vld [vmem:[%s9269_s0 + $0x32] sm:$0xff] }
  0x5b   :  { %206 = vrot.lane.b32.xlu1 %v130_v37, %s6903_s27 }
  0x5c   :  { %172 = vrot.lane.b32.xlu0 %v122_v38, %s6898_s12 }
  0x5f   :  { %335 = vrot.lane.b32.xlu1 %v5775_v40, %s6899_s13 }
  0x60   :  { %250 = vrot.lane.b32.xlu0 %v7010_v7, %s6908_s21  ;;  %v5794_v7 = vld [vmem:[%s9269_s0 + $0x37] sm:$0x3f] }
  0x63   :  { %184 = vrot.lane.b32.xlu1 %v125_v41, %s6900_s17 }
  0x64   :  { %381 = vrot.lane.b32.xlu0 %v5786_v42, %s6902_s23 }
  0x67   :  { %347 = vrot.lane.b32.xlu1 %v5778_v43, %s6901_s18 }
  0x68   :  { %218 = vrot.lane.b32.xlu0 %v133_v44, %s6904_s14 }
  0x6b   :  { %196 = vrot.lane.b32.xlu1 %v128_v45, %s6902_s23 }
  0x6c   :  { %393 = vrot.lane.b32.xlu0 %v5789_v46, %s6903_s27 }
  0x6f   :  { %359 = vrot.lane.b32.xlu1 %v5781_v47, %s6898_s12 }
  0x70   :  { %230 = vrot.lane.b32.xlu0 %v135_v48, %s6905_s25 }
  0x73   :  { %208 = vrot.lane.b32.xlu1 %v131_v49, %s6903_s27 }
  0x74   :  { %405 = vrot.lane.b32.xlu0 %v5792_v50, %s6904_s14 }
  0x77   :  { %371 = vrot.lane.b32.xlu1 %v5784_v51, %s6900_s17 }
  0x78   :  { %241 = vrot.lane.b32.xlu0 %v137_v52, %s6907_s10 }
  0x7b   :  { %220 = vrot.lane.b32.xlu1 %v134_v53, %s6904_s14 }
  0x7c   :  { %417 = vrot.lane.b32.xlu0 %v7135_v54, %s6905_s25 }
  0x7f   :  { %337 = vrot.lane.b32.xlu1 %v5776_v55, %s6899_s13 }
  0x80   :  { %252 = vrot.lane.b32.xlu0 %v139_v56, %s6908_s21 }
  0x83   :  { %428 = vrot.lane.b32.xlu1 %v5775_v40, %s6907_s10 }
  0x84   :  { %383 = vrot.lane.b32.xlu0 %v5787_v57, %s6902_s23 }
  0x87   :  { %349 = vrot.lane.b32.xlu1 %v5779_v58, %s6901_s18 }
  0x88   :  { %232 = vrot.lane.b32.xlu0 %v136_v59, %s6905_s25 }
  0x8b   :  { %439 = vrot.lane.b32.xlu1 %v5778_v43, %s6908_s21 }
  0x8c   :  { %395 = vrot.lane.b32.xlu0 %v5790_v60, %s6903_s27 }
  0x8f   :  { %361 = vrot.lane.b32.xlu1 %v5782_v61, %s6898_s12 }
  0x90   :  { %243 = vrot.lane.b32.xlu0 %v138_v62, %s6907_s10 }
  0x93   :  { %254 = vrot.lane.b32.xlu1 %v140_v63, %s6908_s21 }
  0x94   :  { %407 = vrot.lane.b32.xlu0 %v5793_v0, %s6904_s14 }
  0x97   :  { %419 = vrot.lane.b32.xlu1 %v5795_v1, %s6905_s25 }
  0x98   :  { %373 = vrot.lane.b32.xlu0 %v5785_v2, %s6900_s17 }
  0x9b   :  { %430 = vrot.lane.b32.xlu1 %v5797_v3, %s6907_s10 }
  0x9c   :  { %385 = vrot.lane.b32.xlu0 %v5788_v4, %s6902_s23 }
  0x9f   :  { %441 = vrot.lane.b32.xlu1 %v5799_v5, %s6908_s21 }
  0xa0   :  { %397 = vrot.lane.b32.xlu0 %v5791_v6, %s6903_s27 }
  0xa3   :  { %421 = vrot.lane.b32.xlu1 %v5796_v8, %s6905_s25 }
  0xa4   :  { %409 = vrot.lane.b32.xlu0 %v5794_v7, %s6904_s14 }
  0xa5   :  { %v169_v11 = vpop.permute.xlu1 %168 }
  0xa6   :  { %v145_v12 = vpop.permute.xlu0 %144 }
  0xa7   :  { %443 = vrot.lane.b32.xlu1 %v5800_v10, %s6908_s21  ;;  %v260_v33 = vsel %vm259_vm1, %v111_v29, %v145_v12 }
  0xa8   :  { %432 = vrot.lane.b32.xlu0 %v5798_v9, %s6907_s10 }
  0xa9   :  { %v181_v13 = vpop.permute.xlu1 %180 }
  0xaa   :  { %v157_v14 = vpop.permute.xlu0 %156 }
  0xab   :  { %v264_v34 = vsel %vm263_vm2, %v260_v33, %v157_v14 }
  0xac   :  { %v268_v37 = vsel %vm267_vm3, %v264_v34, %v169_v11 }
  0xad   :  { %v193_v15 = vpop.permute.xlu1 %192  ;;  %v272_v40 = vsel %vm271_vm4, %v268_v37, %v181_v13 }
  0xae   :  { %v147_v16 = vpop.permute.xlu0 %146  ;;  %v276_v41 = vsel %vm275_vm5, %v272_v40, %v193_v15 }
  0xaf   :  { %v261_v62 = vsel %vm259_vm1, %v7047_v23, %v147_v16 }
  0xb1   :  { %v205_v17 = vpop.permute.xlu1 %204 }
  0xb2   :  { %v159_v18 = vpop.permute.xlu0 %158  ;;  %v280_v44 = vsel %vm279_vm6, %v276_v41, %v205_v17  ;;  %v113_v17 = vld [vmem:[%s9269_s0 + $0x10] sm:$0x3f] }
  0xb3   :  { %v265_v1 = vsel %vm263_vm2, %v261_v62, %v159_v18 }
  0xb5   :  { %v171_v19 = vpop.permute.xlu1 %170 }
  0xb6   :  { %v334_v20 = vpop.permute.xlu0 %333  ;;  %v269_v2 = vsel %vm267_vm3, %v265_v1, %v171_v19 }
  0xb7   :  { %v448_v22 = vsel %vm259_vm1, %v5771_v21, %v334_v20 }
  0xb9   :  { %v346_v24 = vpop.permute.xlu1 %345 }
  0xba   :  { %v217_v25 = vpop.permute.xlu0 %216  ;;  %v7227_v26 = vsel %vm263_vm2, %v448_v22, %v346_v24 }
  0xbb   :  { %v284_v45 = vsel %vm283_vm7, %v280_v44, %v217_v25 }
  0xbd   :  { %v183_v27 = vpop.permute.xlu1 %182 }
  0xbe   :  { %v7229_v28 = vpop.permute.xlu0 %148  ;;  %v273_v3 = vsel %vm271_vm4, %v269_v2, %v183_v27 }
  0xbf   :  { %v262_v20 = vsel %vm259_vm1, %v113_v17, %v7229_v28 }
  0xc1   :  { %v7234_v30 = vpop.permute.xlu1 %357 }
  0xc2   :  { %v229_v32 = vpop.permute.xlu0 %228  ;;  %v454_v18 = vsel %vm267_vm3, %v7227_v26, %v7234_v30 }
  0xc3   :  { %v288_v46 = vsel %vm287_vm8, %v284_v45, %v229_v32 }
  0xc5   :  { %v195_v35 = vpop.permute.xlu1 %194 }
  0xc6   :  { %v7238_v36 = vpop.permute.xlu0 %160  ;;  %v277_v4 = vsel %vm275_vm5, %v273_v3, %v195_v35 }
  0xc7   :  { %v266_v25 = vsel %vm263_vm2, %v262_v20, %v7238_v36 }
  0xc9   :  { %v370_v38 = vpop.permute.xlu1 %369 }
  0xca   :  { %v240_v39 = vpop.permute.xlu0 %239  ;;  %v457_v19 = vsel %vm271_vm4, %v454_v18, %v370_v38 }
  0xcb   :  { %v292_v47 = vsel %vm291_vm9, %v288_v46, %v240_v39 }
  0xcd   :  { %v207_v42 = vpop.permute.xlu1 %206 }
  0xce   :  { %v173_v43 = vpop.permute.xlu0 %172  ;;  %v281_v7 = vsel %vm279_vm6, %v277_v4, %v207_v42 }
  0xcf   :  { %v270_v29 = vsel %vm267_vm3, %v266_v25, %v173_v43 }
  0xd1   :  { %v7247_v48 = vpop.permute.xlu1 %335 }
  0xd2   :  { %v251_v49 = vpop.permute.xlu0 %250  ;;  %v449_v46 = vsel %vm259_vm1, %v7135_v54, %v7247_v48 }
  0xd3   :  { %v296_v50 = vsel %vm295_vm10, %v292_v47, %v251_v49 }
  0xd4   :  { %5803 = vmatmul.mubr.msk.f32.vlgmr.msra.gmra.mxu0 %vm519_vm11, %v296_v50 }
  0xd5   :  { %612 = vmatprep.mubr.f32.mxu0 %v9279_v31  ;;  %v185_v51 = vpop.permute.xlu1 %184 }
  0xd6   :  { %v382_v52 = vpop.permute.xlu0 %381  ;;  %v274_v26 = vsel %vm271_vm4, %v270_v29, %v185_v51 }
  0xd7   :  { %v460_v21 = vsel %vm275_vm5, %v457_v19, %v382_v52 }
  0xd9   :  { %v7252_v53 = vpop.permute.xlu1 %347 }
  0xda   :  { %v219_v55 = vpop.permute.xlu0 %218  ;;  %v452_v50 = vsel %vm263_vm2, %v449_v46, %v7252_v53 }
  0xdb   :  { %v285_v8 = vsel %vm283_vm7, %v281_v7, %v219_v55  ;;  %v5773_v55 = vld [vmem:[%s9269_s0 + $0x30] sm:$0x3f]  ;;  %s6909_s0 = smov [#allocation2]  }
  0xdc   :  { %s83_s12 = sshll.u32 %s6909_s0, 4  ;;  %s84_s12 = int_to_ptr.vmem [resolvable:$true] %s83_s12 }
  0xdd   :  { %v197_v56 = vpop.permute.xlu1 %196  ;;  %s6806_s29 = scalar_lea.vmem %s84_s12, 45056  ;;  %p6811_p7 = scmp.lt.s32.totalorder %s84_s12, %s84_s12 }
  0xde   :  { %v394_v57 = vpop.permute.xlu0 %393  ;;  %v278_v33 = vsel %vm275_vm5, %v274_v26, %v197_v56  ;;  %p6807_p6 = scmp.ne.s32.totalorder %s84_s12, %s6806_s29  ;;  %p6812_p8 = scmp.lt.s32.totalorder %s6806_s29, %s6806_s29 }
  0xdf   :  { %v463_v27 = vsel %vm279_vm6, %v460_v21, %v394_v57 }
  0xe0   :  { %p6813_p9 = por %p6812_p8, %p6811_p7 }
  0xe1   :  { %v360_v58 = vpop.permute.xlu1 %359 }
  0xe2   :  { %v231_v59 = vpop.permute.xlu0 %230  ;;  %v455_v51 = vsel %vm267_vm3, %v452_v50, %v360_v58  ;;  %p6814_p10 = pnand %p6813_p9, %p6807_p6 }
  0xe3   :  { %v289_v9 = vsel %vm287_vm8, %v285_v8, %v231_v59 }
  0xe5   :  { %v209_v60 = vpop.permute.xlu1 %208 }
  0xe6   :  { %v406_v61 = vpop.permute.xlu0 %405  ;;  %v282_v37 = vsel %vm279_vm6, %v278_v33, %v209_v60 }
  0xe7   :  { %v466_v32 = vsel %vm283_vm7, %v463_v27, %v406_v61 }
  0xe9   :  { %v372_v63 = vpop.permute.xlu1 %371 }
  0xea   :  { %v242_v0 = vpop.permute.xlu0 %241  ;;  %v458_v52 = vsel %vm271_vm4, %v455_v51, %v372_v63 }
  0xeb   :  { %v293_v23 = vsel %vm291_vm9, %v289_v9, %v242_v0 }
  0xed   :  { %v221_v5 = vpop.permute.xlu1 %220 }
  0xee   :  { %v418_v6 = vpop.permute.xlu0 %417  ;;  %v286_v38 = vsel %vm283_vm7, %v282_v37, %v221_v5 }
  0xef   :  { %v469_v30 = vsel %vm287_vm8, %v466_v32, %v418_v6 }
  0xf1   :  { %v338_v10 = vpop.permute.xlu1 %337 }
  0xf2   :  { %v253_v11 = vpop.permute.xlu0 %252  ;;  %v450_v60 = vsel %vm259_vm1, %v5773_v55, %v338_v10 }
  0xf3   :  { %v297_v12 = vsel %vm295_vm10, %v293_v23, %v253_v11 }
  0xf4   :  { %5804 = vmatmul.mubr.msk.f32.gmra.mxu0 %vm519_vm11, %v297_v12 }
  0xf5   :  { %618 = vmatprep.mubr.f32.mxu0 %v9279_v31  ;;  %v429_v13 = vpop.permute.xlu1 %428 }
  0xf6   :  { %v384_v14 = vpop.permute.xlu0 %383  ;;  %v472_v28 = vsel %vm291_vm9, %v469_v30, %v429_v13 }
  0xf7   :  { %v461_v56 = vsel %vm275_vm5, %v458_v52, %v384_v14 }
  0xf9   :  { %v350_v15 = vpop.permute.xlu1 %349 }
  0xfa   :  { %v233_v16 = vpop.permute.xlu0 %232  ;;  %v453_v58 = vsel %vm263_vm2, %v450_v60, %v350_v15 }
  0xfb   :  { %v290_v39 = vsel %vm287_vm8, %v286_v38, %v233_v16 }
  0xfd   :  { %v440_v22 = vpop.permute.xlu1 %439 }
  0xfe   :  { %v396_v24 = vpop.permute.xlu0 %395  ;;  %v475_v36 = vsel %vm295_vm10, %v472_v28, %v440_v22 }
  0xff   :  { %v482_v40 = vrot.slane %v475_v36, 2  ;;  %v464_v54 = vsel %vm279_vm6, %v461_v56, %v396_v24 }
 0x101   :  { %v362_v34 = vpop.permute.xlu1 %361 }
 0x102   :  { %v244_v35 = vpop.permute.xlu0 %243  ;;  %v456_v0 = vsel %vm267_vm3, %v453_v58, %v362_v34 }
 0x103   :  { %v294_v41 = vsel %vm291_vm9, %v290_v39, %v244_v35 }
 0x105   :  { %v255_v42 = vpop.permute.xlu1 %254 }
 0x106   :  { %v408_v43 = vpop.permute.xlu0 %407  ;;  %v298_v44 = vsel %vm295_vm10, %v294_v41, %v255_v42 }
 0x107   :  { %v488_v45 = vsel %vm481_vm12, %v298_v44, %v482_v40  ;;  %v467_v48 = vsel %vm283_vm7, %v464_v54, %v408_v43 }
 0x108   :  { %5805 = vmatmul.mubr.msk.f32.gmra.mxu0 %vm519_vm11, %v488_v45 }
 0x109   :  { %v420_v47 = vpop.permute.xlu1 %419  ;;  %624 = vmatprep.mubr.f32.mxu0 %v9279_v31 }
 0x10a   :  { %v374_v49 = vpop.permute.xlu0 %373  ;;  %v470_v53 = vsel %vm287_vm8, %v467_v48, %v420_v47 }
 0x10b   :  { %v459_v2 = vsel %vm271_vm4, %v456_v0, %v374_v49 }
 0x10d   :  { %v431_v57 = vpop.permute.xlu1 %430 }
 0x10e   :  { %v386_v59 = vpop.permute.xlu0 %385  ;;  %v473_v61 = vsel %vm291_vm9, %v470_v53, %v431_v57 }
 0x10f   :  { %v462_v4 = vsel %vm275_vm5, %v459_v2, %v386_v59 }
 0x111   :  { %v442_v62 = vpop.permute.xlu1 %441 }
 0x112   :  { %v398_v63 = vpop.permute.xlu0 %397  ;;  %v476_v1 = vsel %vm295_vm10, %v473_v61, %v442_v62 }
 0x113   :  { %v483_v3 = vrot.slane %v476_v1, 2  ;;  %v465_v5 = vsel %vm279_vm6, %v462_v4, %v398_v63 }
 0x115   :  { %v422_v7 = vpop.permute.xlu1 %421  ;;  %v484_v8 = vsel %vm481_vm12, %v482_v40, %v483_v3 }
 0x116   :  { %v410_v6 = vpop.permute.xlu0 %409  ;;  %5806 = vmatmul.mubr.msk.f32.gmra.mxu0 %vm519_vm11, %v484_v8 }
 0x117   :  { %v468_v9 = vsel %vm283_vm7, %v465_v5, %v410_v6  ;;  %630 = vmatprep.mubr.f32.mxu0 %v9279_v31 }
 0x118   :  { %v471_v23 = vsel %vm287_vm8, %v468_v9, %v422_v7 }
 0x119   :  { %v444_v11 = vpop.permute.xlu1 %443 }
 0x11a   :  { %v433_v10 = vpop.permute.xlu0 %432 }
 0x11b   :  { %v474_v12 = vsel %vm291_vm9, %v471_v23, %v433_v10 }
 0x11c   :  { %v477_v13 = vsel %vm295_vm10, %v474_v12, %v444_v11 }
 0x11d   :  { %v485_v14 = vrot.slane %v477_v13, 2 }
 0x11f   :  { %v486_v15 = vsel %vm481_vm12, %v483_v3, %v485_v14 }
 0x120   :  { %5807 = vmatmul.mubr.msk.f32.gmra.mxu0 %vm519_vm11, %v486_v15 }
 0x121   :  { %636 = vmatprep.mubr.f32.mxu0 %v9279_v31 }
 0x124   :  { %5808 = vmatmul.mubr.msk.f32.gmra.mxu0 %vm519_vm11, %v485_v14 }
 0x125   :  { %6817 = shalt.err (!%p6814_p10)  }
 0x126   :  { %86 = dma.hbm_to_vmem [thread:$0]  %s9275_s6, 45056, %s84_s12, [#allocation5] }
 0x127   :  { %s6826_s3 = scalar_lea.vmem %s96_s28, 50176  ;;  %p6831_p12 = scmp.lt.s32.totalorder %s96_s28, %s96_s28 }
 0x128   :  { %p6827_p11 = scmp.ne.s32.totalorder %s96_s28, %s6826_s3  ;;  %p6832_p13 = scmp.lt.s32.totalorder %s6826_s3, %s6826_s3 }
 0x12a   :  { %p6833_p0 = por %p6832_p13, %p6831_p12 }
 0x12c   :  { %p6834_p1 = pnand %p6833_p0, %p6827_p11 }
 0x12e   :  { %6837 = shalt.err (!%p6834_p1)  }
 0x12f   :  { %98 = dma.hbm_to_vmem [thread:$0]  %s9276_s7, 50176, %s96_s28, [#allocation5 + $0x1] }
 0x130   :  { %s6911_s17 = smov [#allocation4]  }
 0x131   :  { %s107_s15 = sshll.u32 %s6911_s17, 4  ;;  %s108_s15 = int_to_ptr.vmem [resolvable:$true] %s107_s15 }
 0x132   :  { %s6846_s16 = scalar_lea.vmem %s108_s15, 50176  ;;  %p6851_p3 = scmp.lt.s32.totalorder %s108_s15, %s108_s15 }
 0x133   :  { %p6847_p2 = scmp.ne.s32.totalorder %s108_s15, %s6846_s16  ;;  %p6852_p4 = scmp.lt.s32.totalorder %s6846_s16, %s6846_s16 }
 0x135   :  { %p6853_p5 = por %p6852_p4, %p6851_p3 }
 0x137   :  { %p6854_p6 = pnand %p6853_p5, %p6847_p2 }
 0x139   :  { %6857 = shalt.err (!%p6854_p6)  }
 0x13a   :  { %110 = dma.hbm_to_vmem [thread:$0]  %s9277_s8, 50176, %s108_s15, [#allocation5 + $0x2]  ;;  %v509_v16 = vlaneseq  ;;  %v507_v19 = vld [vmem:[#allocation9] sm:$0x3]  ;;  %vm662_vm13 = vcmask 1043456   ;;  %vm645_vm14 = vcmask 1046528  }
 0x13b   :  { %vm669_vm15 = vcmask 1042432   ;;  %vm684_vm1 = vcmask 1040384   ;;  %vm656_vm2 = vcmask 1044480  }
 0x13c   :  { %v7337_v17 = vshrl.u32 %v509_v16, 7 }
 0x13e   :  { %9509 = vst [vmem:[#allocation30_spill] sm:$0xff] %v7337_v17  ;;  %v7340_v18 = vsub.s32 0, %v7337_v17  ;;  %v7343_v20 = vsub.s32 1, %v7337_v17 }
 0x140   :  { %9510 = vst [vmem:[#allocation31_spill] sm:$0xff] %v7340_v18  ;;  %9511 = vst [vmem:[#allocation32_spill] sm:$0xff] %v7343_v20  ;;  %v7346_v22 = vrot.slane %v507_v19, %v7340_v18  ;;  %v7349_v24 = vrot.slane %v507_v19, %v7343_v20 }
 0x194   :  { %v608_v21 = vpop.f32.mrf.mxu0 }
 0x195   :  { %v7352_v27 = vadd.f32 %v608_v21, %v7346_v22 }
 0x196   :  { %v610_v25 = vpop.f32.mrf.mxu0 }
 0x197   :  { %9512 = vst [vmem:[#allocation33_spill] sm:$0xff] %v7352_v27  ;;  %v7355_v29 = vadd.f32 %v610_v25, %v7349_v24  ;;  %v646_v32 = vrot.slane %v7352_v27, 1  ;;  %v651_v26 = vrot.slane %v7352_v27, 2  ;;  %v657_v30 = vrot.slane %v7352_v27, 3 }
 0x198   :  { %v663_v33 = vrot.slane %v7352_v27, 4  ;;  %v670_v28 = vrot.slane %v7352_v27, 5  ;;  %v677_v34 = vrot.slane %v7352_v27, 6  ;;  %v685_v35 = vrot.slane %v7352_v27, 7 }
 0x199   :  { %9513 = vst [vmem:[#allocation34_spill] sm:$0xff] %v7355_v29  ;;  %v809_v36 = vrot.slane %v7355_v29, 1  ;;  %v814_v38 = vrot.slane %v7355_v29, 2  ;;  %v819_v39 = vrot.slane %v7355_v29, 3  ;;  %v824_v41 = vrot.slane %v7355_v29, 4 }
 0x19a   :  { %v830_v42 = vrot.slane %v7355_v29, 5  ;;  %v837_v43 = vrot.slane %v7355_v29, 6  ;;  %v844_v44 = vrot.slane %v7355_v29, 7 }
 0x1b4   :  { %v614_v37 = vpop.f32.mrf.mxu0 }
 0x1b5   :  { %v7368_v40 = vadd.f32 %v614_v37, %v7346_v22 }
 0x1b6   :  { %v616_v45 = vpop.f32.mrf.mxu0 }
 0x1b7   :  { %9514 = vst [vmem:[#allocation35_spill] sm:$0xff] %v7368_v40  ;;  %v9284_v46 = vrot.slane %v7368_v40, 3  ;;  %v9283_v47 = vrot.slane %v7368_v40, 4  ;;  %v7377_v49 = vadd.f32 %v616_v45, %v7349_v24  ;;  %v7380_v50 = vrot.slane %v7368_v40, 1 }
 0x1b8   :  { %v7383_v51 = vrot.slane %v7368_v40, 2  ;;  %v671_v52 = vrot.slane %v7368_v40, 5  ;;  %v678_v55 = vrot.slane %v7368_v40, 6  ;;  %v686_v56 = vrot.slane %v7368_v40, 7 }
 0x1b9   :  { %v7391_v57 = vsel %vm662_vm13, %v663_v33, %v9283_v47  ;;  %v9282_v59 = vrot.slane %v7377_v49, 3  ;;  %v9281_v54 = vrot.slane %v7377_v49, 4  ;;  %v7397_v48 = vsel %vm645_vm14, %v646_v32, %v7380_v50 }
 0x1ba   :  { %9515 = vst [vmem:[#allocation36_spill] sm:$0xff] %v7391_v57  ;;  %v7401_v60 = vsel %vm481_vm12, %v651_v26, %v7383_v51  ;;  %v7404_v53 = vsel %vm669_vm15, %v670_v28, %v671_v52  ;;  %v7407_v58 = vsel %vm535_vm0, %v677_v34, %v678_v55  ;;  %v7410_v61 = vsel %vm684_vm1, %v685_v35, %v686_v56 }
 0x1bb   :  { %9516 = vst [vmem:[#allocation37_spill] sm:$0xff] %v7401_v60  ;;  %9517 = vst [vmem:[#allocation38_spill] sm:$0xff] %v7404_v53  ;;  %v7415_v62 = vsel %vm662_vm13, %v824_v41, %v9281_v54  ;;  %v7418_v63 = vrot.slane %v7377_v49, 1  ;;  %v7421_v0 = vrot.slane %v7377_v49, 2  ;;  %v831_v1 = vrot.slane %v7377_v49, 5 }
 0x1bc   :  { %9518 = vst [vmem:[#allocation39_spill] sm:$0xff] %v7407_v58  ;;  %9519 = vst [vmem:[#allocation40_spill] sm:$0xff] %v7410_v61  ;;  %v838_v2 = vrot.slane %v7377_v49, 6  ;;  %v845_v3 = vrot.slane %v7377_v49, 7  ;;  %v7429_v4 = vsel %vm656_vm2, %v657_v30, %v9284_v46  ;;  %v7434_v5 = vsel %vm656_vm2, %v819_v39, %v9282_v59 }
 0x1bd   :  { %9520 = vst [vmem:[#allocation41_spill] sm:$0xff] %v7415_v62  ;;  %9521 = vst [vmem:[#allocation42_spill] sm:$0xff] %v7434_v5  ;;  %v7438_v6 = vsel %vm645_vm14, %v809_v36, %v7418_v63  ;;  %v7442_v7 = vsel %vm481_vm12, %v814_v38, %v7421_v0  ;;  %v7445_v8 = vsel %vm669_vm15, %v830_v42, %v831_v1 }
 0x1be   :  { %9522 = vst [vmem:[#allocation43_spill] sm:$0xff] %v7438_v6  ;;  %9523 = vst [vmem:[#allocation44_spill] sm:$0xff] %v7442_v7  ;;  %v7448_v9 = vsel %vm535_vm0, %v837_v43, %v838_v2  ;;  %v7451_v23 = vsel %vm684_vm1, %v844_v44, %v845_v3 }
 0x1bf   :  { %9524 = vst [vmem:[#allocation45_spill] sm:$0xff] %v7445_v8  ;;  %9525 = vst [vmem:[#allocation46_spill] sm:$0xff] %v7448_v9 }
 0x1c0   :  { %9526 = vst [vmem:[#allocation47_spill] sm:$0xff] %v7451_v23 }
 0x1c8   :  { %v620_v10 = vpop.f32.mrf.mxu0 }
 0x1c9   :  { %v7454_v11 = vadd.f32 %v620_v10, %v7346_v22 }
 0x1ca   :  { %v622_v12 = vpop.f32.mrf.mxu0 }
 0x1cb   :  { %v7457_v13 = vrot.slane %v7454_v11, 1  ;;  %v7460_v14 = vrot.slane %v7454_v11, 2  ;;  %v7463_v15 = vadd.f32 %v622_v12, %v7349_v24  ;;  %v673_v30 = vrot.slane %v7454_v11, 5 }
 0x1cc   :  { %v680_v33 = vrot.slane %v7454_v11, 6  ;;  %v688_v28 = vrot.slane %v7454_v11, 7 }
 0x1cd   :  { %v7468_v16 = vsel %vm645_vm14, %v7380_v50, %v7457_v13  ;;  %v7473_v19 = vsel %vm481_vm12, %v7383_v51, %v7460_v14  ;;  %v7476_v21 = vrot.slane %v7463_v15, 1  ;;  %v7479_v25 = vrot.slane %v7463_v15, 2 }
 0x1ce   :  { %9527 = vst [vmem:[#allocation48_spill] sm:$0xff] %v7468_v16  ;;  %9528 = vst [vmem:[#allocation49_spill] sm:$0xff] %v7473_v19  ;;  %v833_v35 = vrot.slane %v7463_v15, 5  ;;  %v840_v37 = vrot.slane %v7463_v15, 6  ;;  %v847_v36 = vrot.slane %v7463_v15, 7  ;;  %v7501_v39 = vsel %vm669_vm15, %v671_v52, %v673_v30 }
 0x1cf   :  { %v7484_v32 = vsel %vm645_vm14, %v7418_v63, %v7476_v21  ;;  %v7489_v26 = vsel %vm481_vm12, %v7421_v0, %v7479_v25  ;;  %v7504_v41 = vsel %vm535_vm0, %v678_v55, %v680_v33  ;;  %v7519_v30 = vsel %vm684_vm1, %v686_v56, %v688_v28 }
 0x1d0   :  { %9529 = vst [vmem:[#allocation50_spill] sm:$0xff] %v7484_v32  ;;  %9530 = vst [vmem:[#allocation51_spill] sm:$0xff] %v7489_v26  ;;  %v7522_v33 = vsel %vm669_vm15, %v831_v1, %v833_v35  ;;  %v7525_v31 = vsel %vm535_vm0, %v838_v2, %v840_v37  ;;  %v7528_v54 = vsel %vm684_vm1, %v845_v3, %v847_v36 }
 0x1d6   :  { %v626_v34 = vpop.f32.mrf.mxu0 }
 0x1d7   :  { %v7498_v38 = vadd.f32 %v626_v34, %v7346_v22 }
 0x1d8   :  { %v628_v42 = vpop.f32.mrf.mxu0 }
 0x1d9   :  { %v709_v43 = vrot.slane %v7498_v38, 3  ;;  %v712_v44 = vrot.slane %v7498_v38, 4  ;;  %v715_v45 = vrot.slane %v7498_v38, 5  ;;  %v718_v10 = vrot.slane %v7498_v38, 6 }
 0x1da   :  { %v7511_v12 = vadd.f32 %v628_v42, %v7349_v24  ;;  %v9287_v34 = vrot.slane %v7498_v38, 1  ;;  %v7515_v52 = vrot.slane %v7498_v38, 2  ;;  %v9531_v37 = vrot.slane %v7498_v38, 7 }
 0x1db   :  { %v738_v55 = vrot.slane %v709_v43, 2  ;;  %v741_v56 = vrot.slane %v712_v44, 2  ;;  %v744_v28 = vrot.slane %v715_v45, 2  ;;  %v747_v2 = vrot.slane %v718_v10, 2 }
 0x1dc   :  { %v9292_v42 = vrot.slane %v7511_v12, 3  ;;  %v731_v1 = vsel %vm481_vm12, %v7460_v14, %v7515_v52  ;;  %v7541_v3 = vsel %vm645_vm14, %v7457_v13, %v9287_v34  ;;  %v7546_v36 = vrot.slane %v9531_v37, 2 }
 0x1dd   :  { %v7554_v59 = vsel %vm662_vm13, %v7368_v40, %v731_v1  ;;  %v7558_v34 = vrot.slane %v7511_v12, 2  ;;  %v9533_v35 = vrot.slane %v7511_v12, 4  ;;  %v9534_v37 = vrot.slane %v7511_v12, 5 }
 0x1de   :  { %v7550_v46 = vrot.slane %v9292_v42, 2  ;;  %9532 = vst [vmem:[#allocation52_spill] sm:$0xff] %v7554_v59  ;;  %v9535_v42 = vrot.slane %v7511_v12, 6  ;;  %v9536_v9 = vrot.slane %v7511_v12, 1 }
 0x1df   :  { %v7562_v20 = vrot.slane %v9533_v35, 2  ;;  %v7566_v18 = vrot.slane %v9534_v37, 2  ;;  %v7586_v37 = vsel %vm481_vm12, %v7479_v25, %v7558_v34 }
 0x1e0   :  { %v632_v47 = vpop.f32.mrf.mxu0  ;;  %v7570_v26 = vrot.slane %v9535_v42, 2  ;;  %v7580_v35 = vsel %vm645_vm14, %v7476_v21, %v9536_v9 }
 0x1e1   :  { %v7573_v1 = vadd.f32 %v632_v47, %v7346_v22 }
 0x1e2   :  { %v634_v32 = vpop.f32.mrf.mxu0 }
 0x1e3   :  { %v710_v42 = vrot.slane %v7573_v1, 3  ;;  %v713_v47 = vrot.slane %v7573_v1, 4  ;;  %v716_v62 = vrot.slane %v7573_v1, 5  ;;  %v719_v17 = vrot.slane %v7573_v1, 6 }
 0x1e4   :  { %v7593_v8 = vadd.f32 %v634_v32, %v7349_v24  ;;  %v7596_v9 = vrot.slane %v7573_v1, 1  ;;  %v7599_v23 = vrot.slane %v7573_v1, 2 }
 0x1e5   :  { %v711_v29 = vsel %vm656_vm2, %v709_v43, %v710_v42  ;;  %v714_v5 = vsel %vm662_vm13, %v712_v44, %v713_v47  ;;  %v717_v6 = vsel %vm669_vm15, %v715_v45, %v716_v62  ;;  %v720_v19 = vsel %vm535_vm0, %v718_v10, %v719_v17 }
 0x1e6   :  { %v739_v16 = vrot.slane %v711_v29, 2  ;;  %v742_v58 = vrot.slane %v714_v5, 2  ;;  %v745_v32 = vrot.slane %v717_v6, 2  ;;  %v748_v61 = vrot.slane %v720_v19, 2 }
 0x1e7   :  { %v761_v57 = vrot.slane %v710_v42, 2  ;;  %v763_v53 = vrot.slane %v713_v47, 2  ;;  %v765_v59 = vrot.slane %v716_v62, 2  ;;  %v767_v60 = vrot.slane %v719_v17, 2  ;;  %v638_v17 = vpop.f32.mrf.mxu0 }
 0x1e8   :  { %v740_v27 = vsel %vm481_vm12, %v738_v55, %v739_v16  ;;  %v743_v7 = vsel %vm481_vm12, %v741_v56, %v742_v58  ;;  %v746_v43 = vsel %vm481_vm12, %v744_v28, %v745_v32  ;;  %v749_v44 = vsel %vm481_vm12, %v747_v2, %v748_v61 }
 0x1e9   :  { %v7611_v45 = vsel %vm481_vm12, %v739_v16, %v761_v57  ;;  %v7614_v29 = vsel %vm481_vm12, %v742_v58, %v763_v53  ;;  %v7617_v5 = vsel %vm481_vm12, %v745_v32, %v765_v59  ;;  %v7620_v62 = vsel %vm481_vm12, %v748_v61, %v767_v60 }
 0x1ea   :  { %9537 = vst [vmem:[#allocation53_spill] sm:$0xff] %v7620_v62  ;;  %v9538_v6 = vrot.slane %v7368_v40, 3  ;;  %v9539_v10 = vrot.slane %v7368_v40, 4  ;;  %v7634_v53 = vsel %vm662_vm13, %v7501_v39, %v746_v43  ;;  %v7638_v59 = vsel %vm662_vm13, %v7504_v41, %v749_v44 }
 0x1eb   :  { %v869_v60 = vrot.slane %v7593_v8, 3  ;;  %v872_v58 = vrot.slane %v7593_v8, 4  ;;  %v878_v61 = vrot.slane %v7593_v8, 6  ;;  %v639_v16 = vadd.f32 %v638_v17, %v7346_v22 }
 0x1ec   :  { %v7625_v19 = vsel %vm662_vm13, %v9538_v6, %v740_v27  ;;  %v7630_v57 = vsel %vm662_vm13, %v9539_v10, %v743_v7  ;;  %v875_v27 = vrot.slane %v7593_v8, 5  ;;  %v9540_v7 = vrot.slane %v7498_v38, 1 }
 0x1ed   :  { %v7652_v41 = vsel %vm481_vm12, %v7515_v52, %v7599_v23  ;;  %v9541_v55 = vrot.slane %v7573_v1, 7  ;;  %v9542_v56 = vrot.slane %v7498_v38, 7  ;;  %v9543_v2 = vrot.slane %v7511_v12, 3 }
 0x1ee   :  { %v705_v39 = vsel %vm645_vm14, %v9540_v7, %v7596_v9  ;;  %v9544_v42 = vrot.slane %v7511_v12, 4  ;;  %v9545_v32 = vrot.slane %v7511_v12, 5  ;;  %v9546_v44 = vrot.slane %v7511_v12, 6 }
 0x1ef   :  { %v724_v28 = vsel %vm684_vm1, %v9542_v56, %v9541_v55  ;;  %v870_v22 = vsel %vm656_vm2, %v9543_v2, %v869_v60  ;;  %v920_v55 = vrot.slane %v869_v60, 2  ;;  %v922_v56 = vrot.slane %v872_v58, 2 }
 0x1f0   :  { %v873_v47 = vsel %vm662_vm13, %v9544_v42, %v872_v58  ;;  %v876_v43 = vsel %vm669_vm15, %v9545_v32, %v875_v27  ;;  %v879_v17 = vsel %vm535_vm0, %v9546_v44, %v878_v61  ;;  %v898_v6 = vrot.slane %v870_v22, 2 }
 0x1f1   :  { %v901_v38 = vrot.slane %v873_v47, 2  ;;  %v904_v10 = vrot.slane %v876_v43, 2  ;;  %v907_v7 = vrot.slane %v879_v17, 2  ;;  %v924_v40 = vrot.slane %v875_v27, 2 }
 0x1f2   :  { %v926_v2 = vrot.slane %v878_v61, 2  ;;  %v899_v62 = vsel %vm481_vm12, %v7550_v46, %v898_v6  ;;  %v7680_v22 = vsel %vm481_vm12, %v898_v6, %v920_v55  ;;  %v725_v47 = vrot.slane %v639_v16, 7 }
 0x1f3   :  { %v902_v42 = vsel %vm481_vm12, %v7562_v20, %v901_v38  ;;  %v905_v32 = vsel %vm481_vm12, %v7566_v18, %v904_v10  ;;  %v908_v44 = vsel %vm481_vm12, %v7570_v26, %v907_v7  ;;  %v7683_v60 = vsel %vm481_vm12, %v901_v38, %v922_v56 }
 0x1f4   :  { %v7686_v58 = vsel %vm481_vm12, %v904_v10, %v924_v40  ;;  %v7689_v46 = vsel %vm481_vm12, %v907_v7, %v926_v2  ;;  %v9547_v20 = vrot.slane %v7377_v49, 3  ;;  %v9548_v18 = vrot.slane %v7377_v49, 4 }
 0x1f5   :  { %v7703_v61 = vsel %vm662_vm13, %v7522_v33, %v905_v32  ;;  %v7707_v40 = vsel %vm662_vm13, %v7525_v31, %v908_v44  ;;  %v727_v43 = vrot.slane %v639_v16, 1  ;;  %v729_v17 = vrot.slane %v639_v16, 2 }
 0x1f6   :  { %v7694_v27 = vsel %vm662_vm13, %v9547_v20, %v899_v62  ;;  %v7699_v26 = vsel %vm662_vm13, %v9548_v18, %v902_v42  ;;  %v733_v6 = vrot.slane %v705_v39, 2  ;;  %v736_v62 = vrot.slane %v7652_v41, 2 }
 0x1f7   :  { %v751_v38 = vrot.slane %v724_v28, 2  ;;  %v755_v10 = vrot.slane %v7599_v23, 2  ;;  %v758_v7 = vrot.slane %v7596_v9, 2  ;;  %v9549_v55 = vrot.slane %v7573_v1, 7 }
 0x1f8   :  { %v728_v56 = vsel %vm645_vm14, %v7596_v9, %v727_v43  ;;  %v7719_v31 = vsel %vm481_vm12, %v7599_v23, %v729_v17  ;;  %v9550_v16 = vrot.slane %v7541_v3, 2  ;;  %v9551_v28 = vrot.slane %v7515_v52, 2 }
 0x1f9   :  { %v726_v33 = vsel %vm684_vm1, %v9549_v55, %v725_v47  ;;  %v752_v1 = vsel %vm481_vm12, %v7546_v36, %v751_v38  ;;  %v753_v42 = vrot.slane %v728_v56, 2  ;;  %v756_v32 = vrot.slane %v7719_v31, 2  ;;  %v640_v36 = vpop.f32.mrf.mxu0 }
 0x1fa   :  { %v734_v39 = vsel %vm481_vm12, %v9550_v16, %v733_v6  ;;  %v737_v2 = vsel %vm481_vm12, %v9551_v28, %v736_v62  ;;  %v7731_v9 = vsel %vm481_vm12, %v733_v6, %v758_v7  ;;  %v7734_v23 = vsel %vm481_vm12, %v736_v62, %v755_v10 }
 0x1fb   :  { %v769_v44 = vrot.slane %v726_v33, 2  ;;  %v771_v3 = vrot.slane %v727_v43, 2  ;;  %v754_v20 = vsel %vm481_vm12, %v733_v6, %v753_v42  ;;  %v757_v52 = vsel %vm481_vm12, %v755_v10, %v756_v32 }
 0x1fc   :  { %v773_v18 = vrot.slane %v729_v17, 2  ;;  %v7740_v47 = vsel %vm662_vm13, %v7380_v50, %v734_v39  ;;  %v7750_v62 = vsel %vm662_vm13, %v7383_v51, %v737_v2  ;;  %v7754_v43 = vsel %vm662_vm13, %v7519_v30, %v752_v1 }
 0x1fd   :  { %v7743_v55 = vsel %vm481_vm12, %v751_v38, %v769_v44  ;;  %v7746_v7 = vsel %vm481_vm12, %v753_v42, %v771_v3  ;;  %v7762_v50 = vsel %vm662_vm13, %v7454_v11, %v7652_v41  ;;  %v7766_v6 = vsel %vm662_vm13, %v7457_v13, %v754_v20 }
 0x1fe   :  { %v7757_v17 = vsel %vm481_vm12, %v756_v32, %v773_v18  ;;  %v7770_v51 = vsel %vm662_vm13, %v7460_v14, %v757_v52  ;;  %v641_v38 = vadd.f32 %v640_v36, %v7349_v24  ;;  %v863_v30 = vrot.slane %v7593_v8, 1 }
 0x1ff   :  { %v866_v10 = vrot.slane %v7593_v8, 2  ;;  %v882_v33 = vrot.slane %v7593_v8, 7  ;;  %v891_v56 = vrot.slane %v7580_v35, 2  ;;  %v894_v11 = vrot.slane %v7558_v34, 2 }
 0x200   :  { %v9552_v16 = vrot.slane %v7511_v12, 7  ;;  %v7783_v14 = vsel %vm662_vm13, %v7377_v49, %v7586_v37  ;;  %v9553_v24 = vrot.slane %v7511_v12, 1  ;;  %v884_v2 = vrot.slane %v641_v38, 7 }
 0x201   :  { %v7790_v28 = vsel %vm481_vm12, %v7558_v34, %v866_v10  ;;  %v886_v1 = vrot.slane %v641_v38, 1  ;;  %v888_v42 = vrot.slane %v641_v38, 2  ;;  %v914_v20 = vrot.slane %v866_v10, 2 }
 0x202   :  { %v909_v13 = vrot.slane %v9552_v16, 2  ;;  %v864_v39 = vsel %vm645_vm14, %v9553_v24, %v863_v30  ;;  %v9554_v8 = vmov %v9552_v16  ;;  %v895_v44 = vrot.slane %v7790_v28, 2 }
 0x203   :  { %v883_v35 = vsel %vm684_vm1, %v9554_v8, %v882_v33  ;;  %v892_v32 = vrot.slane %v864_v39, 2  ;;  %v885_v37 = vsel %vm684_vm1, %v882_v33, %v884_v2  ;;  %v917_v52 = vrot.slane %v863_v30, 2 }
 0x204   :  { %v910_v3 = vrot.slane %v883_v35, 2  ;;  %v887_v18 = vsel %vm645_vm14, %v863_v30, %v886_v1  ;;  %v7799_v34 = vsel %vm481_vm12, %v866_v10, %v888_v42  ;;  %v896_v36 = vsel %vm481_vm12, %v894_v11, %v895_v44 }
 0x205   :  { %v893_v12 = vsel %vm481_vm12, %v891_v56, %v892_v32  ;;  %v912_v38 = vrot.slane %v887_v18, 2  ;;  %v915_v24 = vrot.slane %v7799_v34, 2  ;;  %v7806_v39 = vsel %vm481_vm12, %v892_v32, %v917_v52 }
 0x206   :  { %v911_v16 = vsel %vm481_vm12, %v909_v13, %v910_v3  ;;  %v7809_v33 = vsel %vm481_vm12, %v895_v44, %v914_v20  ;;  %v928_v8 = vrot.slane %v885_v37, 2  ;;  %v930_v30 = vrot.slane %v886_v1, 2 }
 0x207   :  { %v932_v35 = vrot.slane %v888_v42, 2  ;;  %v913_v10 = vsel %vm481_vm12, %v892_v32, %v912_v38  ;;  %v916_v56 = vsel %vm481_vm12, %v914_v20, %v915_v24  ;;  %v7815_v11 = vsel %vm662_vm13, %v7418_v63, %v893_v12 }
 0x208   :  { %v7819_v13 = vsel %vm662_vm13, %v7421_v0, %v896_v36  ;;  %v7822_v2 = vsel %vm481_vm12, %v910_v3, %v928_v8  ;;  %v7825_v44 = vsel %vm481_vm12, %v912_v38, %v930_v30  ;;  %v7832_v42 = vsel %vm662_vm13, %v7528_v54, %v911_v16 }
 0x209   :  { %v7828_v1 = vsel %vm481_vm12, %v915_v24, %v932_v35  ;;  %v7837_v63 = vsel %vm662_vm13, %v7463_v15, %v7790_v28  ;;  %v7841_v0 = vsel %vm662_vm13, %v7476_v21, %v913_v10  ;;  %v7845_v32 = vsel %vm662_vm13, %v7479_v25, %v916_v56 }
 0x20a   :  { %6884 = dma.done.wait [#allocation5], 45056 }
 0x20b   :  { %6885 = vsyncadd [#allocation5], 4294922240  ;;  %1210 = vmatprep.mubr.f32.mxu1 %v7397_v48  ;;  %1290 = vmatprep.mubr.f32.mxu0 %v7429_v4  ;;  %v1001_v54 = vld [vmem:[#allocation2 + $0xf8] sm:$0xff]  ;;  %v1000_v20 = vld [vmem:[#allocation2 + $0xf0] sm:$0xff]  ;;  %vm6912_vm3 = vmmov 0   ;;  %vm2332_vm4 = vcmask 1045507  }
 0x20c   :  { %v1033_v37 = vld [vmem:[#allocation2 + $0x1f8] sm:$0xff]  ;;  %5848 = vmatprep.subr.mxu1 %v1001_v54  ;;  %v1032_v52 = vld [vmem:[#allocation2 + $0x1f0] sm:$0xff]  ;;  %v999_v25 = vld [vmem:[#allocation2 + $0xe8] sm:$0xff]  ;;  %vm2368_vm5 = vcmask 1047558   ;;  %vm2315_vm6 = vcmask 1046532   ;;  %vm2404_vm7 = vcmask 1043457  }
 0x20d   :  { %v985_v3 = vld [vmem:[#allocation2 + $0x78] sm:$0xff]  ;;  %5889 = vmatprep.subr.mxu0 %v1033_v37  ;;  %v984_v21 = vld [vmem:[#allocation2 + $0x70] sm:$0xff]  ;;  %v1031_v12 = vld [vmem:[#allocation2 + $0x1e8] sm:$0xff]  ;;  %vm2347_vm8 = vcmask 1047559   ;;  %vm2387_vm9 = vcmask 1044482   ;;  %vm2419_vm10 = vcmask 1047557  }
 0x20e   :  { %v1017_v15 = vld [vmem:[#allocation2 + $0x178] sm:$0xff]  ;;  %5849 = vmatpush3.msra.mxu1 %v985_v3  ;;  %v1016_v18 = vld [vmem:[#allocation2 + $0x170] sm:$0xff]  ;;  %v983_v36 = vld [vmem:[#allocation2 + $0x68] sm:$0xff]  ;;  %s6913_s7 = smov 64   ;;  %vm2444_vm11 = vcmask 523264  }
 0x20f   :  { %5890 = vmatpush3.msra.mxu0 %v1017_v15  ;;  %5850 = vmatprep.subr.mxu1 %v1000_v20  ;;  %v1015_v48 = vld [vmem:[#allocation2 + $0x168] sm:$0xff]  ;;  %v998_v4 = vld [vmem:[#allocation2 + $0xe0] sm:$0xff]  ;;  %v997_v8 = vld [vmem:[#allocation2 + $0xd8] sm:$0xff] }
 0x210   :  { %5891 = vmatprep.subr.mxu0 %v1032_v52  ;;  %5851 = vmatpush3.msra.mxu1 %v984_v21  ;;  %v1030_v16 = vld [vmem:[#allocation2 + $0x1e0] sm:$0xff]  ;;  %v1029_v30 = vld [vmem:[#allocation2 + $0x1d8] sm:$0xff]  ;;  %v996_v56 = vld [vmem:[#allocation2 + $0xd0] sm:$0xff] }
 0x211   :  { %5892 = vmatpush3.msra.mxu0 %v1016_v18  ;;  %5852 = vmatprep.subr.mxu1 %v999_v25  ;;  %v982_v38 = vld [vmem:[#allocation2 + $0x60] sm:$0xff]  ;;  %v981_v35 = vld [vmem:[#allocation2 + $0x58] sm:$0xff]  ;;  %v1028_v54 = vld [vmem:[#allocation2 + $0x1d0] sm:$0xff] }
 0x212   :  { %5893 = vmatprep.subr.mxu0 %v1031_v12  ;;  %v1014_v24 = vld [vmem:[#allocation2 + $0x160] sm:$0xff]  ;;  %5853 = vmatpush3.msra.mxu1 %v983_v36  ;;  %v1013_v10 = vld [vmem:[#allocation2 + $0x158] sm:$0xff]  ;;  %v980_v37 = vld [vmem:[#allocation2 + $0x50] sm:$0xff] }
 0x213   :  { %5894 = vmatpush3.msra.mxu0 %v1015_v48  ;;  %5854 = vmatprep.subr.mxu1 %v998_v4  ;;  %v1012_v3 = vld [vmem:[#allocation2 + $0x150] sm:$0xff]  ;;  %v995_v15 = vld [vmem:[#allocation2 + $0xc8] sm:$0xff]  ;;  %v994_v18 = vld [vmem:[#allocation2 + $0xc0] sm:$0xff] }
 0x214   :  { %5895 = vmatprep.subr.mxu0 %v1030_v16  ;;  %5855 = vmatpush3.msra.mxu1 %v982_v38  ;;  %v1027_v20 = vld [vmem:[#allocation2 + $0x1c8] sm:$0xff]  ;;  %v1026_v25 = vld [vmem:[#allocation2 + $0x1c0] sm:$0xff]  ;;  %v993_v48 = vld [vmem:[#allocation2 + $0xb8] sm:$0xff] }
 0x215   :  { %5896 = vmatpush3.msra.mxu0 %v1014_v24  ;;  %5856 = vmatprep.subr.mxu1 %v997_v8  ;;  %v979_v52 = vld [vmem:[#allocation2 + $0x48] sm:$0xff]  ;;  %v978_v12 = vld [vmem:[#allocation2 + $0x40] sm:$0xff]  ;;  %v1025_v4 = vld [vmem:[#allocation2 + $0x1b8] sm:$0xff] }
 0x216   :  { %5897 = vmatprep.subr.mxu0 %v1029_v30  ;;  %5857 = vmatpush3.msra.mxu1 %v981_v35  ;;  %v1011_v21 = vld [vmem:[#allocation2 + $0x148] sm:$0xff]  ;;  %v1010_v36 = vld [vmem:[#allocation2 + $0x140] sm:$0xff]  ;;  %v977_v16 = vld [vmem:[#allocation2 + $0x38] sm:$0xff] }
 0x217   :  { %5898 = vmatpush3.msra.mxu0 %v1013_v10  ;;  %5858 = vmatprep.subr.mxu1 %v996_v56  ;;  %v1009_v38 = vld [vmem:[#allocation2 + $0x138] sm:$0xff]  ;;  %v992_v24 = vld [vmem:[#allocation2 + $0xb0] sm:$0xff]  ;;  %v991_v10 = vld [vmem:[#allocation2 + $0xa8] sm:$0xff] }
 0x218   :  { %5899 = vmatprep.subr.mxu0 %v1028_v54  ;;  %5859 = vmatpush3.msra.mxu1 %v980_v37  ;;  %v1024_v8 = vld [vmem:[#allocation2 + $0x1b0] sm:$0xff]  ;;  %v1023_v56 = vld [vmem:[#allocation2 + $0x1a8] sm:$0xff] }
 0x219   :  { %5900 = vmatpush3.msra.mxu0 %v1012_v3  ;;  %5860 = vmatprep.subr.mxu1 %v995_v15  ;;  %v976_v30 = vld [vmem:[#allocation2 + $0x30] sm:$0xff]  ;;  %v975_v54 = vld [vmem:[#allocation2 + $0x28] sm:$0xff]  ;;  %v990_v3 = vld [vmem:[#allocation2 + $0xa0] sm:$0xff] }
 0x21a   :  { %5901 = vmatprep.subr.mxu0 %v1027_v20  ;;  %5861 = vmatpush3.msra.mxu1 %v979_v52  ;;  %v1008_v35 = vld [vmem:[#allocation2 + $0x130] sm:$0xff]  ;;  %v1007_v37 = vld [vmem:[#allocation2 + $0x128] sm:$0xff]  ;;  %v1022_v15 = vld [vmem:[#allocation2 + $0x1a0] sm:$0xff] }
 0x21b   :  { %5902 = vmatpush3.msra.mxu0 %v1011_v21  ;;  %5862 = vmatprep.subr.mxu1 %v994_v18  ;;  %v974_v20 = vld [vmem:[#allocation2 + $0x20] sm:$0xff]  ;;  %v989_v21 = vld [vmem:[#allocation2 + $0x98] sm:$0xff] }
 0x21c   :  { %5903 = vmatprep.subr.mxu0 %v1026_v25  ;;  %5863 = vmatpush3.msra.mxu1 %v978_v12  ;;  %v1006_v52 = vld [vmem:[#allocation2 + $0x120] sm:$0xff]  ;;  %v1021_v18 = vld [vmem:[#allocation2 + $0x198] sm:$0xff] }
 0x21d   :  { %5904 = vmatpush3.msra.mxu0 %v1010_v36  ;;  %5864 = vmatprep.subr.mxu1 %v993_v48  ;;  %v973_v25 = vld [vmem:[#allocation2 + $0x18] sm:$0xff]  ;;  %v988_v36 = vld [vmem:[#allocation2 + $0x90] sm:$0xff] }
 0x21e   :  { %5905 = vmatprep.subr.mxu0 %v1025_v4  ;;  %5865 = vmatpush3.msra.mxu1 %v977_v16  ;;  %v1005_v12 = vld [vmem:[#allocation2 + $0x118] sm:$0xff]  ;;  %v1020_v48 = vld [vmem:[#allocation2 + $0x190] sm:$0xff] }
 0x21f   :  { %5906 = vmatpush3.msra.mxu0 %v1009_v38  ;;  %5866 = vmatprep.subr.mxu1 %v992_v24  ;;  %v972_v4 = vld [vmem:[#allocation2 + $0x10] sm:$0xff]  ;;  %v987_v38 = vld [vmem:[#allocation2 + $0x88] sm:$0xff] }
 0x220   :  { %5907 = vmatprep.subr.mxu0 %v1024_v8  ;;  %5867 = vmatpush3.msra.mxu1 %v976_v30  ;;  %v1004_v16 = vld [vmem:[#allocation2 + $0x110] sm:$0xff]  ;;  %v1019_v24 = vld [vmem:[#allocation2 + $0x188] sm:$0xff] }
 0x221   :  { %5908 = vmatpush3.msra.mxu0 %v1008_v35  ;;  %5868 = vmatprep.subr.mxu1 %v991_v10  ;;  %v971_v8 = vld [vmem:[#allocation2 + $0x8] sm:$0xff]  ;;  %v986_v35 = vld [vmem:[#allocation2 + $0x80] sm:$0xff] }
 0x222   :  { %5909 = vmatprep.subr.mxu0 %v1023_v56  ;;  %5869 = vmatpush3.msra.mxu1 %v975_v54  ;;  %v1003_v30 = vld [vmem:[#allocation2 + $0x108] sm:$0xff]  ;;  %v1018_v10 = vld [vmem:[#allocation2 + $0x180] sm:$0xff] }
 0x223   :  { %5910 = vmatpush3.msra.mxu0 %v1007_v37  ;;  %5870 = vmatprep.subr.mxu1 %v990_v3  ;;  %v970_v56 = vld [vmem:[#allocation2] sm:$0xff]  ;;  %v1065_v37 = vld [vmem:[#allocation2 + $0x2f8] sm:$0xff] }
 0x224   :  { %5911 = vmatprep.subr.mxu0 %v1022_v15  ;;  %5871 = vmatpush3.msra.mxu1 %v974_v20  ;;  %v1002_v54 = vld [vmem:[#allocation2 + $0x100] sm:$0xff]  ;;  %v1097_v3 = vld [vmem:[#allocation2 + $0x3f8] sm:$0xff] }
 0x225   :  { %5912 = vmatpush3.msra.mxu0 %v1006_v52  ;;  %5872 = vmatprep.subr.mxu1 %v989_v21  ;;  %v1049_v15 = vld [vmem:[#allocation2 + $0x278] sm:$0xff]  ;;  %v9555_v52 = vld [vmem:[#allocation33_spill] sm:$0xff] }
 0x226   :  { %5913 = vmatprep.subr.mxu0 %v1021_v18  ;;  %5873 = vmatpush3.msra.mxu1 %v973_v25  ;;  %v1081_v20 = vld [vmem:[#allocation2 + $0x378] sm:$0xff]  ;;  %v9556_v21 = vld [vmem:[#allocation37_spill] sm:$0xff] }
 0x227   :  { %5914 = vmatpush3.msra.mxu0 %v1005_v12  ;;  %5874 = vmatprep.subr.mxu1 %v988_v36  ;;  %v1064_v18 = vld [vmem:[#allocation2 + $0x2f0] sm:$0xff] }
 0x228   :  { %5915 = vmatprep.subr.mxu0 %v1020_v48  ;;  %5875 = vmatpush3.msra.mxu1 %v972_v4  ;;  %v1096_v25 = vld [vmem:[#allocation2 + $0x3f0] sm:$0xff]  ;;  %v1063_v48 = vld [vmem:[#allocation2 + $0x2e8] sm:$0xff] }
 0x229   :  { %5916 = vmatpush3.msra.mxu0 %v1004_v16  ;;  %5876 = vmatprep.subr.mxu1 %v987_v38  ;;  %v1048_v12 = vld [vmem:[#allocation2 + $0x270] sm:$0xff]  ;;  %v1095_v4 = vld [vmem:[#allocation2 + $0x3e8] sm:$0xff] }
 0x22a   :  { %5917 = vmatprep.subr.mxu0 %v1019_v24  ;;  %5877 = vmatpush3.msra.mxu1 %v971_v8  ;;  %v1080_v36 = vld [vmem:[#allocation2 + $0x370] sm:$0xff]  ;;  %v1047_v16 = vld [vmem:[#allocation2 + $0x268] sm:$0xff]  ;;  %v1062_v24 = vld [vmem:[#allocation2 + $0x2e0] sm:$0xff] }
 0x22b   :  { %5918 = vmatpush3.msra.mxu0 %v1003_v30  ;;  %5878 = vmatprep.subr.mxu1 %v986_v35  ;;  %v1079_v38 = vld [vmem:[#allocation2 + $0x368] sm:$0xff]  ;;  %v1094_v8 = vld [vmem:[#allocation2 + $0x3e0] sm:$0xff] }
 0x22c   :  { %5919 = vmatprep.subr.mxu0 %v1018_v10  ;;  %5879 = vmatpush3.msra.mxu1 %v970_v56  ;;  %v1046_v30 = vld [vmem:[#allocation2 + $0x260] sm:$0xff]  ;;  %v1061_v10 = vld [vmem:[#allocation2 + $0x2d8] sm:$0xff] }
 0x22d   :  { %5920 = vmatpush3.msra.mxu0 %v1002_v54  ;;  %1211 = vmatmul.mubr.f32.vlgmr.msra.gmra.mxu1 %v9555_v52  ;;  %v1078_v35 = vld [vmem:[#allocation2 + $0x360] sm:$0xff]  ;;  %v1093_v56 = vld [vmem:[#allocation2 + $0x3d8] sm:$0xff]  ;;  %v1076_v52 = vld [vmem:[#allocation2 + $0x350] sm:$0xff] }
 0x22e   :  { %1291 = vmatmul.mubr.f32.vlgmr.msra.gmra.mxu0 %v9556_v21  ;;  %5930 = vmatprep.subr.mxu1 %v1065_v37  ;;  %v1045_v54 = vld [vmem:[#allocation2 + $0x258] sm:$0xff]  ;;  %v1059_v21 = vld [vmem:[#allocation2 + $0x2c8] sm:$0xff] }
 0x22f   :  { %5971 = vmatprep.subr.mxu0 %v1097_v3  ;;  %5931 = vmatpush3.msra.mxu1 %v1049_v15  ;;  %v1077_v37 = vld [vmem:[#allocation2 + $0x358] sm:$0xff]  ;;  %v1060_v3 = vld [vmem:[#allocation2 + $0x2d0] sm:$0xff] }
 0x230   :  { %5972 = vmatpush3.msra.mxu0 %v1081_v20  ;;  %5932 = vmatprep.subr.mxu1 %v1064_v18  ;;  %v1092_v15 = vld [vmem:[#allocation2 + $0x3d0] sm:$0xff]  ;;  %v1091_v18 = vld [vmem:[#allocation2 + $0x3c8] sm:$0xff] }
 0x231   :  { %5973 = vmatprep.subr.mxu0 %v1096_v25  ;;  %5933 = vmatpush3.msra.mxu1 %v1048_v12  ;;  %v1044_v20 = vld [vmem:[#allocation2 + $0x250] sm:$0xff]  ;;  %v1043_v25 = vld [vmem:[#allocation2 + $0x248] sm:$0xff] }
 0x232   :  { %5974 = vmatpush3.msra.mxu0 %v1080_v36  ;;  %5934 = vmatprep.subr.mxu1 %v1063_v48  ;;  %v1075_v12 = vld [vmem:[#allocation2 + $0x348] sm:$0xff]  ;;  %v1058_v36 = vld [vmem:[#allocation2 + $0x2c0] sm:$0xff] }
 0x233   :  { %5975 = vmatprep.subr.mxu0 %v1095_v4  ;;  %5935 = vmatpush3.msra.mxu1 %v1047_v16  ;;  %v1090_v48 = vld [vmem:[#allocation2 + $0x3c0] sm:$0xff] }
 0x234   :  { %5976 = vmatpush3.msra.mxu0 %v1079_v38  ;;  %5936 = vmatprep.subr.mxu1 %v1062_v24  ;;  %v1042_v4 = vld [vmem:[#allocation2 + $0x240] sm:$0xff]  ;;  %v1057_v38 = vld [vmem:[#allocation2 + $0x2b8] sm:$0xff] }
 0x235   :  { %5977 = vmatprep.subr.mxu0 %v1094_v8  ;;  %5937 = vmatpush3.msra.mxu1 %v1046_v30  ;;  %v1074_v16 = vld [vmem:[#allocation2 + $0x340] sm:$0xff]  ;;  %v1089_v24 = vld [vmem:[#allocation2 + $0x3b8] sm:$0xff] }
 0x236   :  { %5978 = vmatpush3.msra.mxu0 %v1078_v35  ;;  %5938 = vmatprep.subr.mxu1 %v1061_v10  ;;  %v1041_v8 = vld [vmem:[#allocation2 + $0x238] sm:$0xff]  ;;  %v1056_v35 = vld [vmem:[#allocation2 + $0x2b0] sm:$0xff] }
 0x237   :  { %5979 = vmatprep.subr.mxu0 %v1093_v56  ;;  %5939 = vmatpush3.msra.mxu1 %v1045_v54  ;;  %v1073_v30 = vld [vmem:[#allocation2 + $0x338] sm:$0xff]  ;;  %v1088_v10 = vld [vmem:[#allocation2 + $0x3b0] sm:$0xff] }
 0x238   :  { %5980 = vmatpush3.msra.mxu0 %v1077_v37  ;;  %5940 = vmatprep.subr.mxu1 %v1060_v3  ;;  %v1040_v56 = vld [vmem:[#allocation2 + $0x230] sm:$0xff]  ;;  %v1055_v37 = vld [vmem:[#allocation2 + $0x2a8] sm:$0xff] }
 0x239   :  { %5981 = vmatprep.subr.mxu0 %v1092_v15  ;;  %5941 = vmatpush3.msra.mxu1 %v1044_v20  ;;  %v1072_v54 = vld [vmem:[#allocation2 + $0x330] sm:$0xff]  ;;  %v1087_v3 = vld [vmem:[#allocation2 + $0x3a8] sm:$0xff] }
 0x23a   :  { %5982 = vmatpush3.msra.mxu0 %v1076_v52  ;;  %5942 = vmatprep.subr.mxu1 %v1059_v21  ;;  %v1039_v15 = vld [vmem:[#allocation2 + $0x228] sm:$0xff]  ;;  %v1054_v52 = vld [vmem:[#allocation2 + $0x2a0] sm:$0xff] }
 0x23b   :  { %5983 = vmatprep.subr.mxu0 %v1091_v18  ;;  %5943 = vmatpush3.msra.mxu1 %v1043_v25  ;;  %v1071_v20 = vld [vmem:[#allocation2 + $0x328] sm:$0xff]  ;;  %v1086_v21 = vld [vmem:[#allocation2 + $0x3a0] sm:$0xff] }
 0x23c   :  { %5984 = vmatpush3.msra.mxu0 %v1075_v12  ;;  %5944 = vmatprep.subr.mxu1 %v1058_v36  ;;  %v1038_v18 = vld [vmem:[#allocation2 + $0x220] sm:$0xff]  ;;  %v1053_v12 = vld [vmem:[#allocation2 + $0x298] sm:$0xff] }
 0x23d   :  { %5985 = vmatprep.subr.mxu0 %v1090_v48  ;;  %5945 = vmatpush3.msra.mxu1 %v1042_v4  ;;  %v1070_v25 = vld [vmem:[#allocation2 + $0x320] sm:$0xff]  ;;  %v1085_v36 = vld [vmem:[#allocation2 + $0x398] sm:$0xff]  ;;  %v9557_v48 = vld [vmem:[#allocation52_spill] sm:$0xff] }
 0x23e   :  { %5986 = vmatpush3.msra.mxu0 %v1074_v16  ;;  %5946 = vmatprep.subr.mxu1 %v1057_v38  ;;  %v1037_v4 = vld [vmem:[#allocation2 + $0x218] sm:$0xff]  ;;  %v1052_v38 = vld [vmem:[#allocation2 + $0x290] sm:$0xff] }
 0x23f   :  { %5987 = vmatprep.subr.mxu0 %v1089_v24  ;;  %5947 = vmatpush3.msra.mxu1 %v1041_v8  ;;  %v1069_v16 = vld [vmem:[#allocation2 + $0x318] sm:$0xff]  ;;  %v1068_v24 = vld [vmem:[#allocation2 + $0x310] sm:$0xff]  ;;  %v1051_v8 = vld [vmem:[#allocation2 + $0x288] sm:$0xff] }
 0x240   :  { %5988 = vmatpush3.msra.mxu0 %v1073_v30  ;;  %5948 = vmatprep.subr.mxu1 %v1056_v35  ;;  %v1035_v30 = vld [vmem:[#allocation2 + $0x208] sm:$0xff] }
 0x241   :  { %5989 = vmatprep.subr.mxu0 %v1088_v10  ;;  %5949 = vmatpush3.msra.mxu1 %v1040_v56  ;;  %v1067_v35 = vld [vmem:[#allocation2 + $0x308] sm:$0xff]  ;;  %v1050_v10 = vld [vmem:[#allocation2 + $0x280] sm:$0xff] }
 0x242   :  { %5990 = vmatpush3.msra.mxu0 %v1072_v54  ;;  %5950 = vmatprep.subr.mxu1 %v1055_v37  ;;  %v1082_v56 = vld [vmem:[#allocation2 + $0x380] sm:$0xff]  ;;  %v1129_v54 = vld [vmem:[#allocation2 + $0x4f8] sm:$0xff] }
 0x243   :  { %5991 = vmatprep.subr.mxu0 %v1087_v3  ;;  %5951 = vmatpush3.msra.mxu1 %v1039_v15  ;;  %v9558_v37 = vld [vmem:[#allocation38_spill] sm:$0xff]  ;;  %v9560_v15 = vld [vmem:[#allocation40_spill] sm:$0xff] }
 0x244   :  { %5992 = vmatpush3.msra.mxu0 %v1071_v20  ;;  %1215 = vmatprep.mubr.f32.mxu1 %v7740_v47  ;;  %v1084_v47 = vld [vmem:[#allocation2 + $0x390] sm:$0xff]  ;;  %v1145_v3 = vld [vmem:[#allocation2 + $0x578] sm:$0xff] }
 0x245   :  { %1295 = vmatprep.mubr.f32.mxu0 %v7625_v19  ;;  %5952 = vmatprep.subr.mxu1 %v1054_v52  ;;  %v1036_v19 = vld [vmem:[#allocation2 + $0x210] sm:$0xff]  ;;  %v9561_v52 = vmov 0.0  }
 0x246   :  { %5993 = vmatprep.subr.mxu0 %v1086_v21  ;;  %1216 = vmatmul.mubr.f32.gmra.mxu1 %v9557_v48  ;;  %v1128_v20 = vld [vmem:[#allocation2 + $0x4f0] sm:$0xff]  ;;  %v9562_v21 = vld [vmem:[#allocation39_spill] sm:$0xff]  ;;  %v1143_v48 = vld [vmem:[#allocation2 + $0x568] sm:$0xff] }
 0x247   :  { %1296 = vmatmul.mubr.f32.gmra.mxu0 %v7750_v62  ;;  %5953 = vmatpush3.msra.mxu1 %v1038_v18  ;;  %v1083_v62 = vld [vmem:[#allocation2 + $0x388] sm:$0xff]  ;;  %v1112_v18 = vld [vmem:[#allocation2 + $0x470] sm:$0xff] }
 0x248   :  { %5994 = vmatpush3.msra.mxu0 %v1070_v25  ;;  %5954 = vmatprep.subr.mxu1 %v1053_v12  ;;  %v1144_v25 = vld [vmem:[#allocation2 + $0x570] sm:$0xff]  ;;  %v1127_v12 = vld [vmem:[#allocation2 + $0x4e8] sm:$0xff] }
 0x249   :  { %5995 = vmatprep.subr.mxu0 %v1085_v36  ;;  %5955 = vmatpush3.msra.mxu1 %v1037_v4  ;;  %v1111_v36 = vld [vmem:[#allocation2 + $0x468] sm:$0xff]  ;;  %v1126_v4 = vld [vmem:[#allocation2 + $0x4e0] sm:$0xff] }
 0x24a   :  { %5996 = vmatpush3.msra.mxu0 %v1069_v16  ;;  %1220 = vmatprep.mubr.f32.mxu1 %v7731_v9  ;;  %v1034_v9 = vld [vmem:[#allocation2 + $0x200] sm:$0xff] }
 0x24b   :  { %1300 = vmatprep.mubr.f32.mxu0 %v7611_v45  ;;  %5956 = vmatprep.subr.mxu1 %v1052_v38  ;;  %v1066_v45 = vld [vmem:[#allocation2 + $0x300] sm:$0xff] }
 0x24c   :  { %5997 = vmatprep.subr.mxu0 %v1084_v47  ;;  %1221 = vmatmul.mubr.f32.gmra.mxu1 %v7652_v41  ;;  %v9559_v41 = vld [vmem:[#allocation36_spill] sm:$0xff]  ;;  %v1110_v16 = vld [vmem:[#allocation2 + $0x460] sm:$0xff]  ;;  %v1141_v47 = vld [vmem:[#allocation2 + $0x558] sm:$0xff] }
 0x24d   :  { %1301 = vmatmul.mubr.f32.gmra.mxu0 %v7734_v23  ;;  %5957 = vmatpush3.msra.mxu1 %v1036_v19  ;;  %v1113_v23 = vld [vmem:[#allocation2 + $0x478] sm:$0xff]  ;;  %v1142_v38 = vld [vmem:[#allocation2 + $0x560] sm:$0xff]  ;;  %v1124_v19 = vld [vmem:[#allocation2 + $0x4d0] sm:$0xff] }
 0x24e   :  { %5998 = vmatpush3.msra.mxu0 %v1068_v24  ;;  %5958 = vmatprep.subr.mxu1 %v1051_v8  ;;  %v1123_v24 = vld [vmem:[#allocation2 + $0x4c8] sm:$0xff]  ;;  %v9563_v8 = vld [vmem:[#allocation53_spill] sm:$0xff] }
 0x24f   :  { %5999 = vmatprep.subr.mxu0 %v1083_v62  ;;  %5959 = vmatpush3.msra.mxu1 %v1035_v30  ;;  %v1139_v62 = vld [vmem:[#allocation2 + $0x548] sm:$0xff]  ;;  %v1106_v30 = vld [vmem:[#allocation2 + $0x440] sm:$0xff] }
 0x250   :  { %6000 = vmatpush3.msra.mxu0 %v1067_v35  ;;  %5960 = vmatprep.subr.mxu1 %v1050_v10  ;;  %v1121_v35 = vld [vmem:[#allocation2 + $0x4b8] sm:$0xff] }
 0x251   :  { %6001 = vmatprep.subr.mxu0 %v1082_v56  ;;  %5961 = vmatpush3.msra.mxu1 %v1034_v9  ;;  %v1105_v10 = vld [vmem:[#allocation2 + $0x438] sm:$0xff]  ;;  %v1120_v9 = vld [vmem:[#allocation2 + $0x4b0] sm:$0xff] }
 0x252   :  { %1370 = vmatprep.mubr.f32.mxu1 %v9558_v37  ;;  %6002 = vmatpush3.msra.mxu0 %v1066_v45  ;;  %v1137_v56 = vld [vmem:[#allocation2 + $0x538] sm:$0xff]  ;;  %v1104_v45 = vld [vmem:[#allocation2 + $0x430] sm:$0xff]  ;;  %v1119_v37 = vld [vmem:[#allocation2 + $0x4a8] sm:$0xff] }
 0x253   :  { %1371 = vmatmul.mubr.f32.vlgmr.msra.gmra.mxu1 %v9559_v41  ;;  %1450 = vmatprep.mubr.f32.mxu0 %v9560_v15  ;;  %v1103_v41 = vld [vmem:[#allocation2 + $0x428] sm:$0xff]  ;;  %v1102_v15 = vld [vmem:[#allocation2 + $0x420] sm:$0xff] }
 0x254   :  { %6012 = vmatprep.subr.mxu1 %v1129_v54  ;;  %6331 = vmatprep.subr.mxu0 %v9561_v52  ;;  %v1136_v54 = vld [vmem:[#allocation2 + $0x530] sm:$0xff] }
 0x255   :  { %1451 = vmatmul.mubr.f32.vlgmr.msra.gmra.mxu0 %v9562_v21  ;;  %6013 = vmatpush3.msra.mxu1 %v1113_v23  ;;  %v1135_v23 = vld [vmem:[#allocation2 + $0x528] sm:$0xff]  ;;  %v1117_v21 = vld [vmem:[#allocation2 + $0x498] sm:$0xff] }
 0x256   :  { %6332 = vmatpush3.msra.mxu0 %v1145_v3  ;;  %6014 = vmatprep.subr.mxu1 %v1128_v20  ;;  %v1118_v3 = vld [vmem:[#allocation2 + $0x4a0] sm:$0xff] }
 0x257   :  { %6333 = vmatprep.subr.mxu0 %v9561_v52  ;;  %1375 = vmatprep.mubr.f32.mxu1 %v7634_v53  ;;  %v1125_v53 = vld [vmem:[#allocation2 + $0x4d8] sm:$0xff]  ;;  %v1134_v20 = vld [vmem:[#allocation2 + $0x520] sm:$0xff] }
 0x258   :  { %6015 = vmatpush3.msra.mxu1 %v1112_v18  ;;  %6334 = vmatpush3.msra.mxu0 %v1144_v25  ;;  %v1101_v18 = vld [vmem:[#allocation2 + $0x418] sm:$0xff] }
 0x259   :  { %1376 = vmatmul.mubr.f32.gmra.mxu1 %v7630_v57  ;;  %6016 = vmatprep.subr.mxu1 %v1127_v12  ;;  %v1109_v57 = vld [vmem:[#allocation2 + $0x458] sm:$0xff]  ;;  %v1116_v12 = vld [vmem:[#allocation2 + $0x490] sm:$0xff] }
 0x25a   :  { %6335 = vmatprep.subr.mxu0 %v9561_v52  ;;  %1455 = vmatprep.mubr.f32.mxu0 %v7754_v43  ;;  %v1108_v43 = vld [vmem:[#allocation2 + $0x450] sm:$0xff]  ;;  %v1133_v25 = vld [vmem:[#allocation2 + $0x518] sm:$0xff] }
 0x25b   :  { %6017 = vmatpush3.msra.mxu1 %v1111_v36  ;;  %6336 = vmatpush3.msra.mxu0 %v1143_v48  ;;  %v1100_v36 = vld [vmem:[#allocation2 + $0x410] sm:$0xff] }
 0x25c   :  { %6018 = vmatprep.subr.mxu1 %v1126_v4  ;;  %1456 = vmatmul.mubr.f32.gmra.mxu0 %v7638_v59  ;;  %v1140_v59 = vld [vmem:[#allocation2 + $0x550] sm:$0xff]  ;;  %v1115_v4 = vld [vmem:[#allocation2 + $0x488] sm:$0xff] }
 0x25d   :  { %6337 = vmatprep.subr.mxu0 %v9561_v52  ;;  %1380 = vmatprep.mubr.f32.mxu1 %v7617_v5  ;;  %v1107_v5 = vld [vmem:[#allocation2 + $0x448] sm:$0xff]  ;;  %v1132_v48 = vld [vmem:[#allocation2 + $0x510] sm:$0xff] }
 0x25e   :  { %6019 = vmatpush3.msra.mxu1 %v1110_v16  ;;  %6338 = vmatpush3.msra.mxu0 %v1142_v38  ;;  %v1099_v16 = vld [vmem:[#allocation2 + $0x408] sm:$0xff] }
 0x25f   :  { %1381 = vmatmul.mubr.f32.gmra.mxu1 %v7614_v29  ;;  %6020 = vmatprep.subr.mxu1 %v1125_v53  ;;  %v1122_v29 = vld [vmem:[#allocation2 + $0x4c0] sm:$0xff]  ;;  %v1131_v38 = vld [vmem:[#allocation2 + $0x508] sm:$0xff] }
 0x260   :  { %6339 = vmatprep.subr.mxu0 %v9561_v52  ;;  %1460 = vmatprep.mubr.f32.mxu0 %v7743_v55  ;;  %v1138_v55 = vld [vmem:[#allocation2 + $0x540] sm:$0xff] }
 0x261   :  { %6021 = vmatpush3.msra.mxu1 %v1109_v57  ;;  %6340 = vmatpush3.msra.mxu0 %v1141_v47  ;;  %v1114_v53 = vld [vmem:[#allocation2 + $0x480] sm:$0xff] }
 0x262   :  { %6022 = vmatprep.subr.mxu1 %v1124_v19  ;;  %1461 = vmatmul.mubr.f32.gmra.mxu0 %v9563_v8  ;;  %v1098_v57 = vld [vmem:[#allocation2 + $0x400] sm:$0xff]  ;;  %v1658_v19 = vld [vmem:[#allocation2 + $0x678] sm:$0xff] }
 0x263   :  { %6341 = vmatprep.subr.mxu0 %v9561_v52  ;;  %6023 = vmatpush3.msra.mxu1 %v1108_v43  ;;  %v1130_v47 = vld [vmem:[#allocation2 + $0x500] sm:$0xff]  ;;  %v9564_v43 = vld [vmem:[#allocation48_spill] sm:$0xff]  ;;  %v1642_v8 = vld [vmem:[#allocation2 + $0x5f8] sm:$0xff] }
 0x264   :  { %6342 = vmatpush3.msra.mxu0 %v1140_v59  ;;  %6024 = vmatprep.subr.mxu1 %v1123_v24  ;;  %v1690_v59 = vld [vmem:[#allocation2 + $0x778] sm:$0xff]  ;;  %v9565_v24 = vld [vmem:[#allocation35_spill] sm:$0xff] }
 0x265   :  { %6343 = vmatprep.subr.mxu0 %v9561_v52  ;;  %6025 = vmatpush3.msra.mxu1 %v1107_v5  ;;  %v1674_v5 = vld [vmem:[#allocation2 + $0x6f8] sm:$0xff] }
 0x266   :  { %6344 = vmatpush3.msra.mxu0 %v1139_v62  ;;  %6026 = vmatprep.subr.mxu1 %v1122_v29  ;;  %v1657_v62 = vld [vmem:[#allocation2 + $0x670] sm:$0xff] }
 0x267   :  { %6345 = vmatprep.subr.mxu0 %v9561_v52  ;;  %6027 = vmatpush3.msra.mxu1 %v1106_v30  ;;  %v1689_v29 = vld [vmem:[#allocation2 + $0x770] sm:$0xff] }
 0x268   :  { %6346 = vmatpush3.msra.mxu0 %v1138_v55  ;;  %6028 = vmatprep.subr.mxu1 %v1121_v35  ;;  %v9566_v30 = vld [vmem:[#allocation49_spill] sm:$0xff] }
 0x269   :  { %6347 = vmatprep.subr.mxu0 %v9561_v52  ;;  %6029 = vmatpush3.msra.mxu1 %v1105_v10  ;;  %v1641_v55 = vld [vmem:[#allocation2 + $0x5f0] sm:$0xff]  ;;  %v1656_v10 = vld [vmem:[#allocation2 + $0x668] sm:$0xff] }
 0x26a   :  { %6348 = vmatpush3.msra.mxu0 %v1137_v56  ;;  %6030 = vmatprep.subr.mxu1 %v1120_v9  ;;  %v1673_v35 = vld [vmem:[#allocation2 + $0x6f0] sm:$0xff]  ;;  %v1688_v56 = vld [vmem:[#allocation2 + $0x768] sm:$0xff] }
 0x26b   :  { %6349 = vmatprep.subr.mxu0 %v9561_v52  ;;  %6031 = vmatpush3.msra.mxu1 %v1104_v45  ;;  %v1640_v9 = vld [vmem:[#allocation2 + $0x5e8] sm:$0xff] }
 0x26c   :  { %6350 = vmatpush3.msra.mxu0 %v1136_v54  ;;  %6032 = vmatprep.subr.mxu1 %v1119_v37  ;;  %v1672_v45 = vld [vmem:[#allocation2 + $0x6e8] sm:$0xff]  ;;  %v1655_v54 = vld [vmem:[#allocation2 + $0x660] sm:$0xff] }
 0x26d   :  { %6351 = vmatprep.subr.mxu0 %v9561_v52  ;;  %6033 = vmatpush3.msra.mxu1 %v1103_v41  ;;  %v1687_v37 = vld [vmem:[#allocation2 + $0x760] sm:$0xff] }
 0x26e   :  { %6352 = vmatpush3.msra.mxu0 %v1135_v23  ;;  %6034 = vmatprep.subr.mxu1 %v1118_v3  ;;  %v1639_v41 = vld [vmem:[#allocation2 + $0x5e0] sm:$0xff]  ;;  %v1654_v3 = vld [vmem:[#allocation2 + $0x658] sm:$0xff] }
 0x26f   :  { %6353 = vmatprep.subr.mxu0 %v9561_v52  ;;  %6035 = vmatpush3.msra.mxu1 %v1102_v15  ;;  %v1671_v23 = vld [vmem:[#allocation2 + $0x6e0] sm:$0xff]  ;;  %v1686_v15 = vld [vmem:[#allocation2 + $0x758] sm:$0xff] }
 0x270   :  { %6354 = vmatpush3.msra.mxu0 %v1134_v20  ;;  %6036 = vmatprep.subr.mxu1 %v1117_v21  ;;  %v1653_v20 = vld [vmem:[#allocation2 + $0x650] sm:$0xff] }
 0x271   :  { %6355 = vmatprep.subr.mxu0 %v9561_v52  ;;  %6037 = vmatpush3.msra.mxu1 %v1101_v18  ;;  %v1685_v21 = vld [vmem:[#allocation2 + $0x750] sm:$0xff] }
 0x272   :  { %6356 = vmatpush3.msra.mxu0 %v1133_v25  ;;  %6038 = vmatprep.subr.mxu1 %v1116_v12  ;;  %v1637_v18 = vld [vmem:[#allocation2 + $0x5d0] sm:$0xff]  ;;  %v1652_v12 = vld [vmem:[#allocation2 + $0x648] sm:$0xff] }
 0x273   :  { %6357 = vmatprep.subr.mxu0 %v9561_v52  ;;  %6039 = vmatpush3.msra.mxu1 %v1100_v36  ;;  %v1669_v25 = vld [vmem:[#allocation2 + $0x6d0] sm:$0xff]  ;;  %v1636_v36 = vld [vmem:[#allocation2 + $0x5c8] sm:$0xff] }
 0x274   :  { %6358 = vmatpush3.msra.mxu0 %v1132_v48  ;;  %6040 = vmatprep.subr.mxu1 %v1115_v4  ;;  %v1651_v48 = vld [vmem:[#allocation2 + $0x640] sm:$0xff] }
 0x275   :  { %6359 = vmatprep.subr.mxu0 %v9561_v52  ;;  %6041 = vmatpush3.msra.mxu1 %v1099_v16  ;;  %v1683_v4 = vld [vmem:[#allocation2 + $0x740] sm:$0xff] }
 0x276   :  { %6360 = vmatpush3.msra.mxu0 %v1131_v38  ;;  %6042 = vmatprep.subr.mxu1 %v1114_v53  ;;  %v1635_v16 = vld [vmem:[#allocation2 + $0x5c0] sm:$0xff]  ;;  %v1650_v53 = vld [vmem:[#allocation2 + $0x638] sm:$0xff] }
 0x277   :  { %6361 = vmatprep.subr.mxu0 %v9561_v52  ;;  %6043 = vmatpush3.msra.mxu1 %v1098_v57  ;;  %v1667_v38 = vld [vmem:[#allocation2 + $0x6c0] sm:$0xff]  ;;  %v1682_v57 = vld [vmem:[#allocation2 + $0x738] sm:$0xff] }
 0x278   :  { %1530 = vmatprep.mubr.f32.mxu1 %v9564_v43  ;;  %6362 = vmatpush3.msra.mxu0 %v1130_v47  ;;  %v1666_v47 = vld [vmem:[#allocation2 + $0x6b8] sm:$0xff]  ;;  %v1681_v43 = vld [vmem:[#allocation2 + $0x730] sm:$0xff] }
 0x279   :  { %1531 = vmatmul.mubr.f32.vlgmr.msra.gmra.mxu1 %v9565_v24  ;;  %6363 = vmatprep.mubr.msk.f32.mxu0 %vm6912_vm3, %v9561_v52  ;;  %v1665_v24 = vld [vmem:[#allocation2 + $0x6b0] sm:$0xff] }
 0x27a   :  { %6072 = vmatprep.subr.mxu1 %v1658_v19  ;;  %6113 = vmatprep.subr.mxu0 %v1690_v59  ;;  %v1649_v19 = vld [vmem:[#allocation2 + $0x630] sm:$0xff] }
 0x27b   :  { %6364 = vmatmul.mubr.f32.vlgmr.msra.gmra.mxu0 %v9566_v30  ;;  %6073 = vmatpush3.msra.mxu1 %v1642_v8  ;;  %v1633_v59 = vld [vmem:[#allocation2 + $0x5b0] sm:$0xff]  ;;  %v1648_v8 = vld [vmem:[#allocation2 + $0x628] sm:$0xff]  ;;  %v1679_v30 = vld [vmem:[#allocation2 + $0x720] sm:$0xff] }
 0x27c   :  { %6114 = vmatpush3.msra.mxu0 %v1674_v5  ;;  %6074 = vmatprep.subr.mxu1 %v1657_v62  ;;  %v1680_v5 = vld [vmem:[#allocation2 + $0x728] sm:$0xff] }
 0x27d   :  { %6115 = vmatprep.subr.mxu0 %v1689_v29  ;;  %1535 = vmatprep.mubr.f32.mxu1 %v7766_v6  ;;  %v1638_v6 = vld [vmem:[#allocation2 + $0x5d8] sm:$0xff]  ;;  %v1632_v62 = vld [vmem:[#allocation2 + $0x5a8] sm:$0xff] }
 0x27e   :  { %6075 = vmatpush3.msra.mxu1 %v1641_v55  ;;  %6116 = vmatpush3.msra.mxu0 %v1673_v35  ;;  %v1664_v29 = vld [vmem:[#allocation2 + $0x6a8] sm:$0xff]  ;;  %v1631_v55 = vld [vmem:[#allocation2 + $0x5a0] sm:$0xff] }
 0x27f   :  { %1536 = vmatmul.mubr.f32.gmra.mxu1 %v7762_v50  ;;  %6076 = vmatprep.subr.mxu1 %v1656_v10  ;;  %v1670_v50 = vld [vmem:[#allocation2 + $0x6d8] sm:$0xff]  ;;  %v1663_v35 = vld [vmem:[#allocation2 + $0x6a0] sm:$0xff] }
 0x280   :  { %6117 = vmatprep.subr.mxu0 %v1688_v56  ;;  %6077 = vmatpush3.msra.mxu1 %v1640_v9  ;;  %v1646_v10 = vld [vmem:[#allocation2 + $0x618] sm:$0xff] }
 0x281   :  { %6118 = vmatpush3.msra.mxu0 %v1672_v45  ;;  %6078 = vmatprep.subr.mxu1 %v1655_v54  ;;  %v1678_v56 = vld [vmem:[#allocation2 + $0x718] sm:$0xff]  ;;  %v1645_v54 = vld [vmem:[#allocation2 + $0x610] sm:$0xff] }
 0x282   :  { %6119 = vmatprep.subr.mxu0 %v1687_v37  ;;  %1540 = vmatprep.mubr.f32.mxu1 %v7746_v7  ;;  %v1684_v7 = vld [vmem:[#allocation2 + $0x748] sm:$0xff]  ;;  %v1630_v9 = vld [vmem:[#allocation2 + $0x598] sm:$0xff]  ;;  %v1677_v37 = vld [vmem:[#allocation2 + $0x710] sm:$0xff] }
 0x283   :  { %6079 = vmatpush3.msra.mxu1 %v1639_v41  ;;  %6120 = vmatpush3.msra.mxu0 %v1671_v23  ;;  %v1662_v45 = vld [vmem:[#allocation2 + $0x698] sm:$0xff]  ;;  %v1629_v41 = vld [vmem:[#allocation2 + $0x590] sm:$0xff] }
 0x284   :  { %1541 = vmatmul.mubr.f32.gmra.mxu1 %v7719_v31  ;;  %6080 = vmatprep.subr.mxu1 %v1654_v3  ;;  %v1668_v31 = vld [vmem:[#allocation2 + $0x6c8] sm:$0xff]  ;;  %v1661_v23 = vld [vmem:[#allocation2 + $0x690] sm:$0xff] }
 0x285   :  { %6121 = vmatprep.subr.mxu0 %v1686_v15  ;;  %6366 = vmatprep.mubr.msk.f32.mxu0 %vm6912_vm3, %v9561_v52  ;;  %v1644_v3 = vld [vmem:[#allocation2 + $0x608] sm:$0xff] }
 0x286   :  { %6081 = vmatpush3.msra.mxu1 %v1638_v6  ;;  %6122 = vmatpush3.msra.mxu0 %v1670_v50  ;;  %v1676_v15 = vld [vmem:[#allocation2 + $0x708] sm:$0xff] }
 0x287   :  { %6082 = vmatprep.subr.mxu1 %v1653_v20  ;;  %6367 = vmatmul.mubr.f32.gmra.mxu0 %v7770_v51  ;;  %v1634_v51 = vld [vmem:[#allocation2 + $0x5b8] sm:$0xff]  ;;  %v1628_v6 = vld [vmem:[#allocation2 + $0x588] sm:$0xff]  ;;  %v1643_v20 = vld [vmem:[#allocation2 + $0x600] sm:$0xff] }
 0x288   :  { %6123 = vmatprep.subr.mxu0 %v1685_v21  ;;  %6083 = vmatpush3.msra.mxu1 %v1637_v18  ;;  %v1660_v50 = vld [vmem:[#allocation2 + $0x688] sm:$0xff]  ;;  %v1675_v21 = vld [vmem:[#allocation2 + $0x700] sm:$0xff] }
 0x289   :  { %6124 = vmatpush3.msra.mxu0 %v1669_v25  ;;  %6084 = vmatprep.subr.mxu1 %v1652_v12  ;;  %v1627_v18 = vld [vmem:[#allocation2 + $0x580] sm:$0xff] }
 0x28a   :  { %6125 = vmatprep.subr.mxu0 %v1684_v7  ;;  %6369 = vmatprep.mubr.msk.f32.mxu0 %vm6912_vm3, %v9561_v52  ;;  %v1659_v25 = vld [vmem:[#allocation2 + $0x680] sm:$0xff]  ;;  %v1722_v7 = vld [vmem:[#allocation2 + $0x878] sm:$0xff] }
 0x28b   :  { %6085 = vmatpush3.msra.mxu1 %v1636_v36  ;;  %6126 = vmatpush3.msra.mxu0 %v1668_v31  ;;  %v9567_v12 = vld [vmem:[#allocation43_spill] sm:$0xff]  ;;  %v1754_v36 = vld [vmem:[#allocation2 + $0x978] sm:$0xff] }
 0x28c   :  { %6086 = vmatprep.subr.mxu1 %v1651_v48  ;;  %6370 = vmatmul.mubr.f32.gmra.mxu0 %v7757_v17  ;;  %v1647_v17 = vld [vmem:[#allocation2 + $0x620] sm:$0xff]  ;;  %v9568_v31 = vld [vmem:[#allocation42_spill] sm:$0xff] }
 0x28d   :  { %6127 = vmatprep.subr.mxu0 %v1683_v4  ;;  %6087 = vmatpush3.msra.mxu1 %v1635_v16  ;;  %v1706_v48 = vld [vmem:[#allocation2 + $0x7f8] sm:$0xff] }
 0x28e   :  { %6128 = vmatpush3.msra.mxu0 %v1667_v38  ;;  %6088 = vmatprep.subr.mxu1 %v1650_v53  ;;  %v1738_v4 = vld [vmem:[#allocation2 + $0x8f8] sm:$0xff]  ;;  %v9570_v38 = vld [vmem:[#allocation44_spill] sm:$0xff]  ;;  %v1721_v53 = vld [vmem:[#allocation2 + $0x870] sm:$0xff] }
 0x28f   :  { %6129 = vmatprep.subr.mxu0 %v1682_v57  ;;  %6089 = vmatpush3.msra.mxu1 %v1634_v51  ;;  %v9569_v16 = vld [vmem:[#allocation34_spill] sm:$0xff]  ;;  %v1753_v57 = vld [vmem:[#allocation2 + $0x970] sm:$0xff] }
 0x290   :  { %6130 = vmatpush3.msra.mxu0 %v1666_v47  ;;  %6090 = vmatprep.subr.mxu1 %v1649_v19  ;;  %v1705_v51 = vld [vmem:[#allocation2 + $0x7f0] sm:$0xff]  ;;  %v1720_v19 = vld [vmem:[#allocation2 + $0x868] sm:$0xff] }
 0x291   :  { %6131 = vmatprep.subr.mxu0 %v1681_v43  ;;  %6091 = vmatpush3.msra.mxu1 %v1633_v59  ;;  %v1737_v47 = vld [vmem:[#allocation2 + $0x8f0] sm:$0xff]  ;;  %v1752_v43 = vld [vmem:[#allocation2 + $0x968] sm:$0xff] }
 0x292   :  { %6132 = vmatpush3.msra.mxu0 %v1665_v24  ;;  %6092 = vmatprep.subr.mxu1 %v1648_v8  ;;  %v1704_v59 = vld [vmem:[#allocation2 + $0x7e8] sm:$0xff]  ;;  %v1719_v8 = vld [vmem:[#allocation2 + $0x860] sm:$0xff] }
 0x293   :  { %6133 = vmatprep.subr.mxu0 %v1680_v5  ;;  %6093 = vmatpush3.msra.mxu1 %v1632_v62  ;;  %v1736_v24 = vld [vmem:[#allocation2 + $0x8e8] sm:$0xff]  ;;  %v1751_v5 = vld [vmem:[#allocation2 + $0x960] sm:$0xff] }
 0x294   :  { %6134 = vmatpush3.msra.mxu0 %v1664_v29  ;;  %6094 = vmatprep.subr.mxu1 %v1647_v17  ;;  %v1703_v62 = vld [vmem:[#allocation2 + $0x7e0] sm:$0xff]  ;;  %v1718_v17 = vld [vmem:[#allocation2 + $0x858] sm:$0xff] }
 0x295   :  { %6135 = vmatprep.subr.mxu0 %v1679_v30  ;;  %6095 = vmatpush3.msra.mxu1 %v1631_v55  ;;  %v1735_v29 = vld [vmem:[#allocation2 + $0x8e0] sm:$0xff]  ;;  %v1750_v30 = vld [vmem:[#allocation2 + $0x958] sm:$0xff] }
 0x296   :  { %6136 = vmatpush3.msra.mxu0 %v1663_v35  ;;  %6096 = vmatprep.subr.mxu1 %v1646_v10  ;;  %v1702_v55 = vld [vmem:[#allocation2 + $0x7d8] sm:$0xff]  ;;  %v1717_v10 = vld [vmem:[#allocation2 + $0x850] sm:$0xff] }
 0x297   :  { %6137 = vmatprep.subr.mxu0 %v1678_v56  ;;  %6097 = vmatpush3.msra.mxu1 %v1630_v9  ;;  %v1734_v35 = vld [vmem:[#allocation2 + $0x8d8] sm:$0xff]  ;;  %v1749_v56 = vld [vmem:[#allocation2 + $0x950] sm:$0xff] }
 0x298   :  { %6138 = vmatpush3.msra.mxu0 %v1662_v45  ;;  %6098 = vmatprep.subr.mxu1 %v1645_v54  ;;  %v1701_v9 = vld [vmem:[#allocation2 + $0x7d0] sm:$0xff]  ;;  %v1716_v54 = vld [vmem:[#allocation2 + $0x848] sm:$0xff] }
 0x299   :  { %6139 = vmatprep.subr.mxu0 %v1677_v37  ;;  %6099 = vmatpush3.msra.mxu1 %v1629_v41  ;;  %v1733_v45 = vld [vmem:[#allocation2 + $0x8d0] sm:$0xff]  ;;  %v1748_v37 = vld [vmem:[#allocation2 + $0x948] sm:$0xff] }
 0x29a   :  { %6140 = vmatpush3.msra.mxu0 %v1661_v23  ;;  %6100 = vmatprep.subr.mxu1 %v1644_v3  ;;  %v1700_v41 = vld [vmem:[#allocation2 + $0x7c8] sm:$0xff]  ;;  %v1715_v3 = vld [vmem:[#allocation2 + $0x840] sm:$0xff] }
 0x29b   :  { %6141 = vmatprep.subr.mxu0 %v1676_v15  ;;  %6101 = vmatpush3.msra.mxu1 %v1628_v6  ;;  %v1732_v23 = vld [vmem:[#allocation2 + $0x8c8] sm:$0xff]  ;;  %v1747_v15 = vld [vmem:[#allocation2 + $0x940] sm:$0xff] }
 0x29c   :  { %6142 = vmatpush3.msra.mxu0 %v1660_v50  ;;  %6102 = vmatprep.subr.mxu1 %v1643_v20  ;;  %v1699_v6 = vld [vmem:[#allocation2 + $0x7c0] sm:$0xff]  ;;  %v1714_v20 = vld [vmem:[#allocation2 + $0x838] sm:$0xff] }
 0x29d   :  { %6143 = vmatprep.subr.mxu0 %v1675_v21  ;;  %6103 = vmatpush3.msra.mxu1 %v1627_v18  ;;  %v1731_v50 = vld [vmem:[#allocation2 + $0x8c0] sm:$0xff]  ;;  %v1746_v21 = vld [vmem:[#allocation2 + $0x938] sm:$0xff] }
 0x29e   :  { %1867 = vmatprep.mubr.f32.mxu1 %v9567_v12  ;;  %6144 = vmatpush3.msra.mxu0 %v1659_v25  ;;  %v1698_v18 = vld [vmem:[#allocation2 + $0x7b8] sm:$0xff]  ;;  %v1713_v12 = vld [vmem:[#allocation2 + $0x830] sm:$0xff] }
 0x29f   :  { %1947 = vmatprep.mubr.f32.mxu0 %v9568_v31  ;;  %1868 = vmatmul.mubr.f32.vlgmr.msra.gmra.mxu1 %v9569_v16  ;;  %v1730_v25 = vld [vmem:[#allocation2 + $0x8b8] sm:$0xff]  ;;  %v1729_v31 = vld [vmem:[#allocation2 + $0x8b0] sm:$0xff]  ;;  %v1711_v16 = vld [vmem:[#allocation2 + $0x820] sm:$0xff] }
 0x2a0   :  { %1948 = vmatmul.mubr.f32.vlgmr.msra.gmra.mxu0 %v9570_v38  ;;  %6154 = vmatprep.subr.mxu1 %v1722_v7  ;;  %v1745_v7 = vld [vmem:[#allocation2 + $0x930] sm:$0xff]  ;;  %v1744_v38 = vld [vmem:[#allocation2 + $0x928] sm:$0xff] }
 0x2a1   :  { %6195 = vmatprep.subr.mxu0 %v1754_v36  ;;  %6155 = vmatpush3.msra.mxu1 %v1706_v48  ;;  %v1697_v36 = vld [vmem:[#allocation2 + $0x7b0] sm:$0xff]  ;;  %v1712_v48 = vld [vmem:[#allocation2 + $0x828] sm:$0xff] }
 0x2a2   :  { %6196 = vmatpush3.msra.mxu0 %v1738_v4  ;;  %6156 = vmatprep.subr.mxu1 %v1721_v53  ;;  %v1696_v4 = vld [vmem:[#allocation2 + $0x7a8] sm:$0xff]  ;;  %v1695_v53 = vld [vmem:[#allocation2 + $0x7a0] sm:$0xff] }
 0x2a3   :  { %6197 = vmatprep.subr.mxu0 %v1753_v57  ;;  %6157 = vmatpush3.msra.mxu1 %v1705_v51  ;;  %v1728_v57 = vld [vmem:[#allocation2 + $0x8a8] sm:$0xff]  ;;  %v1710_v51 = vld [vmem:[#allocation2 + $0x818] sm:$0xff] }
 0x2a4   :  { %6198 = vmatpush3.msra.mxu0 %v1737_v47  ;;  %6158 = vmatprep.subr.mxu1 %v1720_v19  ;;  %v1743_v47 = vld [vmem:[#allocation2 + $0x920] sm:$0xff]  ;;  %v1694_v19 = vld [vmem:[#allocation2 + $0x798] sm:$0xff] }
 0x2a5   :  { %6199 = vmatprep.subr.mxu0 %v1752_v43  ;;  %6159 = vmatpush3.msra.mxu1 %v1704_v59  ;;  %v1727_v43 = vld [vmem:[#allocation2 + $0x8a0] sm:$0xff]  ;;  %v1742_v59 = vld [vmem:[#allocation2 + $0x918] sm:$0xff] }
 0x2a6   :  { %6200 = vmatpush3.msra.mxu0 %v1736_v24  ;;  %6160 = vmatprep.subr.mxu1 %v1719_v8  ;;  %v1726_v24 = vld [vmem:[#allocation2 + $0x898] sm:$0xff]  ;;  %v1692_v8 = vld [vmem:[#allocation2 + $0x788] sm:$0xff] }
 0x2a7   :  { %6201 = vmatprep.subr.mxu0 %v1751_v5  ;;  %6161 = vmatpush3.msra.mxu1 %v1703_v62  ;;  %v1725_v5 = vld [vmem:[#allocation2 + $0x890] sm:$0xff]  ;;  %v1707_v62 = vld [vmem:[#allocation2 + $0x800] sm:$0xff] }
 0x2a8   :  { %6202 = vmatpush3.msra.mxu0 %v1735_v29  ;;  %6162 = vmatprep.subr.mxu1 %v1718_v17  ;;  %v1740_v29 = vld [vmem:[#allocation2 + $0x908] sm:$0xff]  ;;  %v1739_v17 = vld [vmem:[#allocation2 + $0x900] sm:$0xff] }
 0x2a9   :  { %6203 = vmatprep.subr.mxu0 %v1750_v30  ;;  %6163 = vmatpush3.msra.mxu1 %v1702_v55  ;;  %v1786_v30 = vld [vmem:[#allocation2 + $0xa78] sm:$0xff]  ;;  %v9572_v55 = vld [vmem:[#allocation41_spill] sm:$0xff] }
 0x2aa   :  { %6204 = vmatpush3.msra.mxu0 %v1734_v35  ;;  %6164 = vmatprep.subr.mxu1 %v1717_v10  ;;  %v1770_v35 = vld [vmem:[#allocation2 + $0x9f8] sm:$0xff]  ;;  %v1785_v10 = vld [vmem:[#allocation2 + $0xa70] sm:$0xff] }
 0x2ab   :  { %6205 = vmatprep.subr.mxu0 %v1749_v56  ;;  %6165 = vmatpush3.msra.mxu1 %v1701_v9  ;;  %v9573_v56 = vld [vmem:[#allocation47_spill] sm:$0xff]  ;;  %v1769_v9 = vld [vmem:[#allocation2 + $0x9f0] sm:$0xff] }
 0x2ac   :  { %6206 = vmatpush3.msra.mxu0 %v1733_v45  ;;  %6166 = vmatprep.subr.mxu1 %v1716_v54  ;;  %v9574_v45 = vld [vmem:[#allocation46_spill] sm:$0xff]  ;;  %v1784_v54 = vld [vmem:[#allocation2 + $0xa68] sm:$0xff] }
 0x2ad   :  { %6207 = vmatprep.subr.mxu0 %v1748_v37  ;;  %6167 = vmatpush3.msra.mxu1 %v1700_v41  ;;  %v1768_v37 = vld [vmem:[#allocation2 + $0x9e8] sm:$0xff]  ;;  %v1802_v41 = vld [vmem:[#allocation2 + $0xaf8] sm:$0xff] }
 0x2ae   :  { %6208 = vmatpush3.msra.mxu0 %v1732_v23  ;;  %6168 = vmatprep.subr.mxu1 %v1715_v3  ;;  %v1783_v23 = vld [vmem:[#allocation2 + $0xa60] sm:$0xff] }
 0x2af   :  { %6209 = vmatprep.subr.mxu0 %v1747_v15  ;;  %6169 = vmatpush3.msra.mxu1 %v1699_v6  ;;  %v1767_v3 = vld [vmem:[#allocation2 + $0x9e0] sm:$0xff]  ;;  %v1801_v15 = vld [vmem:[#allocation2 + $0xaf0] sm:$0xff]  ;;  %v1766_v6 = vld [vmem:[#allocation2 + $0x9d8] sm:$0xff] }
 0x2b0   :  { %6210 = vmatpush3.msra.mxu0 %v1731_v50  ;;  %6170 = vmatprep.subr.mxu1 %v1714_v20  ;;  %v1781_v50 = vld [vmem:[#allocation2 + $0xa50] sm:$0xff]  ;;  %v1780_v20 = vld [vmem:[#allocation2 + $0xa48] sm:$0xff] }
 0x2b1   :  { %6211 = vmatprep.subr.mxu0 %v1746_v21  ;;  %6171 = vmatpush3.msra.mxu1 %v1698_v18  ;;  %v1798_v21 = vld [vmem:[#allocation2 + $0xad8] sm:$0xff]  ;;  %v1763_v18 = vld [vmem:[#allocation2 + $0x9c0] sm:$0xff] }
 0x2b2   :  { %6212 = vmatpush3.msra.mxu0 %v1730_v25  ;;  %6172 = vmatprep.subr.mxu1 %v1713_v12  ;;  %v1778_v25 = vld [vmem:[#allocation2 + $0xa38] sm:$0xff] }
 0x2b3   :  { %6213 = vmatprep.subr.mxu0 %v1745_v7  ;;  %6173 = vmatpush3.msra.mxu1 %v1697_v36  ;;  %v1762_v12 = vld [vmem:[#allocation2 + $0x9b8] sm:$0xff]  ;;  %v1777_v7 = vld [vmem:[#allocation2 + $0xa30] sm:$0xff] }
 0x2b4   :  { %6214 = vmatpush3.msra.mxu0 %v1729_v31  ;;  %6174 = vmatprep.subr.mxu1 %v1712_v48  ;;  %v1761_v36 = vld [vmem:[#allocation2 + $0x9b0] sm:$0xff]  ;;  %v1795_v31 = vld [vmem:[#allocation2 + $0xac0] sm:$0xff]  ;;  %v1776_v48 = vld [vmem:[#allocation2 + $0xa28] sm:$0xff] }
 0x2b5   :  { %1872 = vmatprep.mubr.f32.mxu1 %v7815_v11  ;;  %6175 = vmatpush3.msra.mxu1 %v1696_v4  ;;  %v1709_v11 = vld [vmem:[#allocation2 + $0x810] sm:$0xff]  ;;  %v1760_v4 = vld [vmem:[#allocation2 + $0x9a8] sm:$0xff] }
 0x2b6   :  { %1952 = vmatprep.mubr.f32.mxu0 %v7694_v27  ;;  %6176 = vmatprep.subr.mxu1 %v1711_v16  ;;  %v1693_v27 = vld [vmem:[#allocation2 + $0x790] sm:$0xff]  ;;  %v1794_v16 = vld [vmem:[#allocation2 + $0xab8] sm:$0xff] }
 0x2b7   :  { %6215 = vmatprep.subr.mxu0 %v1744_v38  ;;  %1873 = vmatmul.mubr.f32.gmra.mxu1 %v7783_v14  ;;  %v1708_v14 = vld [vmem:[#allocation2 + $0x808] sm:$0xff]  ;;  %v1775_v38 = vld [vmem:[#allocation2 + $0xa20] sm:$0xff] }
 0x2b8   :  { %1953 = vmatmul.mubr.f32.gmra.mxu0 %v7819_v13  ;;  %6177 = vmatpush3.msra.mxu1 %v1695_v53  ;;  %v1741_v13 = vld [vmem:[#allocation2 + $0x910] sm:$0xff]  ;;  %v1759_v53 = vld [vmem:[#allocation2 + $0x9a0] sm:$0xff] }
 0x2b9   :  { %6216 = vmatpush3.msra.mxu0 %v1728_v57  ;;  %6178 = vmatprep.subr.mxu1 %v1710_v51  ;;  %v1793_v57 = vld [vmem:[#allocation2 + $0xab0] sm:$0xff]  ;;  %v1774_v51 = vld [vmem:[#allocation2 + $0xa18] sm:$0xff] }
 0x2ba   :  { %6217 = vmatprep.subr.mxu0 %v1743_v47  ;;  %6179 = vmatpush3.msra.mxu1 %v1694_v19  ;;  %v1758_v47 = vld [vmem:[#allocation2 + $0x998] sm:$0xff]  ;;  %v1792_v19 = vld [vmem:[#allocation2 + $0xaa8] sm:$0xff] }
 0x2bb   :  { %6218 = vmatpush3.msra.mxu0 %v1727_v43  ;;  %1877 = vmatprep.mubr.f32.mxu1 %v7806_v39  ;;  %v1691_v39 = vld [vmem:[#allocation2 + $0x780] sm:$0xff]  ;;  %v1773_v43 = vld [vmem:[#allocation2 + $0xa10] sm:$0xff] }
 0x2bc   :  { %1957 = vmatprep.mubr.f32.mxu0 %v7680_v22  ;;  %6180 = vmatprep.subr.mxu1 %v1709_v11  ;;  %v1724_v22 = vld [vmem:[#allocation2 + $0x888] sm:$0xff]  ;;  %v1757_v11 = vld [vmem:[#allocation2 + $0x990] sm:$0xff] }
 0x2bd   :  { %6219 = vmatprep.subr.mxu0 %v1742_v59  ;;  %1878 = vmatmul.mubr.f32.gmra.mxu1 %v7790_v28  ;;  %v9571_v28 = vld [vmem:[#allocation45_spill] sm:$0xff]  ;;  %v1791_v59 = vld [vmem:[#allocation2 + $0xaa0] sm:$0xff] }
 0x2be   :  { %1958 = vmatmul.mubr.f32.gmra.mxu0 %v7809_v33  ;;  %6181 = vmatpush3.msra.mxu1 %v1693_v27  ;;  %v1723_v33 = vld [vmem:[#allocation2 + $0x880] sm:$0xff]  ;;  %v1772_v27 = vld [vmem:[#allocation2 + $0xa08] sm:$0xff] }
 0x2bf   :  { %6220 = vmatpush3.msra.mxu0 %v1726_v24  ;;  %6182 = vmatprep.subr.mxu1 %v1708_v14  ;;  %v1756_v24 = vld [vmem:[#allocation2 + $0x988] sm:$0xff]  ;;  %v1790_v14 = vld [vmem:[#allocation2 + $0xa98] sm:$0xff] }
 0x2c0   :  { %6221 = vmatprep.subr.mxu0 %v1741_v13  ;;  %6183 = vmatpush3.msra.mxu1 %v1692_v8  ;;  %v1771_v13 = vld [vmem:[#allocation2 + $0xa00] sm:$0xff] }
 0x2c1   :  { %6222 = vmatpush3.msra.mxu0 %v1725_v5  ;;  %6184 = vmatprep.subr.mxu1 %v1707_v62  ;;  %v1755_v8 = vld [vmem:[#allocation2 + $0x980] sm:$0xff]  ;;  %v1789_v5 = vld [vmem:[#allocation2 + $0xa90] sm:$0xff]  ;;  %v9575_v62 = vld [vmem:[#allocation50_spill] sm:$0xff] }
 0x2c2   :  { %6223 = vmatprep.subr.mxu0 %v1740_v29  ;;  %6185 = vmatpush3.msra.mxu1 %v1691_v39  ;;  %v1788_v29 = vld [vmem:[#allocation2 + $0xa88] sm:$0xff]  ;;  %v1787_v39 = vld [vmem:[#allocation2 + $0xa80] sm:$0xff] }
 0x2c3   :  { %2027 = vmatprep.mubr.f32.mxu1 %v9571_v28  ;;  %6224 = vmatpush3.msra.mxu0 %v1724_v22  ;;  %v9576_v22 = vld [vmem:[#allocation51_spill] sm:$0xff] }
 0x2c4   :  { %2028 = vmatmul.mubr.f32.vlgmr.msra.gmra.mxu1 %v9572_v55  ;;  %6225 = vmatprep.subr.mxu0 %v1739_v17 }
 0x2c5   :  { %6236 = vmatprep.subr.mxu1 %v1786_v30  ;;  %6226 = vmatpush3.msra.mxu0 %v1723_v33 }
 0x2c6   :  { %2107 = vmatprep.mubr.f32.mxu0 %v9573_v56  ;;  %6237 = vmatpush3.msra.mxu1 %v1770_v35 }
 0x2c7   :  { %2108 = vmatmul.mubr.f32.vlgmr.msra.gmra.mxu0 %v9574_v45  ;;  %6238 = vmatprep.subr.mxu1 %v1785_v10 }
 0x2c8   :  { %2032 = vmatprep.mubr.f32.mxu1 %v7703_v61  ;;  %6239 = vmatpush3.msra.mxu1 %v1769_v9  ;;  %v1782_v61 = vld [vmem:[#allocation2 + $0xa58] sm:$0xff] }
 0x2c9   :  { %6372 = vmatprep.subr.mxu0 %v9561_v52  ;;  %2033 = vmatmul.mubr.f32.gmra.mxu1 %v7699_v26  ;;  %v1800_v26 = vld [vmem:[#allocation2 + $0xae8] sm:$0xff] }
 0x2ca   :  { %6240 = vmatprep.subr.mxu1 %v1784_v54  ;;  %2112 = vmatprep.mubr.f32.mxu0 %v7832_v42  ;;  %v1765_v42 = vld [vmem:[#allocation2 + $0x9d0] sm:$0xff] }
 0x2cb   :  { %6241 = vmatpush3.msra.mxu1 %v1768_v37  ;;  %6373 = vmatpush3.msra.mxu0 %v1802_v41 }
 0x2cc   :  { %6242 = vmatprep.subr.mxu1 %v1783_v23  ;;  %2113 = vmatmul.mubr.f32.gmra.mxu0 %v7707_v40  ;;  %v1799_v40 = vld [vmem:[#allocation2 + $0xae0] sm:$0xff] }
 0x2cd   :  { %6374 = vmatprep.subr.mxu0 %v9561_v52  ;;  %2037 = vmatprep.mubr.f32.mxu1 %v7686_v58  ;;  %v1764_v58 = vld [vmem:[#allocation2 + $0x9c8] sm:$0xff] }
 0x2ce   :  { %6243 = vmatpush3.msra.mxu1 %v1767_v3  ;;  %6375 = vmatpush3.msra.mxu0 %v1801_v15 }
 0x2cf   :  { %2038 = vmatmul.mubr.f32.gmra.mxu1 %v7683_v60  ;;  %6244 = vmatprep.subr.mxu1 %v1782_v61  ;;  %v1779_v60 = vld [vmem:[#allocation2 + $0xa40] sm:$0xff] }
 0x2d0   :  { %6376 = vmatprep.subr.mxu0 %v9561_v52  ;;  %2117 = vmatprep.mubr.f32.mxu0 %v7822_v2  ;;  %v1797_v2 = vld [vmem:[#allocation2 + $0xad0] sm:$0xff] }
 0x2d1   :  { %6245 = vmatpush3.msra.mxu1 %v1766_v6  ;;  %6377 = vmatpush3.msra.mxu0 %v1800_v26 }
 0x2d2   :  { %6246 = vmatprep.subr.mxu1 %v1781_v50  ;;  %2118 = vmatmul.mubr.f32.gmra.mxu0 %v7689_v46  ;;  %v1796_v46 = vld [vmem:[#allocation2 + $0xac8] sm:$0xff] }
 0x2d3   :  { %6378 = vmatprep.subr.mxu0 %v9561_v52  ;;  %6247 = vmatpush3.msra.mxu1 %v1765_v42 }
 0x2d4   :  { %6379 = vmatpush3.msra.mxu0 %v1799_v40  ;;  %6248 = vmatprep.subr.mxu1 %v1780_v20 }
 0x2d5   :  { %6380 = vmatprep.subr.mxu0 %v9561_v52  ;;  %6249 = vmatpush3.msra.mxu1 %v1764_v58 }
 0x2d6   :  { %6381 = vmatpush3.msra.mxu0 %v1798_v21  ;;  %6250 = vmatprep.subr.mxu1 %v1779_v60 }
 0x2d7   :  { %6382 = vmatprep.subr.mxu0 %v9561_v52  ;;  %6251 = vmatpush3.msra.mxu1 %v1763_v18 }
 0x2d8   :  { %6383 = vmatpush3.msra.mxu0 %v1797_v2  ;;  %6252 = vmatprep.subr.mxu1 %v1778_v25 }
 0x2d9   :  { %6384 = vmatprep.subr.mxu0 %v9561_v52  ;;  %6253 = vmatpush3.msra.mxu1 %v1762_v12  ;;  %v7957_v12 = vld [vmem:[#allocation11] sm:$0x3] }
 0x2da   :  { %6385 = vmatpush3.msra.mxu0 %v1796_v46  ;;  %6254 = vmatprep.subr.mxu1 %v1777_v7 }
 0x2db   :  { %6386 = vmatprep.subr.mxu0 %v9561_v52  ;;  %6255 = vmatpush3.msra.mxu1 %v1761_v36 }
 0x2dc   :  { %6387 = vmatpush3.msra.mxu0 %v1795_v31  ;;  %6256 = vmatprep.subr.mxu1 %v1776_v48 }
 0x2dd   :  { %6388 = vmatprep.subr.mxu0 %v9561_v52  ;;  %6257 = vmatpush3.msra.mxu1 %v1760_v4 }
 0x2de   :  { %6389 = vmatpush3.msra.mxu0 %v1794_v16  ;;  %6258 = vmatprep.subr.mxu1 %v1775_v38  ;;  %v9577_v38 = vld [vmem:[#allocation31_spill] sm:$0xff] }
 0x2df   :  { %6390 = vmatprep.subr.mxu0 %v9561_v52  ;;  %6259 = vmatpush3.msra.mxu1 %v1759_v53  ;;  %v2288_v53 = vrot.slane %v7957_v12, %v9577_v38 }
 0x2e0   :  { %6391 = vmatpush3.msra.mxu0 %v1793_v57  ;;  %6260 = vmatprep.subr.mxu1 %v1774_v51 }
 0x2e1   :  { %6392 = vmatprep.subr.mxu0 %v9561_v52  ;;  %6261 = vmatpush3.msra.mxu1 %v1758_v47 }
 0x2e2   :  { %6393 = vmatpush3.msra.mxu0 %v1792_v19  ;;  %6262 = vmatprep.subr.mxu1 %v1773_v43 }
 0x2e3   :  { %6394 = vmatprep.subr.mxu0 %v9561_v52  ;;  %6263 = vmatpush3.msra.mxu1 %v1757_v11 }
 0x2e4   :  { %6395 = vmatpush3.msra.mxu0 %v1791_v59  ;;  %6264 = vmatprep.subr.mxu1 %v1772_v27 }
 0x2e5   :  { %6396 = vmatprep.subr.mxu0 %v9561_v52  ;;  %6265 = vmatpush3.msra.mxu1 %v1756_v24 }
 0x2e6   :  { %6397 = vmatpush3.msra.mxu0 %v1790_v14  ;;  %6266 = vmatprep.subr.mxu1 %v1771_v13 }
 0x2e7   :  { %6398 = vmatprep.subr.mxu0 %v9561_v52  ;;  %6267 = vmatpush3.msra.mxu1 %v1755_v8 }
 0x2e8   :  { %2187 = vmatprep.mubr.f32.mxu1 %v9575_v62  ;;  %6399 = vmatpush3.msra.mxu0 %v1789_v5 }
 0x2e9   :  { %2188 = vmatmul.mubr.f32.vlgmr.msra.gmra.mxu1 %v7377_v49  ;;  %6400 = vmatprep.subr.mxu0 %v9561_v52 }
 0x2ea   :  { %2192 = vmatprep.mubr.f32.mxu1 %v7841_v0  ;;  %6401 = vmatpush3.msra.mxu0 %v1788_v29 }
 0x2eb   :  { %6404 = vmatprep.mubr.msk.f32.mxu0 %vm6912_vm3, %v9561_v52  ;;  %6402 = vmatprep.subr.mxu0 %v9561_v52 }
 0x2ec   :  { %6403 = vmatpush3.msra.mxu0 %v1787_v39 }
 0x2ed   :  { %2193 = vmatmul.mubr.f32.gmra.mxu1 %v7837_v63  ;;  %6405 = vmatmul.mubr.f32.vlgmr.msra.gmra.mxu0 %v9576_v22  ;;  %v5880_v49 = vpop.f32.mrf.mxu1 }
 0x2ee   :  { %2197 = vmatprep.mubr.f32.mxu1 %v7825_v44  ;;  %6407 = vmatprep.mubr.msk.f32.mxu0 %vm6912_vm3, %v9561_v52  ;;  %v5921_v0 = vpop.f32.mrf.mxu0 }
 0x2ef   :  { %v5881_v17 = vpop.f32.mrf.mxu1 }
 0x2f0   :  { %v5922_v30 = vpop.f32.mrf.mxu0  ;;  %v5882_v23 = vadd.f32 %v5881_v17, %v5880_v49 }
 0x2f1   :  { %2198 = vmatmul.mubr.f32.gmra.mxu1 %v7799_v34  ;;  %6408 = vmatmul.mubr.f32.gmra.mxu0 %v7845_v32  ;;  %v5923_v3 = vadd.f32 %v5922_v30, %v5921_v0 }
 0x2f2   :  { %6410 = vmatprep.mubr.msk.f32.mxu0 %vm6912_vm3, %v9561_v52 }
 0x2f3   :  { %v1293_v26 = vadd.f32 %v5923_v3, %v5882_v23 }
 0x2f5   :  { %6411 = vmatmul.mubr.f32.gmra.mxu0 %v7828_v1 }
 0x306   :  { %v5883_v63 = vpop.f32.mrf.mxu1 }
 0x307   :  { %v5924_v28 = vpop.f32.mrf.mxu0 }
 0x308   :  { %v5884_v33 = vpop.f32.mrf.mxu1 }
 0x309   :  { %v5925_v44 = vpop.f32.mrf.mxu0  ;;  %v5885_v20 = vadd.f32 %v5884_v33, %v5883_v63 }
 0x30a   :  { %v5926_v58 = vadd.f32 %v5925_v44, %v5924_v28 }
 0x30c   :  { %v5886_v55 = vpop.f32.mrf.mxu1  ;;  %v1298_v36 = vadd.f32 %v5926_v58, %v5885_v20 }
 0x30d   :  { %v5927_v35 = vpop.f32.mrf.mxu0 }
 0x30e   :  { %v5887_v10 = vpop.f32.mrf.mxu1 }
 0x30f   :  { %v5928_v56 = vpop.f32.mrf.mxu0  ;;  %v5888_v48 = vadd.f32 %v5887_v10, %v5886_v55 }
 0x310   :  { %v5929_v4 = vadd.f32 %v5928_v56, %v5927_v35 }
 0x312   :  { %v1303_v59 = vadd.f32 %v5929_v4, %v5888_v48 }
 0x313   :  { %v5962_v34 = vpop.f32.mrf.mxu1 }
 0x315   :  { %v6003_v9 = vpop.f32.mrf.mxu0  ;;  %v5963_v32 = vpop.f32.mrf.mxu1 }
 0x316   :  { %v5964_v61 = vadd.f32 %v5963_v32, %v5962_v34 }
 0x317   :  { %v6004_v45 = vpop.f32.mrf.mxu0 }
 0x318   :  { %v1373_v42 = vadd.f32 %v5964_v61, %v1293_v26  ;;  %v6005_v40 = vadd.f32 %v6004_v45, %v6003_v9 }
 0x319   :  { %v5965_v54 = vpop.f32.mrf.mxu1 }
 0x31a   :  { %v1453_v46 = vadd.f32 %v6005_v40, %v1373_v42 }
 0x31b   :  { %v5966_v41 = vpop.f32.mrf.mxu1 }
 0x31c   :  { %v6006_v37 = vpop.f32.mrf.mxu0  ;;  %v5967_v18 = vadd.f32 %v5966_v41, %v5965_v54 }
 0x31e   :  { %v6007_v1 = vpop.f32.mrf.mxu0  ;;  %v1378_v57 = vadd.f32 %v5967_v18, %v1298_v36 }
 0x31f   :  { %v5968_v15 = vpop.f32.mrf.mxu1  ;;  %v6008_v51 = vadd.f32 %v6007_v1, %v6006_v37 }
 0x321   :  { %v5969_v50 = vpop.f32.mrf.mxu1  ;;  %v1458_v14 = vadd.f32 %v6008_v51, %v1378_v57 }
 0x322   :  { %v6009_v6 = vpop.f32.mrf.mxu0  ;;  %v5970_v19 = vadd.f32 %v5969_v50, %v5968_v15 }
 0x324   :  { %v6010_v21 = vpop.f32.mrf.mxu0  ;;  %v1383_v13 = vadd.f32 %v5970_v19, %v1303_v59 }
 0x325   :  { %v6011_v8 = vadd.f32 %v6010_v21, %v6009_v6 }
 0x327   :  { %v1463_v0 = vadd.f32 %v6011_v8, %v1383_v13 }
 0x339   :  { %v6044_v60 = vpop.f32.mrf.mxu1 }
 0x33b   :  { %v6045_v2 = vpop.f32.mrf.mxu1  ;;  %v1612_v25 = vpop.f32.mrf.mxu0 }
 0x33c   :  { %v6046_v7 = vadd.f32 %v6045_v2, %v6044_v60 }
 0x33d   :  { %v6365_v31 = vpop.f32.mrf.mxu0 }
 0x33e   :  { %v1533_v16 = vadd.f32 %v6046_v7, %v1453_v46 }
 0x33f   :  { %v6047_v47 = vpop.f32.mrf.mxu1 }
 0x340   :  { %v1613_v43 = vadd.f32 %v1612_v25, %v1533_v16 }
 0x341   :  { %v6048_v11 = vpop.f32.mrf.mxu1 }
 0x342   :  { %v2295_v27 = vadd.f32 %v2288_v53, %v1613_v43  ;;  %v6049_v24 = vadd.f32 %v6048_v11, %v6047_v47 }
 0x344   :  { %v6050_v5 = vpop.f32.mrf.mxu1  ;;  %v2301_v62 = vsel %vm669_vm15, %v2295_v27, -inf  ;;  %v1538_v29 = vadd.f32 %v6049_v24, %v1458_v14  ;;  %v2333_v39 = vsel %vm2332_vm4, %v2295_v27, -inf  ;;  %v2369_v56 = vsel %vm2368_vm5, %v2295_v27, -inf }
 0x345   :  { %v2302_v17 = vrot.slane %v2301_v62, 4  ;;  %v2334_v30 = vrot.slane %v2333_v39, 4 }
 0x346   :  { %v6051_v22 = vpop.f32.mrf.mxu1 }
 0x347   :  { %v6052_v49 = vadd.f32 %v6051_v22, %v6050_v5  ;;  %v1617_v63 = vpop.f32.mrf.mxu0  ;;  %v2303_v35 = vmax.f32 %v2301_v62, %v2302_v17  ;;  %v2335_v10 = vmax.f32 %v2333_v39, %v2334_v30 }
 0x348   :  { %v1618_v28 = vadd.f32 %v1617_v63, %v1538_v29 }
 0x349   :  { %v6368_v33 = vpop.f32.mrf.mxu0  ;;  %v1543_v44 = vadd.f32 %v6052_v49, %v1463_v0  ;;  %v2304_v3 = vrot.slane %v2303_v35, 2  ;;  %v2336_v26 = vrot.slane %v2335_v10, 2 }
 0x34a   :  { %v2297_v55 = vadd.f32 %v2288_v53, %v1618_v28 }
 0x34b   :  { %v2305_v25 = vmax.f32 %v2303_v35, %v2304_v3 }
 0x34c   :  { %v2370_v34 = vsel %vm684_vm1, %v2297_v55, -inf  ;;  %v1622_v9 = vpop.f32.mrf.mxu0  ;;  %v2316_v32 = vsel %vm2315_vm6, %v2297_v55, -inf  ;;  %v2405_v1 = vsel %vm2404_vm7, %v2297_v55, -inf  ;;  %v2348_v6 = vsel %vm2347_vm8, %v2297_v55, -inf }
 0x34d   :  { %v1623_v45 = vadd.f32 %v1622_v9, %v1543_v44  ;;  %v2317_v54 = vrot.slane %v2316_v32, 4  ;;  %v2371_v37 = vmax.f32 %v2369_v56, %v2370_v34  ;;  %v2406_v50 = vrot.slane %v2405_v1, 4 }
 0x34e   :  { %v6371_v41 = vpop.f32.mrf.mxu0  ;;  %v2306_v11 = vrot.slane %v2305_v25, 1 }
 0x34f   :  { %v2299_v23 = vadd.f32 %v2288_v53, %v1623_v45  ;;  %v2318_v15 = vmax.f32 %v2316_v32, %v2317_v54  ;;  %v2372_v61 = vrot.slane %v2371_v37, 4  ;;  %v2407_v7 = vmax.f32 %v2405_v1, %v2406_v50 }
 0x350   :  { %v2337_v53 = vmax.f32 %v2335_v10, %v2336_v26  ;;  %v2307_v49 = vmax.f32 %v2305_v25, %v2306_v11 }
 0x351   :  { %v2349_v42 = vsel %vm535_vm0, %v2299_v23, -inf  ;;  %v2388_v40 = vsel %vm2387_vm9, %v2299_v23, -inf  ;;  %v2420_v20 = vsel %vm2419_vm10, %v2299_v23, -inf  ;;  %v2319_v58 = vrot.slane %v2318_v15, 2 }
 0x352   :  { %v2350_v21 = vmax.f32 %v2348_v6, %v2349_v42  ;;  %v2389_v60 = vrot.slane %v2388_v40, 4  ;;  %v2421_v18 = vrot.slane %v2420_v20, 4  ;;  %v2373_v2 = vmax.f32 %v2371_v37, %v2372_v61 }
 0x353   :  { %v2320_v46 = vmax.f32 %v2318_v15, %v2319_v58  ;;  %v2408_v57 = vrot.slane %v2407_v7, 2  ;;  %v2338_v5 = vrot.slane %v2337_v53, 1 }
 0x354   :  { %v2351_v36 = vrot.slane %v2350_v21, 4  ;;  %v2390_v31 = vmax.f32 %v2388_v40, %v2389_v60  ;;  %v2422_v48 = vmax.f32 %v2420_v20, %v2421_v18  ;;  %v2374_v4 = vrot.slane %v2373_v2, 2 }
 0x355   :  { %v2321_v16 = vrot.slane %v2320_v46, 1  ;;  %v2409_v59 = vmax.f32 %v2407_v7, %v2408_v57  ;;  %v2339_v28 = vmax.f32 %v2337_v53, %v2338_v5 }
 0x356   :  { %v2375_v51 = vmax.f32 %v2373_v2, %v2374_v4  ;;  %v2391_v47 = vrot.slane %v2390_v31, 2  ;;  %v2352_v19 = vmax.f32 %v2350_v21, %v2351_v36  ;;  %v2423_v43 = vrot.slane %v2422_v48, 2 }
 0x357   :  { %v2322_v8 = vmax.f32 %v2320_v46, %v2321_v16  ;;  %v2410_v39 = vrot.slane %v2409_v59, 1 }
 0x358   :  { %v2376_v27 = vrot.slane %v2375_v51, 1  ;;  %v2392_v24 = vmax.f32 %v2390_v31, %v2391_v47  ;;  %v2353_v14 = vrot.slane %v2352_v19, 2  ;;  %v2424_v13 = vmax.f32 %v2422_v48, %v2423_v43 }
 0x359   :  { %v7972_v33 = vsel %vm684_vm1, %v2307_v49, %v2322_v8  ;;  %v2411_v35 = vmax.f32 %v2409_v59, %v2410_v39 }
 0x35a   :  { %v2393_v62 = vrot.slane %v2392_v24, 1  ;;  %v2354_v29 = vmax.f32 %v2352_v19, %v2353_v14  ;;  %v2425_v22 = vrot.slane %v2424_v13, 1  ;;  %v2377_v0 = vmax.f32 %v2375_v51, %v2376_v27 }
 0x35c   :  { %v2394_v17 = vmax.f32 %v2392_v24, %v2393_v62  ;;  %v2355_v63 = vrot.slane %v2354_v29, 1  ;;  %v2426_v30 = vmax.f32 %v2424_v13, %v2425_v22  ;;  %v9578_v22 = vld [vmem:[#allocation32_spill] sm:$0xff] }
 0x35d   :  { %v2292_v49 = vrot.slane %v7957_v12, %v9578_v22 }
 0x35e   :  { %v7975_v44 = vsel %vm684_vm1, %v2377_v0, %v2394_v17  ;;  %v2356_v55 = vmax.f32 %v2354_v29, %v2355_v63  ;;  %v7983_v34 = vsel %vm684_vm1, %v2411_v35, %v2426_v30 }
 0x35f   :  { %v6436_v10 = vpack.i.bf16 %v7975_v44, %v7972_v33  ;;  %v6104_v32 = vpop.f32.mrf.mxu1 }
 0x360   :  { %v7980_v56 = vsel %vm684_vm1, %v2339_v28, %v2356_v55  ;;  %v6145_v37 = vpop.f32.mrf.mxu0 }
 0x361   :  { %6437 = vrot.lane.b32.xlu0 %v6436_v10, %s6913_s7  ;;  %v6446_v9 = vpack.i.bf16 %v7983_v34, %v7980_v56  ;;  %v6105_v45 = vpop.f32.mrf.mxu1 }
 0x362   :  { %v6146_v1 = vpop.f32.mrf.mxu0  ;;  %v6106_v18 = vadd.f32 %v6105_v45, %v6104_v32 }
 0x363   :  { %6447 = vrot.lane.b32.xlu1 %v6446_v9, %s6913_s7  ;;  %v6147_v2 = vadd.f32 %v6146_v1, %v6145_v37 }
 0x365   :  { %v1950_v36 = vadd.f32 %v6147_v2, %v6106_v18 }
 0x377   :  { %v6107_v54 = vpop.f32.mrf.mxu1 }
 0x378   :  { %v6148_v23 = vpop.f32.mrf.mxu0 }
 0x379   :  { %v6108_v41 = vpop.f32.mrf.mxu1 }
 0x37a   :  { %v6149_v15 = vpop.f32.mrf.mxu0  ;;  %v6109_v31 = vadd.f32 %v6108_v41, %v6107_v54 }
 0x37b   :  { %v6150_v48 = vadd.f32 %v6149_v15, %v6148_v23 }
 0x37d   :  { %v6110_v3 = vpop.f32.mrf.mxu1  ;;  %v1955_v19 = vadd.f32 %v6150_v48, %v6109_v31 }
 0x37e   :  { %v6151_v6 = vpop.f32.mrf.mxu0 }
 0x37f   :  { %v6111_v61 = vpop.f32.mrf.mxu1 }
 0x380   :  { %v6152_v50 = vpop.f32.mrf.mxu0  ;;  %v6112_v43 = vadd.f32 %v6111_v61, %v6110_v3 }
 0x381   :  { %v6153_v11 = vadd.f32 %v6152_v50, %v6151_v6 }
 0x383   :  { %v1960_v0 = vadd.f32 %v6153_v11, %v6112_v43 }
 0x384   :  { %v6186_v26 = vpop.f32.mrf.mxu1 }
 0x386   :  { %v6187_v42 = vpop.f32.mrf.mxu1 }
 0x387   :  { %v6227_v40 = vpop.f32.mrf.mxu0  ;;  %v6188_v46 = vadd.f32 %v6187_v42, %v6186_v26 }
 0x389   :  { %v6189_v20 = vpop.f32.mrf.mxu1  ;;  %v6228_v58 = vpop.f32.mrf.mxu0  ;;  %v2030_v16 = vadd.f32 %v6188_v46, %v1950_v36 }
 0x38a   :  { %v6229_v53 = vadd.f32 %v6228_v58, %v6227_v40 }
 0x38b   :  { %v6190_v21 = vpop.f32.mrf.mxu1 }
 0x38c   :  { %v6230_v60 = vpop.f32.mrf.mxu0  ;;  %v6191_v57 = vadd.f32 %v6190_v21, %v6189_v20  ;;  %v2110_v27 = vadd.f32 %v6229_v53, %v2030_v16 }
 0x38e   :  { %v6231_v7 = vpop.f32.mrf.mxu0  ;;  %v2035_v24 = vadd.f32 %v6191_v57, %v1955_v19 }
 0x38f   :  { %v6192_v25 = vpop.f32.mrf.mxu1  ;;  %v6232_v14 = vadd.f32 %v6231_v7, %v6230_v60 }
 0x391   :  { %v6193_v4 = vpop.f32.mrf.mxu1  ;;  %v2115_v63 = vadd.f32 %v6232_v14, %v2035_v24 }
 0x392   :  { %v6233_v51 = vpop.f32.mrf.mxu0  ;;  %v6194_v5 = vadd.f32 %v6193_v4, %v6192_v25 }
 0x394   :  { %v6234_v13 = vpop.f32.mrf.mxu0  ;;  %v2040_v35 = vadd.f32 %v6194_v5, %v1960_v0 }
 0x395   :  { %v6235_v10 = vadd.f32 %v6234_v13, %v6233_v51 }
 0x397   :  { %v2120_v12 = vadd.f32 %v6235_v10, %v2040_v35 }
 0x3a9   :  { %v6268_v47 = vpop.f32.mrf.mxu1 }
 0x3ab   :  { %v6269_v59 = vpop.f32.mrf.mxu1 }
 0x3ac   :  { %v6270_v8 = vadd.f32 %v6269_v59, %v6268_v47 }
 0x3ad   :  { %v6271_v62 = vpop.f32.mrf.mxu1  ;;  %v2269_v39 = vpop.f32.mrf.mxu0 }
 0x3ae   :  { %v2190_v29 = vadd.f32 %v6270_v8, %v2110_v27 }
 0x3af   :  { %v6272_v17 = vpop.f32.mrf.mxu1  ;;  %v6406_v55 = vpop.f32.mrf.mxu0 }
 0x3b0   :  { %v2270_v30 = vadd.f32 %v2269_v39, %v2190_v29  ;;  %v6273_v28 = vadd.f32 %v6272_v17, %v6271_v62 }
 0x3b1   :  { %v6274_v9 = vpop.f32.mrf.mxu1  ;;  %v2274_v54 = vpop.f32.mrf.mxu0 }
 0x3b2   :  { %v2296_v32 = vadd.f32 %v2292_v49, %v2270_v30  ;;  %v2195_v45 = vadd.f32 %v6273_v28, %v2115_v63 }
 0x3b3   :  { %v6275_v37 = vpop.f32.mrf.mxu1  ;;  %v6409_v3 = vpop.f32.mrf.mxu0 }
 0x3b4   :  { %v2308_v41 = vsel %vm669_vm15, %v2296_v32, -inf  ;;  %v2340_v1 = vsel %vm2332_vm4, %v2296_v32, -inf  ;;  %v2275_v23 = vadd.f32 %v2274_v54, %v2195_v45  ;;  %v6276_v6 = vadd.f32 %v6275_v37, %v6274_v9 }
 0x3b5   :  { %v2309_v15 = vrot.slane %v2308_v41, 4  ;;  %v2341_v61 = vrot.slane %v2340_v1, 4  ;;  %v2279_v50 = vpop.f32.mrf.mxu0  ;;  %v2378_v42 = vsel %vm2368_vm5, %v2296_v32, -inf }
 0x3b6   :  { %v2298_v26 = vadd.f32 %v2292_v49, %v2275_v23  ;;  %v2200_v40 = vadd.f32 %v6276_v6, %v2120_v12 }
 0x3b7   :  { %v2310_v20 = vmax.f32 %v2308_v41, %v2309_v15  ;;  %v6412_v18 = vpop.f32.mrf.mxu0  ;;  %v2342_v2 = vmax.f32 %v2340_v1, %v2341_v61 }
 0x3b8   :  { %v2323_v58 = vsel %vm2315_vm6, %v2298_v26, -inf  ;;  %v2379_v21 = vsel %vm684_vm1, %v2298_v26, -inf  ;;  %v2412_v60 = vsel %vm2404_vm7, %v2298_v26, -inf  ;;  %v2280_v36 = vadd.f32 %v2279_v50, %v2200_v40 }
 0x3b9   :  { %v2324_v25 = vrot.slane %v2323_v58, 4  ;;  %v2380_v46 = vmax.f32 %v2378_v42, %v2379_v21  ;;  %v2413_v7 = vrot.slane %v2412_v60, 4  ;;  %v2311_v4 = vrot.slane %v2310_v20, 2 }
 0x3ba   :  { %v2300_v16 = vadd.f32 %v2292_v49, %v2280_v36  ;;  %v2343_v57 = vrot.slane %v2342_v2, 2  ;;  %v2357_v51 = vsel %vm2347_vm8, %v2298_v26, -inf }
 0x3bb   :  { %v2325_v31 = vmax.f32 %v2323_v58, %v2324_v25  ;;  %v2381_v48 = vrot.slane %v2380_v46, 4  ;;  %v2414_v53 = vmax.f32 %v2412_v60, %v2413_v7  ;;  %v2312_v8 = vmax.f32 %v2310_v20, %v2311_v4 }
 0x3bc   :  { %v2358_v43 = vsel %vm535_vm0, %v2300_v16, -inf  ;;  %v2395_v11 = vsel %vm2387_vm9, %v2300_v16, -inf  ;;  %v2427_v59 = vsel %vm2419_vm10, %v2300_v16, -inf  ;;  %v2344_v17 = vmax.f32 %v2342_v2, %v2343_v57 }
 0x3bd   :  { %v2326_v47 = vrot.slane %v2325_v31, 2  ;;  %v2382_v19 = vmax.f32 %v2380_v46, %v2381_v48  ;;  %v2415_v27 = vrot.slane %v2414_v53, 2  ;;  %v2359_v24 = vmax.f32 %v2357_v51, %v2358_v43 }
 0x3be   :  { %v2396_v14 = vrot.slane %v2395_v11, 4  ;;  %v2428_v13 = vrot.slane %v2427_v59, 4  ;;  %v2313_v10 = vrot.slane %v2312_v8, 1  ;;  %v2345_v37 = vrot.slane %v2344_v17, 1 }
 0x3bf   :  { %v2327_v5 = vmax.f32 %v2325_v31, %v2326_v47  ;;  %v2383_v62 = vrot.slane %v2382_v19, 2  ;;  %v2360_v29 = vrot.slane %v2359_v24, 4  ;;  %v2416_v63 = vmax.f32 %v2414_v53, %v2415_v27 }
 0x3c0   :  { %v2397_v39 = vmax.f32 %v2395_v11, %v2396_v14  ;;  %v2429_v49 = vmax.f32 %v2427_v59, %v2428_v13  ;;  %v2314_v15 = vmax.f32 %v2312_v8, %v2313_v10  ;;  %v2346_v42 = vmax.f32 %v2344_v17, %v2345_v37 }
 0x3c1   :  { %v2384_v0 = vmax.f32 %v2382_v19, %v2383_v62  ;;  %v2361_v30 = vmax.f32 %v2359_v24, %v2360_v29  ;;  %v2328_v35 = vrot.slane %v2327_v5, 1  ;;  %v2417_v41 = vrot.slane %v2416_v63, 1 }
 0x3c2   :  { %v2398_v28 = vrot.slane %v2397_v39, 2  ;;  %v2430_v55 = vrot.slane %v2429_v49, 2 }
 0x3c3   :  { %v2385_v9 = vrot.slane %v2384_v0, 1  ;;  %v2362_v45 = vrot.slane %v2361_v30, 2  ;;  %v2329_v1 = vmax.f32 %v2327_v5, %v2328_v35  ;;  %v2418_v21 = vmax.f32 %v2416_v63, %v2417_v41 }
 0x3c4   :  { %v2399_v32 = vmax.f32 %v2397_v39, %v2398_v28  ;;  %v2431_v54 = vmax.f32 %v2429_v49, %v2430_v55 }
 0x3c5   :  { %v2363_v3 = vmax.f32 %v2361_v30, %v2362_v45  ;;  %v2386_v61 = vmax.f32 %v2384_v0, %v2385_v9  ;;  %v2331_v40 = vsel %vm684_vm1, %v2314_v15, %v2329_v1 }
 0x3c6   :  { %v2400_v23 = vrot.slane %v2399_v32, 1  ;;  %v2432_v12 = vrot.slane %v2431_v54, 1 }
 0x3c7   :  { %v2364_v26 = vrot.slane %v2363_v3, 1 }
 0x3c8   :  { %v2401_v6 = vmax.f32 %v2399_v32, %v2400_v23  ;;  %v2433_v50 = vmax.f32 %v2431_v54, %v2432_v12 }
 0x3c9   :  { %v2365_v58 = vmax.f32 %v2363_v3, %v2364_v26 }
 0x3ca   :  { %v2403_v20 = vsel %vm684_vm1, %v2386_v61, %v2401_v6  ;;  %v2435_v2 = vsel %vm684_vm1, %v2418_v21, %v2433_v50 }
 0x3cb   :  { %v6451_v60 = vpack.i.bf16 %v2403_v20, %v2331_v40  ;;  %v2367_v18 = vsel %vm684_vm1, %v2346_v42, %v2365_v58 }
 0x3cc   :  { %v6441_v25 = vpack.i.bf16 %v2435_v2, %v2367_v18 }
 0x3cd   :  { %6452 = vrot.lane.b32.xlu1 %v6451_v60, %s6913_s7 }
 0x3ce   :  { %6442 = vrot.lane.b32.xlu0 %v6441_v25, %s6913_s7 }
 0x3d3   :  { %v6438_v46 = vpop.permute.xlu0 %6437 }
 0x3d4   :  { %v6440_v7 = vunpack.i.h.bf16 %v6438_v46  ;;  %v6439_v36 = vunpack.i.l.bf16 %v6438_v46 }
 0x3d5   :  { %v6448_v31 = vpop.permute.xlu1 %6447 }
 0x3d6   :  { %v2456_v48 = vsel %vm2444_vm11, %v6440_v7, %v7983_v34  ;;  %v2455_v4 = vsel %vm2444_vm11, %v6439_v36, %v7980_v56  ;;  %v6450_v16 = vunpack.i.h.bf16 %v6448_v31  ;;  %v6449_v53 = vunpack.i.l.bf16 %v6448_v31 }
 0x3d7   :  { %v2480_v43 = vrot.slane %v2456_v48, 6  ;;  %v2479_v11 = vrot.slane %v2455_v4, 6 }
 0x3d8   :  { %v2446_v24 = vsel %vm2444_vm11, %v7975_v44, %v6450_v16  ;;  %v2445_v14 = vsel %vm2444_vm11, %v7972_v33, %v6449_v53 }
 0x3d9   :  { %v2495_v29 = vsel %vm535_vm0, %v2445_v14, %v2479_v11  ;;  %v2496_v39 = vsel %vm535_vm0, %v2446_v24, %v2480_v43 }
 0x43f   :  { %v6453_v57 = vpop.permute.xlu1 %6452 }
 0x440   :  { %v6455_v51 = vunpack.i.h.bf16 %v6453_v57  ;;  %v6454_v47 = vunpack.i.l.bf16 %v6453_v57  ;;  %v6443_v19 = vpop.permute.xlu0 %6442 }
 0x441   :  { %v6445_v59 = vunpack.i.h.bf16 %v6443_v19  ;;  %v6444_v27 = vunpack.i.l.bf16 %v6443_v19 }
 0x442   :  { %v2476_v34 = vsel %vm2444_vm11, %v6455_v51, %v2435_v2  ;;  %v2475_v56 = vsel %vm2444_vm11, %v6454_v47, %v2367_v18 }
 0x443   :  { %v2466_v13 = vsel %vm2444_vm11, %v2403_v20, %v6445_v59  ;;  %v2465_v8 = vsel %vm2444_vm11, %v2331_v40, %v6444_v27  ;;  %v2492_v49 = vrot.slane %v2476_v34, 2  ;;  %v2491_v0 = vrot.slane %v2475_v56, 2 }
 0x444   :  { %v2486_v5 = vrot.slane %v2466_v13, 4  ;;  %v2485_v62 = vrot.slane %v2465_v8, 4 }
 0x446   :  { %v2497_v44 = vsel %vm662_vm13, %v2495_v29, %v2485_v62  ;;  %v2498_v33 = vsel %vm662_vm13, %v2496_v39, %v2486_v5 }
 0x447   :  { %v8024_v17 = vsel %vm481_vm12, %v2497_v44, %v2491_v0  ;;  %v8027_v63 = vsel %vm481_vm12, %v2498_v33, %v2492_v49 }
 0x448   :  { %6886 = dma.done.wait [#allocation5 + $0x1], 50176 }
 0x449   :  { %6887 = vsyncadd [#allocation5 + $0x1], 4294917120  ;;  %2870 = vmatprep.mubr.f32.mxu1 %v8027_v63  ;;  %2941 = vmatprep.mubr.f32.mxu0 %v8027_v63  ;;  %v2626_v30 = vld [vmem:[#allocation3 + $0x3c8] sm:$0xff]  ;;  %v2625_v28 = vld [vmem:[#allocation3 + $0x3c0] sm:$0xff] }
 0x44a   :  { %v2618_v55 = vld [vmem:[#allocation3 + $0x388] sm:$0xff]  ;;  %2806 = vmatprep.subr.mxu1 %v2626_v30  ;;  %v2617_v35 = vld [vmem:[#allocation3 + $0x380] sm:$0xff]  ;;  %v2628_v45 = vld [vmem:[#allocation3 + $0x3d8] sm:$0xff] }
 0x44b   :  { %2807 = vmatpush1.msra.mxu1 %v2625_v28  ;;  %v2610_v10 = vld [vmem:[#allocation3 + $0x348] sm:$0xff]  ;;  %v2609_v9 = vld [vmem:[#allocation3 + $0x340] sm:$0xff]  ;;  %2877 = vmatprep.subr.mxu0 %v2628_v45  ;;  %v2627_v37 = vld [vmem:[#allocation3 + $0x3d0] sm:$0xff] }
 0x44c   :  { %2808 = vmatprep.subr.mxu1 %v2618_v55  ;;  %v2602_v32 = vld [vmem:[#allocation3 + $0x308] sm:$0xff]  ;;  %v2601_v54 = vld [vmem:[#allocation3 + $0x300] sm:$0xff]  ;;  %v2620_v41 = vld [vmem:[#allocation3 + $0x398] sm:$0xff]  ;;  %2878 = vmatpush1.msra.mxu0 %v2627_v37 }
 0x44d   :  { %2809 = vmatpush1.msra.mxu1 %v2617_v35  ;;  %v2594_v1 = vld [vmem:[#allocation3 + $0x2c8] sm:$0xff]  ;;  %v2619_v23 = vld [vmem:[#allocation3 + $0x390] sm:$0xff]  ;;  %v2593_v3 = vld [vmem:[#allocation3 + $0x2c0] sm:$0xff]  ;;  %2879 = vmatprep.subr.mxu0 %v2620_v41 }
 0x44e   :  { %2810 = vmatprep.subr.mxu1 %v2610_v10  ;;  %v2612_v12 = vld [vmem:[#allocation3 + $0x358] sm:$0xff]  ;;  %v2611_v15 = vld [vmem:[#allocation3 + $0x350] sm:$0xff]  ;;  %v2586_v61 = vld [vmem:[#allocation3 + $0x288] sm:$0xff]  ;;  %2880 = vmatpush1.msra.mxu0 %v2619_v23 }
 0x44f   :  { %2811 = vmatpush1.msra.mxu1 %v2609_v9  ;;  %v2604_v6 = vld [vmem:[#allocation3 + $0x318] sm:$0xff]  ;;  %v2585_v26 = vld [vmem:[#allocation3 + $0x280] sm:$0xff]  ;;  %2881 = vmatprep.subr.mxu0 %v2612_v12  ;;  %v2603_v50 = vld [vmem:[#allocation3 + $0x310] sm:$0xff] }
 0x450   :  { %2812 = vmatprep.subr.mxu1 %v2602_v32  ;;  %v2578_v42 = vld [vmem:[#allocation3 + $0x248] sm:$0xff]  ;;  %2882 = vmatpush1.msra.mxu0 %v2611_v15  ;;  %v2596_v40 = vld [vmem:[#allocation3 + $0x2d8] sm:$0xff]  ;;  %v2577_v20 = vld [vmem:[#allocation3 + $0x240] sm:$0xff] }
 0x451   :  { %2813 = vmatpush1.msra.mxu1 %v2601_v54  ;;  %2883 = vmatprep.subr.mxu0 %v2604_v6  ;;  %v2595_v58 = vld [vmem:[#allocation3 + $0x2d0] sm:$0xff]  ;;  %v2570_v21 = vld [vmem:[#allocation3 + $0x208] sm:$0xff]  ;;  %v2588_v60 = vld [vmem:[#allocation3 + $0x298] sm:$0xff] }
 0x452   :  { %2814 = vmatprep.subr.mxu1 %v2594_v1  ;;  %2884 = vmatpush1.msra.mxu0 %v2603_v50  ;;  %v2569_v18 = vld [vmem:[#allocation3 + $0x200] sm:$0xff]  ;;  %v2587_v2 = vld [vmem:[#allocation3 + $0x290] sm:$0xff]  ;;  %v2562_v25 = vld [vmem:[#allocation3 + $0x1c8] sm:$0xff] }
 0x453   :  { %2815 = vmatpush1.msra.mxu1 %v2593_v3  ;;  %2885 = vmatprep.subr.mxu0 %v2596_v40  ;;  %v2580_v46 = vld [vmem:[#allocation3 + $0x258] sm:$0xff]  ;;  %v2561_v7 = vld [vmem:[#allocation3 + $0x1c0] sm:$0xff]  ;;  %v2579_v36 = vld [vmem:[#allocation3 + $0x250] sm:$0xff] }
 0x454   :  { %2816 = vmatprep.subr.mxu1 %v2586_v61  ;;  %2886 = vmatpush1.msra.mxu0 %v2595_v58  ;;  %v2554_v31 = vld [vmem:[#allocation3 + $0x188] sm:$0xff]  ;;  %v2572_v48 = vld [vmem:[#allocation3 + $0x218] sm:$0xff]  ;;  %v2553_v4 = vld [vmem:[#allocation3 + $0x180] sm:$0xff] }
 0x455   :  { %2817 = vmatpush1.msra.mxu1 %v2585_v26  ;;  %2887 = vmatprep.subr.mxu0 %v2588_v60  ;;  %v2571_v16 = vld [vmem:[#allocation3 + $0x210] sm:$0xff]  ;;  %v2546_v53 = vld [vmem:[#allocation3 + $0x148] sm:$0xff]  ;;  %v2564_v57 = vld [vmem:[#allocation3 + $0x1d8] sm:$0xff] }
 0x456   :  { %2818 = vmatprep.subr.mxu1 %v2578_v42  ;;  %2888 = vmatpush1.msra.mxu0 %v2587_v2  ;;  %v2545_v51 = vld [vmem:[#allocation3 + $0x140] sm:$0xff]  ;;  %v2563_v47 = vld [vmem:[#allocation3 + $0x1d0] sm:$0xff]  ;;  %v2538_v19 = vld [vmem:[#allocation3 + $0x108] sm:$0xff] }
 0x457   :  { %2819 = vmatpush1.msra.mxu1 %v2577_v20  ;;  %2889 = vmatprep.subr.mxu0 %v2580_v46  ;;  %v2556_v43 = vld [vmem:[#allocation3 + $0x198] sm:$0xff]  ;;  %v2537_v11 = vld [vmem:[#allocation3 + $0x100] sm:$0xff]  ;;  %v2555_v59 = vld [vmem:[#allocation3 + $0x190] sm:$0xff] }
 0x458   :  { %2820 = vmatprep.subr.mxu1 %v2570_v21  ;;  %2890 = vmatpush1.msra.mxu0 %v2579_v36  ;;  %v2530_v27 = vld [vmem:[#allocation3 + $0xc8] sm:$0xff]  ;;  %v2548_v24 = vld [vmem:[#allocation3 + $0x158] sm:$0xff]  ;;  %v2529_v14 = vld [vmem:[#allocation3 + $0xc0] sm:$0xff] }
 0x459   :  { %2821 = vmatpush1.msra.mxu1 %v2569_v18  ;;  %2891 = vmatprep.subr.mxu0 %v2572_v48  ;;  %v2547_v34 = vld [vmem:[#allocation3 + $0x150] sm:$0xff]  ;;  %v2522_v56 = vld [vmem:[#allocation3 + $0x88] sm:$0xff]  ;;  %v2540_v13 = vld [vmem:[#allocation3 + $0x118] sm:$0xff] }
 0x45a   :  { %2822 = vmatprep.subr.mxu1 %v2562_v25  ;;  %2892 = vmatpush1.msra.mxu0 %v2571_v16  ;;  %v2521_v8 = vld [vmem:[#allocation3 + $0x80] sm:$0xff]  ;;  %v2539_v5 = vld [vmem:[#allocation3 + $0x110] sm:$0xff]  ;;  %v2514_v62 = vld [vmem:[#allocation3 + $0x48] sm:$0xff] }
 0x45b   :  { %2823 = vmatpush1.msra.mxu1 %v2561_v7  ;;  %2893 = vmatprep.subr.mxu0 %v2564_v57  ;;  %v2532_v29 = vld [vmem:[#allocation3 + $0xd8] sm:$0xff]  ;;  %v2513_v39 = vld [vmem:[#allocation3 + $0x40] sm:$0xff]  ;;  %v2531_v49 = vld [vmem:[#allocation3 + $0xd0] sm:$0xff] }
 0x45c   :  { %2824 = vmatprep.subr.mxu1 %v2554_v31  ;;  %2894 = vmatpush1.msra.mxu0 %v2563_v47  ;;  %v2506_v0 = vld [vmem:[#allocation3 + $0x8] sm:$0xff]  ;;  %v2524_v44 = vld [vmem:[#allocation3 + $0x98] sm:$0xff]  ;;  %v2505_v33 = vld [vmem:[#allocation3] sm:$0xff] }
 0x45d   :  { %2825 = vmatpush1.msra.mxu1 %v2553_v4  ;;  %2895 = vmatprep.subr.mxu0 %v2556_v43  ;;  %v2523_v30 = vld [vmem:[#allocation3 + $0x90] sm:$0xff]  ;;  %v2754_v28 = vld [vmem:[#allocation3 + $0x7c8] sm:$0xff]  ;;  %v2516_v55 = vld [vmem:[#allocation3 + $0x58] sm:$0xff] }
 0x45e   :  { %2826 = vmatprep.subr.mxu1 %v2546_v53  ;;  %2896 = vmatpush1.msra.mxu0 %v2555_v59  ;;  %v2753_v35 = vld [vmem:[#allocation3 + $0x7c0] sm:$0xff]  ;;  %v2515_v10 = vld [vmem:[#allocation3 + $0x50] sm:$0xff]  ;;  %v2746_v9 = vld [vmem:[#allocation3 + $0x788] sm:$0xff] }
 0x45f   :  { %2827 = vmatpush1.msra.mxu1 %v2545_v51  ;;  %2897 = vmatprep.subr.mxu0 %v2548_v24  ;;  %v2508_v32 = vld [vmem:[#allocation3 + $0x18] sm:$0xff]  ;;  %v2745_v45 = vld [vmem:[#allocation3 + $0x780] sm:$0xff]  ;;  %v2507_v54 = vld [vmem:[#allocation3 + $0x10] sm:$0xff] }
 0x460   :  { %2828 = vmatprep.subr.mxu1 %v2538_v19  ;;  %2898 = vmatpush1.msra.mxu0 %v2547_v34  ;;  %v2738_v37 = vld [vmem:[#allocation3 + $0x748] sm:$0xff]  ;;  %v2756_v41 = vld [vmem:[#allocation3 + $0x7d8] sm:$0xff]  ;;  %v2737_v1 = vld [vmem:[#allocation3 + $0x740] sm:$0xff] }
 0x461   :  { %2829 = vmatpush1.msra.mxu1 %v2537_v11  ;;  %2899 = vmatprep.subr.mxu0 %v2540_v13  ;;  %v2755_v23 = vld [vmem:[#allocation3 + $0x7d0] sm:$0xff]  ;;  %v2730_v3 = vld [vmem:[#allocation3 + $0x708] sm:$0xff]  ;;  %v2748_v12 = vld [vmem:[#allocation3 + $0x798] sm:$0xff] }
 0x462   :  { %2830 = vmatprep.subr.mxu1 %v2530_v27  ;;  %2900 = vmatpush1.msra.mxu0 %v2539_v5  ;;  %v2729_v15 = vld [vmem:[#allocation3 + $0x700] sm:$0xff]  ;;  %v2747_v61 = vld [vmem:[#allocation3 + $0x790] sm:$0xff]  ;;  %v2722_v6 = vld [vmem:[#allocation3 + $0x6c8] sm:$0xff] }
 0x463   :  { %2831 = vmatpush1.msra.mxu1 %v2529_v14  ;;  %2901 = vmatprep.subr.mxu0 %v2532_v29  ;;  %v2740_v26 = vld [vmem:[#allocation3 + $0x758] sm:$0xff]  ;;  %v2721_v50 = vld [vmem:[#allocation3 + $0x6c0] sm:$0xff]  ;;  %v2739_v42 = vld [vmem:[#allocation3 + $0x750] sm:$0xff] }
 0x464   :  { %2832 = vmatprep.subr.mxu1 %v2522_v56  ;;  %2902 = vmatpush1.msra.mxu0 %v2531_v49  ;;  %v2714_v40 = vld [vmem:[#allocation3 + $0x688] sm:$0xff]  ;;  %v2732_v20 = vld [vmem:[#allocation3 + $0x718] sm:$0xff]  ;;  %v2713_v58 = vld [vmem:[#allocation3 + $0x680] sm:$0xff] }
 0x465   :  { %2833 = vmatpush1.msra.mxu1 %v2521_v8  ;;  %2903 = vmatprep.subr.mxu0 %v2524_v44  ;;  %v2731_v21 = vld [vmem:[#allocation3 + $0x710] sm:$0xff]  ;;  %v2706_v60 = vld [vmem:[#allocation3 + $0x648] sm:$0xff]  ;;  %v2724_v18 = vld [vmem:[#allocation3 + $0x6d8] sm:$0xff] }
 0x466   :  { %2834 = vmatprep.subr.mxu1 %v2514_v62  ;;  %2904 = vmatpush1.msra.mxu0 %v2523_v30  ;;  %v2705_v2 = vld [vmem:[#allocation3 + $0x640] sm:$0xff]  ;;  %v2723_v25 = vld [vmem:[#allocation3 + $0x6d0] sm:$0xff]  ;;  %v2698_v46 = vld [vmem:[#allocation3 + $0x608] sm:$0xff] }
 0x467   :  { %2835 = vmatpush1.msra.mxu1 %v2513_v39  ;;  %2905 = vmatprep.subr.mxu0 %v2516_v55  ;;  %v2716_v7 = vld [vmem:[#allocation3 + $0x698] sm:$0xff]  ;;  %v2697_v36 = vld [vmem:[#allocation3 + $0x600] sm:$0xff]  ;;  %v2715_v31 = vld [vmem:[#allocation3 + $0x690] sm:$0xff] }
 0x468   :  { %2836 = vmatprep.subr.mxu1 %v2506_v0  ;;  %2906 = vmatpush1.msra.mxu0 %v2515_v10  ;;  %v2690_v48 = vld [vmem:[#allocation3 + $0x5c8] sm:$0xff]  ;;  %v2708_v4 = vld [vmem:[#allocation3 + $0x658] sm:$0xff]  ;;  %v2689_v16 = vld [vmem:[#allocation3 + $0x5c0] sm:$0xff] }
 0x469   :  { %2837 = vmatpush1.msra.mxu1 %v2505_v33  ;;  %2907 = vmatprep.subr.mxu0 %v2508_v32  ;;  %v2707_v53 = vld [vmem:[#allocation3 + $0x650] sm:$0xff]  ;;  %v2682_v57 = vld [vmem:[#allocation3 + $0x588] sm:$0xff]  ;;  %v2700_v51 = vld [vmem:[#allocation3 + $0x618] sm:$0xff] }
 0x46a   :  { %2838 = vmatprep.subr.mxu1 %v2754_v28  ;;  %2908 = vmatpush1.msra.mxu0 %v2507_v54  ;;  %v2681_v47 = vld [vmem:[#allocation3 + $0x580] sm:$0xff]  ;;  %v2699_v19 = vld [vmem:[#allocation3 + $0x610] sm:$0xff]  ;;  %v2674_v43 = vld [vmem:[#allocation3 + $0x548] sm:$0xff] }
 0x46b   :  { %2839 = vmatpush2.msra.mxu1 %v2753_v35  ;;  %2909 = vmatprep.subr.mxu0 %v2756_v41  ;;  %v2692_v11 = vld [vmem:[#allocation3 + $0x5d8] sm:$0xff]  ;;  %v2673_v59 = vld [vmem:[#allocation3 + $0x540] sm:$0xff]  ;;  %v2691_v27 = vld [vmem:[#allocation3 + $0x5d0] sm:$0xff] }
 0x46c   :  { %2840 = vmatprep.subr.mxu1 %v2746_v9  ;;  %2910 = vmatpush2.msra.mxu0 %v2755_v23  ;;  %v2666_v24 = vld [vmem:[#allocation3 + $0x508] sm:$0xff]  ;;  %v2684_v14 = vld [vmem:[#allocation3 + $0x598] sm:$0xff]  ;;  %v2665_v34 = vld [vmem:[#allocation3 + $0x500] sm:$0xff] }
 0x46d   :  { %2841 = vmatpush2.msra.mxu1 %v2745_v45  ;;  %2911 = vmatprep.subr.mxu0 %v2748_v12  ;;  %v2683_v56 = vld [vmem:[#allocation3 + $0x590] sm:$0xff]  ;;  %v2658_v13 = vld [vmem:[#allocation3 + $0x4c8] sm:$0xff]  ;;  %v2676_v8 = vld [vmem:[#allocation3 + $0x558] sm:$0xff] }
 0x46e   :  { %2842 = vmatprep.subr.mxu1 %v2738_v37  ;;  %2912 = vmatpush2.msra.mxu0 %v2747_v61  ;;  %v2657_v5 = vld [vmem:[#allocation3 + $0x4c0] sm:$0xff]  ;;  %v2675_v62 = vld [vmem:[#allocation3 + $0x550] sm:$0xff]  ;;  %v2650_v29 = vld [vmem:[#allocation3 + $0x488] sm:$0xff] }
 0x46f   :  { %2843 = vmatpush2.msra.mxu1 %v2737_v1  ;;  %2913 = vmatprep.subr.mxu0 %v2740_v26  ;;  %v2668_v39 = vld [vmem:[#allocation3 + $0x518] sm:$0xff]  ;;  %v2649_v49 = vld [vmem:[#allocation3 + $0x480] sm:$0xff]  ;;  %v2667_v0 = vld [vmem:[#allocation3 + $0x510] sm:$0xff] }
 0x470   :  { %2844 = vmatprep.subr.mxu1 %v2730_v3  ;;  %2914 = vmatpush2.msra.mxu0 %v2739_v42  ;;  %v2642_v44 = vld [vmem:[#allocation3 + $0x448] sm:$0xff]  ;;  %v2660_v33 = vld [vmem:[#allocation3 + $0x4d8] sm:$0xff]  ;;  %v2641_v30 = vld [vmem:[#allocation3 + $0x440] sm:$0xff] }
 0x471   :  { %2845 = vmatpush2.msra.mxu1 %v2729_v15  ;;  %2915 = vmatprep.subr.mxu0 %v2732_v20  ;;  %v2659_v28 = vld [vmem:[#allocation3 + $0x4d0] sm:$0xff]  ;;  %v2634_v55 = vld [vmem:[#allocation3 + $0x408] sm:$0xff]  ;;  %v2652_v35 = vld [vmem:[#allocation3 + $0x498] sm:$0xff] }
 0x472   :  { %2846 = vmatprep.subr.mxu1 %v2722_v6  ;;  %2916 = vmatpush2.msra.mxu0 %v2731_v21  ;;  %v2633_v10 = vld [vmem:[#allocation3 + $0x400] sm:$0xff]  ;;  %v2651_v9 = vld [vmem:[#allocation3 + $0x490] sm:$0xff]  ;;  %v2630_v32 = vld [vmem:[#allocation3 + $0x3e8] sm:$0xff] }
 0x473   :  { %2847 = vmatpush2.msra.mxu1 %v2721_v50  ;;  %2917 = vmatprep.subr.mxu0 %v2724_v18  ;;  %v2629_v45 = vld [vmem:[#allocation3 + $0x3e0] sm:$0xff]  ;;  %v2644_v54 = vld [vmem:[#allocation3 + $0x458] sm:$0xff]  ;;  %v2622_v37 = vld [vmem:[#allocation3 + $0x3a8] sm:$0xff] }
 0x474   :  { %2848 = vmatprep.subr.mxu1 %v2714_v40  ;;  %2918 = vmatpush2.msra.mxu0 %v2723_v25  ;;  %v2643_v41 = vld [vmem:[#allocation3 + $0x450] sm:$0xff]  ;;  %v2621_v1 = vld [vmem:[#allocation3 + $0x3a0] sm:$0xff]  ;;  %v2636_v23 = vld [vmem:[#allocation3 + $0x418] sm:$0xff] }
 0x475   :  { %2849 = vmatpush2.msra.mxu1 %v2713_v58  ;;  %2919 = vmatprep.subr.mxu0 %v2716_v7  ;;  %v2614_v3 = vld [vmem:[#allocation3 + $0x368] sm:$0xff]  ;;  %v2635_v12 = vld [vmem:[#allocation3 + $0x410] sm:$0xff]  ;;  %v2613_v15 = vld [vmem:[#allocation3 + $0x360] sm:$0xff] }
 0x476   :  { %2850 = vmatprep.subr.mxu1 %v2706_v60  ;;  %2920 = vmatpush2.msra.mxu0 %v2715_v31  ;;  %v2632_v61 = vld [vmem:[#allocation3 + $0x3f8] sm:$0xff]  ;;  %v2606_v6 = vld [vmem:[#allocation3 + $0x328] sm:$0xff]  ;;  %v2605_v26 = vld [vmem:[#allocation3 + $0x320] sm:$0xff] }
 0x477   :  { %2851 = vmatpush2.msra.mxu1 %v2705_v2  ;;  %2921 = vmatprep.subr.mxu0 %v2708_v4  ;;  %v2631_v50 = vld [vmem:[#allocation3 + $0x3f0] sm:$0xff]  ;;  %v2598_v42 = vld [vmem:[#allocation3 + $0x2e8] sm:$0xff]  ;;  %v2624_v40 = vld [vmem:[#allocation3 + $0x3b8] sm:$0xff] }
 0x478   :  { %2852 = vmatprep.subr.mxu1 %v2698_v46  ;;  %2922 = vmatpush2.msra.mxu0 %v2707_v53  ;;  %v2597_v20 = vld [vmem:[#allocation3 + $0x2e0] sm:$0xff]  ;;  %v2623_v58 = vld [vmem:[#allocation3 + $0x3b0] sm:$0xff]  ;;  %v2590_v21 = vld [vmem:[#allocation3 + $0x2a8] sm:$0xff] }
 0x479   :  { %2853 = vmatpush2.msra.mxu1 %v2697_v36  ;;  %2923 = vmatprep.subr.mxu0 %v2700_v51  ;;  %v2616_v60 = vld [vmem:[#allocation3 + $0x378] sm:$0xff]  ;;  %v2589_v18 = vld [vmem:[#allocation3 + $0x2a0] sm:$0xff]  ;;  %v2615_v2 = vld [vmem:[#allocation3 + $0x370] sm:$0xff] }
 0x47a   :  { %2854 = vmatprep.subr.mxu1 %v2690_v48  ;;  %2924 = vmatpush2.msra.mxu0 %v2699_v19  ;;  %v2582_v25 = vld [vmem:[#allocation3 + $0x268] sm:$0xff]  ;;  %v2608_v46 = vld [vmem:[#allocation3 + $0x338] sm:$0xff]  ;;  %v2581_v7 = vld [vmem:[#allocation3 + $0x260] sm:$0xff] }
 0x47b   :  { %2855 = vmatpush2.msra.mxu1 %v2689_v16  ;;  %2925 = vmatprep.subr.mxu0 %v2692_v11  ;;  %v2607_v36 = vld [vmem:[#allocation3 + $0x330] sm:$0xff]  ;;  %v2574_v31 = vld [vmem:[#allocation3 + $0x228] sm:$0xff]  ;;  %v2600_v48 = vld [vmem:[#allocation3 + $0x2f8] sm:$0xff] }
 0x47c   :  { %2856 = vmatprep.subr.mxu1 %v2682_v57  ;;  %2926 = vmatpush2.msra.mxu0 %v2691_v27  ;;  %v2573_v4 = vld [vmem:[#allocation3 + $0x220] sm:$0xff]  ;;  %v2599_v16 = vld [vmem:[#allocation3 + $0x2f0] sm:$0xff]  ;;  %v2566_v53 = vld [vmem:[#allocation3 + $0x1e8] sm:$0xff] }
 0x47d   :  { %2857 = vmatpush2.msra.mxu1 %v2681_v47  ;;  %2927 = vmatprep.subr.mxu0 %v2684_v14  ;;  %v2592_v57 = vld [vmem:[#allocation3 + $0x2b8] sm:$0xff]  ;;  %v2565_v51 = vld [vmem:[#allocation3 + $0x1e0] sm:$0xff]  ;;  %v2591_v47 = vld [vmem:[#allocation3 + $0x2b0] sm:$0xff] }
 0x47e   :  { %2858 = vmatprep.subr.mxu1 %v2674_v43  ;;  %2928 = vmatpush2.msra.mxu0 %v2683_v56  ;;  %v2558_v19 = vld [vmem:[#allocation3 + $0x1a8] sm:$0xff]  ;;  %v2584_v43 = vld [vmem:[#allocation3 + $0x278] sm:$0xff]  ;;  %v2557_v11 = vld [vmem:[#allocation3 + $0x1a0] sm:$0xff] }
 0x47f   :  { %2859 = vmatpush2.msra.mxu1 %v2673_v59  ;;  %2929 = vmatprep.subr.mxu0 %v2676_v8  ;;  %v2583_v59 = vld [vmem:[#allocation3 + $0x270] sm:$0xff]  ;;  %v2550_v27 = vld [vmem:[#allocation3 + $0x168] sm:$0xff]  ;;  %v2549_v14 = vld [vmem:[#allocation3 + $0x160] sm:$0xff] }
 0x480   :  { %2860 = vmatprep.subr.mxu1 %v2666_v24  ;;  %2930 = vmatpush2.msra.mxu0 %v2675_v62  ;;  %v2576_v24 = vld [vmem:[#allocation3 + $0x238] sm:$0xff]  ;;  %v2542_v56 = vld [vmem:[#allocation3 + $0x128] sm:$0xff]  ;;  %v2541_v8 = vld [vmem:[#allocation3 + $0x120] sm:$0xff] }
 0x481   :  { %2861 = vmatpush2.msra.mxu1 %v2665_v34  ;;  %2931 = vmatprep.subr.mxu0 %v2668_v39  ;;  %v2575_v34 = vld [vmem:[#allocation3 + $0x230] sm:$0xff]  ;;  %v2534_v62 = vld [vmem:[#allocation3 + $0xe8] sm:$0xff]  ;;  %v2533_v39 = vld [vmem:[#allocation3 + $0xe0] sm:$0xff] }
 0x482   :  { %2862 = vmatprep.subr.mxu1 %v2658_v13  ;;  %2932 = vmatpush2.msra.mxu0 %v2667_v0  ;;  %v2568_v13 = vld [vmem:[#allocation3 + $0x1f8] sm:$0xff]  ;;  %v2526_v0 = vld [vmem:[#allocation3 + $0xa8] sm:$0xff] }
 0x483   :  { %2863 = vmatpush2.msra.mxu1 %v2657_v5  ;;  %2933 = vmatprep.subr.mxu0 %v2660_v33  ;;  %v2567_v5 = vld [vmem:[#allocation3 + $0x1f0] sm:$0xff]  ;;  %v2525_v33 = vld [vmem:[#allocation3 + $0xa0] sm:$0xff]  ;;  %v8217_v22 = vld [vmem:[#allocation3 + $0x818] sm:$0xff] }
 0x484   :  { %2864 = vmatprep.subr.mxu1 %v2650_v29  ;;  %2934 = vmatpush2.msra.mxu0 %v2659_v28  ;;  %v2560_v29 = vld [vmem:[#allocation3 + $0x1b8] sm:$0xff]  ;;  %v2518_v28 = vld [vmem:[#allocation3 + $0x68] sm:$0xff]  ;;  %9594 = vst [vmem:[#allocation45_spill] sm:$0xff] %v8217_v22 }
 0x485   :  { %2865 = vmatpush2.msra.mxu1 %v2649_v49  ;;  %2935 = vmatprep.subr.mxu0 %v2652_v35  ;;  %v2559_v49 = vld [vmem:[#allocation3 + $0x1b0] sm:$0xff]  ;;  %v2517_v35 = vld [vmem:[#allocation3 + $0x60] sm:$0xff] }
 0x486   :  { %2866 = vmatprep.subr.mxu1 %v2642_v44  ;;  %2936 = vmatpush2.msra.mxu0 %v2651_v9  ;;  %v2552_v44 = vld [vmem:[#allocation3 + $0x178] sm:$0xff]  ;;  %v2510_v9 = vld [vmem:[#allocation3 + $0x28] sm:$0xff] }
 0x487   :  { %2867 = vmatpush2.msra.mxu1 %v2641_v30  ;;  %2937 = vmatprep.subr.mxu0 %v2644_v54  ;;  %v2551_v30 = vld [vmem:[#allocation3 + $0x170] sm:$0xff] }
 0x488   :  { %2868 = vmatprep.subr.mxu1 %v2634_v55  ;;  %2938 = vmatpush2.msra.mxu0 %v2643_v41  ;;  %v2544_v55 = vld [vmem:[#allocation3 + $0x138] sm:$0xff]  ;;  %v2535_v54 = vld [vmem:[#allocation3 + $0xf0] sm:$0xff] }
 0x489   :  { %2869 = vmatpush2.msra.mxu1 %v2633_v10  ;;  %2939 = vmatprep.subr.mxu0 %v2636_v23  ;;  %v2543_v10 = vld [vmem:[#allocation3 + $0x130] sm:$0xff]  ;;  %v2528_v41 = vld [vmem:[#allocation3 + $0xb8] sm:$0xff] }
 0x48a   :  { %2871 = vmatmul.mubr.f32.vlgmr.msra.gmra.mxu1 %v8024_v17  ;;  %2948 = vmatprep.subr.mxu1 %v2630_v32  ;;  %v2536_v32 = vld [vmem:[#allocation3 + $0xf8] sm:$0xff]  ;;  %v2527_v23 = vld [vmem:[#allocation3 + $0xb0] sm:$0xff] }
 0x48b   :  { %2949 = vmatpush1.msra.mxu1 %v2629_v45  ;;  %2940 = vmatpush2.msra.mxu0 %v2635_v12  ;;  %v2509_v45 = vld [vmem:[#allocation3 + $0x20] sm:$0xff]  ;;  %v2520_v12 = vld [vmem:[#allocation3 + $0x78] sm:$0xff] }
 0x48c   :  { %2950 = vmatprep.subr.mxu1 %v2622_v37  ;;  %3019 = vmatprep.subr.mxu0 %v2632_v61  ;;  %v2758_v37 = vld [vmem:[#allocation3 + $0x7e8] sm:$0xff]  ;;  %v2519_v61 = vld [vmem:[#allocation3 + $0x70] sm:$0xff] }
 0x48d   :  { %2951 = vmatpush1.msra.mxu1 %v2621_v1  ;;  %2942 = vmatmul.mubr.f32.vlgmr.msra.gmra.mxu0 %v8024_v17  ;;  %v2757_v1 = vld [vmem:[#allocation3 + $0x7e0] sm:$0xff] }
 0x48e   :  { %2952 = vmatprep.subr.mxu1 %v2614_v3  ;;  %3020 = vmatpush1.msra.mxu0 %v2631_v50  ;;  %v2750_v3 = vld [vmem:[#allocation3 + $0x7a8] sm:$0xff]  ;;  %v2741_v50 = vld [vmem:[#allocation3 + $0x760] sm:$0xff] }
 0x48f   :  { %2953 = vmatpush1.msra.mxu1 %v2613_v15  ;;  %3021 = vmatprep.subr.mxu0 %v2624_v40  ;;  %v2749_v15 = vld [vmem:[#allocation3 + $0x7a0] sm:$0xff]  ;;  %v2734_v40 = vld [vmem:[#allocation3 + $0x728] sm:$0xff] }
 0x490   :  { %2954 = vmatprep.subr.mxu1 %v2606_v6  ;;  %3022 = vmatpush1.msra.mxu0 %v2623_v58  ;;  %v2742_v6 = vld [vmem:[#allocation3 + $0x768] sm:$0xff]  ;;  %v2733_v58 = vld [vmem:[#allocation3 + $0x720] sm:$0xff] }
 0x491   :  { %2955 = vmatpush1.msra.mxu1 %v2605_v26  ;;  %3023 = vmatprep.subr.mxu0 %v2616_v60  ;;  %v2512_v26 = vld [vmem:[#allocation3 + $0x38] sm:$0xff]  ;;  %v2726_v60 = vld [vmem:[#allocation3 + $0x6e8] sm:$0xff] }
 0x492   :  { %2956 = vmatprep.subr.mxu1 %v2598_v42  ;;  %3024 = vmatpush1.msra.mxu0 %v2615_v2  ;;  %v2511_v42 = vld [vmem:[#allocation3 + $0x30] sm:$0xff]  ;;  %v2725_v2 = vld [vmem:[#allocation3 + $0x6e0] sm:$0xff] }
 0x493   :  { %2957 = vmatpush1.msra.mxu1 %v2597_v20  ;;  %3025 = vmatprep.subr.mxu0 %v2608_v46  ;;  %v2760_v20 = vld [vmem:[#allocation3 + $0x7f8] sm:$0xff]  ;;  %v2718_v46 = vld [vmem:[#allocation3 + $0x6a8] sm:$0xff] }
 0x494   :  { %2958 = vmatprep.subr.mxu1 %v2590_v21  ;;  %3026 = vmatpush1.msra.mxu0 %v2607_v36  ;;  %v2759_v21 = vld [vmem:[#allocation3 + $0x7f0] sm:$0xff]  ;;  %v2717_v36 = vld [vmem:[#allocation3 + $0x6a0] sm:$0xff] }
 0x495   :  { %2959 = vmatpush1.msra.mxu1 %v2589_v18  ;;  %3027 = vmatprep.subr.mxu0 %v2600_v48  ;;  %v2752_v18 = vld [vmem:[#allocation3 + $0x7b8] sm:$0xff]  ;;  %v2710_v48 = vld [vmem:[#allocation3 + $0x668] sm:$0xff] }
 0x496   :  { %2960 = vmatprep.subr.mxu1 %v2582_v25  ;;  %3028 = vmatpush1.msra.mxu0 %v2599_v16  ;;  %v2751_v25 = vld [vmem:[#allocation3 + $0x7b0] sm:$0xff]  ;;  %v2709_v16 = vld [vmem:[#allocation3 + $0x660] sm:$0xff] }
 0x497   :  { %2961 = vmatpush1.msra.mxu1 %v2581_v7  ;;  %3029 = vmatprep.subr.mxu0 %v2592_v57  ;;  %v2744_v7 = vld [vmem:[#allocation3 + $0x778] sm:$0xff]  ;;  %v2702_v57 = vld [vmem:[#allocation3 + $0x628] sm:$0xff] }
 0x498   :  { %2962 = vmatprep.subr.mxu1 %v2574_v31  ;;  %3030 = vmatpush1.msra.mxu0 %v2591_v47  ;;  %v2743_v31 = vld [vmem:[#allocation3 + $0x770] sm:$0xff]  ;;  %v2701_v47 = vld [vmem:[#allocation3 + $0x620] sm:$0xff] }
 0x499   :  { %2963 = vmatpush1.msra.mxu1 %v2573_v4  ;;  %3031 = vmatprep.subr.mxu0 %v2584_v43  ;;  %v2736_v4 = vld [vmem:[#allocation3 + $0x738] sm:$0xff]  ;;  %v2694_v43 = vld [vmem:[#allocation3 + $0x5e8] sm:$0xff] }
 0x49a   :  { %2964 = vmatprep.subr.mxu1 %v2566_v53  ;;  %3032 = vmatpush1.msra.mxu0 %v2583_v59  ;;  %v2735_v53 = vld [vmem:[#allocation3 + $0x730] sm:$0xff]  ;;  %v2693_v59 = vld [vmem:[#allocation3 + $0x5e0] sm:$0xff] }
 0x49b   :  { %2965 = vmatpush1.msra.mxu1 %v2565_v51  ;;  %3033 = vmatprep.subr.mxu0 %v2576_v24  ;;  %v2728_v51 = vld [vmem:[#allocation3 + $0x6f8] sm:$0xff]  ;;  %v2686_v24 = vld [vmem:[#allocation3 + $0x5a8] sm:$0xff] }
 0x49c   :  { %2966 = vmatprep.subr.mxu1 %v2558_v19  ;;  %3034 = vmatpush1.msra.mxu0 %v2575_v34  ;;  %v2727_v19 = vld [vmem:[#allocation3 + $0x6f0] sm:$0xff]  ;;  %v2685_v34 = vld [vmem:[#allocation3 + $0x5a0] sm:$0xff] }
 0x49d   :  { %2967 = vmatpush1.msra.mxu1 %v2557_v11  ;;  %3035 = vmatprep.subr.mxu0 %v2568_v13  ;;  %v2720_v11 = vld [vmem:[#allocation3 + $0x6b8] sm:$0xff]  ;;  %v2678_v13 = vld [vmem:[#allocation3 + $0x568] sm:$0xff] }
 0x49e   :  { %2968 = vmatprep.subr.mxu1 %v2550_v27  ;;  %3036 = vmatpush1.msra.mxu0 %v2567_v5  ;;  %v2719_v27 = vld [vmem:[#allocation3 + $0x6b0] sm:$0xff]  ;;  %v2677_v5 = vld [vmem:[#allocation3 + $0x560] sm:$0xff] }
 0x49f   :  { %2969 = vmatpush1.msra.mxu1 %v2549_v14  ;;  %3037 = vmatprep.subr.mxu0 %v2560_v29  ;;  %v2712_v14 = vld [vmem:[#allocation3 + $0x678] sm:$0xff]  ;;  %v2670_v29 = vld [vmem:[#allocation3 + $0x528] sm:$0xff] }
 0x4a0   :  { %2970 = vmatprep.subr.mxu1 %v2542_v56  ;;  %3038 = vmatpush1.msra.mxu0 %v2559_v49  ;;  %v2711_v56 = vld [vmem:[#allocation3 + $0x670] sm:$0xff]  ;;  %v2669_v49 = vld [vmem:[#allocation3 + $0x520] sm:$0xff] }
 0x4a1   :  { %2971 = vmatpush1.msra.mxu1 %v2541_v8  ;;  %3039 = vmatprep.subr.mxu0 %v2552_v44  ;;  %v2704_v8 = vld [vmem:[#allocation3 + $0x638] sm:$0xff]  ;;  %v2662_v44 = vld [vmem:[#allocation3 + $0x4e8] sm:$0xff] }
 0x4a2   :  { %2972 = vmatprep.subr.mxu1 %v2534_v62  ;;  %3040 = vmatpush1.msra.mxu0 %v2551_v30  ;;  %v2703_v62 = vld [vmem:[#allocation3 + $0x630] sm:$0xff]  ;;  %v2661_v30 = vld [vmem:[#allocation3 + $0x4e0] sm:$0xff] }
 0x4a3   :  { %2973 = vmatpush1.msra.mxu1 %v2533_v39  ;;  %3041 = vmatprep.subr.mxu0 %v2544_v55  ;;  %v2696_v39 = vld [vmem:[#allocation3 + $0x5f8] sm:$0xff]  ;;  %v2687_v55 = vld [vmem:[#allocation3 + $0x5b0] sm:$0xff] }
 0x4a4   :  { %2974 = vmatprep.subr.mxu1 %v2526_v0  ;;  %3042 = vmatpush1.msra.mxu0 %v2543_v10  ;;  %v2695_v0 = vld [vmem:[#allocation3 + $0x5f0] sm:$0xff]  ;;  %v2680_v10 = vld [vmem:[#allocation3 + $0x578] sm:$0xff] }
 0x4a5   :  { %2975 = vmatpush1.msra.mxu1 %v2525_v33  ;;  %3043 = vmatprep.subr.mxu0 %v2536_v32  ;;  %v2688_v33 = vld [vmem:[#allocation3 + $0x5b8] sm:$0xff]  ;;  %v2679_v32 = vld [vmem:[#allocation3 + $0x570] sm:$0xff] }
 0x4a6   :  { %2976 = vmatprep.subr.mxu1 %v2518_v28  ;;  %3044 = vmatpush1.msra.mxu0 %v2535_v54  ;;  %v2654_v28 = vld [vmem:[#allocation3 + $0x4a8] sm:$0xff]  ;;  %v2672_v54 = vld [vmem:[#allocation3 + $0x538] sm:$0xff] }
 0x4a7   :  { %2977 = vmatpush1.msra.mxu1 %v2517_v35  ;;  %3045 = vmatprep.subr.mxu0 %v2528_v41  ;;  %v2653_v35 = vld [vmem:[#allocation3 + $0x4a0] sm:$0xff]  ;;  %v2671_v41 = vld [vmem:[#allocation3 + $0x530] sm:$0xff] }
 0x4a8   :  { %2978 = vmatprep.subr.mxu1 %v2510_v9  ;;  %3046 = vmatpush1.msra.mxu0 %v2527_v23  ;;  %v2646_v9 = vld [vmem:[#allocation3 + $0x468] sm:$0xff]  ;;  %v2664_v23 = vld [vmem:[#allocation3 + $0x4f8] sm:$0xff] }
 0x4a9   :  { %2979 = vmatpush1.msra.mxu1 %v2509_v45  ;;  %3047 = vmatprep.subr.mxu0 %v2520_v12  ;;  %v2645_v45 = vld [vmem:[#allocation3 + $0x460] sm:$0xff]  ;;  %v2656_v12 = vld [vmem:[#allocation3 + $0x4b8] sm:$0xff] }
 0x4aa   :  { %2980 = vmatprep.subr.mxu1 %v2758_v37  ;;  %3048 = vmatpush1.msra.mxu0 %v2519_v61  ;;  %v2638_v37 = vld [vmem:[#allocation3 + $0x428] sm:$0xff]  ;;  %v2648_v61 = vld [vmem:[#allocation3 + $0x478] sm:$0xff] }
 0x4ab   :  { %2981 = vmatpush2.msra.mxu1 %v2757_v1  ;;  %3049 = vmatprep.subr.mxu0 %v2512_v26  ;;  %v2637_v1 = vld [vmem:[#allocation3 + $0x420] sm:$0xff]  ;;  %v2640_v26 = vld [vmem:[#allocation3 + $0x438] sm:$0xff] }
 0x4ac   :  { %2982 = vmatprep.subr.mxu1 %v2750_v3  ;;  %3050 = vmatpush1.msra.mxu0 %v2511_v42  ;;  %v2663_v3 = vld [vmem:[#allocation3 + $0x4f0] sm:$0xff]  ;;  %v8039_v42 = vld [vmem:[#allocation3 + $0xbc8] sm:$0xff] }
 0x4ad   :  { %2983 = vmatpush2.msra.mxu1 %v2749_v15  ;;  %3051 = vmatprep.subr.mxu0 %v2760_v20  ;;  %v2655_v15 = vld [vmem:[#allocation3 + $0x4b0] sm:$0xff] }
 0x4ae   :  { %2984 = vmatprep.subr.mxu1 %v2742_v6  ;;  %3052 = vmatpush2.msra.mxu0 %v2759_v21  ;;  %v2647_v6 = vld [vmem:[#allocation3 + $0x470] sm:$0xff]  ;;  %v8057_v21 = vld [vmem:[#allocation3 + $0xb80] sm:$0xff] }
 0x4af   :  { %2985 = vmatpush2.msra.mxu1 %v2741_v50  ;;  %3053 = vmatprep.subr.mxu0 %v2752_v18  ;;  %v2639_v50 = vld [vmem:[#allocation3 + $0x430] sm:$0xff]  ;;  %v8063_v18 = vld [vmem:[#allocation3 + $0xb48] sm:$0xff] }
 0x4b0   :  { %2986 = vmatprep.subr.mxu1 %v2734_v40  ;;  %3054 = vmatpush2.msra.mxu0 %v2751_v25  ;;  %v8041_v40 = vld [vmem:[#allocation3 + $0xbd8] sm:$0xff]  ;;  %v8047_v20 = vld [vmem:[#allocation3 + $0xbd0] sm:$0xff]  ;;  %v8069_v25 = vld [vmem:[#allocation3 + $0xb40] sm:$0xff] }
 0x4b1   :  { %2987 = vmatpush2.msra.mxu1 %v2733_v58  ;;  %3055 = vmatprep.subr.mxu0 %v2744_v7  ;;  %v8051_v58 = vld [vmem:[#allocation3 + $0xb88] sm:$0xff] }
 0x4b2   :  { %2988 = vmatprep.subr.mxu1 %v2726_v60  ;;  %3056 = vmatpush2.msra.mxu0 %v2743_v31  ;;  %v8059_v60 = vld [vmem:[#allocation3 + $0xb90] sm:$0xff]  ;;  %v8075_v7 = vld [vmem:[#allocation3 + $0xb08] sm:$0xff]  ;;  %v8081_v31 = vld [vmem:[#allocation3 + $0xb00] sm:$0xff] }
 0x4b3   :  { %2989 = vmatpush2.msra.mxu1 %v2725_v2  ;;  %3057 = vmatprep.subr.mxu0 %v2736_v4  ;;  %v8065_v2 = vld [vmem:[#allocation3 + $0xb58] sm:$0xff]  ;;  %v8087_v4 = vld [vmem:[#allocation3 + $0xac8] sm:$0xff] }
 0x4b4   :  { %2990 = vmatprep.subr.mxu1 %v2718_v46  ;;  %3058 = vmatpush2.msra.mxu0 %v2735_v53  ;;  %v8071_v46 = vld [vmem:[#allocation3 + $0xb50] sm:$0xff]  ;;  %v8093_v53 = vld [vmem:[#allocation3 + $0xac0] sm:$0xff] }
 0x4b5   :  { %2991 = vmatpush2.msra.mxu1 %v2717_v36  ;;  %3059 = vmatprep.subr.mxu0 %v2728_v51  ;;  %v8077_v36 = vld [vmem:[#allocation3 + $0xb18] sm:$0xff]  ;;  %v8099_v51 = vld [vmem:[#allocation3 + $0xa88] sm:$0xff] }
 0x4b6   :  { %2992 = vmatprep.subr.mxu1 %v2710_v48  ;;  %3060 = vmatpush2.msra.mxu0 %v2727_v19  ;;  %v8083_v48 = vld [vmem:[#allocation3 + $0xb10] sm:$0xff]  ;;  %v8105_v19 = vld [vmem:[#allocation3 + $0xa80] sm:$0xff] }
 0x4b7   :  { %2993 = vmatpush2.msra.mxu1 %v2709_v16  ;;  %3061 = vmatprep.subr.mxu0 %v2720_v11  ;;  %v8089_v16 = vld [vmem:[#allocation3 + $0xad8] sm:$0xff]  ;;  %v8111_v11 = vld [vmem:[#allocation3 + $0xa48] sm:$0xff] }
 0x4b8   :  { %2994 = vmatprep.subr.mxu1 %v2702_v57  ;;  %3062 = vmatpush2.msra.mxu0 %v2719_v27  ;;  %v8095_v57 = vld [vmem:[#allocation3 + $0xad0] sm:$0xff]  ;;  %v8117_v27 = vld [vmem:[#allocation3 + $0xa40] sm:$0xff] }
 0x4b9   :  { %2995 = vmatpush2.msra.mxu1 %v2701_v47  ;;  %3063 = vmatprep.subr.mxu0 %v2712_v14  ;;  %v8101_v47 = vld [vmem:[#allocation3 + $0xa98] sm:$0xff]  ;;  %v8123_v14 = vld [vmem:[#allocation3 + $0xa08] sm:$0xff] }
 0x4ba   :  { %2996 = vmatprep.subr.mxu1 %v2694_v43  ;;  %3064 = vmatpush2.msra.mxu0 %v2711_v56  ;;  %v8107_v43 = vld [vmem:[#allocation3 + $0xa90] sm:$0xff]  ;;  %v8129_v56 = vld [vmem:[#allocation3 + $0xa00] sm:$0xff] }
 0x4bb   :  { %2997 = vmatpush2.msra.mxu1 %v2693_v59  ;;  %3065 = vmatprep.subr.mxu0 %v2704_v8  ;;  %v8113_v59 = vld [vmem:[#allocation3 + $0xa58] sm:$0xff]  ;;  %v8133_v8 = vld [vmem:[#allocation3 + $0x9c8] sm:$0xff] }
 0x4bc   :  { %2998 = vmatprep.subr.mxu1 %v2686_v24  ;;  %3066 = vmatpush2.msra.mxu0 %v2703_v62  ;;  %v8119_v24 = vld [vmem:[#allocation3 + $0xa50] sm:$0xff]  ;;  %v8139_v62 = vld [vmem:[#allocation3 + $0x9c0] sm:$0xff] }
 0x4bd   :  { %2999 = vmatpush2.msra.mxu1 %v2685_v34  ;;  %3067 = vmatprep.subr.mxu0 %v2696_v39  ;;  %v8125_v34 = vld [vmem:[#allocation3 + $0xa18] sm:$0xff]  ;;  %v8145_v39 = vld [vmem:[#allocation3 + $0x988] sm:$0xff] }
 0x4be   :  { %3000 = vmatprep.subr.mxu1 %v2678_v13  ;;  %3068 = vmatpush2.msra.mxu0 %v2695_v0  ;;  %v8131_v13 = vld [vmem:[#allocation3 + $0xa10] sm:$0xff]  ;;  %v8149_v0 = vld [vmem:[#allocation3 + $0x980] sm:$0xff] }
 0x4bf   :  { %3001 = vmatpush2.msra.mxu1 %v2677_v5  ;;  %3069 = vmatprep.subr.mxu0 %v2688_v33  ;;  %v8137_v5 = vld [vmem:[#allocation3 + $0x9d8] sm:$0xff]  ;;  %v8155_v33 = vld [vmem:[#allocation3 + $0x948] sm:$0xff] }
 0x4c0   :  { %3002 = vmatprep.subr.mxu1 %v2670_v29  ;;  %3012 = vmatprep.mubr.f32.mxu1 %v8027_v63  ;;  %v8141_v29 = vld [vmem:[#allocation3 + $0x9d0] sm:$0xff] }
 0x4c1   :  { %3003 = vmatpush2.msra.mxu1 %v2669_v49  ;;  %3070 = vmatpush2.msra.mxu0 %v2687_v55  ;;  %v8147_v49 = vld [vmem:[#allocation3 + $0x998] sm:$0xff]  ;;  %v8163_v55 = vld [vmem:[#allocation3 + $0x950] sm:$0xff] }
 0x4c2   :  { %3004 = vmatprep.subr.mxu1 %v2662_v44  ;;  %3071 = vmatprep.subr.mxu0 %v2680_v10  ;;  %v8153_v44 = vld [vmem:[#allocation3 + $0x990] sm:$0xff]  ;;  %v8169_v10 = vld [vmem:[#allocation3 + $0x918] sm:$0xff] }
 0x4c3   :  { %3005 = vmatpush2.msra.mxu1 %v2661_v30  ;;  %3072 = vmatpush2.msra.mxu0 %v2679_v32  ;;  %v8157_v30 = vld [vmem:[#allocation3 + $0x958] sm:$0xff]  ;;  %v8175_v32 = vld [vmem:[#allocation3 + $0x910] sm:$0xff] }
 0x4c4   :  { %3006 = vmatprep.subr.mxu1 %v2654_v28  ;;  %3073 = vmatprep.subr.mxu0 %v2672_v54  ;;  %v8161_v28 = vld [vmem:[#allocation3 + $0x940] sm:$0xff]  ;;  %9580 = vst [vmem:[#allocation37_spill] sm:$0xff] %v8175_v32  ;;  %v8181_v54 = vld [vmem:[#allocation3 + $0x8d8] sm:$0xff] }
 0x4c5   :  { %3007 = vmatpush2.msra.mxu1 %v2653_v35  ;;  %3074 = vmatpush2.msra.mxu0 %v2671_v41  ;;  %v8167_v35 = vld [vmem:[#allocation3 + $0x908] sm:$0xff]  ;;  %9582 = vst [vmem:[#allocation38_spill] sm:$0xff] %v8181_v54  ;;  %v8187_v41 = vld [vmem:[#allocation3 + $0x8d0] sm:$0xff] }
 0x4c6   :  { %3008 = vmatprep.subr.mxu1 %v2646_v9  ;;  %3075 = vmatprep.subr.mxu0 %v2664_v23  ;;  %v8173_v9 = vld [vmem:[#allocation3 + $0x900] sm:$0xff]  ;;  %9584 = vst [vmem:[#allocation40_spill] sm:$0xff] %v8187_v41  ;;  %v8193_v23 = vld [vmem:[#allocation3 + $0x898] sm:$0xff] }
 0x4c7   :  { %3009 = vmatpush2.msra.mxu1 %v2645_v45  ;;  %3076 = vmatpush2.msra.mxu0 %v2663_v3  ;;  %9579 = vst [vmem:[#allocation33_spill] sm:$0xff] %v8173_v9  ;;  %v8179_v45 = vld [vmem:[#allocation3 + $0x8c8] sm:$0xff]  ;;  %9586 = vst [vmem:[#allocation53_spill] sm:$0xff] %v8193_v23  ;;  %v8197_v3 = vld [vmem:[#allocation3 + $0x880] sm:$0xff] }
 0x4c8   :  { %3010 = vmatprep.subr.mxu1 %v2638_v37  ;;  %3077 = vmatprep.subr.mxu0 %v2656_v12  ;;  %9581 = vst [vmem:[#allocation52_spill] sm:$0xff] %v8179_v45  ;;  %v8185_v37 = vld [vmem:[#allocation3 + $0x8c0] sm:$0xff]  ;;  %9587 = vst [vmem:[#allocation48_spill] sm:$0xff] %v8197_v3  ;;  %v8199_v12 = vld [vmem:[#allocation3 + $0x890] sm:$0xff] }
 0x4c9   :  { %3011 = vmatpush2.msra.mxu1 %v2637_v1  ;;  %3083 = vmatprep.mubr.f32.mxu0 %v8027_v63  ;;  %v8045_v63 = vld [vmem:[#allocation3 + $0xbc0] sm:$0xff]  ;;  %9583 = vst [vmem:[#allocation36_spill] sm:$0xff] %v8185_v37  ;;  %v8191_v1 = vld [vmem:[#allocation3 + $0x888] sm:$0xff]  ;;  %9588 = vst [vmem:[#allocation35_spill] sm:$0xff] %v8199_v12 }
 0x4ca   :  { %3013 = vmatmul.mubr.f32.vlgmr.msra.gmra.mxu1 %v8024_v17  ;;  %3078 = vmatpush2.msra.mxu0 %v2655_v15  ;;  %9585 = vst [vmem:[#allocation39_spill] sm:$0xff] %v8191_v1  ;;  %v8203_v15 = vld [vmem:[#allocation3 + $0x848] sm:$0xff] }
 0x4cb   :  { %3314 = vmatprep.mubr.f32.mxu1 %v9561_v52  ;;  %3079 = vmatprep.subr.mxu0 %v2648_v61  ;;  %9589 = vst [vmem:[#allocation49_spill] sm:$0xff] %v8203_v15  ;;  %v8205_v61 = vld [vmem:[#allocation3 + $0x858] sm:$0xff] }
 0x4cc   :  { %3080 = vmatpush2.msra.mxu0 %v2647_v6  ;;  %3250 = vmatprep.subr.mxu1 %v8039_v42  ;;  %9590 = vst [vmem:[#allocation43_spill] sm:$0xff] %v8205_v61  ;;  %v8209_v6 = vld [vmem:[#allocation3 + $0x840] sm:$0xff] }
 0x4cd   :  { %3081 = vmatprep.subr.mxu0 %v2640_v26  ;;  %3251 = vmatpush1.msra.mxu1 %v8045_v63  ;;  %9591 = vst [vmem:[#allocation42_spill] sm:$0xff] %v8209_v6  ;;  %v8211_v26 = vld [vmem:[#allocation3 + $0x850] sm:$0xff] }
 0x4ce   :  { %3082 = vmatpush2.msra.mxu0 %v2639_v50  ;;  %3252 = vmatprep.subr.mxu1 %v8051_v58  ;;  %9592 = vst [vmem:[#allocation34_spill] sm:$0xff] %v8211_v26  ;;  %v8215_v50 = vld [vmem:[#allocation3 + $0x808] sm:$0xff] }
 0x4cf   :  { %3084 = vmatmul.mubr.f32.vlgmr.msra.gmra.mxu0 %v8024_v17  ;;  %3321 = vmatprep.subr.mxu0 %v8041_v40  ;;  %v8053_v17 = vld [vmem:[#allocation3 + $0xb98] sm:$0xff]  ;;  %9593 = vst [vmem:[#allocation44_spill] sm:$0xff] %v8215_v50 }
 0x4d0   :  { %3385 = vmatprep.mubr.f32.mxu0 %v9561_v52  ;;  %3322 = vmatpush1.msra.mxu0 %v8047_v20 }
 0x4d1   :  { %3323 = vmatprep.subr.mxu0 %v8053_v17  ;;  %3253 = vmatpush1.msra.mxu1 %v8057_v21 }
 0x4d2   :  { %3324 = vmatpush1.msra.mxu0 %v8059_v60  ;;  %3254 = vmatprep.subr.mxu1 %v8063_v18 }
 0x4d3   :  { %3325 = vmatprep.subr.mxu0 %v8065_v2  ;;  %3255 = vmatpush1.msra.mxu1 %v8069_v25 }
 0x4d4   :  { %3326 = vmatpush1.msra.mxu0 %v8071_v46  ;;  %3256 = vmatprep.subr.mxu1 %v8075_v7 }
 0x4d5   :  { %3327 = vmatprep.subr.mxu0 %v8077_v36  ;;  %3257 = vmatpush1.msra.mxu1 %v8081_v31 }
 0x4d6   :  { %3328 = vmatpush1.msra.mxu0 %v8083_v48  ;;  %3258 = vmatprep.subr.mxu1 %v8087_v4 }
 0x4d7   :  { %3329 = vmatprep.subr.mxu0 %v8089_v16  ;;  %3259 = vmatpush1.msra.mxu1 %v8093_v53 }
 0x4d8   :  { %3330 = vmatpush1.msra.mxu0 %v8095_v57  ;;  %3260 = vmatprep.subr.mxu1 %v8099_v51 }
 0x4d9   :  { %3331 = vmatprep.subr.mxu0 %v8101_v47  ;;  %3261 = vmatpush1.msra.mxu1 %v8105_v19 }
 0x4da   :  { %3332 = vmatpush1.msra.mxu0 %v8107_v43  ;;  %3262 = vmatprep.subr.mxu1 %v8111_v11 }
 0x4db   :  { %3333 = vmatprep.subr.mxu0 %v8113_v59  ;;  %3263 = vmatpush1.msra.mxu1 %v8117_v27 }
 0x4dc   :  { %3334 = vmatpush1.msra.mxu0 %v8119_v24  ;;  %3264 = vmatprep.subr.mxu1 %v8123_v14 }
 0x4dd   :  { %3335 = vmatprep.subr.mxu0 %v8125_v34  ;;  %3265 = vmatpush1.msra.mxu1 %v8129_v56 }
 0x4de   :  { %3336 = vmatpush1.msra.mxu0 %v8131_v13  ;;  %3266 = vmatprep.subr.mxu1 %v8133_v8 }
 0x4df   :  { %3337 = vmatprep.subr.mxu0 %v8137_v5  ;;  %3267 = vmatpush1.msra.mxu1 %v8139_v62 }
 0x4e0   :  { %3338 = vmatpush1.msra.mxu0 %v8141_v29  ;;  %3268 = vmatprep.subr.mxu1 %v8145_v39 }
 0x4e1   :  { %3339 = vmatprep.subr.mxu0 %v8147_v49  ;;  %3269 = vmatpush1.msra.mxu1 %v8149_v0 }
 0x4e2   :  { %3340 = vmatpush1.msra.mxu0 %v8153_v44  ;;  %3270 = vmatprep.subr.mxu1 %v8155_v33 }
 0x4e3   :  { %3341 = vmatprep.subr.mxu0 %v8157_v30  ;;  %3271 = vmatpush1.msra.mxu1 %v8161_v28 }
 0x4e4   :  { %3342 = vmatpush1.msra.mxu0 %v8163_v55  ;;  %3272 = vmatprep.subr.mxu1 %v8167_v35 }
 0x4e5   :  { %3343 = vmatprep.subr.mxu0 %v8169_v10  ;;  %3273 = vmatpush1.msra.mxu1 %v8173_v9 }
 0x4e6   :  { %3344 = vmatpush1.msra.mxu0 %v8175_v32  ;;  %3274 = vmatprep.subr.mxu1 %v8179_v45 }
 0x4e7   :  { %3345 = vmatprep.subr.mxu0 %v8181_v54  ;;  %3275 = vmatpush1.msra.mxu1 %v8185_v37 }
 0x4e8   :  { %3346 = vmatpush1.msra.mxu0 %v8187_v41  ;;  %3276 = vmatprep.subr.mxu1 %v8191_v1  ;;  %v8221_v41 = vld [vmem:[#allocation3 + $0x800] sm:$0xff]  ;;  %v8223_v1 = vld [vmem:[#allocation3 + $0x810] sm:$0xff] }
 0x4e9   :  { %3347 = vmatprep.subr.mxu0 %v8193_v23  ;;  %3277 = vmatpush1.msra.mxu1 %v8197_v3  ;;  %9595 = vst [vmem:[#allocation41_spill] sm:$0xff] %v8221_v41  ;;  %9596 = vst [vmem:[#allocation47_spill] sm:$0xff] %v8223_v1 }
 0x4ea   :  { %3348 = vmatpush1.msra.mxu0 %v8199_v12  ;;  %3278 = vmatprep.subr.mxu1 %v8203_v15  ;;  %v8231_v12 = vld [vmem:[#allocation3 + $0xbe8] sm:$0xff]  ;;  %v8233_v15 = vld [vmem:[#allocation3 + $0xbf8] sm:$0xff] }
 0x4eb   :  { %3349 = vmatprep.subr.mxu0 %v8205_v61  ;;  %3279 = vmatpush1.msra.mxu1 %v8209_v6  ;;  %9597 = vst [vmem:[#allocation46_spill] sm:$0xff] %v8231_v12  ;;  %9598 = vst [vmem:[#allocation50_spill] sm:$0xff] %v8233_v15  ;;  %v2762_v61 = vld [vmem:[#allocation3 + $0xc00] ss:$8 sm:$0xf] }
 0x4ec   :  { %3350 = vmatpush1.msra.mxu0 %v8211_v26  ;;  %3280 = vmatprep.subr.mxu1 %v8215_v50  ;;  %v2763_v6 = vld [vmem:[#allocation3 + $0xc00] ss:$8 sm:$0xf0] }
 0x4ed   :  { %3351 = vmatprep.subr.mxu0 %v8217_v22  ;;  %3281 = vmatpush1.msra.mxu1 %v8221_v41  ;;  %v8237_v3 = vor.u32 %v2763_v6, %v2762_v61  ;;  %v9600_v41 = vld [vmem:[#allocation30_spill] sm:$0xff] }
 0x4ee   :  { %3352 = vmatpush1.msra.mxu0 %v8223_v1  ;;  %3411 = vmatprep.subr.mxu1 %v8231_v12  ;;  %v9331_v1 = vsub.s32 3, %v9600_v41  ;;  %v9337_v37 = vsub.s32 2, %v9600_v41 }
 0x4ef   :  { %3482 = vmatprep.subr.mxu0 %v8233_v15  ;;  %v2769_v50 = vrot.slane %v8237_v3, %v9577_v38 }
 0x4f0   :  { %v2781_v12 = vrot.slane %v8237_v3, %v9331_v1 }
 0x54a   :  { %v2872_v22 = vpop.f32.mrf.mxu1 }
 0x54b   :  { %v8241_v26 = vadd.f32 %v2872_v22, %v2769_v50  ;;  %v2777_v22 = vrot.slane %v8237_v3, %v9337_v37 }
 0x54d   :  { %9599 = vst [vmem:[#allocation51_spill] sm:$0xff] %v8241_v26  ;;  %v5809_v23 = vmul.f32 -1.442695, %v8241_v26  ;;  %v2943_v15 = vpop.f32.mrf.mxu0 }
 0x54e   :  { %v8255_v50 = vadd.f32 %v2943_v15, %v2777_v22  ;;  %v8263_v15 = vld [vmem:[#allocation3 + $0xbf0] sm:$0xff]  ;;  %v8265_v22 = vld [vmem:[#allocation3 + $0xba8] sm:$0xff] }
 0x54f   :  { %6456 = vpow2.f32 %v5809_v23  ;;  %v2945_v61 = vpop.f32.mrf.mxu0  ;;  %9605 = vst [vmem:[#allocation58_spill] sm:$0xff] %v8263_v15  ;;  %9606 = vst [vmem:[#allocation59_spill] sm:$0xff] %v8265_v22 }
 0x550   :  { %v8249_v6 = vadd.f32 %v2945_v61, %v2781_v12  ;;  %9602 = vst [vmem:[#allocation55_spill] sm:$0xff] %v8255_v50 }
 0x552   :  { %9601 = vst [vmem:[#allocation54_spill] sm:$0xff] %v8249_v6  ;;  %v5810_v38 = vmul.f32 -1.442695, %v8249_v6 }
 0x554   :  { %6458 = vpow2.f32 %v5810_v38  ;;  %v8261_v38 = vld [vmem:[#allocation3 + $0xbe0] sm:$0xff] }
 0x555   :  { %6460 = vtanh.f32 %v8255_v50  ;;  %9604 = vst [vmem:[#allocation57_spill] sm:$0xff] %v8261_v38 }
 0x55c   :  { %v6457_v23 = vpop.eup %6456 }
 0x55d   :  { %v3224_v26 = vadd.f32 1.0, %v6457_v23  ;;  %v8267_v23 = vld [vmem:[#allocation3 + $0xbb8] sm:$0xff] }
 0x55e   :  { %9607 = vst [vmem:[#allocation60_spill] sm:$0xff] %v8267_v23 }
 0x55f   :  { %6462 = vrcp.f32 %v3224_v26  ;;  %v8281_v26 = vld [vmem:[#allocation3 + $0xb60] sm:$0xff] }
 0x560   :  { %9612 = vst [vmem:[#allocation65_spill] sm:$0xff] %v8281_v26 }
 0x561   :  { %v6459_v1 = vpop.eup %6458 }
 0x562   :  { %v3225_v54 = vadd.f32 1.0, %v6459_v1  ;;  %v6461_v45 = vpop.eup %6460  ;;  %v8269_v1 = vld [vmem:[#allocation3 + $0xba0] sm:$0xff] }
 0x563   :  { %9608 = vst [vmem:[#allocation61_spill] sm:$0xff] %v8269_v1 }
 0x564   :  { %6464 = vrcp.f32 %v3225_v54  ;;  %v8277_v54 = vld [vmem:[#allocation3 + $0xb78] sm:$0xff] }
 0x565   :  { %9611 = vst [vmem:[#allocation64_spill] sm:$0xff] %v8277_v54 }
 0x56c   :  { %v6463_v32 = vpop.eup %6462 }
 0x56d   :  { %v8258_v12 = vmul.f32 %v6463_v32, %v6461_v45  ;;  %v8271_v32 = vld [vmem:[#allocation3 + $0xbb0] sm:$0xff]  ;;  %v8275_v45 = vld [vmem:[#allocation3 + $0xb68] sm:$0xff] }
 0x56e   :  { %9609 = vst [vmem:[#allocation62_spill] sm:$0xff] %v8271_v32  ;;  %9610 = vst [vmem:[#allocation63_spill] sm:$0xff] %v8275_v45 }
 0x56f   :  { %9603 = vst [vmem:[#allocation56_spill] sm:$0xff] %v8258_v12  ;;  %6466 = vtanh.f32 %v8258_v12  ;;  %v8325_v12 = vpop.f32.mrf.mxu1 }
 0x570   :  { %9627 = vst [vmem:[#allocation79_spill] sm:$0xff] %v8325_v12 }
 0x571   :  { %v6465_v61 = vpop.eup %6464 }
 0x57c   :  { %v6467_v6 = vpop.eup %6466 }
 0x57d   :  { %v3233_v37 = vmul.f32 %v6467_v6, %v6465_v61  ;;  %v8283_v6 = vld [vmem:[#allocation3 + $0xb70] sm:$0xff]  ;;  %v8289_v61 = vld [vmem:[#allocation3 + $0xb38] sm:$0xff] }
 0x57e   :  { %9613 = vst [vmem:[#allocation66_spill] sm:$0xff] %v8283_v6  ;;  %9615 = vst [vmem:[#allocation68_spill] sm:$0xff] %v8289_v61 }
 0x57f   :  { %3315 = vmatmul.mubr.f32.vlgmr.msra.gmra.mxu1 %v3233_v37  ;;  %6468 = vtanh.f32 %v3233_v37  ;;  %3386 = vmatmul.mubr.f32.vlgmr.msra.gmra.mxu0 %v3233_v37  ;;  %v8287_v37 = vld [vmem:[#allocation3 + $0xb28] sm:$0xff] }
 0x580   :  { %3412 = vmatpush1.msra.mxu1 %v8261_v38  ;;  %3483 = vmatpush1.msra.mxu0 %v8263_v15  ;;  %9614 = vst [vmem:[#allocation67_spill] sm:$0xff] %v8287_v37  ;;  %v8306_v15 = vld [vmem:[#allocation3 + $0xae0] sm:$0xff] }
 0x581   :  { %3413 = vmatprep.subr.mxu1 %v8265_v22  ;;  %3484 = vmatprep.subr.mxu0 %v8267_v23  ;;  %v8294_v22 = vld [vmem:[#allocation3 + $0xb20] sm:$0xff]  ;;  %v8296_v23 = vld [vmem:[#allocation3 + $0xb30] sm:$0xff]  ;;  %9620 = vst [vmem:[#allocation73_spill] sm:$0xff] %v8306_v15 }
 0x582   :  { %3414 = vmatpush1.msra.mxu1 %v8269_v1  ;;  %3485 = vmatpush1.msra.mxu0 %v8271_v32  ;;  %9616 = vst [vmem:[#allocation69_spill] sm:$0xff] %v8294_v22  ;;  %9617 = vst [vmem:[#allocation70_spill] sm:$0xff] %v8296_v23  ;;  %v8300_v1 = vld [vmem:[#allocation3 + $0xae8] sm:$0xff]  ;;  %v8302_v32 = vld [vmem:[#allocation3 + $0xaf8] sm:$0xff] }
 0x583   :  { %3415 = vmatprep.subr.mxu1 %v8275_v45  ;;  %3486 = vmatprep.subr.mxu0 %v8277_v54  ;;  %9618 = vst [vmem:[#allocation71_spill] sm:$0xff] %v8300_v1  ;;  %9619 = vst [vmem:[#allocation72_spill] sm:$0xff] %v8302_v32  ;;  %v8308_v45 = vld [vmem:[#allocation3 + $0xaf0] sm:$0xff]  ;;  %v8312_v54 = vld [vmem:[#allocation3 + $0xaa8] sm:$0xff] }
 0x584   :  { %3416 = vmatpush1.msra.mxu1 %v8281_v26  ;;  %3487 = vmatpush1.msra.mxu0 %v8283_v6  ;;  %9621 = vst [vmem:[#allocation74_spill] sm:$0xff] %v8308_v45  ;;  %9622 = vst [vmem:[#allocation75_spill] sm:$0xff] %v8312_v54  ;;  %v8314_v26 = vld [vmem:[#allocation3 + $0xab8] sm:$0xff]  ;;  %v9624_v6 = vsub.s32 4, %v9600_v41 }
 0x585   :  { %3417 = vmatprep.subr.mxu1 %v8287_v37  ;;  %3488 = vmatprep.subr.mxu0 %v8289_v61  ;;  %9623 = vst [vmem:[#allocation76_spill] sm:$0xff] %v8314_v26  ;;  %v8321_v61 = vld [vmem:[#allocation3 + $0xaa0] sm:$0xff]  ;;  %v8323_v37 = vld [vmem:[#allocation3 + $0xab0] sm:$0xff] }
 0x586   :  { %3418 = vmatpush1.msra.mxu1 %v8294_v22  ;;  %3489 = vmatpush1.msra.mxu0 %v8296_v23  ;;  %v2785_v38 = vrot.slane %v8237_v3, %v9624_v6  ;;  %9625 = vst [vmem:[#allocation77_spill] sm:$0xff] %v8321_v61  ;;  %9626 = vst [vmem:[#allocation78_spill] sm:$0xff] %v8323_v37  ;;  %v8329_v23 = vld [vmem:[#allocation3 + $0xa68] sm:$0xff]  ;;  %v8331_v22 = vld [vmem:[#allocation3 + $0xa78] sm:$0xff] }
 0x587   :  { %3419 = vmatprep.subr.mxu1 %v8300_v1  ;;  %3490 = vmatprep.subr.mxu0 %v8302_v32  ;;  %9628 = vst [vmem:[#allocation80_spill] sm:$0xff] %v8329_v23  ;;  %9629 = vst [vmem:[#allocation81_spill] sm:$0xff] %v8331_v22  ;;  %v8335_v6 = vld [vmem:[#allocation3 + $0xa60] sm:$0xff]  ;;  %v8337_v32 = vld [vmem:[#allocation3 + $0xa70] sm:$0xff] }
 0x588   :  { %3420 = vmatpush1.msra.mxu1 %v8306_v15  ;;  %3491 = vmatpush1.msra.mxu0 %v8308_v45  ;;  %9630 = vst [vmem:[#allocation82_spill] sm:$0xff] %v8335_v6  ;;  %9631 = vst [vmem:[#allocation83_spill] sm:$0xff] %v8337_v32  ;;  %v8341_v15 = vld [vmem:[#allocation3 + $0xa28] sm:$0xff]  ;;  %v8343_v45 = vld [vmem:[#allocation3 + $0xa38] sm:$0xff] }
 0x589   :  { %3421 = vmatprep.subr.mxu1 %v8312_v54  ;;  %3492 = vmatprep.subr.mxu0 %v8314_v26  ;;  %9632 = vst [vmem:[#allocation84_spill] sm:$0xff] %v8341_v15  ;;  %9633 = vst [vmem:[#allocation85_spill] sm:$0xff] %v8343_v45  ;;  %v8349_v26 = vld [vmem:[#allocation3 + $0xa20] sm:$0xff]  ;;  %v8351_v54 = vld [vmem:[#allocation3 + $0xa30] sm:$0xff] }
 0x58a   :  { %v3014_v1 = vpop.f32.mrf.mxu1  ;;  %3422 = vmatpush1.msra.mxu1 %v8321_v61  ;;  %3493 = vmatpush1.msra.mxu0 %v8323_v37  ;;  %9635 = vst [vmem:[#allocation87_spill] sm:$0xff] %v8349_v26  ;;  %9636 = vst [vmem:[#allocation88_spill] sm:$0xff] %v8351_v54  ;;  %v8358_v37 = vld [vmem:[#allocation3 + $0x9e8] sm:$0xff] }
 0x58b   :  { %v8345_v50 = vadd.f32 %v3014_v1, %v2785_v38  ;;  %3423 = vmatprep.subr.mxu1 %v8329_v23  ;;  %3494 = vmatprep.subr.mxu0 %v8331_v22  ;;  %9638 = vst [vmem:[#allocation90_spill] sm:$0xff] %v8358_v37  ;;  %v8360_v38 = vld [vmem:[#allocation3 + $0x9f8] sm:$0xff]  ;;  %v8365_v22 = vld [vmem:[#allocation3 + $0x9e0] sm:$0xff]  ;;  %v8367_v23 = vld [vmem:[#allocation3 + $0x9f0] sm:$0xff] }
 0x58c   :  { %v8353_v12 = vpop.eup %6468  ;;  %3424 = vmatpush1.msra.mxu1 %v8335_v6  ;;  %3495 = vmatpush1.msra.mxu0 %v8337_v32  ;;  %9639 = vst [vmem:[#allocation91_spill] sm:$0xff] %v8360_v38  ;;  %9640 = vst [vmem:[#allocation92_spill] sm:$0xff] %v8365_v22  ;;  %v8371_v61 = vld [vmem:[#allocation3 + $0x9a8] sm:$0xff]  ;;  %v9646_v32 = vsub.s32 7, %v9600_v41 }
 0x58d   :  { %9634 = vst [vmem:[#allocation86_spill] sm:$0xff] %v8345_v50  ;;  %9637 = vst [vmem:[#allocation89_spill] sm:$0xff] %v8353_v12  ;;  %v5811_v1 = vmul.f32 -1.442695, %v8345_v50  ;;  %3425 = vmatprep.subr.mxu1 %v8341_v15  ;;  %3496 = vmatprep.subr.mxu0 %v8343_v45  ;;  %v8373_v12 = vld [vmem:[#allocation3 + $0x9b8] sm:$0xff]  ;;  %v8377_v15 = vld [vmem:[#allocation3 + $0x9a0] sm:$0xff] }
 0x58e   :  { %9641 = vst [vmem:[#allocation93_spill] sm:$0xff] %v8367_v23  ;;  %3426 = vmatpush1.msra.mxu1 %v8349_v26  ;;  %3497 = vmatpush1.msra.mxu0 %v8351_v54  ;;  %9642 = vst [vmem:[#allocation94_spill] sm:$0xff] %v8371_v61  ;;  %v8379_v45 = vld [vmem:[#allocation3 + $0x9b0] sm:$0xff]  ;;  %v2797_v6 = vrot.slane %v8237_v3, %v9646_v32  ;;  %v8386_v54 = vld [vmem:[#allocation3 + $0x968] sm:$0xff] }
 0x58f   :  { %9643 = vst [vmem:[#allocation95_spill] sm:$0xff] %v8373_v12  ;;  %6470 = vpow2.f32 %v5811_v1  ;;  %3427 = vmatprep.subr.mxu1 %v8358_v37  ;;  %3498 = vmatprep.subr.mxu0 %v8360_v38  ;;  %9644 = vst [vmem:[#allocation96_spill] sm:$0xff] %v8377_v15  ;;  %v8388_v26 = vld [vmem:[#allocation3 + $0x978] sm:$0xff]  ;;  %v3085_v1 = vpop.f32.mrf.mxu0  ;;  %v8392_v38 = vld [vmem:[#allocation3 + $0x960] sm:$0xff] }
 0x590   :  { %9645 = vst [vmem:[#allocation97_spill] sm:$0xff] %v8379_v45  ;;  %3428 = vmatpush1.msra.mxu1 %v8365_v22  ;;  %3499 = vmatpush1.msra.mxu0 %v8367_v23  ;;  %9647 = vst [vmem:[#allocation98_spill] sm:$0xff] %v8386_v54  ;;  %v8394_v37 = vld [vmem:[#allocation3 + $0x970] sm:$0xff]  ;;  %v8399_v32 = vld [vmem:[#allocation3 + $0x928] sm:$0xff] }
 0x591   :  { %9648 = vst [vmem:[#allocation99_spill] sm:$0xff] %v8388_v26  ;;  %3429 = vmatprep.subr.mxu1 %v8371_v61  ;;  %3500 = vmatprep.subr.mxu0 %v8373_v12  ;;  %9649 = vst [vmem:[#allocation100_spill] sm:$0xff] %v8392_v38  ;;  %v8401_v23 = vld [vmem:[#allocation3 + $0x938] sm:$0xff]  ;;  %v3087_v22 = vpop.f32.mrf.mxu0  ;;  %v8405_v12 = vld [vmem:[#allocation3 + $0x920] sm:$0xff] }
 0x592   :  { %9650 = vst [vmem:[#allocation101_spill] sm:$0xff] %v8394_v37  ;;  %3430 = vmatpush1.msra.mxu1 %v8377_v15  ;;  %3501 = vmatpush1.msra.mxu0 %v8379_v45  ;;  %9651 = vst [vmem:[#allocation102_spill] sm:$0xff] %v8399_v32  ;;  %v8407_v61 = vld [vmem:[#allocation3 + $0x930] sm:$0xff]  ;;  %v8409_v9 = vadd.f32 %v3087_v22, %v2797_v6  ;;  %v8413_v50 = vld [vmem:[#allocation3 + $0x8e8] sm:$0xff]  ;;  %v9659_v15 = vsub.s32 6, %v9600_v41 }
 0x593   :  { %9652 = vst [vmem:[#allocation103_spill] sm:$0xff] %v8401_v23  ;;  %3431 = vmatprep.subr.mxu1 %v8386_v54  ;;  %3502 = vmatprep.subr.mxu0 %v8388_v26  ;;  %9653 = vst [vmem:[#allocation104_spill] sm:$0xff] %v8405_v12  ;;  %v8415_v45 = vld [vmem:[#allocation3 + $0x8f8] sm:$0xff]  ;;  %v8419_v54 = vld [vmem:[#allocation3 + $0x8e0] sm:$0xff] }
 0x594   :  { %9654 = vst [vmem:[#allocation105_spill] sm:$0xff] %v8407_v61  ;;  %3432 = vmatpush1.msra.mxu1 %v8392_v38  ;;  %3503 = vmatpush1.msra.mxu0 %v8394_v37  ;;  %9655 = vst [vmem:[#allocation106_spill] sm:$0xff] %v8413_v50  ;;  %v8421_v26 = vld [vmem:[#allocation3 + $0x8f0] sm:$0xff]  ;;  %v2793_v22 = vrot.slane %v8237_v3, %v9659_v15  ;;  %v5812_v6 = vmul.f32 -1.442695, %v8409_v9  ;;  %v8429_v37 = vld [vmem:[#allocation3 + $0x8a8] sm:$0xff] }
 0x595   :  { %9656 = vst [vmem:[#allocation107_spill] sm:$0xff] %v8415_v45  ;;  %3433 = vmatprep.subr.mxu1 %v8399_v32  ;;  %3504 = vmatprep.subr.mxu0 %v8401_v23  ;;  %9657 = vst [vmem:[#allocation108_spill] sm:$0xff] %v8419_v54  ;;  %v8431_v38 = vld [vmem:[#allocation3 + $0x8b8] sm:$0xff]  ;;  %v8435_v23 = vld [vmem:[#allocation3 + $0x8a0] sm:$0xff] }
 0x596   :  { %9658 = vst [vmem:[#allocation109_spill] sm:$0xff] %v8421_v26  ;;  %3434 = vmatpush1.msra.mxu1 %v8405_v12  ;;  %3505 = vmatpush1.msra.mxu0 %v8407_v61  ;;  %9660 = vst [vmem:[#allocation110_spill] sm:$0xff] %v8429_v37  ;;  %v8437_v32 = vld [vmem:[#allocation3 + $0x8b0] sm:$0xff]  ;;  %v8441_v15 = vld [vmem:[#allocation3 + $0x868] sm:$0xff]  ;;  %6472 = vpow2.f32 %v5812_v6 }
 0x597   :  { %9661 = vst [vmem:[#allocation111_spill] sm:$0xff] %v8431_v38  ;;  %3435 = vmatprep.subr.mxu1 %v8413_v50  ;;  %3506 = vmatprep.subr.mxu0 %v8415_v45  ;;  %9662 = vst [vmem:[#allocation112_spill] sm:$0xff] %v8435_v23  ;;  %v8443_v12 = vld [vmem:[#allocation3 + $0x878] sm:$0xff]  ;;  %v8447_v61 = vld [vmem:[#allocation3 + $0x860] sm:$0xff]  ;;  %v8451_v45 = vadd.f32 %v3085_v1, %v2793_v22 }
 0x598   :  { %9663 = vst [vmem:[#allocation113_spill] sm:$0xff] %v8437_v32  ;;  %3436 = vmatpush1.msra.mxu1 %v8419_v54  ;;  %3507 = vmatpush1.msra.mxu0 %v8421_v26  ;;  %9664 = vst [vmem:[#allocation114_spill] sm:$0xff] %v8441_v15  ;;  %v8449_v50 = vld [vmem:[#allocation3 + $0x870] sm:$0xff]  ;;  %v8455_v26 = vld [vmem:[#allocation3 + $0x828] sm:$0xff] }
 0x599   :  { %9665 = vst [vmem:[#allocation115_spill] sm:$0xff] %v8443_v12  ;;  %3437 = vmatprep.subr.mxu1 %v8429_v37  ;;  %3508 = vmatprep.subr.mxu0 %v8431_v38  ;;  %9666 = vst [vmem:[#allocation116_spill] sm:$0xff] %v8447_v61  ;;  %v8457_v54 = vld [vmem:[#allocation3 + $0x838] sm:$0xff]  ;;  %v8461_v38 = vld [vmem:[#allocation3 + $0x820] sm:$0xff]  ;;  %6474 = vtanh.f32 %v8451_v45 }
 0x59a   :  { %9667 = vst [vmem:[#allocation117_spill] sm:$0xff] %v8449_v50  ;;  %3438 = vmatpush1.msra.mxu1 %v8435_v23  ;;  %3509 = vmatpush1.msra.mxu0 %v8437_v32  ;;  %9668 = vst [vmem:[#allocation118_spill] sm:$0xff] %v8455_v26  ;;  %v8465_v1 = vld [vmem:[#allocation3 + $0x830] sm:$0xff] }
 0x59b   :  { %9669 = vst [vmem:[#allocation119_spill] sm:$0xff] %v8457_v54  ;;  %3439 = vmatprep.subr.mxu1 %v8441_v15  ;;  %3510 = vmatprep.subr.mxu0 %v8443_v12  ;;  %9670 = vst [vmem:[#allocation120_spill] sm:$0xff] %v8461_v38 }
 0x59c   :  { %v6471_v37 = vpop.eup %6470  ;;  %3440 = vmatpush1.msra.mxu1 %v8447_v61  ;;  %3511 = vmatpush1.msra.mxu0 %v8449_v50  ;;  %9671 = vst [vmem:[#allocation121_spill] sm:$0xff] %v8465_v1 }
 0x59d   :  { %v3240_v22 = vadd.f32 1.0, %v6471_v37  ;;  %3441 = vmatprep.subr.mxu1 %v8455_v26  ;;  %3512 = vmatprep.subr.mxu0 %v8457_v54 }
 0x59e   :  { %3442 = vmatpush1.msra.mxu1 %v8461_v38  ;;  %3475 = vmatprep.mubr.f32.mxu1 %v9561_v52 }
 0x59f   :  { %6476 = vrcp.f32 %v3240_v22  ;;  %3513 = vmatpush1.msra.mxu0 %v8465_v1  ;;  %3546 = vmatprep.mubr.f32.mxu0 %v9561_v52 }
 0x5a0   :  { %3626 = vmatprep.subr.mxu1 %v8039_v42  ;;  %3697 = vmatprep.subr.mxu0 %v8041_v40  ;;  %v9673_v40 = vld [vmem:[#allocation33_spill] sm:$0xff] }
 0x5a3   :  { %v6473_v37 = vpop.eup %6472 }
 0x5a4   :  { %v3241_v6 = vadd.f32 1.0, %v6473_v37  ;;  %v9698_v37 = vld [vmem:[#allocation56_spill] sm:$0xff] }
 0x5a6   :  { %v6475_v26 = vpop.eup %6474  ;;  %6478 = vrcp.f32 %v3241_v6  ;;  %v3589_v6 = vrot.slane %v9698_v37, 6 }
 0x5ac   :  { %v6477_v50 = vpop.eup %6476 }
 0x5ad   :  { %v8476_v54 = vmul.f32 %v6477_v50, %v6475_v26 }
 0x5af   :  { %6480 = vtanh.f32 %v8476_v54 }
 0x5b3   :  { %v6479_v38 = vpop.eup %6478 }
 0x5bc   :  { %v6481_v61 = vpop.eup %6480 }
 0x5bd   :  { %v3249_v22 = vmul.f32 %v6481_v61, %v6479_v38 }
 0x5bf   :  { %v3409_v12 = vrot.slane %v3249_v22, 6  ;;  %6482 = vtanh.f32 %v3249_v22 }
 0x5c1   :  { %3476 = vmatmul.mubr.f32.vlgmr.msra.gmra.mxu1 %v3409_v12  ;;  %3547 = vmatmul.mubr.f32.vlgmr.msra.gmra.mxu0 %v3409_v12 }
 0x5c2   :  { %3627 = vmatpush1.msra.mxu1 %v8045_v63  ;;  %3698 = vmatpush1.msra.mxu0 %v8047_v20  ;;  %v9674_v63 = vld [vmem:[#allocation37_spill] sm:$0xff]  ;;  %v9675_v20 = vld [vmem:[#allocation52_spill] sm:$0xff] }
 0x5c3   :  { %3628 = vmatprep.subr.mxu1 %v8051_v58  ;;  %3699 = vmatprep.subr.mxu0 %v8053_v17  ;;  %v9676_v58 = vld [vmem:[#allocation38_spill] sm:$0xff]  ;;  %v9677_v17 = vld [vmem:[#allocation36_spill] sm:$0xff] }
 0x5c4   :  { %3629 = vmatpush1.msra.mxu1 %v8057_v21  ;;  %3700 = vmatpush1.msra.mxu0 %v8059_v60  ;;  %v9678_v21 = vld [vmem:[#allocation40_spill] sm:$0xff]  ;;  %v9679_v60 = vld [vmem:[#allocation39_spill] sm:$0xff] }
 0x5c5   :  { %3630 = vmatprep.subr.mxu1 %v8063_v18  ;;  %3701 = vmatprep.subr.mxu0 %v8065_v2  ;;  %v9680_v18 = vld [vmem:[#allocation53_spill] sm:$0xff]  ;;  %v9681_v2 = vld [vmem:[#allocation48_spill] sm:$0xff] }
 0x5c6   :  { %3631 = vmatpush1.msra.mxu1 %v8069_v25  ;;  %3702 = vmatpush1.msra.mxu0 %v8071_v46  ;;  %v9682_v25 = vld [vmem:[#allocation35_spill] sm:$0xff]  ;;  %v9683_v46 = vld [vmem:[#allocation49_spill] sm:$0xff] }
 0x5c7   :  { %3632 = vmatprep.subr.mxu1 %v8075_v7  ;;  %3703 = vmatprep.subr.mxu0 %v8077_v36  ;;  %v9684_v7 = vld [vmem:[#allocation43_spill] sm:$0xff]  ;;  %v9685_v36 = vld [vmem:[#allocation42_spill] sm:$0xff] }
 0x5c8   :  { %3633 = vmatpush1.msra.mxu1 %v8081_v31  ;;  %3704 = vmatpush1.msra.mxu0 %v8083_v48  ;;  %v9686_v31 = vld [vmem:[#allocation34_spill] sm:$0xff]  ;;  %v9687_v48 = vld [vmem:[#allocation44_spill] sm:$0xff] }
 0x5c9   :  { %3634 = vmatprep.subr.mxu1 %v8087_v4  ;;  %3705 = vmatprep.subr.mxu0 %v8089_v16  ;;  %v9688_v4 = vld [vmem:[#allocation45_spill] sm:$0xff] }
 0x5ca   :  { %3635 = vmatpush1.msra.mxu1 %v8093_v53  ;;  %3706 = vmatpush1.msra.mxu0 %v8095_v57  ;;  %v9689_v16 = vld [vmem:[#allocation41_spill] sm:$0xff]  ;;  %v9690_v53 = vld [vmem:[#allocation47_spill] sm:$0xff]  ;;  %v9691_v57 = vld [vmem:[#allocation46_spill] sm:$0xff] }
 0x5cb   :  { %3636 = vmatprep.subr.mxu1 %v8099_v51  ;;  %3707 = vmatprep.subr.mxu0 %v8101_v47  ;;  %v9692_v51 = vld [vmem:[#allocation50_spill] sm:$0xff]  ;;  %v8547_v47 = vpop.f32.mrf.mxu1 }
 0x5cc   :  { %v8499_v42 = vpop.eup %6482  ;;  %3637 = vmatpush1.msra.mxu1 %v8105_v19  ;;  %3708 = vmatpush1.msra.mxu0 %v8107_v43  ;;  %v9693_v19 = vld [vmem:[#allocation32_spill] sm:$0xff] }
 0x5cd   :  { %9672 = vst [vmem:[#allocation122_spill] sm:$0xff] %v8499_v42  ;;  %3638 = vmatprep.subr.mxu1 %v8111_v11  ;;  %3709 = vmatprep.subr.mxu0 %v8113_v59  ;;  %v2773_v43 = vrot.slane %v8237_v3, %v9693_v19  ;;  %v9723_v19 = vld [vmem:[#allocation80_spill] sm:$0xff] }
 0x5ce   :  { %3639 = vmatpush1.msra.mxu1 %v8117_v27  ;;  %3710 = vmatpush1.msra.mxu0 %v8119_v24  ;;  %v9694_v24 = vld [vmem:[#allocation79_spill] sm:$0xff]  ;;  %v9727_v42 = vld [vmem:[#allocation84_spill] sm:$0xff] }
 0x5cf   :  { %3640 = vmatprep.subr.mxu1 %v8123_v14  ;;  %3711 = vmatprep.subr.mxu0 %v8125_v34  ;;  %v8552_v14 = vadd.f32 %v9694_v24, %v2773_v43  ;;  %v9695_v34 = vld [vmem:[#allocation51_spill] sm:$0xff]  ;;  %v2788_v24 = vsub.s32 5, %v9600_v41  ;;  %v9724_v41 = vld [vmem:[#allocation81_spill] sm:$0xff] }
 0x5d0   :  { %3641 = vmatpush1.msra.mxu1 %v8129_v56  ;;  %3712 = vmatpush1.msra.mxu0 %v8131_v13 }
 0x5d1   :  { %3642 = vmatprep.subr.mxu1 %v8133_v8  ;;  %3713 = vmatprep.subr.mxu0 %v8137_v5 }
 0x5d2   :  { %3643 = vmatpush1.msra.mxu1 %v8139_v62  ;;  %3714 = vmatpush1.msra.mxu0 %v8141_v29 }
 0x5d3   :  { %3644 = vmatprep.subr.mxu1 %v8145_v39  ;;  %3715 = vmatprep.subr.mxu0 %v8147_v49 }
 0x5d4   :  { %3645 = vmatpush1.msra.mxu1 %v8149_v0  ;;  %3716 = vmatpush1.msra.mxu0 %v8153_v44  ;;  %v9696_v0 = vld [vmem:[#allocation54_spill] sm:$0xff] }
 0x5d5   :  { %3646 = vmatprep.subr.mxu1 %v8155_v33  ;;  %3717 = vmatprep.subr.mxu0 %v8157_v30 }
 0x5d6   :  { %3647 = vmatpush1.msra.mxu1 %v8161_v28  ;;  %3718 = vmatpush1.msra.mxu0 %v8163_v55  ;;  %v9697_v55 = vld [vmem:[#allocation55_spill] sm:$0xff] }
 0x5d7   :  { %3648 = vmatprep.subr.mxu1 %v8167_v35  ;;  %3719 = vmatprep.subr.mxu0 %v8169_v10 }
 0x5d8   :  { %3649 = vmatpush1.msra.mxu1 %v9673_v40  ;;  %3720 = vmatpush1.msra.mxu0 %v9674_v63 }
 0x5d9   :  { %3650 = vmatprep.subr.mxu1 %v9675_v20  ;;  %3721 = vmatprep.subr.mxu0 %v9676_v58 }
 0x5da   :  { %3651 = vmatpush1.msra.mxu1 %v9677_v17  ;;  %3722 = vmatpush1.msra.mxu0 %v9678_v21 }
 0x5db   :  { %3652 = vmatprep.subr.mxu1 %v9679_v60  ;;  %3723 = vmatprep.subr.mxu0 %v9680_v18 }
 0x5dc   :  { %3653 = vmatpush1.msra.mxu1 %v9681_v2  ;;  %3724 = vmatpush1.msra.mxu0 %v9682_v25 }
 0x5dd   :  { %3654 = vmatprep.subr.mxu1 %v9683_v46  ;;  %3725 = vmatprep.subr.mxu0 %v9684_v7 }
 0x5de   :  { %3655 = vmatpush1.msra.mxu1 %v9685_v36  ;;  %3726 = vmatpush1.msra.mxu0 %v9686_v31 }
 0x5df   :  { %3656 = vmatprep.subr.mxu1 %v9687_v48  ;;  %3727 = vmatprep.subr.mxu0 %v9688_v4 }
 0x5e0   :  { %3657 = vmatpush1.msra.mxu1 %v9689_v16  ;;  %3690 = vmatprep.mubr.f32.mxu1 %v9561_v52 }
 0x5e1   :  { %3728 = vmatpush1.msra.mxu0 %v9690_v53  ;;  %3761 = vmatprep.mubr.f32.mxu0 %v9561_v52 }
 0x5e2   :  { %3787 = vmatprep.subr.mxu1 %v9691_v57  ;;  %3858 = vmatprep.subr.mxu0 %v9692_v51 }
 0x63f   :  { %v3316_v11 = vpop.f32.mrf.mxu1  ;;  %v3387_v13 = vpop.f32.mrf.mxu0 }
 0x640   :  { %v3396_v59 = vrot.slane %v3316_v11, 6  ;;  %v3398_v33 = vrot.slane %v3387_v13, 6  ;;  %v9700_v13 = vld [vmem:[#allocation58_spill] sm:$0xff] }
 0x641   :  { %v3318_v27 = vpop.f32.mrf.mxu1  ;;  %v3389_v39 = vpop.f32.mrf.mxu0 }
 0x642   :  { %v3404_v56 = vadd.f32 %v3396_v59, %v9695_v34  ;;  %v3397_v8 = vrot.slane %v3318_v27, 6  ;;  %v3399_v49 = vrot.slane %v3389_v39, 6  ;;  %v3406_v35 = vadd.f32 %v3398_v33, %v9697_v55 }
 0x643   :  { %v2789_v39 = vrot.slane %v8237_v3, %v2788_v24  ;;  %v9719_v24 = vld [vmem:[#allocation76_spill] sm:$0xff] }
 0x644   :  { %v5813_v5 = vmul.f32 -1.442695, %v3404_v56  ;;  %v3405_v62 = vadd.f32 %v3397_v8, %v8552_v14  ;;  %v3407_v44 = vadd.f32 %v3399_v49, %v9696_v0  ;;  %v9699_v56 = vld [vmem:[#allocation57_spill] sm:$0xff]  ;;  %v9701_v8 = vld [vmem:[#allocation59_spill] sm:$0xff] }
 0x645   :  { %v9705_v49 = vld [vmem:[#allocation63_spill] sm:$0xff]  ;;  %v8579_v3 = vadd.f32 %v8547_v47, %v2789_v39  ;;  %v9721_v39 = vld [vmem:[#allocation77_spill] sm:$0xff] }
 0x646   :  { %6484 = vpow2.f32 %v5813_v5  ;;  %v5814_v29 = vmul.f32 -1.442695, %v3405_v62  ;;  %v5815_v30 = vmul.f32 -1.442695, %v3407_v44  ;;  %v9702_v5 = vld [vmem:[#allocation60_spill] sm:$0xff]  ;;  %v9703_v62 = vld [vmem:[#allocation61_spill] sm:$0xff] }
 0x647   :  { %v9706_v44 = vld [vmem:[#allocation64_spill] sm:$0xff] }
 0x648   :  { %6486 = vpow2.f32 %v5814_v29  ;;  %v9704_v29 = vld [vmem:[#allocation62_spill] sm:$0xff] }
 0x649   :  { %6488 = vpow2.f32 %v5815_v30  ;;  %v9707_v30 = vld [vmem:[#allocation65_spill] sm:$0xff] }
 0x653   :  { %v6485_v28 = vpop.eup %6484 }
 0x654   :  { %v3578_v10 = vadd.f32 1.0, %v6485_v28  ;;  %v9708_v28 = vld [vmem:[#allocation66_spill] sm:$0xff] }
 0x655   :  { %v6487_v50 = vpop.eup %6486 }
 0x656   :  { %6490 = vrcp.f32 %v3578_v10  ;;  %v3579_v12 = vadd.f32 1.0, %v6487_v50  ;;  %v6489_v26 = vpop.eup %6488  ;;  %v9709_v10 = vld [vmem:[#allocation67_spill] sm:$0xff]  ;;  %v9710_v50 = vld [vmem:[#allocation68_spill] sm:$0xff] }
 0x657   :  { %6492 = vtanh.f32 %v3406_v35  ;;  %v3580_v40 = vadd.f32 1.0, %v6489_v26  ;;  %v9711_v26 = vld [vmem:[#allocation69_spill] sm:$0xff] }
 0x658   :  { %6494 = vrcp.f32 %v3579_v12 }
 0x659   :  { %6496 = vrcp.f32 %v3580_v40  ;;  %v9714_v40 = vld [vmem:[#allocation71_spill] sm:$0xff] }
 0x663   :  { %v6491_v61 = vpop.eup %6490 }
 0x664   :  { %v6493_v38 = vpop.eup %6492 }
 0x665   :  { %v6495_v22 = vpop.eup %6494  ;;  %v3592_v63 = vmul.f32 %v6493_v38, %v6491_v61  ;;  %v9712_v61 = vld [vmem:[#allocation70_spill] sm:$0xff] }
 0x666   :  { %v3591_v20 = vmul.f32 %v6495_v22, %v3589_v6  ;;  %v6497_v43 = vpop.eup %6496  ;;  %v9713_v38 = vld [vmem:[#allocation86_spill] sm:$0xff] }
 0x668   :  { %v8559_v58 = vadd.f32 %v3592_v63, %v3591_v20  ;;  %v9715_v63 = vld [vmem:[#allocation72_spill] sm:$0xff]  ;;  %v9716_v20 = vld [vmem:[#allocation73_spill] sm:$0xff] }
 0x66a   :  { %6498 = vtanh.f32 %v8559_v58 }
 0x677   :  { %v6499_v11 = vpop.eup %6498 }
 0x678   :  { %v3595_v59 = vmul.f32 %v6499_v11, %v6497_v43  ;;  %v9717_v43 = vld [vmem:[#allocation74_spill] sm:$0xff] }
 0x67a   :  { %v3624_v27 = vrot.slane %v3595_v59, 2  ;;  %6500 = vtanh.f32 %v3595_v59 }
 0x67c   :  { %3691 = vmatmul.mubr.f32.vlgmr.msra.gmra.mxu1 %v3624_v27  ;;  %3762 = vmatmul.mubr.f32.vlgmr.msra.gmra.mxu0 %v3624_v27  ;;  %v9718_v27 = vld [vmem:[#allocation75_spill] sm:$0xff] }
 0x67d   :  { %3788 = vmatpush1.msra.mxu1 %v9699_v56  ;;  %3859 = vmatpush1.msra.mxu0 %v9700_v13 }
 0x67e   :  { %3789 = vmatprep.subr.mxu1 %v9701_v8  ;;  %3860 = vmatprep.subr.mxu0 %v9702_v5 }
 0x67f   :  { %3790 = vmatpush1.msra.mxu1 %v9703_v62  ;;  %3861 = vmatpush1.msra.mxu0 %v9704_v29 }
 0x680   :  { %3791 = vmatprep.subr.mxu1 %v9705_v49  ;;  %3862 = vmatprep.subr.mxu0 %v9706_v44 }
 0x681   :  { %v3477_v33 = vpop.f32.mrf.mxu1  ;;  %3792 = vmatpush1.msra.mxu1 %v9707_v30  ;;  %3863 = vmatpush1.msra.mxu0 %v9708_v28  ;;  %v3548_v6 = vpop.f32.mrf.mxu0 }
 0x682   :  { %v3557_v35 = vrot.slane %v3477_v33, 4  ;;  %3793 = vmatprep.subr.mxu1 %v9709_v10  ;;  %3864 = vmatprep.subr.mxu0 %v9710_v50  ;;  %v9722_v33 = vld [vmem:[#allocation78_spill] sm:$0xff] }
 0x683   :  { %v3479_v12 = vpop.f32.mrf.mxu1  ;;  %3794 = vmatpush1.msra.mxu1 %v9711_v26  ;;  %3865 = vmatpush1.msra.mxu0 %v9712_v61 }
 0x684   :  { %v3565_v37 = vadd.f32 %v3557_v35, %v9713_v38  ;;  %v3558_v22 = vrot.slane %v3479_v12, 4  ;;  %3795 = vmatprep.subr.mxu1 %v9714_v40  ;;  %3866 = vmatprep.subr.mxu0 %v9715_v63  ;;  %v3550_v12 = vpop.f32.mrf.mxu0 }
 0x685   :  { %3796 = vmatpush1.msra.mxu1 %v9716_v20  ;;  %3867 = vmatpush1.msra.mxu0 %v9717_v43 }
 0x686   :  { %v5816_v11 = vmul.f32 -1.442695, %v3565_v37  ;;  %v3566_v59 = vadd.f32 %v3558_v22, %v8579_v3  ;;  %3797 = vmatprep.subr.mxu1 %v9718_v27  ;;  %3868 = vmatprep.subr.mxu0 %v9719_v24  ;;  %v9725_v37 = vld [vmem:[#allocation82_spill] sm:$0xff]  ;;  %v9726_v22 = vld [vmem:[#allocation83_spill] sm:$0xff]  ;;  %v9728_v24 = vld [vmem:[#allocation85_spill] sm:$0xff] }
 0x687   :  { %v8589_v47 = vpop.eup %6500  ;;  %3798 = vmatpush1.msra.mxu1 %v9721_v39  ;;  %3869 = vmatpush1.msra.mxu0 %v9722_v33  ;;  %v9729_v39 = vld [vmem:[#allocation87_spill] sm:$0xff]  ;;  %v9730_v33 = vld [vmem:[#allocation88_spill] sm:$0xff] }
 0x688   :  { %9720 = vst [vmem:[#allocation33_spill] sm:$0xff] %v8589_v47  ;;  %6502 = vpow2.f32 %v5816_v11  ;;  %v5817_v35 = vmul.f32 -1.442695, %v3566_v59  ;;  %3799 = vmatprep.subr.mxu1 %v9723_v19  ;;  %3870 = vmatprep.subr.mxu0 %v9724_v41  ;;  %v3560_v47 = vrot.slane %v3550_v12, 4  ;;  %v9731_v11 = vld [vmem:[#allocation90_spill] sm:$0xff]  ;;  %v9732_v59 = vld [vmem:[#allocation91_spill] sm:$0xff] }
 0x689   :  { %3800 = vmatpush1.msra.mxu1 %v9725_v37  ;;  %3871 = vmatpush1.msra.mxu0 %v9726_v22  ;;  %v9733_v19 = vld [vmem:[#allocation92_spill] sm:$0xff]  ;;  %v9734_v41 = vld [vmem:[#allocation93_spill] sm:$0xff]  ;;  %v9735_v37 = vld [vmem:[#allocation94_spill] sm:$0xff] }
 0x68a   :  { %6504 = vpow2.f32 %v5817_v35  ;;  %3801 = vmatprep.subr.mxu1 %v9727_v42  ;;  %3872 = vmatprep.subr.mxu0 %v9728_v24  ;;  %v9736_v35 = vld [vmem:[#allocation95_spill] sm:$0xff]  ;;  %v3568_v42 = vadd.f32 %v3560_v47, %v8409_v9  ;;  %v9737_v24 = vld [vmem:[#allocation96_spill] sm:$0xff]  ;;  %v9738_v12 = vld [vmem:[#allocation97_spill] sm:$0xff] }
 0x68b   :  { %3802 = vmatpush1.msra.mxu1 %v9729_v39  ;;  %3873 = vmatpush1.msra.mxu0 %v9730_v33  ;;  %v9739_v39 = vld [vmem:[#allocation98_spill] sm:$0xff]  ;;  %v9740_v33 = vld [vmem:[#allocation99_spill] sm:$0xff]  ;;  %v9745_v22 = vld [vmem:[#allocation104_spill] sm:$0xff] }
 0x68c   :  { %3803 = vmatprep.subr.mxu1 %v9731_v11  ;;  %3874 = vmatprep.subr.mxu0 %v9732_v59  ;;  %v3559_v11 = vrot.slane %v3548_v6, 4  ;;  %v9741_v59 = vld [vmem:[#allocation100_spill] sm:$0xff]  ;;  %v9746_v47 = vld [vmem:[#allocation105_spill] sm:$0xff] }
 0x68d   :  { %3804 = vmatpush1.msra.mxu1 %v9733_v19  ;;  %3875 = vmatpush1.msra.mxu0 %v9734_v41  ;;  %v9742_v19 = vld [vmem:[#allocation101_spill] sm:$0xff]  ;;  %v9743_v41 = vld [vmem:[#allocation102_spill] sm:$0xff] }
 0x68e   :  { %3805 = vmatprep.subr.mxu1 %v9735_v37  ;;  %3876 = vmatprep.subr.mxu0 %v9736_v35  ;;  %v9744_v37 = vld [vmem:[#allocation103_spill] sm:$0xff]  ;;  %v5818_v35 = vmul.f32 -1.442695, %v3568_v42  ;;  %v3567_v6 = vadd.f32 %v3559_v11, %v8451_v45 }
 0x68f   :  { %3806 = vmatpush1.msra.mxu1 %v9737_v24  ;;  %3877 = vmatpush1.msra.mxu0 %v9738_v12  ;;  %v9747_v24 = vld [vmem:[#allocation106_spill] sm:$0xff]  ;;  %v9748_v12 = vld [vmem:[#allocation107_spill] sm:$0xff] }
 0x690   :  { %3807 = vmatprep.subr.mxu1 %v9739_v39  ;;  %3878 = vmatprep.subr.mxu0 %v9740_v33  ;;  %v9749_v33 = vld [vmem:[#allocation108_spill] sm:$0xff]  ;;  %6506 = vpow2.f32 %v5818_v35  ;;  %v9753_v11 = vld [vmem:[#allocation115_spill] sm:$0xff] }
 0x691   :  { %3808 = vmatpush1.msra.mxu1 %v9741_v59  ;;  %3879 = vmatpush1.msra.mxu0 %v9742_v19  ;;  %v9750_v59 = vld [vmem:[#allocation109_spill] sm:$0xff]  ;;  %v9758_v35 = vld [vmem:[#allocation120_spill] sm:$0xff] }
 0x692   :  { %3809 = vmatprep.subr.mxu1 %v9743_v41  ;;  %3880 = vmatprep.subr.mxu0 %v9744_v37  ;;  %v9751_v41 = vld [vmem:[#allocation110_spill] sm:$0xff]  ;;  %v9752_v37 = vld [vmem:[#allocation111_spill] sm:$0xff] }
 0x693   :  { %3810 = vmatpush1.msra.mxu1 %v9745_v22  ;;  %3881 = vmatpush1.msra.mxu0 %v9746_v47 }
 0x694   :  { %3811 = vmatprep.subr.mxu1 %v9747_v24  ;;  %3882 = vmatprep.subr.mxu0 %v9748_v12 }
 0x695   :  { %v6503_v39 = vpop.eup %6502  ;;  %3812 = vmatpush1.msra.mxu1 %v9749_v33  ;;  %3883 = vmatpush1.msra.mxu0 %v9750_v59  ;;  %v9754_v33 = vld [vmem:[#allocation116_spill] sm:$0xff]  ;;  %v6595_v59 = vld [vmem:[#allocation3 + $0xbd0] sm:$0xff] }
 0x696   :  { %v3605_v19 = vadd.f32 1.0, %v6503_v39  ;;  %3813 = vmatprep.subr.mxu1 %v9751_v41  ;;  %3884 = vmatprep.subr.mxu0 %v9752_v37  ;;  %v9755_v39 = vld [vmem:[#allocation117_spill] sm:$0xff]  ;;  %v9756_v41 = vld [vmem:[#allocation118_spill] sm:$0xff]  ;;  %v9757_v37 = vld [vmem:[#allocation119_spill] sm:$0xff] }
 0x697   :  { %v6505_v42 = vpop.eup %6504  ;;  %3814 = vmatpush1.msra.mxu1 %v8435_v23  ;;  %3885 = vmatpush1.msra.mxu0 %v8437_v32 }
 0x698   :  { %6508 = vrcp.f32 %v3605_v19  ;;  %v3606_v12 = vadd.f32 1.0, %v6505_v42  ;;  %3815 = vmatprep.subr.mxu1 %v8441_v15  ;;  %3886 = vmatprep.subr.mxu0 %v9753_v11  ;;  %v6592_v19 = vld [vmem:[#allocation3 + $0xbc8] sm:$0xff] }
 0x699   :  { %6510 = vtanh.f32 %v3567_v6  ;;  %3816 = vmatpush1.msra.mxu1 %v9754_v33  ;;  %3887 = vmatpush1.msra.mxu0 %v9755_v39  ;;  %v6593_v6 = vld [vmem:[#allocation3 + $0xbd8] sm:$0xff] }
 0x69a   :  { %6512 = vrcp.f32 %v3606_v12  ;;  %3817 = vmatprep.subr.mxu1 %v9756_v41  ;;  %3888 = vmatprep.subr.mxu0 %v9757_v37  ;;  %v3616_v12 = vrot.slane %v8476_v54, 2  ;;  %v6596_v54 = vld [vmem:[#allocation3 + $0xb88] sm:$0xff] }
 0x69b   :  { %3818 = vmatpush1.msra.mxu1 %v9758_v35  ;;  %3851 = vmatprep.mubr.f32.mxu1 %v9561_v52 }
 0x69c   :  { %3889 = vmatpush1.msra.mxu0 %v8465_v1  ;;  %3922 = vmatprep.mubr.f32.mxu0 %v9561_v52 }
 0x69d   :  { %4002 = vmatprep.subr.mxu1 %v6592_v19  ;;  %4073 = vmatprep.subr.mxu0 %v6593_v6  ;;  %v6507_v42 = vpop.eup %6506  ;;  %v6594_v6 = vld [vmem:[#allocation3 + $0xbc0] sm:$0xff] }
 0x69e   :  { %v3607_v11 = vadd.f32 1.0, %v6507_v42  ;;  %v6607_v42 = vld [vmem:[#allocation3 + $0xb10] sm:$0xff] }
 0x6a0   :  { %6514 = vrcp.f32 %v3607_v11  ;;  %v6601_v11 = vld [vmem:[#allocation3 + $0xb58] sm:$0xff] }
 0x6a5   :  { %v6509_v33 = vpop.eup %6508 }
 0x6a6   :  { %v6511_v39 = vpop.eup %6510 }
 0x6a7   :  { %v6513_v41 = vpop.eup %6512  ;;  %v3619_v37 = vmul.f32 %v6511_v39, %v6509_v33  ;;  %v6597_v33 = vld [vmem:[#allocation3 + $0xb98] sm:$0xff] }
 0x6a8   :  { %v3618_v15 = vmul.f32 %v6513_v41, %v3616_v12  ;;  %v6598_v41 = vld [vmem:[#allocation3 + $0xb80] sm:$0xff]  ;;  %v6605_v39 = vld [vmem:[#allocation3 + $0xb18] sm:$0xff]  ;;  %v6608_v12 = vld [vmem:[#allocation3 + $0xac8] sm:$0xff] }
 0x6aa   :  { %v8638_v35 = vadd.f32 %v3619_v37, %v3618_v15  ;;  %v6599_v15 = vld [vmem:[#allocation3 + $0xb90] sm:$0xff]  ;;  %v6600_v37 = vld [vmem:[#allocation3 + $0xb48] sm:$0xff] }
 0x6ac   :  { %6516 = vtanh.f32 %v8638_v35 }
 0x6ad   :  { %v6515_v1 = vpop.eup %6514 }
 0x6b9   :  { %v6517_v32 = vpop.eup %6516 }
 0x6ba   :  { %v3622_v23 = vmul.f32 %v6517_v32, %v6515_v1  ;;  %v6602_v32 = vld [vmem:[#allocation3 + $0xb40] sm:$0xff]  ;;  %v6604_v1 = vld [vmem:[#allocation3 + $0xb08] sm:$0xff] }
 0x6bc   :  { %v3785_v19 = vrot.slane %v3622_v23, 4  ;;  %6518 = vtanh.f32 %v3622_v23  ;;  %v6603_v23 = vld [vmem:[#allocation3 + $0xb50] sm:$0xff] }
 0x6be   :  { %3852 = vmatmul.mubr.f32.vlgmr.msra.gmra.mxu1 %v3785_v19  ;;  %3923 = vmatmul.mubr.f32.vlgmr.msra.gmra.mxu0 %v3785_v19  ;;  %v6609_v19 = vld [vmem:[#allocation3 + $0xad8] sm:$0xff] }
 0x6bf   :  { %4003 = vmatpush1.msra.mxu1 %v6594_v6  ;;  %4074 = vmatpush1.msra.mxu0 %v6595_v59  ;;  %v6606_v59 = vld [vmem:[#allocation3 + $0xb00] sm:$0xff] }
 0x6c0   :  { %4004 = vmatprep.subr.mxu1 %v6596_v54  ;;  %4075 = vmatprep.subr.mxu0 %v6597_v33  ;;  %v6610_v6 = vld [vmem:[#allocation3 + $0xac0] sm:$0xff]  ;;  %v6611_v54 = vld [vmem:[#allocation3 + $0xad0] sm:$0xff]  ;;  %v6612_v33 = vld [vmem:[#allocation3 + $0xa88] sm:$0xff] }
 0x6c1   :  { %4005 = vmatpush1.msra.mxu1 %v6598_v41  ;;  %4076 = vmatpush1.msra.mxu0 %v6599_v15  ;;  %v6613_v41 = vld [vmem:[#allocation3 + $0xa98] sm:$0xff] }
 0x6c2   :  { %4006 = vmatprep.subr.mxu1 %v6600_v37  ;;  %4077 = vmatprep.subr.mxu0 %v6601_v11  ;;  %v6614_v37 = vld [vmem:[#allocation3 + $0xa80] sm:$0xff]  ;;  %v6615_v11 = vld [vmem:[#allocation3 + $0xa90] sm:$0xff] }
 0x6c3   :  { %4007 = vmatpush1.msra.mxu1 %v6602_v32  ;;  %4078 = vmatpush1.msra.mxu0 %v6603_v23  ;;  %v6616_v32 = vld [vmem:[#allocation3 + $0xa48] sm:$0xff]  ;;  %v6617_v23 = vld [vmem:[#allocation3 + $0xa58] sm:$0xff] }
 0x6c4   :  { %4008 = vmatprep.subr.mxu1 %v6604_v1  ;;  %4079 = vmatprep.subr.mxu0 %v6605_v39  ;;  %v6618_v1 = vld [vmem:[#allocation3 + $0xa40] sm:$0xff]  ;;  %v6619_v39 = vld [vmem:[#allocation3 + $0xa50] sm:$0xff] }
 0x6c5   :  { %4009 = vmatpush1.msra.mxu1 %v6606_v59  ;;  %4080 = vmatpush1.msra.mxu0 %v6607_v42  ;;  %v6620_v59 = vld [vmem:[#allocation3 + $0xa08] sm:$0xff]  ;;  %v6621_v42 = vld [vmem:[#allocation3 + $0xa18] sm:$0xff] }
 0x6c6   :  { %4010 = vmatprep.subr.mxu1 %v6608_v12  ;;  %4081 = vmatprep.subr.mxu0 %v6609_v19  ;;  %v6622_v12 = vld [vmem:[#allocation3 + $0xa00] sm:$0xff]  ;;  %v6623_v19 = vld [vmem:[#allocation3 + $0xa10] sm:$0xff] }
 0x6c7   :  { %4011 = vmatpush1.msra.mxu1 %v6610_v6  ;;  %4082 = vmatpush1.msra.mxu0 %v6611_v54  ;;  %v6624_v6 = vld [vmem:[#allocation3 + $0x9c8] sm:$0xff]  ;;  %v6625_v54 = vld [vmem:[#allocation3 + $0x9d8] sm:$0xff] }
 0x6c8   :  { %4012 = vmatprep.subr.mxu1 %v6612_v33  ;;  %4083 = vmatprep.subr.mxu0 %v6613_v41  ;;  %v6626_v33 = vld [vmem:[#allocation3 + $0x9c0] sm:$0xff]  ;;  %v6627_v41 = vld [vmem:[#allocation3 + $0x9d0] sm:$0xff] }
 0x6c9   :  { %v8641_v15 = vpop.eup %6518  ;;  %4013 = vmatpush1.msra.mxu1 %v6614_v37  ;;  %4084 = vmatpush1.msra.mxu0 %v6615_v11  ;;  %v6628_v37 = vld [vmem:[#allocation3 + $0x988] sm:$0xff]  ;;  %v6629_v11 = vld [vmem:[#allocation3 + $0x998] sm:$0xff] }
 0x6ca   :  { %4014 = vmatprep.subr.mxu1 %v6616_v32  ;;  %4085 = vmatprep.subr.mxu0 %v6617_v23  ;;  %v6630_v32 = vld [vmem:[#allocation3 + $0x980] sm:$0xff]  ;;  %v6631_v23 = vld [vmem:[#allocation3 + $0x990] sm:$0xff] }
 0x6cb   :  { %4015 = vmatpush1.msra.mxu1 %v6618_v1  ;;  %4086 = vmatpush1.msra.mxu0 %v6619_v39  ;;  %v6632_v1 = vld [vmem:[#allocation3 + $0x948] sm:$0xff]  ;;  %v6633_v39 = vld [vmem:[#allocation3 + $0x958] sm:$0xff] }
 0x6cc   :  { %4016 = vmatprep.subr.mxu1 %v6620_v59  ;;  %4087 = vmatprep.subr.mxu0 %v6621_v42  ;;  %v6634_v59 = vld [vmem:[#allocation3 + $0x940] sm:$0xff]  ;;  %v6635_v42 = vld [vmem:[#allocation3 + $0x950] sm:$0xff] }
 0x6cd   :  { %4017 = vmatpush1.msra.mxu1 %v6622_v12  ;;  %4088 = vmatpush1.msra.mxu0 %v6623_v19  ;;  %v6636_v12 = vld [vmem:[#allocation3 + $0x908] sm:$0xff]  ;;  %v6637_v19 = vld [vmem:[#allocation3 + $0x918] sm:$0xff] }
 0x6ce   :  { %4018 = vmatprep.subr.mxu1 %v6624_v6  ;;  %4089 = vmatprep.subr.mxu0 %v6625_v54  ;;  %v6638_v6 = vld [vmem:[#allocation3 + $0x900] sm:$0xff]  ;;  %v6639_v54 = vld [vmem:[#allocation3 + $0x910] sm:$0xff] }
 0x6cf   :  { %4019 = vmatpush1.msra.mxu1 %v6626_v33  ;;  %4090 = vmatpush1.msra.mxu0 %v6627_v41  ;;  %v6640_v33 = vld [vmem:[#allocation3 + $0x8c8] sm:$0xff]  ;;  %v6641_v41 = vld [vmem:[#allocation3 + $0x8d8] sm:$0xff] }
 0x6d0   :  { %4020 = vmatprep.subr.mxu1 %v6628_v37  ;;  %4091 = vmatprep.subr.mxu0 %v6629_v11 }
 0x6d1   :  { %4021 = vmatpush1.msra.mxu1 %v6630_v32  ;;  %4092 = vmatpush1.msra.mxu0 %v6631_v23 }
 0x6d2   :  { %4022 = vmatprep.subr.mxu1 %v6632_v1  ;;  %4093 = vmatprep.subr.mxu0 %v6633_v39 }
 0x6d3   :  { %4023 = vmatpush1.msra.mxu1 %v6634_v59  ;;  %4094 = vmatpush1.msra.mxu0 %v6635_v42  ;;  %v3965_v59 = vrot.slane %v8559_v58, 6 }
 0x6d4   :  { %4024 = vmatprep.subr.mxu1 %v6636_v12  ;;  %4095 = vmatprep.subr.mxu0 %v6637_v19 }
 0x6d5   :  { %4025 = vmatpush1.msra.mxu1 %v6638_v6  ;;  %4096 = vmatpush1.msra.mxu0 %v6639_v54 }
 0x6d6   :  { %4026 = vmatprep.subr.mxu1 %v6640_v33  ;;  %4097 = vmatprep.subr.mxu0 %v6641_v41 }
 0x6d7   :  { %4027 = vmatpush1.msra.mxu1 %v9677_v17  ;;  %4098 = vmatpush1.msra.mxu0 %v9678_v21 }
 0x6d8   :  { %4028 = vmatprep.subr.mxu1 %v9679_v60  ;;  %4099 = vmatprep.subr.mxu0 %v9680_v18 }
 0x6d9   :  { %4029 = vmatpush1.msra.mxu1 %v9681_v2  ;;  %4100 = vmatpush1.msra.mxu0 %v9682_v25 }
 0x6da   :  { %4030 = vmatprep.subr.mxu1 %v9683_v46  ;;  %4101 = vmatprep.subr.mxu0 %v9684_v7 }
 0x6db   :  { %4031 = vmatpush1.msra.mxu1 %v9685_v36  ;;  %4102 = vmatpush1.msra.mxu0 %v9686_v31 }
 0x6dc   :  { %4032 = vmatprep.subr.mxu1 %v9687_v48  ;;  %4103 = vmatprep.subr.mxu0 %v9688_v4 }
 0x6dd   :  { %4033 = vmatpush1.msra.mxu1 %v9689_v16  ;;  %4066 = vmatprep.mubr.f32.mxu1 %v9561_v52 }
 0x6de   :  { %4104 = vmatpush1.msra.mxu0 %v9690_v53  ;;  %4137 = vmatprep.mubr.f32.mxu0 %v9561_v52 }
 0x6df   :  { %4163 = vmatprep.subr.mxu1 %v9691_v57  ;;  %4234 = vmatprep.subr.mxu0 %v9692_v51 }
 0x73c   :  { %v3692_v17 = vpop.f32.mrf.mxu1  ;;  %v3763_v2 = vpop.f32.mrf.mxu0 }
 0x73d   :  { %v3772_v21 = vrot.slane %v3692_v17, 4  ;;  %v3774_v16 = vrot.slane %v3763_v2, 4  ;;  %v9769_v2 = vld [vmem:[#allocation88_spill] sm:$0xff] }
 0x73e   :  { %v3694_v60 = vpop.f32.mrf.mxu1  ;;  %v3765_v31 = vpop.f32.mrf.mxu0 }
 0x73f   :  { %v3780_v18 = vadd.f32 %v3772_v21, %v9695_v34  ;;  %v3773_v25 = vrot.slane %v3694_v60, 4  ;;  %v3775_v48 = vrot.slane %v3765_v31, 4  ;;  %v3782_v51 = vadd.f32 %v3774_v16, %v9697_v55  ;;  %v9774_v31 = vld [vmem:[#allocation94_spill] sm:$0xff]  ;;  %v9776_v16 = vld [vmem:[#allocation96_spill] sm:$0xff] }
 0x741   :  { %v5819_v46 = vmul.f32 -1.442695, %v3780_v18  ;;  %v3781_v7 = vadd.f32 %v3773_v25, %v8552_v14  ;;  %v3783_v4 = vadd.f32 %v3775_v48, %v9696_v0  ;;  %v9768_v18 = vld [vmem:[#allocation87_spill] sm:$0xff]  ;;  %v9770_v25 = vld [vmem:[#allocation90_spill] sm:$0xff] }
 0x742   :  { %v9775_v48 = vld [vmem:[#allocation95_spill] sm:$0xff] }
 0x743   :  { %6520 = vpow2.f32 %v5819_v46  ;;  %v5820_v36 = vmul.f32 -1.442695, %v3781_v7  ;;  %v5821_v53 = vmul.f32 -1.442695, %v3783_v4  ;;  %v9771_v46 = vld [vmem:[#allocation91_spill] sm:$0xff]  ;;  %v9772_v7 = vld [vmem:[#allocation92_spill] sm:$0xff] }
 0x745   :  { %6522 = vpow2.f32 %v5820_v36  ;;  %v9773_v36 = vld [vmem:[#allocation93_spill] sm:$0xff] }
 0x746   :  { %6524 = vpow2.f32 %v5821_v53  ;;  %v9777_v53 = vld [vmem:[#allocation97_spill] sm:$0xff] }
 0x750   :  { %v6521_v57 = vpop.eup %6520 }
 0x751   :  { %v3954_v37 = vadd.f32 1.0, %v6521_v57  ;;  %v9778_v57 = vld [vmem:[#allocation98_spill] sm:$0xff] }
 0x752   :  { %v6523_v11 = vpop.eup %6522 }
 0x753   :  { %6526 = vrcp.f32 %v3954_v37  ;;  %v3955_v32 = vadd.f32 1.0, %v6523_v11  ;;  %v6525_v23 = vpop.eup %6524  ;;  %v9780_v11 = vld [vmem:[#allocation100_spill] sm:$0xff] }
 0x754   :  { %6528 = vtanh.f32 %v3782_v51  ;;  %v3956_v12 = vadd.f32 1.0, %v6525_v23  ;;  %v9779_v51 = vld [vmem:[#allocation99_spill] sm:$0xff]  ;;  %v9782_v23 = vld [vmem:[#allocation102_spill] sm:$0xff] }
 0x755   :  { %6530 = vrcp.f32 %v3955_v32  ;;  %v9781_v32 = vld [vmem:[#allocation101_spill] sm:$0xff] }
 0x756   :  { %6532 = vrcp.f32 %v3956_v12 }
 0x760   :  { %v6527_v1 = vpop.eup %6526 }
 0x761   :  { %v6529_v39 = vpop.eup %6528 }
 0x762   :  { %v6531_v42 = vpop.eup %6530  ;;  %v3968_v19 = vmul.f32 %v6529_v39, %v6527_v1  ;;  %v9783_v1 = vld [vmem:[#allocation103_spill] sm:$0xff] }
 0x763   :  { %v3967_v6 = vmul.f32 %v6531_v42, %v3965_v59  ;;  %v6533_v33 = vpop.eup %6532  ;;  %v9784_v59 = vld [vmem:[#allocation107_spill] sm:$0xff] }
 0x765   :  { %v8666_v54 = vadd.f32 %v3968_v19, %v3967_v6  ;;  %v9785_v19 = vld [vmem:[#allocation108_spill] sm:$0xff]  ;;  %v9786_v6 = vld [vmem:[#allocation109_spill] sm:$0xff] }
 0x767   :  { %6534 = vtanh.f32 %v8666_v54 }
 0x774   :  { %v6535_v41 = vpop.eup %6534 }
 0x775   :  { %v3971_v17 = vmul.f32 %v6535_v41, %v6533_v33  ;;  %v9787_v41 = vld [vmem:[#allocation110_spill] sm:$0xff] }
 0x777   :  { %v4000_v21 = vrot.slane %v3971_v17, 4  ;;  %6536 = vtanh.f32 %v3971_v17  ;;  %v9788_v17 = vld [vmem:[#allocation111_spill] sm:$0xff] }
 0x779   :  { %4067 = vmatmul.mubr.f32.vlgmr.msra.gmra.mxu1 %v4000_v21  ;;  %4138 = vmatmul.mubr.f32.vlgmr.msra.gmra.mxu0 %v4000_v21 }
 0x77a   :  { %4164 = vmatpush1.msra.mxu1 %v9699_v56  ;;  %4235 = vmatpush1.msra.mxu0 %v9700_v13 }
 0x77b   :  { %4165 = vmatprep.subr.mxu1 %v9701_v8  ;;  %4236 = vmatprep.subr.mxu0 %v9702_v5 }
 0x77c   :  { %4166 = vmatpush1.msra.mxu1 %v9703_v62  ;;  %4237 = vmatpush1.msra.mxu0 %v9704_v29 }
 0x77d   :  { %4167 = vmatprep.subr.mxu1 %v9705_v49  ;;  %4238 = vmatprep.subr.mxu0 %v9706_v44  ;;  %v9759_v44 = vld [vmem:[#allocation76_spill] sm:$0xff] }
 0x77e   :  { %v3853_v58 = vpop.f32.mrf.mxu1  ;;  %4168 = vmatpush1.msra.mxu1 %v9707_v30  ;;  %4239 = vmatpush1.msra.mxu0 %v9708_v28  ;;  %v3924_v5 = vpop.f32.mrf.mxu0  ;;  %v9760_v28 = vld [vmem:[#allocation77_spill] sm:$0xff] }
 0x77f   :  { %v3933_v56 = vrot.slane %v3853_v58, 6  ;;  %4169 = vmatprep.subr.mxu1 %v9709_v10  ;;  %4240 = vmatprep.subr.mxu0 %v9710_v50  ;;  %v9761_v10 = vld [vmem:[#allocation78_spill] sm:$0xff]  ;;  %v3935_v37 = vrot.slane %v3924_v5, 6 }
 0x780   :  { %v3855_v13 = vpop.f32.mrf.mxu1  ;;  %4170 = vmatpush1.msra.mxu1 %v9711_v26  ;;  %4241 = vmatpush1.msra.mxu0 %v9712_v61  ;;  %v3926_v26 = vpop.f32.mrf.mxu0  ;;  %v9762_v61 = vld [vmem:[#allocation80_spill] sm:$0xff]  ;;  %v9791_v58 = vld [vmem:[#allocation114_spill] sm:$0xff] }
 0x781   :  { %v3941_v8 = vadd.f32 %v3933_v56, %v9713_v38  ;;  %v3934_v62 = vrot.slane %v3855_v13, 6  ;;  %4171 = vmatprep.subr.mxu1 %v9714_v40  ;;  %4242 = vmatprep.subr.mxu0 %v9715_v63  ;;  %v9763_v40 = vld [vmem:[#allocation81_spill] sm:$0xff]  ;;  %v9764_v63 = vld [vmem:[#allocation82_spill] sm:$0xff]  ;;  %v3936_v60 = vrot.slane %v3926_v26, 6  ;;  %v3943_v12 = vadd.f32 %v3935_v37, %v8451_v45  ;;  %v9792_v56 = vld [vmem:[#allocation115_spill] sm:$0xff] }
 0x782   :  { %4172 = vmatpush1.msra.mxu1 %v9716_v20  ;;  %4243 = vmatpush1.msra.mxu0 %v9717_v43  ;;  %v9765_v20 = vld [vmem:[#allocation83_spill] sm:$0xff]  ;;  %v9766_v43 = vld [vmem:[#allocation84_spill] sm:$0xff]  ;;  %v9795_v5 = vld [vmem:[#allocation118_spill] sm:$0xff] }
 0x783   :  { %v5822_v29 = vmul.f32 -1.442695, %v3941_v8  ;;  %v3942_v49 = vadd.f32 %v3934_v62, %v8579_v3  ;;  %4173 = vmatprep.subr.mxu1 %v9718_v27  ;;  %4244 = vmatprep.subr.mxu0 %v9759_v44  ;;  %v9767_v27 = vld [vmem:[#allocation85_spill] sm:$0xff]  ;;  %v3944_v4 = vadd.f32 %v3936_v60, %v8409_v9  ;;  %v9793_v13 = vld [vmem:[#allocation116_spill] sm:$0xff]  ;;  %v9796_v62 = vld [vmem:[#allocation119_spill] sm:$0xff] }
 0x784   :  { %v8691_v30 = vpop.eup %6536  ;;  %4174 = vmatpush1.msra.mxu1 %v9760_v28  ;;  %4245 = vmatpush1.msra.mxu0 %v9761_v10  ;;  %v9794_v8 = vld [vmem:[#allocation117_spill] sm:$0xff] }
 0x785   :  { %6538 = vpow2.f32 %v5822_v29  ;;  %v5823_v50 = vmul.f32 -1.442695, %v3942_v49  ;;  %4175 = vmatprep.subr.mxu1 %v9762_v61  ;;  %4246 = vmatprep.subr.mxu0 %v9763_v40  ;;  %v5824_v39 = vmul.f32 -1.442695, %v3944_v4  ;;  %v9797_v29 = vld [vmem:[#allocation120_spill] sm:$0xff]  ;;  %v9798_v49 = vld [vmem:[#allocation121_spill] sm:$0xff] }
 0x786   :  { %4176 = vmatpush1.msra.mxu1 %v9764_v63  ;;  %4247 = vmatpush1.msra.mxu0 %v9765_v20 }
 0x787   :  { %6540 = vpow2.f32 %v5823_v50  ;;  %4177 = vmatprep.subr.mxu1 %v9766_v43  ;;  %4248 = vmatprep.subr.mxu0 %v9767_v27  ;;  %v3992_v50 = vrot.slane %v8638_v35, 2 }
 0x788   :  { %4178 = vmatpush1.msra.mxu1 %v9768_v18  ;;  %4249 = vmatpush1.msra.mxu0 %v9769_v2  ;;  %6542 = vpow2.f32 %v5824_v39 }
 0x789   :  { %4179 = vmatprep.subr.mxu1 %v9770_v25  ;;  %4250 = vmatprep.subr.mxu0 %v9771_v46 }
 0x78a   :  { %4180 = vmatpush1.msra.mxu1 %v9772_v7  ;;  %4251 = vmatpush1.msra.mxu0 %v9773_v36 }
 0x78b   :  { %4181 = vmatprep.subr.mxu1 %v9774_v31  ;;  %4252 = vmatprep.subr.mxu0 %v9775_v48 }
 0x78c   :  { %4182 = vmatpush1.msra.mxu1 %v9776_v16  ;;  %4253 = vmatpush1.msra.mxu0 %v9777_v53 }
 0x78d   :  { %4183 = vmatprep.subr.mxu1 %v9778_v57  ;;  %4254 = vmatprep.subr.mxu0 %v9779_v51 }
 0x78e   :  { %4184 = vmatpush1.msra.mxu1 %v9780_v11  ;;  %4255 = vmatpush1.msra.mxu0 %v9781_v32 }
 0x78f   :  { %4185 = vmatprep.subr.mxu1 %v9782_v23  ;;  %4256 = vmatprep.subr.mxu0 %v9783_v1 }
 0x790   :  { %4186 = vmatpush1.msra.mxu1 %v9745_v22  ;;  %4257 = vmatpush1.msra.mxu0 %v9746_v47  ;;  %v9789_v22 = vld [vmem:[#allocation112_spill] sm:$0xff]  ;;  %v9790_v47 = vld [vmem:[#allocation113_spill] sm:$0xff] }
 0x791   :  { %4187 = vmatprep.subr.mxu1 %v9747_v24  ;;  %4258 = vmatprep.subr.mxu0 %v9784_v59 }
 0x792   :  { %v6539_v42 = vpop.eup %6538  ;;  %4188 = vmatpush1.msra.mxu1 %v9785_v19  ;;  %4259 = vmatpush1.msra.mxu0 %v9786_v6 }
 0x793   :  { %v3981_v33 = vadd.f32 1.0, %v6539_v42  ;;  %4189 = vmatprep.subr.mxu1 %v9787_v41  ;;  %4260 = vmatprep.subr.mxu0 %v9788_v17 }
 0x794   :  { %v6541_v21 = vpop.eup %6540  ;;  %4190 = vmatpush1.msra.mxu1 %v9789_v22  ;;  %4261 = vmatpush1.msra.mxu0 %v9790_v47 }
 0x795   :  { %6544 = vrcp.f32 %v3981_v33  ;;  %v3982_v24 = vadd.f32 1.0, %v6541_v21  ;;  %4191 = vmatprep.subr.mxu1 %v9791_v58  ;;  %4262 = vmatprep.subr.mxu0 %v9792_v56  ;;  %v6543_v44 = vpop.eup %6542 }
 0x796   :  { %6546 = vtanh.f32 %v3943_v12  ;;  %4192 = vmatpush1.msra.mxu1 %v9793_v13  ;;  %4263 = vmatpush1.msra.mxu0 %v9794_v8  ;;  %v3983_v61 = vadd.f32 1.0, %v6543_v44  ;;  %v4329_v12 = vrot.slane %v8666_v54, 6 }
 0x797   :  { %6548 = vrcp.f32 %v3982_v24  ;;  %4193 = vmatprep.subr.mxu1 %v9795_v5  ;;  %4264 = vmatprep.subr.mxu0 %v9796_v62 }
 0x798   :  { %4194 = vmatpush1.msra.mxu1 %v9797_v29  ;;  %4227 = vmatprep.mubr.f32.mxu1 %v9561_v52  ;;  %6550 = vrcp.f32 %v3983_v61 }
 0x799   :  { %4265 = vmatpush1.msra.mxu0 %v9798_v49  ;;  %4298 = vmatprep.mubr.f32.mxu0 %v9561_v52 }
 0x7a2   :  { %v6545_v28 = vpop.eup %6544 }
 0x7a3   :  { %v6547_v10 = vpop.eup %6546 }
 0x7a4   :  { %v6549_v26 = vpop.eup %6548  ;;  %v3995_v40 = vmul.f32 %v6547_v10, %v6545_v28 }
 0x7a5   :  { %v3994_v63 = vmul.f32 %v6549_v26, %v3992_v50  ;;  %v6551_v43 = vpop.eup %6550 }
 0x7a7   :  { %v8740_v20 = vadd.f32 %v3995_v40, %v3994_v63 }
 0x7a9   :  { %6552 = vtanh.f32 %v8740_v20  ;;  %v4356_v61 = vrot.slane %v8740_v20, 2 }
 0x7b6   :  { %v6553_v27 = vpop.eup %6552 }
 0x7b7   :  { %v3998_v60 = vmul.f32 %v6553_v27, %v6551_v43 }
 0x7b9   :  { %v4161_v18 = vrot.slane %v3998_v60, 2  ;;  %6554 = vtanh.f32 %v3998_v60 }
 0x7bb   :  { %4228 = vmatmul.mubr.f32.vlgmr.msra.gmra.mxu1 %v4161_v18  ;;  %4299 = vmatmul.mubr.f32.vlgmr.msra.gmra.mxu0 %v4161_v18 }
 0x7c6   :  { %v8743_v2 = vpop.eup %6554 }
 0x839   :  { %v4068_v25 = vpop.f32.mrf.mxu1  ;;  %v4139_v36 = vpop.f32.mrf.mxu0 }
 0x83a   :  { %v4148_v35 = vrot.slane %v4068_v25, 2  ;;  %v4150_v37 = vrot.slane %v4139_v36, 2 }
 0x83b   :  { %v4070_v46 = vpop.f32.mrf.mxu1  ;;  %v4141_v53 = vpop.f32.mrf.mxu0 }
 0x83c   :  { %v4156_v7 = vadd.f32 %v4148_v35, %v9695_v34  ;;  %v4149_v31 = vrot.slane %v4070_v46, 2  ;;  %v4151_v57 = vrot.slane %v4141_v53, 2  ;;  %v4158_v23 = vadd.f32 %v4150_v37, %v9697_v55 }
 0x83e   :  { %v5825_v48 = vmul.f32 -1.442695, %v4156_v7  ;;  %v4157_v4 = vadd.f32 %v4149_v31, %v8552_v14  ;;  %v4159_v51 = vadd.f32 %v4151_v57, %v9696_v0 }
 0x840   :  { %6556 = vpow2.f32 %v5825_v48  ;;  %v5826_v16 = vmul.f32 -1.442695, %v4157_v4  ;;  %v5827_v11 = vmul.f32 -1.442695, %v4159_v51 }
 0x842   :  { %6558 = vpow2.f32 %v5826_v16 }
 0x843   :  { %6560 = vpow2.f32 %v5827_v11 }
 0x84d   :  { %v6557_v32 = vpop.eup %6556 }
 0x84e   :  { %v4318_v1 = vadd.f32 1.0, %v6557_v32 }
 0x84f   :  { %v6559_v39 = vpop.eup %6558 }
 0x850   :  { %6562 = vrcp.f32 %v4318_v1  ;;  %v4319_v34 = vadd.f32 1.0, %v6559_v39  ;;  %v6561_v14 = vpop.eup %6560 }
 0x851   :  { %6564 = vtanh.f32 %v4158_v23  ;;  %v4320_v6 = vadd.f32 1.0, %v6561_v14 }
 0x852   :  { %6566 = vrcp.f32 %v4319_v34 }
 0x853   :  { %6568 = vrcp.f32 %v4320_v6 }
 0x85d   :  { %v6563_v59 = vpop.eup %6562 }
 0x85e   :  { %v6565_v42 = vpop.eup %6564 }
 0x85f   :  { %v6567_v19 = vpop.eup %6566  ;;  %v4332_v0 = vmul.f32 %v6565_v42, %v6563_v59 }
 0x860   :  { %v4331_v33 = vmul.f32 %v6567_v19, %v4329_v12  ;;  %v6569_v55 = vpop.eup %6568 }
 0x862   :  { %v4333_v41 = vadd.f32 %v4332_v0, %v4331_v33 }
 0x864   :  { %6570 = vtanh.f32 %v4333_v41 }
 0x871   :  { %v6571_v17 = vpop.eup %6570 }
 0x872   :  { %v4335_v21 = vmul.f32 %v6571_v17, %v6569_v55 }
 0x874   :  { %6572 = vtanh.f32 %v4335_v21 }
 0x87b   :  { %v4229_v22 = vpop.f32.mrf.mxu1  ;;  %v4300_v54 = vpop.f32.mrf.mxu0 }
 0x87c   :  { %v4305_v47 = vadd.f32 %v4229_v22, %v9713_v38  ;;  %v4307_v44 = vadd.f32 %v4300_v54, %v8451_v45 }
 0x87d   :  { %v4231_v24 = vpop.f32.mrf.mxu1  ;;  %v4302_v5 = vpop.f32.mrf.mxu0 }
 0x87e   :  { %v5828_v58 = vmul.f32 -1.442695, %v4305_v47  ;;  %v4306_v56 = vadd.f32 %v4231_v24, %v8579_v3  ;;  %v4308_v62 = vadd.f32 %v4302_v5, %v8409_v9 }
 0x880   :  { %6574 = vpow2.f32 %v5828_v58  ;;  %v5829_v13 = vmul.f32 -1.442695, %v4306_v56  ;;  %v5830_v29 = vmul.f32 -1.442695, %v4308_v62 }
 0x881   :  { %v8752_v8 = vpop.eup %6572 }
 0x882   :  { %6576 = vpow2.f32 %v5829_v13 }
 0x883   :  { %6578 = vpow2.f32 %v5830_v29 }
 0x88d   :  { %v6575_v49 = vpop.eup %6574 }
 0x88e   :  { %v4345_v28 = vadd.f32 1.0, %v6575_v49 }
 0x88f   :  { %v6577_v10 = vpop.eup %6576 }
 0x890   :  { %6580 = vrcp.f32 %v4345_v28  ;;  %v4346_v38 = vadd.f32 1.0, %v6577_v10  ;;  %v6579_v3 = vpop.eup %6578 }
 0x891   :  { %6582 = vtanh.f32 %v4307_v44  ;;  %v4347_v63 = vadd.f32 1.0, %v6579_v3 }
 0x892   :  { %6584 = vrcp.f32 %v4346_v38 }
 0x893   :  { %6586 = vrcp.f32 %v4347_v63 }
 0x89d   :  { %v6581_v50 = vpop.eup %6580 }
 0x89e   :  { %v6583_v26 = vpop.eup %6582 }
 0x89f   :  { %v6585_v40 = vpop.eup %6584  ;;  %v4359_v43 = vmul.f32 %v6583_v26, %v6581_v50 }
 0x8a0   :  { %v4358_v9 = vmul.f32 %v6585_v40, %v4356_v61  ;;  %v6587_v45 = vpop.eup %6586 }
 0x8a2   :  { %v4360_v27 = vadd.f32 %v4359_v43, %v4358_v9 }
 0x8a4   :  { %6588 = vtanh.f32 %v4360_v27 }
 0x8b1   :  { %v6589_v60 = vpop.eup %6588 }
 0x8b2   :  { %v4362_v18 = vmul.f32 %v6589_v60, %v6587_v45 }
 0x8b4   :  { %6590 = vtanh.f32 %v4362_v18 }
 0x8c1   :  { %v6591_v25 = vpop.eup %6590 }
 0x8c2   :  { %6888 = dma.done.wait [#allocation5 + $0x2], 50176 }
 0x8c3   :  { %6889 = vsyncadd [#allocation5 + $0x2], 4294917120  ;;  %v4374_v35 = vsel %vm535_vm0, %v6591_v25, %v8743_v2  ;;  %v9799_v46 = vld [vmem:[#allocation122_spill] sm:$0xff]  ;;  %v4500_v36 = vld [vmem:[#allocation4 + $0x3c8] sm:$0xff] }
 0x8c4   :  { %v4376_v20 = vsel %vm662_vm13, %v4374_v35, %v8641_v15  ;;  %v4499_v31 = vld [vmem:[#allocation4 + $0x3c0] sm:$0xff]  ;;  %v4492_v48 = vld [vmem:[#allocation4 + $0x388] sm:$0xff]  ;;  %4675 = vmatprep.subr.mxu1 %v4500_v36  ;;  %v4502_v15 = vld [vmem:[#allocation4 + $0x3d8] sm:$0xff] }
 0x8c5   :  { %v8763_v7 = vsel %vm481_vm12, %v4376_v20, %v9799_v46  ;;  %v4491_v4 = vld [vmem:[#allocation4 + $0x380] sm:$0xff]  ;;  %4676 = vmatpush1.msra.mxu1 %v4499_v31  ;;  %v4484_v16 = vld [vmem:[#allocation4 + $0x348] sm:$0xff]  ;;  %4746 = vmatprep.subr.mxu0 %v4502_v15  ;;  %v4501_v51 = vld [vmem:[#allocation4 + $0x3d0] sm:$0xff] }
 0x8c6   :  { %4739 = vmatprep.mubr.f32.mxu1 %v8763_v7  ;;  %4810 = vmatprep.mubr.f32.mxu0 %v8763_v7  ;;  %v4483_v2 = vld [vmem:[#allocation4 + $0x340] sm:$0xff]  ;;  %v4476_v53 = vld [vmem:[#allocation4 + $0x308] sm:$0xff]  ;;  %v4494_v37 = vld [vmem:[#allocation4 + $0x398] sm:$0xff] }
 0x8c7   :  { %4677 = vmatprep.subr.mxu1 %v4492_v48  ;;  %v4475_v57 = vld [vmem:[#allocation4 + $0x300] sm:$0xff]  ;;  %v4468_v11 = vld [vmem:[#allocation4 + $0x2c8] sm:$0xff]  ;;  %4747 = vmatpush1.msra.mxu0 %v4501_v51  ;;  %v4493_v32 = vld [vmem:[#allocation4 + $0x390] sm:$0xff] }
 0x8c8   :  { %4678 = vmatpush1.msra.mxu1 %v4491_v4  ;;  %v4467_v23 = vld [vmem:[#allocation4 + $0x2c0] sm:$0xff]  ;;  %4748 = vmatprep.subr.mxu0 %v4494_v37  ;;  %v4486_v1 = vld [vmem:[#allocation4 + $0x358] sm:$0xff]  ;;  %v4485_v39 = vld [vmem:[#allocation4 + $0x350] sm:$0xff] }
 0x8c9   :  { %4679 = vmatprep.subr.mxu1 %v4484_v16  ;;  %v4460_v34 = vld [vmem:[#allocation4 + $0x288] sm:$0xff]  ;;  %4749 = vmatpush1.msra.mxu0 %v4493_v32  ;;  %v4478_v14 = vld [vmem:[#allocation4 + $0x318] sm:$0xff]  ;;  %v4459_v59 = vld [vmem:[#allocation4 + $0x280] sm:$0xff] }
 0x8ca   :  { %4680 = vmatpush1.msra.mxu1 %v4483_v2  ;;  %4750 = vmatprep.subr.mxu0 %v4486_v1  ;;  %v4477_v42 = vld [vmem:[#allocation4 + $0x310] sm:$0xff]  ;;  %v4452_v12 = vld [vmem:[#allocation4 + $0x248] sm:$0xff]  ;;  %v4470_v19 = vld [vmem:[#allocation4 + $0x2d8] sm:$0xff] }
 0x8cb   :  { %4681 = vmatprep.subr.mxu1 %v4476_v53  ;;  %4751 = vmatpush1.msra.mxu0 %v4485_v39  ;;  %v4451_v6 = vld [vmem:[#allocation4 + $0x240] sm:$0xff]  ;;  %v4469_v0 = vld [vmem:[#allocation4 + $0x2d0] sm:$0xff]  ;;  %v4444_v33 = vld [vmem:[#allocation4 + $0x208] sm:$0xff] }
 0x8cc   :  { %4682 = vmatpush1.msra.mxu1 %v4475_v57  ;;  %4752 = vmatprep.subr.mxu0 %v4478_v14  ;;  %v4462_v41 = vld [vmem:[#allocation4 + $0x298] sm:$0xff]  ;;  %v4443_v55 = vld [vmem:[#allocation4 + $0x200] sm:$0xff]  ;;  %v4461_v17 = vld [vmem:[#allocation4 + $0x290] sm:$0xff] }
 0x8cd   :  { %4683 = vmatprep.subr.mxu1 %v4468_v11  ;;  %4753 = vmatpush1.msra.mxu0 %v4477_v42  ;;  %v4436_v21 = vld [vmem:[#allocation4 + $0x1c8] sm:$0xff]  ;;  %v4454_v22 = vld [vmem:[#allocation4 + $0x258] sm:$0xff]  ;;  %v4435_v47 = vld [vmem:[#allocation4 + $0x1c0] sm:$0xff] }
 0x8ce   :  { %4684 = vmatpush1.msra.mxu1 %v4467_v23  ;;  %4754 = vmatprep.subr.mxu0 %v4470_v19  ;;  %v4453_v24 = vld [vmem:[#allocation4 + $0x250] sm:$0xff]  ;;  %v4428_v58 = vld [vmem:[#allocation4 + $0x188] sm:$0xff]  ;;  %v4446_v56 = vld [vmem:[#allocation4 + $0x218] sm:$0xff] }
 0x8cf   :  { %4685 = vmatprep.subr.mxu1 %v4460_v34  ;;  %4755 = vmatpush1.msra.mxu0 %v4469_v0  ;;  %v4427_v54 = vld [vmem:[#allocation4 + $0x180] sm:$0xff]  ;;  %v4445_v13 = vld [vmem:[#allocation4 + $0x210] sm:$0xff]  ;;  %v4420_v5 = vld [vmem:[#allocation4 + $0x148] sm:$0xff] }
 0x8d0   :  { %4686 = vmatpush1.msra.mxu1 %v4459_v59  ;;  %4756 = vmatprep.subr.mxu0 %v4462_v41  ;;  %v4438_v62 = vld [vmem:[#allocation4 + $0x1d8] sm:$0xff]  ;;  %v4419_v29 = vld [vmem:[#allocation4 + $0x140] sm:$0xff]  ;;  %v4437_v49 = vld [vmem:[#allocation4 + $0x1d0] sm:$0xff] }
 0x8d1   :  { %4687 = vmatprep.subr.mxu1 %v4452_v12  ;;  %4757 = vmatpush1.msra.mxu0 %v4461_v17  ;;  %v4412_v44 = vld [vmem:[#allocation4 + $0x108] sm:$0xff]  ;;  %v4430_v28 = vld [vmem:[#allocation4 + $0x198] sm:$0xff]  ;;  %v4411_v10 = vld [vmem:[#allocation4 + $0x100] sm:$0xff] }
 0x8d2   :  { %4688 = vmatpush1.msra.mxu1 %v4451_v6  ;;  %4758 = vmatprep.subr.mxu0 %v4454_v22  ;;  %v4429_v38 = vld [vmem:[#allocation4 + $0x190] sm:$0xff]  ;;  %v4404_v3 = vld [vmem:[#allocation4 + $0xc8] sm:$0xff]  ;;  %v4422_v50 = vld [vmem:[#allocation4 + $0x158] sm:$0xff] }
 0x8d3   :  { %4689 = vmatprep.subr.mxu1 %v4444_v33  ;;  %4759 = vmatpush1.msra.mxu0 %v4453_v24  ;;  %v4403_v26 = vld [vmem:[#allocation4 + $0xc0] sm:$0xff]  ;;  %v4421_v61 = vld [vmem:[#allocation4 + $0x150] sm:$0xff]  ;;  %v4396_v40 = vld [vmem:[#allocation4 + $0x88] sm:$0xff] }
 0x8d4   :  { %4690 = vmatpush1.msra.mxu1 %v4443_v55  ;;  %4760 = vmatprep.subr.mxu0 %v4446_v56  ;;  %v4414_v63 = vld [vmem:[#allocation4 + $0x118] sm:$0xff]  ;;  %v4395_v43 = vld [vmem:[#allocation4 + $0x80] sm:$0xff]  ;;  %v4413_v9 = vld [vmem:[#allocation4 + $0x110] sm:$0xff] }
 0x8d5   :  { %4691 = vmatprep.subr.mxu1 %v4436_v21  ;;  %4761 = vmatpush1.msra.mxu0 %v4445_v13  ;;  %v4388_v27 = vld [vmem:[#allocation4 + $0x48] sm:$0xff]  ;;  %v4406_v45 = vld [vmem:[#allocation4 + $0xd8] sm:$0xff]  ;;  %v4387_v60 = vld [vmem:[#allocation4 + $0x40] sm:$0xff] }
 0x8d6   :  { %4692 = vmatpush1.msra.mxu1 %v4435_v47  ;;  %4762 = vmatprep.subr.mxu0 %v4438_v62  ;;  %v4405_v18 = vld [vmem:[#allocation4 + $0xd0] sm:$0xff]  ;;  %v4380_v25 = vld [vmem:[#allocation4 + $0x8] sm:$0xff]  ;;  %v4398_v35 = vld [vmem:[#allocation4 + $0x98] sm:$0xff] }
 0x8d7   :  { %4693 = vmatprep.subr.mxu1 %v4428_v58  ;;  %4763 = vmatpush1.msra.mxu0 %v4437_v49  ;;  %v4379_v20 = vld [vmem:[#allocation4] sm:$0xff]  ;;  %v4397_v46 = vld [vmem:[#allocation4 + $0x90] sm:$0xff]  ;;  %v4628_v36 = vld [vmem:[#allocation4 + $0x7c8] sm:$0xff] }
 0x8d8   :  { %4694 = vmatpush1.msra.mxu1 %v4427_v54  ;;  %4764 = vmatprep.subr.mxu0 %v4430_v28  ;;  %v4390_v31 = vld [vmem:[#allocation4 + $0x58] sm:$0xff]  ;;  %v4627_v48 = vld [vmem:[#allocation4 + $0x7c0] sm:$0xff]  ;;  %v4389_v4 = vld [vmem:[#allocation4 + $0x50] sm:$0xff] }
 0x8d9   :  { %4695 = vmatprep.subr.mxu1 %v4420_v5  ;;  %4765 = vmatpush1.msra.mxu0 %v4429_v38  ;;  %v4620_v16 = vld [vmem:[#allocation4 + $0x788] sm:$0xff]  ;;  %v4382_v2 = vld [vmem:[#allocation4 + $0x18] sm:$0xff]  ;;  %v4619_v53 = vld [vmem:[#allocation4 + $0x780] sm:$0xff] }
 0x8da   :  { %4696 = vmatpush1.msra.mxu1 %v4419_v29  ;;  %4766 = vmatprep.subr.mxu0 %v4422_v50  ;;  %v4381_v15 = vld [vmem:[#allocation4 + $0x10] sm:$0xff]  ;;  %v4612_v57 = vld [vmem:[#allocation4 + $0x748] sm:$0xff]  ;;  %v4630_v51 = vld [vmem:[#allocation4 + $0x7d8] sm:$0xff] }
 0x8db   :  { %4697 = vmatprep.subr.mxu1 %v4412_v44  ;;  %4767 = vmatpush1.msra.mxu0 %v4421_v61  ;;  %v4611_v37 = vld [vmem:[#allocation4 + $0x740] sm:$0xff]  ;;  %v4629_v11 = vld [vmem:[#allocation4 + $0x7d0] sm:$0xff]  ;;  %v4604_v32 = vld [vmem:[#allocation4 + $0x708] sm:$0xff] }
 0x8dc   :  { %4698 = vmatpush1.msra.mxu1 %v4411_v10  ;;  %4768 = vmatprep.subr.mxu0 %v4414_v63  ;;  %v4622_v23 = vld [vmem:[#allocation4 + $0x798] sm:$0xff]  ;;  %v4603_v1 = vld [vmem:[#allocation4 + $0x700] sm:$0xff]  ;;  %v4621_v39 = vld [vmem:[#allocation4 + $0x790] sm:$0xff] }
 0x8dd   :  { %4699 = vmatprep.subr.mxu1 %v4404_v3  ;;  %4769 = vmatpush1.msra.mxu0 %v4413_v9  ;;  %v4596_v34 = vld [vmem:[#allocation4 + $0x6c8] sm:$0xff]  ;;  %v4614_v14 = vld [vmem:[#allocation4 + $0x758] sm:$0xff]  ;;  %v4595_v59 = vld [vmem:[#allocation4 + $0x6c0] sm:$0xff] }
 0x8de   :  { %4700 = vmatpush1.msra.mxu1 %v4403_v26  ;;  %4770 = vmatprep.subr.mxu0 %v4406_v45  ;;  %v4613_v42 = vld [vmem:[#allocation4 + $0x750] sm:$0xff]  ;;  %v4588_v12 = vld [vmem:[#allocation4 + $0x688] sm:$0xff]  ;;  %v4606_v19 = vld [vmem:[#allocation4 + $0x718] sm:$0xff] }
 0x8df   :  { %4701 = vmatprep.subr.mxu1 %v4396_v40  ;;  %4771 = vmatpush1.msra.mxu0 %v4405_v18  ;;  %v4587_v6 = vld [vmem:[#allocation4 + $0x680] sm:$0xff]  ;;  %v4605_v0 = vld [vmem:[#allocation4 + $0x710] sm:$0xff]  ;;  %v4580_v33 = vld [vmem:[#allocation4 + $0x648] sm:$0xff] }
 0x8e0   :  { %4702 = vmatpush1.msra.mxu1 %v4395_v43  ;;  %4772 = vmatprep.subr.mxu0 %v4398_v35  ;;  %v4598_v41 = vld [vmem:[#allocation4 + $0x6d8] sm:$0xff]  ;;  %v4579_v55 = vld [vmem:[#allocation4 + $0x640] sm:$0xff]  ;;  %v4597_v17 = vld [vmem:[#allocation4 + $0x6d0] sm:$0xff] }
 0x8e1   :  { %4703 = vmatprep.subr.mxu1 %v4388_v27  ;;  %4773 = vmatpush1.msra.mxu0 %v4397_v46  ;;  %v4572_v21 = vld [vmem:[#allocation4 + $0x608] sm:$0xff]  ;;  %v4590_v22 = vld [vmem:[#allocation4 + $0x698] sm:$0xff]  ;;  %v4571_v47 = vld [vmem:[#allocation4 + $0x600] sm:$0xff] }
 0x8e2   :  { %4704 = vmatpush1.msra.mxu1 %v4387_v60  ;;  %4774 = vmatprep.subr.mxu0 %v4390_v31  ;;  %v4589_v24 = vld [vmem:[#allocation4 + $0x690] sm:$0xff]  ;;  %v4564_v58 = vld [vmem:[#allocation4 + $0x5c8] sm:$0xff]  ;;  %v4582_v56 = vld [vmem:[#allocation4 + $0x658] sm:$0xff] }
 0x8e3   :  { %4705 = vmatprep.subr.mxu1 %v4380_v25  ;;  %4775 = vmatpush1.msra.mxu0 %v4389_v4  ;;  %v4563_v54 = vld [vmem:[#allocation4 + $0x5c0] sm:$0xff]  ;;  %v4581_v13 = vld [vmem:[#allocation4 + $0x650] sm:$0xff]  ;;  %v4556_v5 = vld [vmem:[#allocation4 + $0x588] sm:$0xff] }
 0x8e4   :  { %4706 = vmatpush1.msra.mxu1 %v4379_v20  ;;  %4776 = vmatprep.subr.mxu0 %v4382_v2  ;;  %v4574_v62 = vld [vmem:[#allocation4 + $0x618] sm:$0xff]  ;;  %v4555_v29 = vld [vmem:[#allocation4 + $0x580] sm:$0xff]  ;;  %v4573_v49 = vld [vmem:[#allocation4 + $0x610] sm:$0xff] }
 0x8e5   :  { %4707 = vmatprep.subr.mxu1 %v4628_v36  ;;  %4777 = vmatpush1.msra.mxu0 %v4381_v15  ;;  %v4548_v44 = vld [vmem:[#allocation4 + $0x548] sm:$0xff]  ;;  %v4566_v28 = vld [vmem:[#allocation4 + $0x5d8] sm:$0xff]  ;;  %v4547_v10 = vld [vmem:[#allocation4 + $0x540] sm:$0xff] }
 0x8e6   :  { %4708 = vmatpush2.msra.mxu1 %v4627_v48  ;;  %4778 = vmatprep.subr.mxu0 %v4630_v51  ;;  %v4565_v38 = vld [vmem:[#allocation4 + $0x5d0] sm:$0xff]  ;;  %v4540_v3 = vld [vmem:[#allocation4 + $0x508] sm:$0xff]  ;;  %v4558_v50 = vld [vmem:[#allocation4 + $0x598] sm:$0xff] }
 0x8e7   :  { %4709 = vmatprep.subr.mxu1 %v4620_v16  ;;  %4779 = vmatpush2.msra.mxu0 %v4629_v11  ;;  %v4539_v26 = vld [vmem:[#allocation4 + $0x500] sm:$0xff]  ;;  %v4557_v61 = vld [vmem:[#allocation4 + $0x590] sm:$0xff]  ;;  %v4532_v40 = vld [vmem:[#allocation4 + $0x4c8] sm:$0xff] }
 0x8e8   :  { %4710 = vmatpush2.msra.mxu1 %v4619_v53  ;;  %4780 = vmatprep.subr.mxu0 %v4622_v23  ;;  %v4550_v63 = vld [vmem:[#allocation4 + $0x558] sm:$0xff]  ;;  %v4531_v43 = vld [vmem:[#allocation4 + $0x4c0] sm:$0xff]  ;;  %v4549_v9 = vld [vmem:[#allocation4 + $0x550] sm:$0xff] }
 0x8e9   :  { %4711 = vmatprep.subr.mxu1 %v4612_v57  ;;  %4781 = vmatpush2.msra.mxu0 %v4621_v39  ;;  %v4524_v27 = vld [vmem:[#allocation4 + $0x488] sm:$0xff]  ;;  %v9800_v45 = vld [vmem:[#allocation33_spill] sm:$0xff]  ;;  %v4542_v25 = vld [vmem:[#allocation4 + $0x518] sm:$0xff] }
 0x8ea   :  { %4712 = vmatpush2.msra.mxu1 %v4611_v37  ;;  %4782 = vmatprep.subr.mxu0 %v4614_v14  ;;  %v9801_v60 = vld [vmem:[#allocation89_spill] sm:$0xff]  ;;  %v4523_v35 = vld [vmem:[#allocation4 + $0x480] sm:$0xff]  ;;  %v4516_v46 = vld [vmem:[#allocation4 + $0x448] sm:$0xff] }
 0x8eb   :  { %4713 = vmatprep.subr.mxu1 %v4604_v32  ;;  %4783 = vmatpush2.msra.mxu0 %v4613_v42  ;;  %v4373_v18 = vsel %vm535_vm0, %v9801_v60, %v9800_v45  ;;  %v4541_v20 = vld [vmem:[#allocation4 + $0x510] sm:$0xff]  ;;  %v4534_v36 = vld [vmem:[#allocation4 + $0x4d8] sm:$0xff]  ;;  %v4515_v31 = vld [vmem:[#allocation4 + $0x440] sm:$0xff]  ;;  %vm5732_vm0 = vcmask 50176  }
 0x8ec   :  { %4714 = vmatpush2.msra.mxu1 %v4603_v1  ;;  %4784 = vmatprep.subr.mxu0 %v4606_v19  ;;  %v4375_v48 = vsel %vm662_vm13, %v4373_v18, %v8691_v30  ;;  %v4533_v4 = vld [vmem:[#allocation4 + $0x4d0] sm:$0xff]  ;;  %v4508_v16 = vld [vmem:[#allocation4 + $0x408] sm:$0xff]  ;;  %v4526_v2 = vld [vmem:[#allocation4 + $0x498] sm:$0xff] }
 0x8ed   :  { %4715 = vmatprep.subr.mxu1 %v4596_v34  ;;  %4785 = vmatpush2.msra.mxu0 %v4605_v0  ;;  %v4507_v53 = vld [vmem:[#allocation4 + $0x400] sm:$0xff]  ;;  %v4525_v15 = vld [vmem:[#allocation4 + $0x490] sm:$0xff]  ;;  %v8774_v57 = vsel %vm481_vm12, %v4375_v48, %v8752_v8  ;;  %v4518_v51 = vld [vmem:[#allocation4 + $0x458] sm:$0xff] }
 0x8ee   :  { %4716 = vmatpush2.msra.mxu1 %v4595_v59  ;;  %4786 = vmatprep.subr.mxu0 %v4598_v41  ;;  %v4517_v30 = vld [vmem:[#allocation4 + $0x450] sm:$0xff]  ;;  %v4504_v37 = vld [vmem:[#allocation4 + $0x3e8] sm:$0xff]  ;;  %v4510_v11 = vld [vmem:[#allocation4 + $0x418] sm:$0xff] }
 0x8ef   :  { %4717 = vmatprep.subr.mxu1 %v4588_v12  ;;  %4787 = vmatpush2.msra.mxu0 %v4597_v17  ;;  %v4503_v32 = vld [vmem:[#allocation4 + $0x3e0] sm:$0xff]  ;;  %v4509_v23 = vld [vmem:[#allocation4 + $0x410] sm:$0xff]  ;;  %v4496_v1 = vld [vmem:[#allocation4 + $0x3a8] sm:$0xff] }
 0x8f0   :  { %4718 = vmatpush2.msra.mxu1 %v4587_v6  ;;  %4788 = vmatprep.subr.mxu0 %v4590_v22  ;;  %v4506_v39 = vld [vmem:[#allocation4 + $0x3f8] sm:$0xff]  ;;  %v4505_v8 = vld [vmem:[#allocation4 + $0x3f0] sm:$0xff]  ;;  %v4495_v34 = vld [vmem:[#allocation4 + $0x3a0] sm:$0xff] }
 0x8f1   :  { %4719 = vmatprep.subr.mxu1 %v4580_v33  ;;  %4789 = vmatpush2.msra.mxu0 %v4589_v24  ;;  %v4498_v14 = vld [vmem:[#allocation4 + $0x3b8] sm:$0xff]  ;;  %v4488_v59 = vld [vmem:[#allocation4 + $0x368] sm:$0xff]  ;;  %v4497_v42 = vld [vmem:[#allocation4 + $0x3b0] sm:$0xff] }
 0x8f2   :  { %4720 = vmatpush2.msra.mxu1 %v4579_v55  ;;  %4790 = vmatprep.subr.mxu0 %v4582_v56  ;;  %v4487_v12 = vld [vmem:[#allocation4 + $0x360] sm:$0xff]  ;;  %v4490_v19 = vld [vmem:[#allocation4 + $0x378] sm:$0xff]  ;;  %v4480_v6 = vld [vmem:[#allocation4 + $0x328] sm:$0xff] }
 0x8f3   :  { %4721 = vmatprep.subr.mxu1 %v4572_v21  ;;  %4791 = vmatpush2.msra.mxu0 %v4581_v13  ;;  %v4489_v0 = vld [vmem:[#allocation4 + $0x370] sm:$0xff]  ;;  %v4479_v33 = vld [vmem:[#allocation4 + $0x320] sm:$0xff]  ;;  %v4482_v41 = vld [vmem:[#allocation4 + $0x338] sm:$0xff] }
 0x8f4   :  { %4722 = vmatpush2.msra.mxu1 %v4571_v47  ;;  %4792 = vmatprep.subr.mxu0 %v4574_v62  ;;  %v4472_v55 = vld [vmem:[#allocation4 + $0x2e8] sm:$0xff]  ;;  %v4481_v17 = vld [vmem:[#allocation4 + $0x330] sm:$0xff]  ;;  %v4471_v21 = vld [vmem:[#allocation4 + $0x2e0] sm:$0xff] }
 0x8f5   :  { %4723 = vmatprep.subr.mxu1 %v4564_v58  ;;  %4793 = vmatpush2.msra.mxu0 %v4573_v49  ;;  %v4474_v22 = vld [vmem:[#allocation4 + $0x2f8] sm:$0xff]  ;;  %v4464_v47 = vld [vmem:[#allocation4 + $0x2a8] sm:$0xff]  ;;  %v4473_v24 = vld [vmem:[#allocation4 + $0x2f0] sm:$0xff] }
 0x8f6   :  { %4724 = vmatpush2.msra.mxu1 %v4563_v54  ;;  %4794 = vmatprep.subr.mxu0 %v4566_v28  ;;  %v4463_v58 = vld [vmem:[#allocation4 + $0x2a0] sm:$0xff]  ;;  %v4466_v56 = vld [vmem:[#allocation4 + $0x2b8] sm:$0xff]  ;;  %v4456_v54 = vld [vmem:[#allocation4 + $0x268] sm:$0xff] }
 0x8f7   :  { %4725 = vmatprep.subr.mxu1 %v4556_v5  ;;  %4795 = vmatpush2.msra.mxu0 %v4565_v38  ;;  %v4465_v13 = vld [vmem:[#allocation4 + $0x2b0] sm:$0xff]  ;;  %v4455_v5 = vld [vmem:[#allocation4 + $0x260] sm:$0xff]  ;;  %v4458_v62 = vld [vmem:[#allocation4 + $0x278] sm:$0xff] }
 0x8f8   :  { %4726 = vmatpush2.msra.mxu1 %v4555_v29  ;;  %4796 = vmatprep.subr.mxu0 %v4558_v50  ;;  %v4448_v29 = vld [vmem:[#allocation4 + $0x228] sm:$0xff]  ;;  %v4457_v49 = vld [vmem:[#allocation4 + $0x270] sm:$0xff]  ;;  %v4450_v28 = vld [vmem:[#allocation4 + $0x238] sm:$0xff] }
 0x8f9   :  { %4727 = vmatprep.subr.mxu1 %v4548_v44  ;;  %4797 = vmatpush2.msra.mxu0 %v4557_v61  ;;  %v4447_v44 = vld [vmem:[#allocation4 + $0x220] sm:$0xff]  ;;  %v4449_v38 = vld [vmem:[#allocation4 + $0x230] sm:$0xff]  ;;  %v4442_v50 = vld [vmem:[#allocation4 + $0x1f8] sm:$0xff] }
 0x8fa   :  { %4728 = vmatpush2.msra.mxu1 %v4547_v10  ;;  %4798 = vmatprep.subr.mxu0 %v4550_v63  ;;  %v4440_v10 = vld [vmem:[#allocation4 + $0x1e8] sm:$0xff]  ;;  %v4441_v61 = vld [vmem:[#allocation4 + $0x1f0] sm:$0xff]  ;;  %v4434_v63 = vld [vmem:[#allocation4 + $0x1b8] sm:$0xff] }
 0x8fb   :  { %4729 = vmatprep.subr.mxu1 %v4540_v3  ;;  %4799 = vmatpush2.msra.mxu0 %v4549_v9  ;;  %v4439_v3 = vld [vmem:[#allocation4 + $0x1e0] sm:$0xff]  ;;  %v4433_v9 = vld [vmem:[#allocation4 + $0x1b0] sm:$0xff]  ;;  %v4426_v45 = vld [vmem:[#allocation4 + $0x178] sm:$0xff] }
 0x8fc   :  { %4730 = vmatpush2.msra.mxu1 %v4539_v26  ;;  %4800 = vmatprep.subr.mxu0 %v4542_v25  ;;  %v4432_v26 = vld [vmem:[#allocation4 + $0x1a8] sm:$0xff]  ;;  %v4425_v18 = vld [vmem:[#allocation4 + $0x170] sm:$0xff]  ;;  %v4415_v25 = vld [vmem:[#allocation4 + $0x120] sm:$0xff] }
 0x8fd   :  { %4731 = vmatprep.subr.mxu1 %v4532_v40  ;;  %4801 = vmatpush2.msra.mxu0 %v4541_v20  ;;  %v4431_v40 = vld [vmem:[#allocation4 + $0x1a0] sm:$0xff]  ;;  %v4416_v60 = vld [vmem:[#allocation4 + $0x128] sm:$0xff] }
 0x8fe   :  { %4732 = vmatpush2.msra.mxu1 %v4531_v43  ;;  %4802 = vmatprep.subr.mxu0 %v4534_v36  ;;  %v4424_v43 = vld [vmem:[#allocation4 + $0x168] sm:$0xff]  ;;  %v4407_v36 = vld [vmem:[#allocation4 + $0xe0] sm:$0xff] }
 0x8ff   :  { %4733 = vmatprep.subr.mxu1 %v4524_v27  ;;  %4803 = vmatpush2.msra.mxu0 %v4533_v4  ;;  %v4423_v27 = vld [vmem:[#allocation4 + $0x160] sm:$0xff]  ;;  %v4408_v20 = vld [vmem:[#allocation4 + $0xe8] sm:$0xff]  ;;  %v4409_v4 = vld [vmem:[#allocation4 + $0xf0] sm:$0xff] }
 0x900   :  { %4734 = vmatpush2.msra.mxu1 %v4523_v35  ;;  %4804 = vmatprep.subr.mxu0 %v4526_v2  ;;  %v4418_v35 = vld [vmem:[#allocation4 + $0x138] sm:$0xff]  ;;  %v4400_v48 = vld [vmem:[#allocation4 + $0xa8] sm:$0xff] }
 0x901   :  { %4735 = vmatprep.subr.mxu1 %v4516_v46  ;;  %4805 = vmatpush2.msra.mxu0 %v4525_v15  ;;  %v4417_v46 = vld [vmem:[#allocation4 + $0x130] sm:$0xff]  ;;  %v4402_v2 = vld [vmem:[#allocation4 + $0xb8] sm:$0xff] }
 0x902   :  { %4736 = vmatpush2.msra.mxu1 %v4515_v31  ;;  %4806 = vmatprep.subr.mxu0 %v4518_v51  ;;  %v4410_v31 = vld [vmem:[#allocation4 + $0xf8] sm:$0xff]  ;;  %v4401_v15 = vld [vmem:[#allocation4 + $0xb0] sm:$0xff]  ;;  %v4391_v51 = vld [vmem:[#allocation4 + $0x60] sm:$0xff] }
 0x903   :  { %4737 = vmatprep.subr.mxu1 %v4508_v16  ;;  %4807 = vmatpush2.msra.mxu0 %v4517_v30  ;;  %v4399_v16 = vld [vmem:[#allocation4 + $0xa0] sm:$0xff]  ;;  %v4394_v30 = vld [vmem:[#allocation4 + $0x78] sm:$0xff] }
 0x904   :  { %4738 = vmatpush2.msra.mxu1 %v4507_v53  ;;  %4808 = vmatprep.subr.mxu0 %v4510_v11  ;;  %v4392_v53 = vld [vmem:[#allocation4 + $0x68] sm:$0xff]  ;;  %v4393_v11 = vld [vmem:[#allocation4 + $0x70] sm:$0xff] }
 0x905   :  { %4740 = vmatmul.mubr.f32.vlgmr.msra.gmra.mxu1 %v8774_v57  ;;  %4817 = vmatprep.subr.mxu1 %v4504_v37  ;;  %v4384_v37 = vld [vmem:[#allocation4 + $0x28] sm:$0xff] }
 0x906   :  { %4818 = vmatpush1.msra.mxu1 %v4503_v32  ;;  %4809 = vmatpush2.msra.mxu0 %v4509_v23  ;;  %v4383_v32 = vld [vmem:[#allocation4 + $0x20] sm:$0xff]  ;;  %v4386_v23 = vld [vmem:[#allocation4 + $0x38] sm:$0xff] }
 0x907   :  { %4819 = vmatprep.subr.mxu1 %v4496_v1  ;;  %4811 = vmatmul.mubr.f32.vlgmr.msra.gmra.mxu0 %v8774_v57  ;;  %v4632_v1 = vld [vmem:[#allocation4 + $0x7e8] sm:$0xff] }
 0x908   :  { %4887 = vmatprep.subr.mxu0 %v4506_v39  ;;  %4820 = vmatpush1.msra.mxu1 %v4495_v34  ;;  %v4385_v39 = vld [vmem:[#allocation4 + $0x30] sm:$0xff]  ;;  %v4634_v34 = vld [vmem:[#allocation4 + $0x7f8] sm:$0xff] }
 0x909   :  { %4888 = vmatpush1.msra.mxu0 %v4505_v8  ;;  %4821 = vmatprep.subr.mxu1 %v4488_v59  ;;  %v4631_v8 = vld [vmem:[#allocation4 + $0x7e0] sm:$0xff]  ;;  %v4633_v59 = vld [vmem:[#allocation4 + $0x7f0] sm:$0xff] }
 0x90a   :  { %4889 = vmatprep.subr.mxu0 %v4498_v14  ;;  %4822 = vmatpush1.msra.mxu1 %v4487_v12  ;;  %v4624_v14 = vld [vmem:[#allocation4 + $0x7a8] sm:$0xff]  ;;  %v4626_v12 = vld [vmem:[#allocation4 + $0x7b8] sm:$0xff] }
 0x90b   :  { %4890 = vmatpush1.msra.mxu0 %v4497_v42  ;;  %4823 = vmatprep.subr.mxu1 %v4480_v6  ;;  %v4623_v42 = vld [vmem:[#allocation4 + $0x7a0] sm:$0xff]  ;;  %v4625_v6 = vld [vmem:[#allocation4 + $0x7b0] sm:$0xff] }
 0x90c   :  { %4891 = vmatprep.subr.mxu0 %v4490_v19  ;;  %4824 = vmatpush1.msra.mxu1 %v4479_v33  ;;  %v4616_v19 = vld [vmem:[#allocation4 + $0x768] sm:$0xff]  ;;  %v4618_v33 = vld [vmem:[#allocation4 + $0x778] sm:$0xff] }
 0x90d   :  { %4892 = vmatpush1.msra.mxu0 %v4489_v0  ;;  %4825 = vmatprep.subr.mxu1 %v4472_v55  ;;  %v4615_v0 = vld [vmem:[#allocation4 + $0x760] sm:$0xff]  ;;  %v4617_v55 = vld [vmem:[#allocation4 + $0x770] sm:$0xff] }
 0x90e   :  { %4893 = vmatprep.subr.mxu0 %v4482_v41  ;;  %4826 = vmatpush1.msra.mxu1 %v4471_v21  ;;  %v4608_v41 = vld [vmem:[#allocation4 + $0x728] sm:$0xff]  ;;  %v4610_v21 = vld [vmem:[#allocation4 + $0x738] sm:$0xff] }
 0x90f   :  { %4894 = vmatpush1.msra.mxu0 %v4481_v17  ;;  %4827 = vmatprep.subr.mxu1 %v4464_v47  ;;  %v4607_v17 = vld [vmem:[#allocation4 + $0x720] sm:$0xff]  ;;  %v4609_v47 = vld [vmem:[#allocation4 + $0x730] sm:$0xff] }
 0x910   :  { %4895 = vmatprep.subr.mxu0 %v4474_v22  ;;  %4828 = vmatpush1.msra.mxu1 %v4463_v58  ;;  %v4600_v22 = vld [vmem:[#allocation4 + $0x6e8] sm:$0xff]  ;;  %v4602_v58 = vld [vmem:[#allocation4 + $0x6f8] sm:$0xff] }
 0x911   :  { %4896 = vmatpush1.msra.mxu0 %v4473_v24  ;;  %4829 = vmatprep.subr.mxu1 %v4456_v54  ;;  %v4599_v24 = vld [vmem:[#allocation4 + $0x6e0] sm:$0xff]  ;;  %v4601_v54 = vld [vmem:[#allocation4 + $0x6f0] sm:$0xff] }
 0x912   :  { %4897 = vmatprep.subr.mxu0 %v4466_v56  ;;  %4830 = vmatpush1.msra.mxu1 %v4455_v5  ;;  %v4592_v56 = vld [vmem:[#allocation4 + $0x6a8] sm:$0xff]  ;;  %v4594_v5 = vld [vmem:[#allocation4 + $0x6b8] sm:$0xff] }
 0x913   :  { %4898 = vmatpush1.msra.mxu0 %v4465_v13  ;;  %4831 = vmatprep.subr.mxu1 %v4448_v29  ;;  %v4591_v13 = vld [vmem:[#allocation4 + $0x6a0] sm:$0xff]  ;;  %v4593_v29 = vld [vmem:[#allocation4 + $0x6b0] sm:$0xff] }
 0x914   :  { %4899 = vmatprep.subr.mxu0 %v4458_v62  ;;  %4832 = vmatpush1.msra.mxu1 %v4447_v44  ;;  %v4584_v62 = vld [vmem:[#allocation4 + $0x668] sm:$0xff]  ;;  %v4586_v44 = vld [vmem:[#allocation4 + $0x678] sm:$0xff] }
 0x915   :  { %4900 = vmatpush1.msra.mxu0 %v4457_v49  ;;  %4833 = vmatprep.subr.mxu1 %v4440_v10  ;;  %v4583_v49 = vld [vmem:[#allocation4 + $0x660] sm:$0xff]  ;;  %v4585_v10 = vld [vmem:[#allocation4 + $0x670] sm:$0xff] }
 0x916   :  { %4901 = vmatprep.subr.mxu0 %v4450_v28  ;;  %4834 = vmatpush1.msra.mxu1 %v4439_v3  ;;  %v4576_v28 = vld [vmem:[#allocation4 + $0x628] sm:$0xff]  ;;  %v4578_v3 = vld [vmem:[#allocation4 + $0x638] sm:$0xff] }
 0x917   :  { %4902 = vmatpush1.msra.mxu0 %v4449_v38  ;;  %4835 = vmatprep.subr.mxu1 %v4432_v26  ;;  %v4575_v38 = vld [vmem:[#allocation4 + $0x620] sm:$0xff]  ;;  %v4577_v26 = vld [vmem:[#allocation4 + $0x630] sm:$0xff] }
 0x918   :  { %4903 = vmatprep.subr.mxu0 %v4442_v50  ;;  %4836 = vmatpush1.msra.mxu1 %v4431_v40  ;;  %v4568_v50 = vld [vmem:[#allocation4 + $0x5e8] sm:$0xff] }
 0x919   :  { %4904 = vmatpush1.msra.mxu0 %v4441_v61  ;;  %4837 = vmatprep.subr.mxu1 %v4424_v43  ;;  %v4570_v61 = vld [vmem:[#allocation4 + $0x5f8] sm:$0xff]  ;;  %v4560_v40 = vld [vmem:[#allocation4 + $0x5a8] sm:$0xff]  ;;  %v4559_v43 = vld [vmem:[#allocation4 + $0x5a0] sm:$0xff] }
 0x91a   :  { %4905 = vmatprep.subr.mxu0 %v4434_v63  ;;  %4838 = vmatpush1.msra.mxu1 %v4423_v27  ;;  %v4569_v63 = vld [vmem:[#allocation4 + $0x5f0] sm:$0xff]  ;;  %v4552_v27 = vld [vmem:[#allocation4 + $0x568] sm:$0xff] }
 0x91b   :  { %4906 = vmatpush1.msra.mxu0 %v4433_v9  ;;  %4839 = vmatprep.subr.mxu1 %v4416_v60  ;;  %v4562_v9 = vld [vmem:[#allocation4 + $0x5b8] sm:$0xff]  ;;  %v4551_v60 = vld [vmem:[#allocation4 + $0x560] sm:$0xff] }
 0x91c   :  { %4907 = vmatprep.subr.mxu0 %v4426_v45  ;;  %4840 = vmatpush1.msra.mxu1 %v4415_v25  ;;  %v4561_v45 = vld [vmem:[#allocation4 + $0x5b0] sm:$0xff]  ;;  %v4544_v25 = vld [vmem:[#allocation4 + $0x528] sm:$0xff] }
 0x91d   :  { %4908 = vmatpush1.msra.mxu0 %v4425_v18  ;;  %4841 = vmatprep.subr.mxu1 %v4408_v20  ;;  %v4554_v18 = vld [vmem:[#allocation4 + $0x578] sm:$0xff]  ;;  %v4543_v20 = vld [vmem:[#allocation4 + $0x520] sm:$0xff] }
 0x91e   :  { %4909 = vmatprep.subr.mxu0 %v4418_v35  ;;  %4842 = vmatpush1.msra.mxu1 %v4407_v36  ;;  %v4553_v35 = vld [vmem:[#allocation4 + $0x570] sm:$0xff]  ;;  %v4536_v36 = vld [vmem:[#allocation4 + $0x4e8] sm:$0xff] }
 0x91f   :  { %4910 = vmatpush1.msra.mxu0 %v4417_v46  ;;  %4843 = vmatprep.subr.mxu1 %v4400_v48  ;;  %v4546_v46 = vld [vmem:[#allocation4 + $0x538] sm:$0xff]  ;;  %v4535_v48 = vld [vmem:[#allocation4 + $0x4e0] sm:$0xff] }
 0x920   :  { %4911 = vmatprep.subr.mxu0 %v4410_v31  ;;  %4844 = vmatpush1.msra.mxu1 %v4399_v16  ;;  %v4545_v31 = vld [vmem:[#allocation4 + $0x530] sm:$0xff]  ;;  %v4528_v16 = vld [vmem:[#allocation4 + $0x4a8] sm:$0xff] }
 0x921   :  { %4912 = vmatpush1.msra.mxu0 %v4409_v4  ;;  %4845 = vmatprep.subr.mxu1 %v4392_v53  ;;  %v4538_v4 = vld [vmem:[#allocation4 + $0x4f8] sm:$0xff]  ;;  %v4527_v53 = vld [vmem:[#allocation4 + $0x4a0] sm:$0xff] }
 0x922   :  { %4913 = vmatprep.subr.mxu0 %v4402_v2  ;;  %4846 = vmatpush1.msra.mxu1 %v4391_v51  ;;  %v4537_v2 = vld [vmem:[#allocation4 + $0x4f0] sm:$0xff]  ;;  %v4520_v51 = vld [vmem:[#allocation4 + $0x468] sm:$0xff] }
 0x923   :  { %4914 = vmatpush1.msra.mxu0 %v4401_v15  ;;  %4847 = vmatprep.subr.mxu1 %v4384_v37  ;;  %v4530_v15 = vld [vmem:[#allocation4 + $0x4b8] sm:$0xff]  ;;  %v4519_v37 = vld [vmem:[#allocation4 + $0x460] sm:$0xff] }
 0x924   :  { %4915 = vmatprep.subr.mxu0 %v4394_v30  ;;  %4848 = vmatpush1.msra.mxu1 %v4383_v32  ;;  %v4529_v30 = vld [vmem:[#allocation4 + $0x4b0] sm:$0xff]  ;;  %v4512_v32 = vld [vmem:[#allocation4 + $0x428] sm:$0xff] }
 0x925   :  { %4916 = vmatpush1.msra.mxu0 %v4393_v11  ;;  %4849 = vmatprep.subr.mxu1 %v4632_v1  ;;  %v4522_v11 = vld [vmem:[#allocation4 + $0x478] sm:$0xff]  ;;  %v4511_v1 = vld [vmem:[#allocation4 + $0x420] sm:$0xff] }
 0x926   :  { %4917 = vmatprep.subr.mxu0 %v4386_v23  ;;  %4850 = vmatpush2.msra.mxu1 %v4631_v8  ;;  %v4521_v23 = vld [vmem:[#allocation4 + $0x470] sm:$0xff] }
 0x927   :  { %4918 = vmatpush1.msra.mxu0 %v4385_v39  ;;  %4851 = vmatprep.subr.mxu1 %v4624_v14  ;;  %v4514_v39 = vld [vmem:[#allocation4 + $0x438] sm:$0xff]  ;;  %v4513_v8 = vld [vmem:[#allocation4 + $0x430] sm:$0xff] }
 0x928   :  { %4919 = vmatprep.subr.mxu0 %v4634_v34  ;;  %4852 = vmatpush2.msra.mxu1 %v4623_v42  ;;  %v8781_v34 = vld [vmem:[#allocation4 + $0xbc8] sm:$0xff]  ;;  %v8783_v14 = vld [vmem:[#allocation4 + $0xbd8] sm:$0xff]  ;;  %v8789_v42 = vld [vmem:[#allocation4 + $0xbd0] sm:$0xff] }
 0x929   :  { %4920 = vmatpush2.msra.mxu0 %v4633_v59  ;;  %4853 = vmatprep.subr.mxu1 %v4616_v19  ;;  %9802 = vst [vmem:[#allocation37_spill] sm:$0xff] %v8781_v34  ;;  %9803 = vst [vmem:[#allocation52_spill] sm:$0xff] %v8783_v14  ;;  %v8787_v59 = vld [vmem:[#allocation4 + $0xbc0] sm:$0xff]  ;;  %v8795_v19 = vld [vmem:[#allocation4 + $0xb98] sm:$0xff] }
 0x92a   :  { %4921 = vmatprep.subr.mxu0 %v4626_v12  ;;  %4854 = vmatpush2.msra.mxu1 %v4615_v0  ;;  %v8793_v12 = vld [vmem:[#allocation4 + $0xb88] sm:$0xff]  ;;  %v8801_v0 = vld [vmem:[#allocation4 + $0xb90] sm:$0xff] }
 0x92b   :  { %4922 = vmatpush2.msra.mxu0 %v4625_v6  ;;  %4855 = vmatprep.subr.mxu1 %v4608_v41  ;;  %v8799_v6 = vld [vmem:[#allocation4 + $0xb80] sm:$0xff] }
 0x92c   :  { %4923 = vmatprep.subr.mxu0 %v4618_v33  ;;  %4856 = vmatpush2.msra.mxu1 %v4607_v17  ;;  %v8805_v33 = vld [vmem:[#allocation4 + $0xb48] sm:$0xff]  ;;  %v8811_v41 = vld [vmem:[#allocation4 + $0xb40] sm:$0xff] }
 0x92d   :  { %4924 = vmatpush2.msra.mxu0 %v4617_v55  ;;  %4857 = vmatprep.subr.mxu1 %v4600_v22  ;;  %v8813_v55 = vld [vmem:[#allocation4 + $0xb50] sm:$0xff]  ;;  %v8817_v17 = vld [vmem:[#allocation4 + $0xb08] sm:$0xff]  ;;  %v8823_v22 = vld [vmem:[#allocation4 + $0xb00] sm:$0xff] }
 0x92e   :  { %4925 = vmatprep.subr.mxu0 %v4610_v21  ;;  %4858 = vmatpush2.msra.mxu1 %v4599_v24  ;;  %v8819_v21 = vld [vmem:[#allocation4 + $0xb18] sm:$0xff]  ;;  %v8829_v24 = vld [vmem:[#allocation4 + $0xac8] sm:$0xff] }
 0x92f   :  { %4926 = vmatpush2.msra.mxu0 %v4609_v47  ;;  %4859 = vmatprep.subr.mxu1 %v4592_v56  ;;  %v8825_v47 = vld [vmem:[#allocation4 + $0xb10] sm:$0xff]  ;;  %v8835_v56 = vld [vmem:[#allocation4 + $0xac0] sm:$0xff] }
 0x930   :  { %4927 = vmatprep.subr.mxu0 %v4602_v58  ;;  %4860 = vmatpush2.msra.mxu1 %v4591_v13  ;;  %v8831_v58 = vld [vmem:[#allocation4 + $0xad8] sm:$0xff]  ;;  %v8841_v13 = vld [vmem:[#allocation4 + $0xa88] sm:$0xff] }
 0x931   :  { %4928 = vmatpush2.msra.mxu0 %v4601_v54  ;;  %4881 = vmatprep.mubr.f32.mxu1 %v8763_v7  ;;  %v8837_v54 = vld [vmem:[#allocation4 + $0xad0] sm:$0xff] }
 0x932   :  { %4929 = vmatprep.subr.mxu0 %v4594_v5  ;;  %4951 = vmatprep.mubr.f32.mxu0 %v8763_v7  ;;  %v4567_v7 = vld [vmem:[#allocation4 + $0x5e0] sm:$0xff]  ;;  %v8843_v5 = vld [vmem:[#allocation4 + $0xa98] sm:$0xff] }
 0x933   :  { %4861 = vmatprep.subr.mxu1 %v4584_v62  ;;  %4930 = vmatpush2.msra.mxu0 %v4593_v29  ;;  %v8847_v62 = vld [vmem:[#allocation4 + $0xa80] sm:$0xff]  ;;  %v8849_v29 = vld [vmem:[#allocation4 + $0xa90] sm:$0xff] }
 0x934   :  { %4862 = vmatpush2.msra.mxu1 %v4583_v49  ;;  %4931 = vmatprep.subr.mxu0 %v4586_v44  ;;  %v8853_v49 = vld [vmem:[#allocation4 + $0xa48] sm:$0xff]  ;;  %v8855_v44 = vld [vmem:[#allocation4 + $0xa58] sm:$0xff] }
 0x935   :  { %4863 = vmatprep.subr.mxu1 %v4576_v28  ;;  %4932 = vmatpush2.msra.mxu0 %v4585_v10  ;;  %v8859_v28 = vld [vmem:[#allocation4 + $0xa40] sm:$0xff]  ;;  %v8861_v10 = vld [vmem:[#allocation4 + $0xa50] sm:$0xff] }
 0x936   :  { %4864 = vmatpush2.msra.mxu1 %v4575_v38  ;;  %4933 = vmatprep.subr.mxu0 %v4578_v3  ;;  %v8865_v38 = vld [vmem:[#allocation4 + $0xa08] sm:$0xff]  ;;  %v8867_v3 = vld [vmem:[#allocation4 + $0xa18] sm:$0xff] }
 0x937   :  { %4865 = vmatprep.subr.mxu1 %v4568_v50  ;;  %4934 = vmatpush2.msra.mxu0 %v4577_v26  ;;  %v8871_v50 = vld [vmem:[#allocation4 + $0xa00] sm:$0xff]  ;;  %v8873_v26 = vld [vmem:[#allocation4 + $0xa10] sm:$0xff] }
 0x938   :  { %4866 = vmatpush2.msra.mxu1 %v4567_v7  ;;  %4935 = vmatprep.subr.mxu0 %v4570_v61  ;;  %v8875_v7 = vld [vmem:[#allocation4 + $0x9c8] sm:$0xff]  ;;  %v8879_v61 = vld [vmem:[#allocation4 + $0x9d8] sm:$0xff] }
 0x939   :  { %4867 = vmatprep.subr.mxu1 %v4560_v40  ;;  %4936 = vmatpush2.msra.mxu0 %v4569_v63  ;;  %v8881_v40 = vld [vmem:[#allocation4 + $0x9c0] sm:$0xff]  ;;  %v8883_v63 = vld [vmem:[#allocation4 + $0x9d0] sm:$0xff] }
 0x93a   :  { %4868 = vmatpush2.msra.mxu1 %v4559_v43  ;;  %4937 = vmatprep.subr.mxu0 %v4562_v9  ;;  %v8887_v43 = vld [vmem:[#allocation4 + $0x988] sm:$0xff]  ;;  %v8889_v9 = vld [vmem:[#allocation4 + $0x998] sm:$0xff] }
 0x93b   :  { %4869 = vmatprep.subr.mxu1 %v4552_v27  ;;  %4938 = vmatpush2.msra.mxu0 %v4561_v45  ;;  %v8891_v27 = vld [vmem:[#allocation4 + $0x980] sm:$0xff]  ;;  %v8895_v45 = vld [vmem:[#allocation4 + $0x990] sm:$0xff] }
 0x93c   :  { %4870 = vmatpush2.msra.mxu1 %v4551_v60  ;;  %4939 = vmatprep.subr.mxu0 %v4554_v18  ;;  %v8897_v60 = vld [vmem:[#allocation4 + $0x948] sm:$0xff]  ;;  %v8901_v18 = vld [vmem:[#allocation4 + $0x958] sm:$0xff] }
 0x93d   :  { %4871 = vmatprep.subr.mxu1 %v4544_v25  ;;  %4940 = vmatpush2.msra.mxu0 %v4553_v35  ;;  %v8903_v25 = vld [vmem:[#allocation4 + $0x940] sm:$0xff]  ;;  %v8907_v35 = vld [vmem:[#allocation4 + $0x950] sm:$0xff] }
 0x93e   :  { %4872 = vmatpush2.msra.mxu1 %v4543_v20  ;;  %4941 = vmatprep.subr.mxu0 %v4546_v46  ;;  %v8909_v20 = vld [vmem:[#allocation4 + $0x908] sm:$0xff]  ;;  %v8913_v46 = vld [vmem:[#allocation4 + $0x918] sm:$0xff] }
 0x93f   :  { %4873 = vmatprep.subr.mxu1 %v4536_v36  ;;  %4942 = vmatpush2.msra.mxu0 %v4545_v31  ;;  %9804 = vst [vmem:[#allocation38_spill] sm:$0xff] %v8909_v20  ;;  %9805 = vst [vmem:[#allocation36_spill] sm:$0xff] %v8913_v46  ;;  %v8915_v36 = vld [vmem:[#allocation4 + $0x900] sm:$0xff]  ;;  %v8919_v31 = vld [vmem:[#allocation4 + $0x910] sm:$0xff] }
 0x940   :  { %4874 = vmatpush2.msra.mxu1 %v4535_v48  ;;  %4943 = vmatprep.subr.mxu0 %v4538_v4  ;;  %9806 = vst [vmem:[#allocation40_spill] sm:$0xff] %v8915_v36  ;;  %9807 = vst [vmem:[#allocation39_spill] sm:$0xff] %v8919_v31  ;;  %v8921_v48 = vld [vmem:[#allocation4 + $0x8c8] sm:$0xff]  ;;  %v8925_v4 = vld [vmem:[#allocation4 + $0x8d8] sm:$0xff] }
 0x941   :  { %4875 = vmatprep.subr.mxu1 %v4528_v16  ;;  %4944 = vmatpush2.msra.mxu0 %v4537_v2  ;;  %9808 = vst [vmem:[#allocation53_spill] sm:$0xff] %v8921_v48  ;;  %9809 = vst [vmem:[#allocation48_spill] sm:$0xff] %v8925_v4  ;;  %v8927_v16 = vld [vmem:[#allocation4 + $0x8c0] sm:$0xff]  ;;  %v8931_v2 = vld [vmem:[#allocation4 + $0x8d0] sm:$0xff] }
 0x942   :  { %4876 = vmatpush2.msra.mxu1 %v4527_v53  ;;  %4945 = vmatprep.subr.mxu0 %v4530_v15  ;;  %9810 = vst [vmem:[#allocation35_spill] sm:$0xff] %v8927_v16  ;;  %9811 = vst [vmem:[#allocation49_spill] sm:$0xff] %v8931_v2  ;;  %v8933_v53 = vld [vmem:[#allocation4 + $0x888] sm:$0xff]  ;;  %v8937_v15 = vld [vmem:[#allocation4 + $0x898] sm:$0xff] }
 0x943   :  { %4877 = vmatprep.subr.mxu1 %v4520_v51  ;;  %4946 = vmatpush2.msra.mxu0 %v4529_v30  ;;  %9812 = vst [vmem:[#allocation43_spill] sm:$0xff] %v8933_v53  ;;  %9813 = vst [vmem:[#allocation42_spill] sm:$0xff] %v8937_v15  ;;  %v8939_v51 = vld [vmem:[#allocation4 + $0x880] sm:$0xff]  ;;  %v8943_v30 = vld [vmem:[#allocation4 + $0x890] sm:$0xff] }
 0x944   :  { %4878 = vmatpush2.msra.mxu1 %v4519_v37  ;;  %4947 = vmatprep.subr.mxu0 %v4522_v11  ;;  %9814 = vst [vmem:[#allocation34_spill] sm:$0xff] %v8939_v51  ;;  %9815 = vst [vmem:[#allocation44_spill] sm:$0xff] %v8943_v30  ;;  %v8945_v37 = vld [vmem:[#allocation4 + $0x848] sm:$0xff]  ;;  %v8949_v11 = vld [vmem:[#allocation4 + $0x858] sm:$0xff] }
 0x945   :  { %4879 = vmatprep.subr.mxu1 %v4512_v32  ;;  %4948 = vmatpush2.msra.mxu0 %v4521_v23  ;;  %9816 = vst [vmem:[#allocation45_spill] sm:$0xff] %v8945_v37  ;;  %9817 = vst [vmem:[#allocation41_spill] sm:$0xff] %v8949_v11  ;;  %v8951_v32 = vld [vmem:[#allocation4 + $0x840] sm:$0xff]  ;;  %v8955_v23 = vld [vmem:[#allocation4 + $0x850] sm:$0xff] }
 0x946   :  { %4880 = vmatpush2.msra.mxu1 %v4511_v1  ;;  %4949 = vmatprep.subr.mxu0 %v4514_v39  ;;  %9818 = vst [vmem:[#allocation47_spill] sm:$0xff] %v8951_v32  ;;  %9819 = vst [vmem:[#allocation46_spill] sm:$0xff] %v8955_v23  ;;  %v8957_v1 = vld [vmem:[#allocation4 + $0x808] sm:$0xff]  ;;  %v8961_v39 = vld [vmem:[#allocation4 + $0x818] sm:$0xff] }
 0x947   :  { %4882 = vmatmul.mubr.f32.vlgmr.msra.gmra.mxu1 %v8774_v57  ;;  %4950 = vmatpush2.msra.mxu0 %v4513_v8  ;;  %9820 = vst [vmem:[#allocation50_spill] sm:$0xff] %v8957_v1  ;;  %9821 = vst [vmem:[#allocation79_spill] sm:$0xff] %v8961_v39  ;;  %v8963_v8 = vld [vmem:[#allocation4 + $0x800] sm:$0xff] }
 0x948   :  { %5038 = vmatprep.subr.mxu1 %v8781_v34  ;;  %5109 = vmatprep.subr.mxu0 %v8783_v14  ;;  %9822 = vst [vmem:[#allocation51_spill] sm:$0xff] %v8963_v8 }
 0x949   :  { %4952 = vmatmul.mubr.f32.vlgmr.msra.gmra.mxu0 %v8774_v57  ;;  %5039 = vmatpush1.msra.mxu1 %v8787_v59  ;;  %v8807_v57 = vld [vmem:[#allocation4 + $0xb58] sm:$0xff] }
 0x94a   :  { %5110 = vmatpush1.msra.mxu0 %v8789_v42  ;;  %5040 = vmatprep.subr.mxu1 %v8793_v12 }
 0x94b   :  { %5111 = vmatprep.subr.mxu0 %v8795_v19  ;;  %5041 = vmatpush1.msra.mxu1 %v8799_v6 }
 0x94c   :  { %5112 = vmatpush1.msra.mxu0 %v8801_v0  ;;  %5042 = vmatprep.subr.mxu1 %v8805_v33 }
 0x94d   :  { %5113 = vmatprep.subr.mxu0 %v8807_v57  ;;  %5043 = vmatpush1.msra.mxu1 %v8811_v41 }
 0x94e   :  { %5114 = vmatpush1.msra.mxu0 %v8813_v55  ;;  %5044 = vmatprep.subr.mxu1 %v8817_v17 }
 0x94f   :  { %5115 = vmatprep.subr.mxu0 %v8819_v21  ;;  %5045 = vmatpush1.msra.mxu1 %v8823_v22 }
 0x950   :  { %5116 = vmatpush1.msra.mxu0 %v8825_v47  ;;  %5046 = vmatprep.subr.mxu1 %v8829_v24 }
 0x951   :  { %5117 = vmatprep.subr.mxu0 %v8831_v58  ;;  %5047 = vmatpush1.msra.mxu1 %v8835_v56 }
 0x952   :  { %5118 = vmatpush1.msra.mxu0 %v8837_v54  ;;  %5048 = vmatprep.subr.mxu1 %v8841_v13 }
 0x953   :  { %5119 = vmatprep.subr.mxu0 %v8843_v5  ;;  %5049 = vmatpush1.msra.mxu1 %v8847_v62 }
 0x954   :  { %5120 = vmatpush1.msra.mxu0 %v8849_v29  ;;  %5050 = vmatprep.subr.mxu1 %v8853_v49 }
 0x955   :  { %5121 = vmatprep.subr.mxu0 %v8855_v44  ;;  %5051 = vmatpush1.msra.mxu1 %v8859_v28 }
 0x956   :  { %5122 = vmatpush1.msra.mxu0 %v8861_v10  ;;  %5052 = vmatprep.subr.mxu1 %v8865_v38 }
 0x957   :  { %5123 = vmatprep.subr.mxu0 %v8867_v3  ;;  %5053 = vmatpush1.msra.mxu1 %v8871_v50 }
 0x958   :  { %5124 = vmatpush1.msra.mxu0 %v8873_v26  ;;  %5054 = vmatprep.subr.mxu1 %v8875_v7 }
 0x959   :  { %5125 = vmatprep.subr.mxu0 %v8879_v61  ;;  %5055 = vmatpush1.msra.mxu1 %v8881_v40 }
 0x95a   :  { %5126 = vmatpush1.msra.mxu0 %v8883_v63  ;;  %5056 = vmatprep.subr.mxu1 %v8887_v43 }
 0x95b   :  { %5127 = vmatprep.subr.mxu0 %v8889_v9  ;;  %5057 = vmatpush1.msra.mxu1 %v8891_v27 }
 0x95c   :  { %5128 = vmatpush1.msra.mxu0 %v8895_v45  ;;  %5058 = vmatprep.subr.mxu1 %v8897_v60 }
 0x95d   :  { %5129 = vmatprep.subr.mxu0 %v8901_v18  ;;  %5059 = vmatpush1.msra.mxu1 %v8903_v25 }
 0x95e   :  { %5130 = vmatpush1.msra.mxu0 %v8907_v35  ;;  %5060 = vmatprep.subr.mxu1 %v8909_v20 }
 0x95f   :  { %5131 = vmatprep.subr.mxu0 %v8913_v46  ;;  %5061 = vmatpush1.msra.mxu1 %v8915_v36 }
 0x960   :  { %5132 = vmatpush1.msra.mxu0 %v8919_v31  ;;  %5062 = vmatprep.subr.mxu1 %v8921_v48 }
 0x961   :  { %5133 = vmatprep.subr.mxu0 %v8925_v4  ;;  %5063 = vmatpush1.msra.mxu1 %v8927_v16 }
 0x962   :  { %5134 = vmatpush1.msra.mxu0 %v8931_v2  ;;  %5064 = vmatprep.subr.mxu1 %v8933_v53  ;;  %v8967_v53 = vld [vmem:[#allocation4 + $0x810] sm:$0xff] }
 0x963   :  { %5135 = vmatprep.subr.mxu0 %v8937_v15  ;;  %5065 = vmatpush1.msra.mxu1 %v8939_v51  ;;  %9823 = vst [vmem:[#allocation54_spill] sm:$0xff] %v8967_v53 }
 0x964   :  { %5136 = vmatpush1.msra.mxu0 %v8943_v30  ;;  %5066 = vmatprep.subr.mxu1 %v8945_v37 }
 0x965   :  { %5137 = vmatprep.subr.mxu0 %v8949_v11  ;;  %5067 = vmatpush1.msra.mxu1 %v8951_v32  ;;  %v4636_v32 = vld [vmem:[#allocation4 + $0xc00] ss:$8 sm:$0xf] }
 0x966   :  { %5138 = vmatpush1.msra.mxu0 %v8955_v23  ;;  %5068 = vmatprep.subr.mxu1 %v8957_v1  ;;  %v4637_v11 = vld [vmem:[#allocation4 + $0xc00] ss:$8 sm:$0xf0] }
 0x967   :  { %5139 = vmatprep.subr.mxu0 %v8961_v39  ;;  %5069 = vmatpush1.msra.mxu1 %v8963_v8  ;;  %v8978_v37 = vor.u32 %v4637_v11, %v4636_v32  ;;  %v9825_v23 = vld [vmem:[#allocation31_spill] sm:$0xff] }
 0x968   :  { %5102 = vmatprep.mubr.f32.mxu1 %v9561_v52  ;;  %5140 = vmatpush1.msra.mxu0 %v8967_v53  ;;  %v9827_v53 = vld [vmem:[#allocation30_spill] sm:$0xff] }
 0x969   :  { %5173 = vmatprep.mubr.f32.mxu0 %v9561_v52  ;;  %5226 = vmatprep.subr.mxu1 %v8781_v34  ;;  %9824 = vst [vmem:[#allocation55_spill] sm:$0xff] %v8978_v37  ;;  %v4643_v1 = vrot.slane %v8978_v37, %v9825_v23  ;;  %v9828_v15 = vsub.s32 3, %v9827_v53  ;;  %v9830_v11 = vsub.s32 2, %v9827_v53 }
 0x96a   :  { %5297 = vmatprep.subr.mxu0 %v8783_v14 }
 0x96b   :  { %v4655_v52 = vrot.slane %v8978_v37, %v9828_v15  ;;  %v4651_v32 = vrot.slane %v8978_v37, %v9830_v11 }
 0x9c5   :  { %v4741_v39 = vpop.f32.mrf.mxu1 }
 0x9c6   :  { %v8982_v30 = vadd.f32 %v4741_v39, %v4643_v1 }
 0x9c7   :  { %v4812_v51 = vpop.f32.mrf.mxu0 }
 0x9c8   :  { %9826 = vst [vmem:[#allocation56_spill] sm:$0xff] %v8982_v30  ;;  %v5831_v8 = vmul.f32 -1.442695, %v8982_v30  ;;  %v8994_v2 = vadd.f32 %v4812_v51, %v4651_v32  ;;  %v9833_v51 = vld [vmem:[#allocation43_spill] sm:$0xff]  ;;  %v9835_v32 = vld [vmem:[#allocation34_spill] sm:$0xff] }
 0x9c9   :  { %v4814_v34 = vpop.f32.mrf.mxu0 }
 0x9ca   :  { %6642 = vpow2.f32 %v5831_v8  ;;  %v8988_v14 = vadd.f32 %v4814_v34, %v4655_v52 }
 0x9cc   :  { %9829 = vst [vmem:[#allocation57_spill] sm:$0xff] %v8988_v14  ;;  %v5832_v23 = vmul.f32 -1.442695, %v8988_v14 }
 0x9ce   :  { %6644 = vpow2.f32 %v5832_v23  ;;  %v9836_v23 = vld [vmem:[#allocation44_spill] sm:$0xff] }
 0x9cf   :  { %6646 = vtanh.f32 %v8994_v2 }
 0x9d7   :  { %v6643_v1 = vpop.eup %6642 }
 0x9d8   :  { %v5028_v39 = vadd.f32 1.0, %v6643_v1  ;;  %v9837_v1 = vsub.s32 4, %v9827_v53 }
 0x9da   :  { %6648 = vrcp.f32 %v5028_v39  ;;  %v4659_v39 = vrot.slane %v8978_v37, %v9837_v1  ;;  %v9846_v1 = vld [vmem:[#allocation54_spill] sm:$0xff] }
 0x9db   :  { %v6645_v30 = vpop.eup %6644 }
 0x9dc   :  { %v5029_v15 = vadd.f32 1.0, %v6645_v30  ;;  %v6647_v8 = vpop.eup %6646  ;;  %v9834_v30 = vld [vmem:[#allocation42_spill] sm:$0xff] }
 0x9de   :  { %6650 = vrcp.f32 %v5029_v15  ;;  %v9838_v15 = vld [vmem:[#allocation45_spill] sm:$0xff] }
 0x9e7   :  { %v6649_v16 = vpop.eup %6648 }
 0x9e8   :  { %v8997_v52 = vmul.f32 %v6649_v16, %v6647_v8  ;;  %v9832_v16 = vld [vmem:[#allocation49_spill] sm:$0xff] }
 0x9e9   :  { %v9839_v8 = vld [vmem:[#allocation41_spill] sm:$0xff] }
 0x9ea   :  { %6652 = vtanh.f32 %v8997_v52 }
 0x9eb   :  { %v6651_v34 = vpop.eup %6650 }
 0x9f7   :  { %v6653_v11 = vpop.eup %6652 }
 0x9f8   :  { %v5037_v14 = vmul.f32 %v6653_v11, %v6651_v34  ;;  %v4743_v34 = vpop.f32.mrf.mxu1  ;;  %v9840_v11 = vld [vmem:[#allocation47_spill] sm:$0xff] }
 0x9fa   :  { %5103 = vmatmul.mubr.f32.vlgmr.msra.gmra.mxu1 %v5037_v14  ;;  %5174 = vmatmul.mubr.f32.vlgmr.msra.gmra.mxu0 %v5037_v14  ;;  %v9831_v14 = vld [vmem:[#allocation35_spill] sm:$0xff] }
 0x9fb   :  { %5227 = vmatpush1.msra.mxu1 %v8787_v59  ;;  %5298 = vmatpush1.msra.mxu0 %v8789_v42 }
 0x9fc   :  { %5228 = vmatprep.subr.mxu1 %v8793_v12  ;;  %5299 = vmatprep.subr.mxu0 %v8795_v19 }
 0x9fd   :  { %5229 = vmatpush1.msra.mxu1 %v8799_v6  ;;  %5300 = vmatpush1.msra.mxu0 %v8801_v0 }
 0x9fe   :  { %5230 = vmatprep.subr.mxu1 %v8805_v33  ;;  %5301 = vmatprep.subr.mxu0 %v8807_v57 }
 0x9ff   :  { %5231 = vmatpush1.msra.mxu1 %v8811_v41  ;;  %5302 = vmatpush1.msra.mxu0 %v8813_v55 }
 0xa00   :  { %5232 = vmatprep.subr.mxu1 %v8817_v17  ;;  %5303 = vmatprep.subr.mxu0 %v8819_v21 }
 0xa01   :  { %5233 = vmatpush1.msra.mxu1 %v8823_v22  ;;  %5304 = vmatpush1.msra.mxu0 %v8825_v47 }
 0xa02   :  { %5234 = vmatprep.subr.mxu1 %v8829_v24  ;;  %5305 = vmatprep.subr.mxu0 %v8831_v58 }
 0xa03   :  { %5235 = vmatpush1.msra.mxu1 %v8835_v56  ;;  %5306 = vmatpush1.msra.mxu0 %v8837_v54 }
 0xa04   :  { %5236 = vmatprep.subr.mxu1 %v8841_v13  ;;  %5307 = vmatprep.subr.mxu0 %v8843_v5 }
 0xa05   :  { %5237 = vmatpush1.msra.mxu1 %v8847_v62  ;;  %5308 = vmatpush1.msra.mxu0 %v8849_v29 }
 0xa06   :  { %5238 = vmatprep.subr.mxu1 %v8853_v49  ;;  %5309 = vmatprep.subr.mxu0 %v8855_v44 }
 0xa07   :  { %5239 = vmatpush1.msra.mxu1 %v8859_v28  ;;  %5310 = vmatpush1.msra.mxu0 %v8861_v10 }
 0xa08   :  { %5240 = vmatprep.subr.mxu1 %v8865_v38  ;;  %5311 = vmatprep.subr.mxu0 %v8867_v3 }
 0xa09   :  { %5241 = vmatpush1.msra.mxu1 %v8871_v50  ;;  %5312 = vmatpush1.msra.mxu0 %v8873_v26 }
 0xa0a   :  { %5242 = vmatprep.subr.mxu1 %v8875_v7  ;;  %5313 = vmatprep.subr.mxu0 %v8879_v61 }
 0xa0b   :  { %5243 = vmatpush1.msra.mxu1 %v8881_v40  ;;  %5314 = vmatpush1.msra.mxu0 %v8883_v63 }
 0xa0c   :  { %5244 = vmatprep.subr.mxu1 %v8887_v43  ;;  %5315 = vmatprep.subr.mxu0 %v8889_v9 }
 0xa0d   :  { %5245 = vmatpush1.msra.mxu1 %v8891_v27  ;;  %5316 = vmatpush1.msra.mxu0 %v8895_v45 }
 0xa0e   :  { %5246 = vmatprep.subr.mxu1 %v8897_v60  ;;  %5317 = vmatprep.subr.mxu0 %v8901_v18 }
 0xa0f   :  { %5247 = vmatpush1.msra.mxu1 %v8903_v25  ;;  %5318 = vmatpush1.msra.mxu0 %v8907_v35 }
 0xa10   :  { %5248 = vmatprep.subr.mxu1 %v8909_v20  ;;  %5319 = vmatprep.subr.mxu0 %v8913_v46 }
 0xa11   :  { %5249 = vmatpush1.msra.mxu1 %v8915_v36  ;;  %5320 = vmatpush1.msra.mxu0 %v8919_v31 }
 0xa12   :  { %5250 = vmatprep.subr.mxu1 %v8921_v48  ;;  %5321 = vmatprep.subr.mxu0 %v8925_v4  ;;  %v4953_v48 = vpop.f32.mrf.mxu0 }
 0xa13   :  { %5251 = vmatpush1.msra.mxu1 %v9831_v14  ;;  %5322 = vmatpush1.msra.mxu0 %v9832_v16  ;;  %v9841_v16 = vld [vmem:[#allocation46_spill] sm:$0xff]  ;;  %v9844_v14 = vld [vmem:[#allocation51_spill] sm:$0xff] }
 0xa14   :  { %5252 = vmatprep.subr.mxu1 %v9833_v51  ;;  %5323 = vmatprep.subr.mxu0 %v9834_v30  ;;  %v9842_v51 = vld [vmem:[#allocation50_spill] sm:$0xff]  ;;  %v9843_v30 = vld [vmem:[#allocation79_spill] sm:$0xff] }
 0xa15   :  { %5253 = vmatpush1.msra.mxu1 %v9835_v32  ;;  %5324 = vmatpush1.msra.mxu0 %v9836_v23  ;;  %v4883_v32 = vpop.f32.mrf.mxu1  ;;  %v9845_v23 = vmov 0.0  }
 0xa16   :  { %5254 = vmatprep.subr.mxu1 %v9838_v15  ;;  %5325 = vmatprep.subr.mxu0 %v9839_v8  ;;  %v4884_v4 = vadd.f32 %v4883_v32, %v4659_v39  ;;  %v9847_v15 = vld [vmem:[#allocation37_spill] sm:$0xff] }
 0xa17   :  { %5255 = vmatpush1.msra.mxu1 %v9840_v11  ;;  %5326 = vmatpush1.msra.mxu0 %v9841_v16  ;;  %v4885_v8 = vpop.f32.mrf.mxu1  ;;  %v9848_v11 = vld [vmem:[#allocation52_spill] sm:$0xff] }
 0xa18   :  { %5256 = vmatprep.subr.mxu1 %v9842_v51  ;;  %5327 = vmatprep.subr.mxu0 %v9843_v30  ;;  %v5842_v16 = vmul.f32 -1.442695, %v4884_v4  ;;  %v9849_v51 = vsub.s32 6, %v9827_v53  ;;  %v9851_v8 = vld [vmem:[#allocation32_spill] sm:$0xff]  ;;  %v9076_v4 = vpop.f32.mrf.mxu0 }
 0xa19   :  { %5257 = vmatpush1.msra.mxu1 %v9844_v14  ;;  %5290 = vmatprep.mubr.f32.mxu1 %v9845_v23  ;;  %9852 = vst [vmem:[#allocation59_spill] sm:$0xff] %v9076_v4 }
 0xa1a   :  { %5328 = vmatpush1.msra.mxu0 %v9846_v1  ;;  %5361 = vmatprep.mubr.f32.mxu0 %v9845_v23  ;;  %6654 = vpow2.f32 %v5842_v16  ;;  %v4663_v30 = vrot.slane %v8978_v37, %v9849_v51  ;;  %v9853_v51 = vld [vmem:[#allocation56_spill] sm:$0xff] }
 0xa1b   :  { %5414 = vmatprep.subr.mxu1 %v9847_v15  ;;  %5485 = vmatprep.subr.mxu0 %v9848_v11  ;;  %v4647_v15 = vrot.slane %v8978_v37, %v9851_v8  ;;  %v9854_v8 = vld [vmem:[#allocation57_spill] sm:$0xff] }
 0xa1c   :  { %v4954_v14 = vadd.f32 %v4953_v48, %v4663_v30 }
 0xa1d   :  { %v9078_v23 = vadd.f32 %v4743_v34, %v4647_v15 }
 0xa1e   :  { %6656 = vtanh.f32 %v4954_v14 }
 0xa27   :  { %v6655_v31 = vpop.eup %6654 }
 0xa28   :  { %v5605_v36 = vadd.f32 1.0, %v6655_v31 }
 0xa2a   :  { %6658 = vrcp.f32 %v5605_v36 }
 0xa2b   :  { %v6657_v32 = vpop.eup %6656 }
 0xa37   :  { %v6659_v39 = vpop.eup %6658 }
 0xa38   :  { %v9072_v1 = vmul.f32 %v6659_v39, %v6657_v32 }
 0xa3a   :  { %9850 = vst [vmem:[#allocation58_spill] sm:$0xff] %v9072_v1 }
 0xaba   :  { %v5104_v11 = vpop.f32.mrf.mxu1  ;;  %v5175_v30 = vpop.f32.mrf.mxu0 }
 0xabb   :  { %v5184_v16 = vrot.slane %v5104_v11, 6  ;;  %v5186_v46 = vrot.slane %v5175_v30, 6 }
 0xabc   :  { %v5106_v53 = vpop.f32.mrf.mxu1  ;;  %v5177_v39 = vpop.f32.mrf.mxu0 }
 0xabd   :  { %v5192_v48 = vadd.f32 %v5184_v16, %v9853_v51  ;;  %v5185_v31 = vrot.slane %v5106_v53, 6  ;;  %v5187_v1 = vrot.slane %v5177_v39, 6  ;;  %v5194_v34 = vadd.f32 %v5186_v46, %v8994_v2 }
 0xabf   :  { %v5833_v14 = vmul.f32 -1.442695, %v5192_v48  ;;  %v5193_v36 = vadd.f32 %v5185_v31, %v9078_v23  ;;  %v5195_v37 = vadd.f32 %v5187_v1, %v9854_v8 }
 0xac1   :  { %6660 = vpow2.f32 %v5833_v14  ;;  %v5834_v32 = vmul.f32 -1.442695, %v5193_v36  ;;  %v5835_v4 = vmul.f32 -1.442695, %v5195_v37  ;;  %v5216_v14 = vrot.slane %v8997_v52, 6 }
 0xac3   :  { %6662 = vpow2.f32 %v5834_v32 }
 0xac4   :  { %6664 = vpow2.f32 %v5835_v4 }
 0xace   :  { %v6661_v11 = vpop.eup %6660 }
 0xacf   :  { %v5205_v15 = vadd.f32 1.0, %v6661_v11 }
 0xad0   :  { %v6663_v20 = vpop.eup %6662 }
 0xad1   :  { %6666 = vrcp.f32 %v5205_v15  ;;  %v5206_v53 = vadd.f32 1.0, %v6663_v20  ;;  %v6665_v16 = vpop.eup %6664 }
 0xad2   :  { %6668 = vtanh.f32 %v5194_v34  ;;  %v5207_v32 = vadd.f32 1.0, %v6665_v16 }
 0xad3   :  { %6670 = vrcp.f32 %v5206_v53  ;;  %v9880_v53 = vld [vmem:[#allocation58_spill] sm:$0xff] }
 0xad4   :  { %6672 = vrcp.f32 %v5207_v32 }
 0xade   :  { %v6667_v48 = vpop.eup %6666 }
 0xadf   :  { %v6669_v31 = vpop.eup %6668 }
 0xae0   :  { %v6671_v36 = vpop.eup %6670  ;;  %v5219_v1 = vmul.f32 %v6669_v31, %v6667_v48 }
 0xae1   :  { %v5218_v30 = vmul.f32 %v6671_v36, %v5216_v14  ;;  %v6673_v46 = vpop.eup %6672 }
 0xae3   :  { %v9085_v37 = vadd.f32 %v5219_v1, %v5218_v30 }
 0xae5   :  { %6674 = vtanh.f32 %v9085_v37 }
 0xaf2   :  { %v6675_v4 = vpop.eup %6674 }
 0xaf3   :  { %v5222_v39 = vmul.f32 %v6675_v4, %v6673_v46  ;;  %v5404_v46 = vrot.slane %v9085_v37, 6  ;;  %v5648_v37 = vld [vmem:[%s9273_s4 + $0xf8] sm:$0xff] }
 0xaf5   :  { %v5224_v20 = vrot.slane %v5222_v39, 2 }
 0xaf7   :  { %5291 = vmatmul.mubr.f32.vlgmr.msra.gmra.mxu1 %v5224_v20  ;;  %5362 = vmatmul.mubr.f32.vlgmr.msra.gmra.mxu0 %v5224_v20 }
 0xaf8   :  { %5415 = vmatpush1.msra.mxu1 %v8787_v59  ;;  %5486 = vmatpush1.msra.mxu0 %v8789_v42  ;;  %v9855_v59 = vld [vmem:[#allocation38_spill] sm:$0xff]  ;;  %v9856_v42 = vld [vmem:[#allocation36_spill] sm:$0xff] }
 0xaf9   :  { %5416 = vmatprep.subr.mxu1 %v8793_v12  ;;  %5487 = vmatprep.subr.mxu0 %v8795_v19  ;;  %v9857_v12 = vld [vmem:[#allocation40_spill] sm:$0xff]  ;;  %v9858_v19 = vld [vmem:[#allocation39_spill] sm:$0xff] }
 0xafa   :  { %5417 = vmatpush1.msra.mxu1 %v8799_v6  ;;  %5488 = vmatpush1.msra.mxu0 %v8801_v0  ;;  %v9859_v6 = vld [vmem:[#allocation53_spill] sm:$0xff]  ;;  %v9860_v0 = vld [vmem:[#allocation48_spill] sm:$0xff] }
 0xafb   :  { %5418 = vmatprep.subr.mxu1 %v8805_v33  ;;  %5489 = vmatprep.subr.mxu0 %v8807_v57  ;;  %v9861_v33 = vld [vmem:[#allocation35_spill] sm:$0xff]  ;;  %v9862_v57 = vld [vmem:[#allocation49_spill] sm:$0xff] }
 0xafc   :  { %5419 = vmatpush1.msra.mxu1 %v8811_v41  ;;  %5490 = vmatpush1.msra.mxu0 %v8813_v55  ;;  %v9863_v41 = vld [vmem:[#allocation43_spill] sm:$0xff]  ;;  %v9864_v55 = vld [vmem:[#allocation42_spill] sm:$0xff] }
 0xafd   :  { %5420 = vmatprep.subr.mxu1 %v8817_v17  ;;  %5491 = vmatprep.subr.mxu0 %v8819_v21  ;;  %v9865_v17 = vld [vmem:[#allocation34_spill] sm:$0xff]  ;;  %v9866_v21 = vld [vmem:[#allocation44_spill] sm:$0xff] }
 0xafe   :  { %5421 = vmatpush1.msra.mxu1 %v8823_v22  ;;  %5492 = vmatpush1.msra.mxu0 %v8825_v47  ;;  %v9867_v22 = vld [vmem:[#allocation45_spill] sm:$0xff] }
 0xaff   :  { %5422 = vmatprep.subr.mxu1 %v8829_v24  ;;  %5493 = vmatprep.subr.mxu0 %v8831_v58  ;;  %v9868_v47 = vld [vmem:[#allocation41_spill] sm:$0xff]  ;;  %v9869_v24 = vld [vmem:[#allocation47_spill] sm:$0xff]  ;;  %v9870_v58 = vld [vmem:[#allocation46_spill] sm:$0xff] }
 0xb00   :  { %5423 = vmatpush1.msra.mxu1 %v8835_v56  ;;  %5494 = vmatpush1.msra.mxu0 %v8837_v54  ;;  %v9871_v56 = vld [vmem:[#allocation50_spill] sm:$0xff]  ;;  %v9872_v54 = vld [vmem:[#allocation79_spill] sm:$0xff] }
 0xb01   :  { %5424 = vmatprep.subr.mxu1 %v8841_v13  ;;  %5495 = vmatprep.subr.mxu0 %v8843_v5  ;;  %v9873_v13 = vld [vmem:[#allocation51_spill] sm:$0xff]  ;;  %v9874_v5 = vmov 0.0  }
 0xb02   :  { %5425 = vmatpush1.msra.mxu1 %v8847_v62  ;;  %5496 = vmatpush1.msra.mxu0 %v8849_v29  ;;  %v9875_v62 = vld [vmem:[#allocation54_spill] sm:$0xff] }
 0xb03   :  { %5426 = vmatprep.subr.mxu1 %v8853_v49  ;;  %5497 = vmatprep.subr.mxu0 %v8855_v44  ;;  %v9876_v29 = vld [vmem:[#allocation30_spill] sm:$0xff]  ;;  %v9878_v44 = vld [vmem:[#allocation55_spill] sm:$0xff] }
 0xb04   :  { %5427 = vmatpush1.msra.mxu1 %v8859_v28  ;;  %5498 = vmatpush1.msra.mxu0 %v8861_v10  ;;  %v9877_v49 = vsub.s32 7, %v9876_v29  ;;  %v9879_v10 = vld [vmem:[#allocation59_spill] sm:$0xff]  ;;  %v5626_v29 = vld [vmem:[%s9273_s4 + $0x48] sm:$0xff] }
 0xb05   :  { %5428 = vmatprep.subr.mxu1 %v8865_v38  ;;  %5499 = vmatprep.subr.mxu0 %v8867_v3 }
 0xb06   :  { %5429 = vmatpush1.msra.mxu1 %v8871_v50  ;;  %5500 = vmatpush1.msra.mxu0 %v8873_v26  ;;  %v4667_v28 = vrot.slane %v9878_v44, %v9877_v49  ;;  %v5641_v49 = vld [vmem:[%s9273_s4 + $0xc0] sm:$0xff] }
 0xb07   :  { %5430 = vmatprep.subr.mxu1 %v8875_v7  ;;  %5501 = vmatprep.subr.mxu0 %v8879_v61  ;;  %v5625_v44 = vld [vmem:[%s9273_s4 + $0x40] sm:$0xff] }
 0xb08   :  { %5431 = vmatpush1.msra.mxu1 %v8881_v40  ;;  %5502 = vmatpush1.msra.mxu0 %v8883_v63  ;;  %v4956_v38 = vadd.f32 %v9879_v10, %v4667_v28  ;;  %v5640_v28 = vld [vmem:[%s9273_s4 + $0xb8] sm:$0xff] }
 0xb09   :  { %5432 = vmatprep.subr.mxu1 %v8887_v43  ;;  %5503 = vmatprep.subr.mxu0 %v8889_v9  ;;  %v5624_v10 = vld [vmem:[%s9273_s4 + $0x38] sm:$0xff] }
 0xb0a   :  { %5433 = vmatpush1.msra.mxu1 %v8891_v27  ;;  %5504 = vmatpush1.msra.mxu0 %v8895_v45  ;;  %v5843_v3 = vmul.f32 -1.442695, %v4956_v38  ;;  %v5639_v38 = vld [vmem:[%s9273_s4 + $0xb0] sm:$0xff] }
 0xb0b   :  { %5434 = vmatprep.subr.mxu1 %v8897_v60  ;;  %5505 = vmatprep.subr.mxu0 %v8901_v18 }
 0xb0c   :  { %5435 = vmatpush1.msra.mxu1 %v8903_v25  ;;  %5506 = vmatpush1.msra.mxu0 %v8907_v35  ;;  %6676 = vpow2.f32 %v5843_v3  ;;  %v5623_v3 = vld [vmem:[%s9273_s4 + $0x30] sm:$0xff] }
 0xb0d   :  { %5436 = vmatprep.subr.mxu1 %v9855_v59  ;;  %5507 = vmatprep.subr.mxu0 %v9856_v42 }
 0xb0e   :  { %5437 = vmatpush1.msra.mxu1 %v9857_v12  ;;  %5508 = vmatpush1.msra.mxu0 %v9858_v19 }
 0xb0f   :  { %5438 = vmatprep.subr.mxu1 %v9859_v6  ;;  %5509 = vmatprep.subr.mxu0 %v9860_v0 }
 0xb10   :  { %5439 = vmatpush1.msra.mxu1 %v9861_v33  ;;  %5510 = vmatpush1.msra.mxu0 %v9862_v57 }
 0xb11   :  { %5440 = vmatprep.subr.mxu1 %v9863_v41  ;;  %5511 = vmatprep.subr.mxu0 %v9864_v55  ;;  %v5632_v55 = vld [vmem:[%s9273_s4 + $0x78] sm:$0xff] }
 0xb12   :  { %5441 = vmatpush1.msra.mxu1 %v9865_v17  ;;  %5512 = vmatpush1.msra.mxu0 %v9866_v21  ;;  %v5647_v17 = vld [vmem:[%s9273_s4 + $0xf0] sm:$0xff] }
 0xb13   :  { %5442 = vmatprep.subr.mxu1 %v9867_v22  ;;  %5513 = vmatprep.subr.mxu0 %v9868_v47  ;;  %v5631_v21 = vld [vmem:[%s9273_s4 + $0x70] sm:$0xff]  ;;  %v5646_v22 = vld [vmem:[%s9273_s4 + $0xe8] sm:$0xff] }
 0xb14   :  { %5443 = vmatpush1.msra.mxu1 %v9869_v24  ;;  %5514 = vmatpush1.msra.mxu0 %v9870_v58  ;;  %v5630_v47 = vld [vmem:[%s9273_s4 + $0x68] sm:$0xff]  ;;  %v5645_v24 = vld [vmem:[%s9273_s4 + $0xe0] sm:$0xff] }
 0xb15   :  { %5444 = vmatprep.subr.mxu1 %v9871_v56  ;;  %5515 = vmatprep.subr.mxu0 %v9872_v54  ;;  %v5629_v58 = vld [vmem:[%s9273_s4 + $0x60] sm:$0xff]  ;;  %v5644_v56 = vld [vmem:[%s9273_s4 + $0xd8] sm:$0xff] }
 0xb16   :  { %5445 = vmatpush1.msra.mxu1 %v9873_v13  ;;  %5478 = vmatprep.mubr.f32.mxu1 %v9874_v5  ;;  %v5628_v54 = vld [vmem:[%s9273_s4 + $0x58] sm:$0xff]  ;;  %v5643_v13 = vld [vmem:[%s9273_s4 + $0xd0] sm:$0xff] }
 0xb17   :  { %5516 = vmatpush1.msra.mxu0 %v9875_v62  ;;  %5549 = vmatprep.mubr.f32.mxu0 %v9874_v5  ;;  %v5627_v5 = vld [vmem:[%s9273_s4 + $0x50] sm:$0xff]  ;;  %v5642_v62 = vld [vmem:[%s9273_s4 + $0xc8] sm:$0xff] }
 0xb18   :  { %6296 = vmatprep.subr.mxu1 %v5648_v37 }
 0xb19   :  { %v6677_v18 = vpop.eup %6676 }
 0xb1a   :  { %v5606_v35 = vadd.f32 1.0, %v6677_v18  ;;  %v5617_v18 = vld [vmem:[%s9273_s4] sm:$0xff] }
 0xbb7   :  { %v5292_v50 = vpop.f32.mrf.mxu1  ;;  %v5363_v40 = vpop.f32.mrf.mxu0 }
 0xbb8   :  { %v5372_v26 = vrot.slane %v5292_v50, 4  ;;  %v5374_v52 = vrot.slane %v5363_v40, 4  ;;  %v5638_v50 = vld [vmem:[%s9273_s4 + $0xa8] sm:$0xff]  ;;  %v5636_v40 = vld [vmem:[%s9273_s4 + $0x98] sm:$0xff] }
 0xbb9   :  { %v5294_v7 = vpop.f32.mrf.mxu1  ;;  %v5365_v45 = vpop.f32.mrf.mxu0 }
 0xbba   :  { %v5380_v61 = vadd.f32 %v5372_v26, %v9853_v51  ;;  %v5373_v63 = vrot.slane %v5294_v7, 4  ;;  %v5375_v60 = vrot.slane %v5365_v45, 4  ;;  %v5382_v15 = vadd.f32 %v5374_v52, %v8994_v2  ;;  %v5622_v26 = vld [vmem:[%s9273_s4 + $0x28] sm:$0xff]  ;;  %v5637_v7 = vld [vmem:[%s9273_s4 + $0xa0] sm:$0xff] }
 0xbbb   :  { %v5618_v45 = vld [vmem:[%s9273_s4 + $0x8] sm:$0xff] }
 0xbbc   :  { %v5836_v43 = vmul.f32 -1.442695, %v5380_v61  ;;  %v5381_v9 = vadd.f32 %v5373_v63, %v9078_v23  ;;  %v5383_v25 = vadd.f32 %v5375_v60, %v9854_v8  ;;  %v5621_v61 = vld [vmem:[%s9273_s4 + $0x20] sm:$0xff]  ;;  %v5620_v63 = vld [vmem:[%s9273_s4 + $0x18] sm:$0xff] }
 0xbbd   :  { %v5633_v60 = vld [vmem:[%s9273_s4 + $0x80] sm:$0xff] }
 0xbbe   :  { %6678 = vpow2.f32 %v5836_v43  ;;  %v5837_v27 = vmul.f32 -1.442695, %v5381_v9  ;;  %v5838_v11 = vmul.f32 -1.442695, %v5383_v25  ;;  %v5635_v43 = vld [vmem:[%s9273_s4 + $0x90] sm:$0xff] }
 0xbbf   :  { %v5619_v9 = vld [vmem:[%s9273_s4 + $0x10] sm:$0xff] }
 0xbc0   :  { %6680 = vpow2.f32 %v5837_v27  ;;  %v5634_v27 = vld [vmem:[%s9273_s4 + $0x88] sm:$0xff]  ;;  %s6914_s4 = smov [#allocation14]  }
 0xbc1   :  { %6682 = vrcp.f32 %v5606_v35  ;;  %s5740_s14 = sshll.u32 %s6914_s4, 4  ;;  %s5741_s14 = int_to_ptr.vmem [resolvable:$true] %s5740_s14 }
 0xbc2   :  { %6684 = vtanh.f32 %v9880_v53  ;;  %s6858_s25 = scalar_lea.vmem %s5741_s14, 32  ;;  %p6863_p8 = scmp.lt.s32.totalorder %s5741_s14, %s5741_s14 }
 0xbc3   :  { %6686 = vpow2.f32 %v5838_v11  ;;  %p6859_p7 = scmp.ne.s32.totalorder %s5741_s14, %s6858_s25  ;;  %p6864_p9 = scmp.lt.s32.totalorder %s6858_s25, %s6858_s25 }
 0xbc5   :  { %p6865_p10 = por %p6864_p9, %p6863_p8 }
 0xbc7   :  { %p6866_p11 = pnand %p6865_p10, %p6859_p7 }
 0xbcb   :  { %v6679_v34 = vpop.eup %6678 }
 0xbcc   :  { %v5393_v16 = vadd.f32 1.0, %v6679_v34 }
 0xbcd   :  { %v6681_v48 = vpop.eup %6680 }
 0xbce   :  { %6688 = vrcp.f32 %v5393_v16  ;;  %v5394_v31 = vadd.f32 1.0, %v6681_v48  ;;  %v6683_v14 = vpop.eup %6682 }
 0xbcf   :  { %6690 = vtanh.f32 %v5382_v15  ;;  %v6685_v36 = vpop.eup %6684 }
 0xbd0   :  { %6692 = vrcp.f32 %v5394_v31  ;;  %v6687_v32 = vpop.eup %6686  ;;  %v5614_v42 = vmul.f32 %v6685_v36, %v6683_v14 }
 0xbd1   :  { %v5395_v39 = vadd.f32 1.0, %v6687_v32 }
 0xbd3   :  { %6694 = vrcp.f32 %v5395_v39 }
 0xbdb   :  { %v6689_v1 = vpop.eup %6688 }
 0xbdc   :  { %v6691_v30 = vpop.eup %6690 }
 0xbdd   :  { %v6693_v4 = vpop.eup %6692  ;;  %v5407_v20 = vmul.f32 %v6691_v30, %v6689_v1 }
 0xbde   :  { %v5406_v59 = vmul.f32 %v6693_v4, %v5404_v46 }
 0xbe0   :  { %v9162_v12 = vadd.f32 %v5407_v20, %v5406_v59  ;;  %v6695_v19 = vpop.eup %6694 }
 0xbe2   :  { %6696 = vtanh.f32 %v9162_v12 }
 0xbe3   :  { %6698 = vtanh.f32 %v5614_v42  ;;  %v5592_v42 = vrot.slane %v9162_v12, 6 }
 0xbef   :  { %v6697_v6 = vpop.eup %6696 }
 0xbf0   :  { %v6699_v0 = vpop.eup %6698  ;;  %v5410_v33 = vmul.f32 %v6697_v6, %v6695_v19 }
 0xbf1   :  { %v5659_v41 = vrot.slane %v6699_v0, 6 }
 0xbf2   :  { %v5412_v57 = vrot.slane %v5410_v33, 4 }
 0xbf4   :  { %5479 = vmatmul.mubr.f32.vlgmr.msra.gmra.mxu1 %v5412_v57  ;;  %5550 = vmatmul.mubr.f32.vlgmr.msra.gmra.mxu0 %v5412_v57 }
 0xbf5   :  { %5726 = vmatprep.mubr.f32.mxu1 %v5659_v41  ;;  %6297 = vmatpush3.msra.mxu1 %v5632_v55 }
 0xbf6   :  { %6298 = vmatprep.subr.mxu1 %v5647_v17 }
 0xbf7   :  { %6299 = vmatpush3.msra.mxu1 %v5631_v21  ;;  %v5844_v21 = vld [vmem:[#allocation12] ss:$0 sm:$0xff] }
 0xbf8   :  { %6300 = vmatprep.subr.mxu1 %v5646_v22 }
 0xbf9   :  { %6301 = vmatpush3.msra.mxu1 %v5630_v47 }
 0xbfa   :  { %6302 = vmatprep.subr.mxu1 %v5645_v24 }
 0xbfb   :  { %6303 = vmatpush3.msra.mxu1 %v5629_v58 }
 0xbfc   :  { %6304 = vmatprep.subr.mxu1 %v5644_v56 }
 0xbfd   :  { %6305 = vmatpush3.msra.mxu1 %v5628_v54 }
 0xbfe   :  { %6306 = vmatprep.subr.mxu1 %v5643_v13 }
 0xbff   :  { %6307 = vmatpush3.msra.mxu1 %v5627_v5 }
 0xc00   :  { %6308 = vmatprep.subr.mxu1 %v5642_v62 }
 0xc01   :  { %6309 = vmatpush3.msra.mxu1 %v5626_v29 }
 0xc02   :  { %6310 = vmatprep.subr.mxu1 %v5641_v49 }
 0xc03   :  { %6311 = vmatpush3.msra.mxu1 %v5625_v44 }
 0xc04   :  { %6312 = vmatprep.subr.mxu1 %v5640_v28 }
 0xc05   :  { %6313 = vmatpush3.msra.mxu1 %v5624_v10 }
 0xc06   :  { %6314 = vmatprep.subr.mxu1 %v5639_v38 }
 0xc07   :  { %6315 = vmatpush3.msra.mxu1 %v5623_v3 }
 0xc08   :  { %6316 = vmatprep.subr.mxu1 %v5638_v50 }
 0xc09   :  { %6317 = vmatpush3.msra.mxu1 %v5622_v26 }
 0xc0a   :  { %6318 = vmatprep.subr.mxu1 %v5637_v7 }
 0xc0b   :  { %6319 = vmatpush3.msra.mxu1 %v5621_v61 }
 0xc0c   :  { %6320 = vmatprep.subr.mxu1 %v5636_v40 }
 0xc0d   :  { %6321 = vmatpush3.msra.mxu1 %v5620_v63 }
 0xc0e   :  { %6322 = vmatprep.subr.mxu1 %v5635_v43 }
 0xc0f   :  { %6323 = vmatpush3.msra.mxu1 %v5619_v9 }
 0xc10   :  { %6324 = vmatprep.subr.mxu1 %v5634_v27 }
 0xc11   :  { %6325 = vmatpush3.msra.mxu1 %v5618_v45 }
 0xc12   :  { %6326 = vmatprep.subr.mxu1 %v5633_v60 }
 0xc13   :  { %6327 = vmatpush3.msra.mxu1 %v5617_v18 }
 0xcb4   :  { %v5480_v25 = vpop.f32.mrf.mxu1  ;;  %v5551_v34 = vpop.f32.mrf.mxu0 }
 0xcb5   :  { %v5560_v35 = vrot.slane %v5480_v25, 2  ;;  %v5562_v32 = vrot.slane %v5551_v34, 2 }
 0xcb6   :  { %v5482_v52 = vpop.f32.mrf.mxu1  ;;  %v5553_v31 = vpop.f32.mrf.mxu0 }
 0xcb7   :  { %v5568_v11 = vadd.f32 %v5560_v35, %v9853_v51  ;;  %v5561_v15 = vrot.slane %v5482_v52, 2  ;;  %v5563_v14 = vrot.slane %v5553_v31, 2  ;;  %v5570_v46 = vadd.f32 %v5562_v32, %v8994_v2 }
 0xcb9   :  { %v5839_v53 = vmul.f32 -1.442695, %v5568_v11  ;;  %v5569_v16 = vadd.f32 %v5561_v15, %v9078_v23  ;;  %v5571_v36 = vadd.f32 %v5563_v14, %v9854_v8 }
 0xcbb   :  { %6700 = vpow2.f32 %v5839_v53  ;;  %v5840_v48 = vmul.f32 -1.442695, %v5569_v16  ;;  %v5841_v1 = vmul.f32 -1.442695, %v5571_v36 }
 0xcbd   :  { %6702 = vpow2.f32 %v5840_v48 }
 0xcbe   :  { %6704 = vpow2.f32 %v5841_v1 }
 0xcc8   :  { %v6701_v30 = vpop.eup %6700 }
 0xcc9   :  { %v5581_v4 = vadd.f32 1.0, %v6701_v30 }
 0xcca   :  { %v6703_v39 = vpop.eup %6702 }
 0xccb   :  { %6706 = vrcp.f32 %v5581_v4  ;;  %v5582_v51 = vadd.f32 1.0, %v6703_v39  ;;  %v6705_v23 = vpop.eup %6704 }
 0xccc   :  { %6708 = vtanh.f32 %v5570_v46  ;;  %v5583_v6 = vadd.f32 1.0, %v6705_v23 }
 0xccd   :  { %6710 = vrcp.f32 %v5582_v51 }
 0xcce   :  { %6712 = vrcp.f32 %v5583_v6 }
 0xcd8   :  { %v6707_v20 = vpop.eup %6706 }
 0xcd9   :  { %v6709_v59 = vpop.eup %6708 }
 0xcda   :  { %v6711_v19 = vpop.eup %6710  ;;  %v5595_v8 = vmul.f32 %v6709_v59, %v6707_v20 }
 0xcdb   :  { %v5594_v0 = vmul.f32 %v6711_v19, %v5592_v42  ;;  %v6713_v2 = vpop.eup %6712 }
 0xcdd   :  { %v5596_v33 = vadd.f32 %v5595_v8, %v5594_v0 }
 0xcdf   :  { %6714 = vtanh.f32 %v5596_v33 }
 0xcec   :  { %v6715_v57 = vpop.eup %6714 }
 0xced   :  { %v5598_v41 = vmul.f32 %v6715_v57, %v6713_v2 }
 0xcef   :  { %6716 = vtanh.f32 %v5598_v41 }
 0xcfc   :  { %v6717_v37 = vpop.eup %6716 }
 0xcfd   :  { %v5658_v55 = vrot.slane %v6717_v37, 6 }
 0xcff   :  { %5727 = vmatmul.mubr.f32.vlgmr.msra.gmra.mxu1 %v5658_v55 }
 0xdbf   :  { %v6328_v17 = vpop.f32.mrf.mxu1 }
 0xdc1   :  { %v6329_v22 = vpop.f32.mrf.mxu1 }
 0xdc2   :  { %v6330_v12 = vadd.f32 %v6329_v22, %v6328_v17 }
 0xdc4   :  { %v5729_v47 = vadd.f32 %v6330_v12, %v5844_v21 }
 0xdc6   :  { %5733 = vst.msk [vmem:[#allocation14] sm:$0x3] %vm5732_vm0, %v5729_v47 }
 0xdc7   :  { %6869 = shalt.err (!%p6866_p11)
}
 0xdc8   :  { %5743 = dma.vmem_to_hbm [thread:$0]  %s5741_s14, 32, %s9278_s9, [#allocation8]  }
 0xdc9   :  { %6890 = dma.done.wait [#allocation8], 32  }
 0xdca   :  { %6891 = vsyncadd [#allocation8], 4294967264 }
 0xdcb   :  { %5747 = vsyncpa [#allocation7], 1 }
 0xdcc   :  { %5748 = vsyncpa [#allocation10], 1 }
 0xdcd   :  { %5749 = vsyncpa [#allocation13], 1 }
 0xdce   :  { %5750 = vsyncpa [#allocation8], 1 }
 0xdcf   :  { %5751 = vsyncmov [#allocation5] }
 0xdd2   :  { %s5752_s24 = vpop.sfrf %5751 }
 0xdd3   :  { %p5845_p12 = scmp.ne.s32.totalorder %s5752_s24, 0 }
 0xdd5   :  { %5756 = shalt.err (%p5845_p12)  }
 0xdd6   :  { %5758 = vsyncmov [#allocation5 + $0x1] }
 0xdd9   :  { %s5759_s2 = vpop.sfrf %5758 }
 0xdda   :  { %p5846_p13 = scmp.ne.s32.totalorder %s5759_s2, 0 }
 0xddc   :  { %5763 = shalt.err (%p5846_p13)  }
 0xddd   :  { %5765 = vsyncmov [#allocation5 + $0x2] }
 0xde0   :  { %s5766_s26 = vpop.sfrf %5765 }
 0xde1   :  { %p5847_p0 = scmp.ne.s32.totalorder %s5766_s26, 0 }
 0xde3   :  { %5770 = shalt.err (%p5847_p0)  }

</bundles_post_ra>
